<compile_context>
chip_gen: v7x
topology: tpu7x:2x2x1
jax: 0.10.0
libtpu: 0.0.40
codegen_flags: <defaults>
</compile_context>

<pallas_src>
import math
from functools import partial

import jax
import jax.numpy as jnp
from jax.experimental import pallas as pl
from jax.experimental.pallas import tpu as pltpu


def _embnet_fused_kernel(
    xc_ref, xt_ref, ea_ref,                  # [8,Np], [8,Np], [8,Ep] feature-major
    g0_ref, g1_ref, g0t_ref, invdeg_ref,     # [Np,Ep] bf16, [Np,Ep] bf16, [Ep,Np] bf16, [1,Np] f32
    nmask_ref, emask_ref,                    # [1,Np], [1,Ep]
    w0v_ref, b0v_ref, w0e_ref, b0e_ref,      # [2,U,8], [2,U,1], [2,U,8], [2,U,1]
    wv_ref, bv_ref, we_ref, be_ref,          # [2,D,4U,U], [2,D,4U,1], [2,D,U,U], [2,D,U,1]
    bnvg_ref, bnvb_ref, bneg_ref, bneb_ref,  # [2,D,U,1] each
    wc_out_ref, wt_out_ref,                  # [U,Ep] each, lane-dense
    *, depth, units, eps=1e-5,
):
    act = jax.nn.silu
    f32 = jnp.float32
    bf16 = jnp.bfloat16
    U = units

    g0 = g0_ref[...]
    g1 = g1_ref[...]
    g0t = g0t_ref[...]
    invdeg = invdeg_ref[...]
    nmask = nmask_ref[...]
    emask = emask_ref[...]

    # Valid counts from the masks (keeps one compiled kernel per pad bucket).
    inv_n = 1.0 / jnp.sum(nmask, axis=1, keepdims=True)   # [1,1]
    inv_e = 1.0 / jnp.sum(emask, axis=1, keepdims=True)

    def bn(v, mask, inv_count, gamma, beta):
        # Training-mode BatchNorm1d with masked statistics (padding never leaks),
        # single masked pass: var = E[v^2] - mean^2.
        # TODO(synk): running_mean / running_var buffer updates (training-time
        # side effect of gnn.BatchNorm) are not materialized.
        vm = v * mask
        s1 = jnp.sum(vm, axis=1, keepdims=True)
        s2 = jnp.sum(vm * vm, axis=1, keepdims=True)
        mean = s1 * inv_count
        var = s2 * inv_count - mean * mean
        return (v - mean) * jax.lax.rsqrt(var + eps) * gamma + beta

    def dot(a, b):
        return jnp.dot(a, b, preferred_element_type=f32)

    # lin0 + act (feature dim zero-padded to 8 on both sides -> exact).
    xc = act(dot(w0v_ref[0], xc_ref[...]) + b0v_ref[0]) * nmask
    xt = act(dot(w0v_ref[1], xt_ref[...]) + b0v_ref[1]) * nmask
    wc = act(dot(w0e_ref[0], ea_ref[...]) + b0e_ref[0]) * emask
    wt = act(dot(w0e_ref[1], ea_ref[...]) + b0e_ref[1]) * emask

    for d in range(depth):  # static -> unrolled at trace time
        xc0, xt0, wc0, wt0 = xc, xt, wc, wt

        # Four node linears per branch fused into one [4U,U] x [U,Np] dot.
        hc = dot(wv_ref[0, d], xc0) + bv_ref[0, d]         # [4U, Np]
        ht = dot(wv_ref[1, d], xt0) + bv_ref[1, d]
        xc1, xc2, xc3, xc4 = hc[0:U], hc[U:2 * U], hc[2 * U:3 * U], hc[3 * U:4 * U]
        xt1, xt2, xt3, xt4 = ht[0:U], ht[U:2 * U], ht[2 * U:3 * U], ht[3 * U:4 * U]

        wc1 = dot(we_ref[0, d], wc0) + be_ref[0, d]        # [U, Ep]
        wt1 = dot(we_ref[1, d], wt0) + be_ref[1, d]
        wc2 = jax.nn.sigmoid(wc0)
        wt2 = jax.nn.sigmoid(wt0)

        # Gather x[edge_index[1]] for both branches in one 128-row bf16 MXU dot.
        lhs_e1 = jnp.concatenate([xc2, xc4, xt2, xt4], axis=0).astype(bf16)
        at_e1 = dot(lhs_e1, g1)                            # [4U, Ep] f32 acc
        xc2_e1, xc4_e1 = at_e1[0:U], at_e1[U:2 * U]
        xt2_e1, xt4_e1 = at_e1[2 * U:3 * U], at_e1[3 * U:4 * U]

        # Gather x[edge_index[0]] for both branches.
        lhs_e0 = jnp.concatenate([xc3, xt3], axis=0).astype(bf16)
        at_e0 = dot(lhs_e0, g0)                            # [2U, Ep]
        xc3_e0, xt3_e0 = at_e0[0:U], at_e0[U:2 * U]

        # message = sigmoid(w) * x2[ei1]; scatter-mean over ei0 as
        # (msg @ g0^T) * (1/deg), accumulation + 1/deg scaling kept in f32.
        msg = jnp.concatenate([wc2 * xc2_e1, wt2 * xt2_e1], axis=0).astype(bf16)
        agg = dot(msg, g0t) * invdeg                       # [2U, Np]
        agg_c, agg_t = agg[0:U], agg[U:2 * U]

        # Residual + BN + act; re-zero padded lanes (cheap insurance so junk
        # never reaches the one-hot matmuls next layer).
        xc = (xc0 + act(bn(xc1 + agg_c, nmask, inv_n, bnvg_ref[0, d], bnvb_ref[0, d]))) * nmask
        xt = (xt0 + act(bn(xt1 + agg_t, nmask, inv_n, bnvg_ref[1, d], bnvb_ref[1, d]))) * nmask
        wc = (wc0 + act(bn(wc1 + xc3_e0 + xc4_e1, emask, inv_e, bneg_ref[0, d], bneb_ref[0, d]))) * emask
        wt = (wt0 + act(bn(wt1 + xt3_e0 + xt4_e1, emask, inv_e, bneg_ref[1, d], bneb_ref[1, d]))) * emask

    wc_out_ref[...] = wc.astype(wc_out_ref.dtype)
    wt_out_ref[...] = wt.astype(wt_out_ref.dtype)


def _round_up(n, m):
    return ((n + m - 1) // m) * m


def build_graph_operators(edge_index, num_nodes, num_edges):
    """Dense gather/scatter operators + masks. Build ONCE per graph and cache
    (keyed on edge_index) -- hoisted out of the per-forward path."""
    n_pad = max(_round_up(num_nodes, 128), 128)
    e_pad = max(_round_up(num_edges, 128), 128)
    ei0 = edge_index[0]
    ei1 = edge_index[1]
    e_ids = jnp.arange(num_edges)
    # 0/1 one-hots are exact in bf16 -> half the VMEM of the f32 operators.
    g0 = jnp.zeros((n_pad, e_pad), jnp.bfloat16).at[ei0, e_ids].set(1.0)
    g1 = jnp.zeros((n_pad, e_pad), jnp.bfloat16).at[ei1, e_ids].set(1.0)
    g0t = jnp.zeros((e_pad, n_pad), jnp.bfloat16).at[e_ids, ei0].set(1.0)
    deg = jnp.zeros((n_pad,), jnp.float32).at[ei0].add(1.0)
    invdeg = (1.0 / jnp.maximum(deg, 1.0)).reshape(1, n_pad)
    nmask = jnp.zeros((1, n_pad), jnp.float32).at[:, :num_nodes].set(1.0)
    emask = jnp.zeros((1, e_pad), jnp.float32).at[:, :num_edges].set(1.0)
    return dict(n_pad=n_pad, e_pad=e_pad, g0=g0, g1=g1, g0t=g0t,
                invdeg=invdeg, nmask=nmask, emask=emask)


def _pack_branch_params(params, depth, units, f_pad):
    """Stack both branches' PyTorch-layout weights into kernel-ready tensors."""
    U = units
    branches = ("cvrp", "tw")

    def pad_in(w):
        out = jnp.zeros((U, f_pad), jnp.float32)
        return out.at[:, : w.shape[1]].set(w.astype(jnp.float32))

    w0v = jnp.stack([pad_in(params[b]["w_lin0_v"]) for b in branches])
    b0v = jnp.stack([params[b]["b_lin0_v"].reshape(U, 1) for b in branches])
    w0e = jnp.stack([pad_in(params[b]["w_lin0_e"]) for b in branches])
    b0e = jnp.stack([params[b]["b_lin0_e"].reshape(U, 1) for b in branches])
    wv = jnp.stack([params[b]["w_v"].reshape(depth, 4 * U, U) for b in branches])
    bv = jnp.stack([params[b]["b_v"].reshape(depth, 4 * U, 1) for b in branches])
    we = jnp.stack([params[b]["w_e"] for b in branches])
    be = jnp.stack([params[b]["b_e"].reshape(depth, U, 1) for b in branches])
    bnvg = jnp.stack([params[b]["bn_v_w"].reshape(depth, U, 1) for b in branches])
    bnvb = jnp.stack([params[b]["bn_v_b"].reshape(depth, U, 1) for b in branches])
    bneg = jnp.stack([params[b]["bn_e_w"].reshape(depth, U, 1) for b in branches])
    bneb = jnp.stack([params[b]["bn_e_b"].reshape(depth, U, 1) for b in branches])
    return (w0v, b0v, w0e, b0e, wv, bv, we, be, bnvg, bnvb, bneg, bneb)


def embnet_forward(x, y, edge_index, edge_attr, params, *, depth=4, units=32,
                   graph_ops=None):
    """Pallas forward for EmbNet. Returns (w_cvrp, w_tw), each [E, units]."""
    N = x.shape[0]
    E = edge_attr.shape[0]
    U = units
    f_pad = 8

    if graph_ops is None:
        graph_ops = build_graph_operators(edge_index, N, E)
    n_pad, e_pad = graph_ops["n_pad"], graph_ops["e_pad"]

    def feat_major(a, length, pad_len):
        out = jnp.zeros((f_pad, pad_len), jnp.float32)
        return out.at[: a.shape[1], :length].set(a.T.astype(jnp.float32))

    xc_t = feat_major(x, N, n_pad)
    xt_t = feat_major(y, N, n_pad)
    ea_t = feat_major(edge_attr, E, e_pad)

    args = (xc_t, xt_t, ea_t,
            graph_ops["g0"], graph_ops["g1"], graph_ops["g0t"], graph_ops["invdeg"],
            graph_ops["nmask"], graph_ops["emask"],
            *_pack_branch_params(params, depth, units, f_pad))

    # Advisory cost estimate (one-hot dots dominate).
    matmul_flops = 2 * (
        2 * U * f_pad * (n_pad + e_pad)
        + depth * (2 * 4 * U * U * n_pad + 2 * U * U * e_pad)
        + depth * 8 * U * n_pad * e_pad)
    transcendentals = (2 * depth + 2) * 2 * U * (n_pad + e_pad)

    in_bytes = sum(int(a.size) * a.dtype.itemsize for a in args)
    out_bytes = 2 * U * e_pad * 4
    # Size the scoped-VMEM limit from the real footprint + headroom.
    vmem_limit = int(min(128 * 1024 * 1024,
                         max(32 * 1024 * 1024,
                             2 * (in_bytes + out_bytes) + (8 << 20))))
    # TODO(synk): when 2*(in+out bytes) approaches v7x's 64 MiB physical VMEM
    # (roughly Np=Ep>=2048 with bf16 operators), switch to an edge-tiled grid
    # over Ep (BlockSpec'd g0/g1/g0t/ea/output slices, 'arbitrary' E axis with
    # pl.when-guarded agg accumulation) or to a true gather kernel
    # (PrefetchScalarGridSpec + edge_index in SMEM); the dense one-hot form
    # scales O(U*N*E) flops / O(N*E) VMEM versus O(U*E) for a real gather.

    vmem = pl.BlockSpec(memory_space=pltpu.MemorySpace.VMEM)
    kern = partial(_embnet_fused_kernel, depth=depth, units=units)

    wc_t, wt_t = pl.pallas_call(
        kern,
        out_shape=(jax.ShapeDtypeStruct((U, e_pad), jnp.float32),
                   jax.ShapeDtypeStruct((U, e_pad), jnp.float32)),
        in_specs=[vmem] * len(args),
        out_specs=(vmem, vmem),
        compiler_params=pltpu.CompilerParams(vmem_limit_bytes=vmem_limit),
        cost_estimate=pl.CostEstimate(
            flops=int(matmul_flops),
            transcendentals=int(transcendentals),
            bytes_accessed=int(in_bytes + out_bytes)),
    )(*args)

    # TODO(synk): on v7x (2 TensorCores) the two branches could instead be split
    # across cores via pl.core_map; kept fused here so the shared Np x Ep
    # operators are uploaded once and the gather dots run with a 128-row LHS.

    # Back to the PyTorch [E, units] edge-embedding layout (once, outside).
    return wc_t[:, :E].T, wt_t[:, :E].T


def init_embnet_params(key, *, depth=4, feats_cvrp=1, feats_tw=3, units=32):
    """PyTorch-layout parameters ([out, in] weights), initialized like
    EmbNet.init_parameters(): each tensor ~ U(-1/sqrt(size(-1)), +1/sqrt(size(-1)))."""
    U = units
    keys = iter(jax.random.split(key, 64))

    def u(shape):
        bound = 1.0 / math.sqrt(shape[-1])
        return jax.random.uniform(next(keys), shape, jnp.float32, -bound, bound)

    def branch(feats):
        return {
            "w_lin0_v": u((U, feats)), "b_lin0_v": u((U,)),
            "w_lin0_e": u((U, 1)),     "b_lin0_e": u((U,)),
            "w_v": u((depth, 4, U, U)), "b_v": u((depth, 4, U)),
            "w_e": u((depth, U, U)),    "b_e": u((depth, U)),
            "bn_v_w": u((depth, U)), "bn_v_b": u((depth, U)),
            "bn_e_w": u((depth, U)), "bn_e_b": u((depth, U)),
        }

    return {"cvrp": branch(feats_cvrp), "tw": branch(feats_tw)}


def embnet_reference(x, y, edge_index, edge_attr, params, *, depth=4):
    """Pure-JAX reference mirroring the PyTorch forward (training-mode BN)."""
    ei0 = edge_index[0]
    ei1 = edge_index[1]
    N = x.shape[0]
    E = edge_attr.shape[0]
    act = jax.nn.silu

    def bn(v, gamma, beta, eps=1e-5):
        mean = jnp.mean(v, axis=0, keepdims=True)
        var = jnp.mean((v - mean) ** 2, axis=0, keepdims=True)
        return (v - mean) * jax.lax.rsqrt(var + eps) * gamma + beta

    def branch(node_feats, p):
        h = act(node_feats @ p["w_lin0_v"].T + p["b_lin0_v"])
        w = act(edge_attr @ p["w_lin0_e"].T + p["b_lin0_e"])
        for d in range(depth):
            h0, w0 = h, w
            h1 = h0 @ p["w_v"][d, 0].T + p["b_v"][d, 0]
            h2 = h0 @ p["w_v"][d, 1].T + p["b_v"][d, 1]
            h3 = h0 @ p["w_v"][d, 2].T + p["b_v"][d, 2]
            h4 = h0 @ p["w_v"][d, 3].T + p["b_v"][d, 3]
            w1 = w0 @ p["w_e"][d].T + p["b_e"][d]
            w2 = jax.nn.sigmoid(w0)
            msg = w2 * h2[ei1]
            seg = jax.ops.segment_sum(msg, ei0, num_segments=N)
            cnt = jax.ops.segment_sum(jnp.ones((E,), jnp.float32), ei0, num_segments=N)
            agg = seg / jnp.maximum(cnt, 1.0)[:, None]
            h = h0 + act(bn(h1 + agg, p["bn_v_w"][d], p["bn_v_b"][d]))
            w = w0 + act(bn(w1 + h3[ei0] + h4[ei1], p["bn_e_w"][d], p["bn_e_b"][d]))
        return w

    return branch(x, params["cvrp"]), branch(y, params["tw"])


if __name__ == "__main__":
    depth, units = 4, 32
    feats_cvrp, feats_tw = 1, 3
    n_nodes, n_edges = 16, 48

    key = jax.random.PRNGKey(0)
    k_param, k_x, k_y, k_ea, k_e0, k_e1 = jax.random.split(key, 6)

    params = init_embnet_params(k_param, depth=depth, feats_cvrp=feats_cvrp,
                                feats_tw=feats_tw, units=units)
    x = jax.random.normal(k_x, (n_nodes, feats_cvrp), jnp.float32)
    y = jax.random.normal(k_y, (n_nodes, feats_tw), jnp.float32)
    edge_attr = jax.random.normal(k_ea, (n_edges, 1), jnp.float32)
    edge_index = jnp.stack([
        jax.random.randint(k_e0, (n_edges,), 0, n_nodes),
        jax.random.randint(k_e1, (n_edges,), 0, n_nodes),
    ], axis=0)

    # Graph operators built once and reused (cacheable across forwards).
    graph_ops = build_graph_operators(edge_index, n_nodes, n_edges)

    w_cvrp, w_tw = embnet_forward(x, y, edge_index, edge_attr, params,
                                  depth=depth, units=units, graph_ops=graph_ops)
    w_cvrp, w_tw = jax.block_until_ready((w_cvrp, w_tw))

    ref_cvrp, ref_tw = embnet_reference(x, y, edge_index, edge_attr, params, depth=depth)

    assert w_cvrp.shape == (n_edges, units) and w_tw.shape == (n_edges, units)
    # Gather/scatter dots use bf16 MXU operands (f32 accumulation); tolerance
    # reflects bf16 rounding of activations over 4 residual layers.
    assert jnp.allclose(w_cvrp, ref_cvrp, atol=2e-2, rtol=2e-2)
    assert jnp.allclose(w_tw, ref_tw, atol=2e-2, rtol=2e-2)

    print("KERNEL_OK")
</pallas_src>

<mosaic_0001>
module attributes {stable_mosaic.version = 11 : i64} {
  func.func @_embnet_fused_kernel(%arg0: memref<8x128xf32, #tpu.memory_space<vmem>>, %arg1: memref<8x128xf32, #tpu.memory_space<vmem>>, %arg2: memref<8x128xf32, #tpu.memory_space<vmem>>, %arg3: memref<128x128xbf16, #tpu.memory_space<vmem>>, %arg4: memref<128x128xbf16, #tpu.memory_space<vmem>>, %arg5: memref<128x128xbf16, #tpu.memory_space<vmem>>, %arg6: memref<1x128xf32, #tpu.memory_space<vmem>>, %arg7: memref<1x128xf32, #tpu.memory_space<vmem>>, %arg8: memref<1x128xf32, #tpu.memory_space<vmem>>, %arg9: memref<2x32x8xf32, #tpu.memory_space<vmem>>, %arg10: memref<2x32x1xf32, #tpu.memory_space<vmem>>, %arg11: memref<2x32x8xf32, #tpu.memory_space<vmem>>, %arg12: memref<2x32x1xf32, #tpu.memory_space<vmem>>, %arg13: memref<2x4x128x32xf32, #tpu.memory_space<vmem>>, %arg14: memref<2x4x128x1xf32, #tpu.memory_space<vmem>>, %arg15: memref<2x4x32x32xf32, #tpu.memory_space<vmem>>, %arg16: memref<2x4x32x1xf32, #tpu.memory_space<vmem>>, %arg17: memref<2x4x32x1xf32, #tpu.memory_space<vmem>>, %arg18: memref<2x4x32x1xf32, #tpu.memory_space<vmem>>, %arg19: memref<2x4x32x1xf32, #tpu.memory_space<vmem>>, %arg20: memref<2x4x32x1xf32, #tpu.memory_space<vmem>>, %arg21: memref<32x128xf32, #tpu.memory_space<vmem>>, %arg22: memref<32x128xf32, #tpu.memory_space<vmem>>) attributes {dimension_semantics = [], scalar_prefetch = 0 : i64, scratch_operands = 0 : i64, tpu.core_type = #tpu.core_type<tc>} {
    %c0 = arith.constant 0 : index
    %c0_0 = arith.constant 0 : index
    %0 = vector.load %arg3[%c0, %c0_0] : memref<128x128xbf16, #tpu.memory_space<vmem>>, vector<128x128xbf16>
    %c0_1 = arith.constant 0 : index
    %c0_2 = arith.constant 0 : index
    %1 = vector.load %arg4[%c0_1, %c0_2] : memref<128x128xbf16, #tpu.memory_space<vmem>>, vector<128x128xbf16>
    %c0_3 = arith.constant 0 : index
    %c0_4 = arith.constant 0 : index
    %2 = vector.load %arg5[%c0_3, %c0_4] : memref<128x128xbf16, #tpu.memory_space<vmem>>, vector<128x128xbf16>
    %c0_5 = arith.constant 0 : index
    %c0_6 = arith.constant 0 : index
    %3 = vector.load %arg6[%c0_5, %c0_6] : memref<1x128xf32, #tpu.memory_space<vmem>>, vector<1x128xf32>
    %c0_7 = arith.constant 0 : index
    %c0_8 = arith.constant 0 : index
    %4 = vector.load %arg7[%c0_7, %c0_8] : memref<1x128xf32, #tpu.memory_space<vmem>>, vector<1x128xf32>
    %c0_9 = arith.constant 0 : index
    %c0_10 = arith.constant 0 : index
    %5 = vector.load %arg8[%c0_9, %c0_10] : memref<1x128xf32, #tpu.memory_space<vmem>>, vector<1x128xf32>
    %cst = arith.constant dense<0.000000e+00> : vector<1xf32>
    %6 = vector.multi_reduction <add>, %4, %cst [1] : vector<1x128xf32> to vector<1xf32>
    %7 = vector.shape_cast %6 : vector<1xf32> to vector<1x1xf32>
    %cst_11 = arith.constant 1.000000e+00 : f32
    %8 = vector.broadcast %cst_11 : f32 to vector<1x1xf32>
    %9 = arith.divf %8, %7 : vector<1x1xf32>
    %cst_12 = arith.constant dense<0.000000e+00> : vector<1xf32>
    %10 = vector.multi_reduction <add>, %5, %cst_12 [1] : vector<1x128xf32> to vector<1xf32>
    %11 = vector.shape_cast %10 : vector<1xf32> to vector<1x1xf32>
    %cst_13 = arith.constant 1.000000e+00 : f32
    %12 = vector.broadcast %cst_13 : f32 to vector<1x1xf32>
    %13 = arith.divf %12, %11 : vector<1x1xf32>
    %c0_14 = arith.constant 0 : index
    %c0_15 = arith.constant 0 : index
    %c0_16 = arith.constant 0 : index
    %14 = vector.load %arg9[%c0_14, %c0_15, %c0_16] : memref<2x32x8xf32, #tpu.memory_space<vmem>>, vector<1x32x8xf32>
    %15 = vector.shape_cast %14 : vector<1x32x8xf32> to vector<32x8xf32>
    %c0_17 = arith.constant 0 : index
    %c0_18 = arith.constant 0 : index
    %16 = vector.load %arg0[%c0_17, %c0_18] : memref<8x128xf32, #tpu.memory_space<vmem>>, vector<8x128xf32>
    %cst_19 = arith.constant dense<0.000000e+00> : vector<32x128xf32>
    %17 = tpu.matmul %15, %16, %cst_19 {dimension_numbers = #tpu.dot_dimension_numbers<[1], [0], [0], [1], [0, 0, 1, 1], [], []>} : vector<32x8xf32>, vector<8x128xf32>, vector<32x128xf32> -> vector<32x128xf32>
    %c0_20 = arith.constant 0 : index
    %c0_21 = arith.constant 0 : index
    %c0_22 = arith.constant 0 : index
    %18 = vector.load %arg10[%c0_20, %c0_21, %c0_22] : memref<2x32x1xf32, #tpu.memory_space<vmem>>, vector<1x32x1xf32>
    %19 = vector.shape_cast %18 : vector<1x32x1xf32> to vector<32x1xf32>
    %20 = vector.broadcast %19 : vector<32x1xf32> to vector<32x128xf32>
    %21 = arith.addf %17, %20 : vector<32x128xf32>
    %22 = arith.negf %21 : vector<32x128xf32>
    %23 = math.exp %22 : vector<32x128xf32>
    %cst_23 = arith.constant 1.000000e+00 : f32
    %24 = vector.broadcast %cst_23 : f32 to vector<32x128xf32>
    %25 = arith.addf %24, %23 : vector<32x128xf32>
    %26 = arith.divf %24, %25 : vector<32x128xf32>
    %27 = arith.mulf %21, %26 : vector<32x128xf32>
    %28 = vector.broadcast %4 : vector<1x128xf32> to vector<32x128xf32>
    %29 = arith.mulf %27, %28 : vector<32x128xf32>
    %c1 = arith.constant 1 : index
    %c0_24 = arith.constant 0 : index
    %c0_25 = arith.constant 0 : index
    %30 = vector.load %arg9[%c1, %c0_24, %c0_25] : memref<2x32x8xf32, #tpu.memory_space<vmem>>, vector<1x32x8xf32>
    %31 = vector.shape_cast %30 : vector<1x32x8xf32> to vector<32x8xf32>
    %c0_26 = arith.constant 0 : index
    %c0_27 = arith.constant 0 : index
    %32 = vector.load %arg1[%c0_26, %c0_27] : memref<8x128xf32, #tpu.memory_space<vmem>>, vector<8x128xf32>
    %cst_28 = arith.constant dense<0.000000e+00> : vector<32x128xf32>
    %33 = tpu.matmul %31, %32, %cst_28 {dimension_numbers = #tpu.dot_dimension_numbers<[1], [0], [0], [1], [0, 0, 1, 1], [], []>} : vector<32x8xf32>, vector<8x128xf32>, vector<32x128xf32> -> vector<32x128xf32>
    %c1_29 = arith.constant 1 : index
    %c0_30 = arith.constant 0 : index
    %c0_31 = arith.constant 0 : index
    %34 = vector.load %arg10[%c1_29, %c0_30, %c0_31] : memref<2x32x1xf32, #tpu.memory_space<vmem>>, vector<1x32x1xf32>
    %35 = vector.shape_cast %34 : vector<1x32x1xf32> to vector<32x1xf32>
    %36 = vector.broadcast %35 : vector<32x1xf32> to vector<32x128xf32>
    %37 = arith.addf %33, %36 : vector<32x128xf32>
    %38 = arith.negf %37 : vector<32x128xf32>
    %39 = math.exp %38 : vector<32x128xf32>
    %cst_32 = arith.constant 1.000000e+00 : f32
    %40 = vector.broadcast %cst_32 : f32 to vector<32x128xf32>
    %41 = arith.addf %40, %39 : vector<32x128xf32>
    %42 = arith.divf %40, %41 : vector<32x128xf32>
    %43 = arith.mulf %37, %42 : vector<32x128xf32>
    %44 = vector.broadcast %4 : vector<1x128xf32> to vector<32x128xf32>
    %45 = arith.mulf %43, %44 : vector<32x128xf32>
    %c0_33 = arith.constant 0 : index
    %c0_34 = arith.constant 0 : index
    %c0_35 = arith.constant 0 : index
    %46 = vector.load %arg11[%c0_33, %c0_34, %c0_35] : memref<2x32x8xf32, #tpu.memory_space<vmem>>, vector<1x32x8xf32>
    %47 = vector.shape_cast %46 : vector<1x32x8xf32> to vector<32x8xf32>
    %c0_36 = arith.constant 0 : index
    %c0_37 = arith.constant 0 : index
    %48 = vector.load %arg2[%c0_36, %c0_37] : memref<8x128xf32, #tpu.memory_space<vmem>>, vector<8x128xf32>
    %cst_38 = arith.constant dense<0.000000e+00> : vector<32x128xf32>
    %49 = tpu.matmul %47, %48, %cst_38 {dimension_numbers = #tpu.dot_dimension_numbers<[1], [0], [0], [1], [0, 0, 1, 1], [], []>} : vector<32x8xf32>, vector<8x128xf32>, vector<32x128xf32> -> vector<32x128xf32>
    %c0_39 = arith.constant 0 : index
    %c0_40 = arith.constant 0 : index
    %c0_41 = arith.constant 0 : index
    %50 = vector.load %arg12[%c0_39, %c0_40, %c0_41] : memref<2x32x1xf32, #tpu.memory_space<vmem>>, vector<1x32x1xf32>
    %51 = vector.shape_cast %50 : vector<1x32x1xf32> to vector<32x1xf32>
    %52 = vector.broadcast %51 : vector<32x1xf32> to vector<32x128xf32>
    %53 = arith.addf %49, %52 : vector<32x128xf32>
    %54 = arith.negf %53 : vector<32x128xf32>
    %55 = math.exp %54 : vector<32x128xf32>
    %cst_42 = arith.constant 1.000000e+00 : f32
    %56 = vector.broadcast %cst_42 : f32 to vector<32x128xf32>
    %57 = arith.addf %56, %55 : vector<32x128xf32>
    %58 = arith.divf %56, %57 : vector<32x128xf32>
    %59 = arith.mulf %53, %58 : vector<32x128xf32>
    %60 = vector.broadcast %5 : vector<1x128xf32> to vector<32x128xf32>
    %61 = arith.mulf %59, %60 : vector<32x128xf32>
    %c1_43 = arith.constant 1 : index
    %c0_44 = arith.constant 0 : index
    %c0_45 = arith.constant 0 : index
    %62 = vector.load %arg11[%c1_43, %c0_44, %c0_45] : memref<2x32x8xf32, #tpu.memory_space<vmem>>, vector<1x32x8xf32>
    %63 = vector.shape_cast %62 : vector<1x32x8xf32> to vector<32x8xf32>
    %c0_46 = arith.constant 0 : index
    %c0_47 = arith.constant 0 : index
    %64 = vector.load %arg2[%c0_46, %c0_47] : memref<8x128xf32, #tpu.memory_space<vmem>>, vector<8x128xf32>
    %cst_48 = arith.constant dense<0.000000e+00> : vector<32x128xf32>
    %65 = tpu.matmul %63, %64, %cst_48 {dimension_numbers = #tpu.dot_dimension_numbers<[1], [0], [0], [1], [0, 0, 1, 1], [], []>} : vector<32x8xf32>, vector<8x128xf32>, vector<32x128xf32> -> vector<32x128xf32>
    %c1_49 = arith.constant 1 : index
    %c0_50 = arith.constant 0 : index
    %c0_51 = arith.constant 0 : index
    %66 = vector.load %arg12[%c1_49, %c0_50, %c0_51] : memref<2x32x1xf32, #tpu.memory_space<vmem>>, vector<1x32x1xf32>
    %67 = vector.shape_cast %66 : vector<1x32x1xf32> to vector<32x1xf32>
    %68 = vector.broadcast %67 : vector<32x1xf32> to vector<32x128xf32>
    %69 = arith.addf %65, %68 : vector<32x128xf32>
    %70 = arith.negf %69 : vector<32x128xf32>
    %71 = math.exp %70 : vector<32x128xf32>
    %cst_52 = arith.constant 1.000000e+00 : f32
    %72 = vector.broadcast %cst_52 : f32 to vector<32x128xf32>
    %73 = arith.addf %72, %71 : vector<32x128xf32>
    %74 = arith.divf %72, %73 : vector<32x128xf32>
    %75 = arith.mulf %69, %74 : vector<32x128xf32>
    %76 = vector.broadcast %5 : vector<1x128xf32> to vector<32x128xf32>
    %77 = arith.mulf %75, %76 : vector<32x128xf32>
    %c0_53 = arith.constant 0 : index
    %c0_54 = arith.constant 0 : index
    %c0_55 = arith.constant 0 : index
    %c0_56 = arith.constant 0 : index
    %78 = vector.load %arg13[%c0_53, %c0_54, %c0_55, %c0_56] : memref<2x4x128x32xf32, #tpu.memory_space<vmem>>, vector<1x1x128x32xf32>
    %79 = vector.shape_cast %78 : vector<1x1x128x32xf32> to vector<128x32xf32>
    %cst_57 = arith.constant dense<0.000000e+00> : vector<128x128xf32>
    %80 = tpu.matmul %79, %29, %cst_57 {dimension_numbers = #tpu.dot_dimension_numbers<[1], [0], [0], [1], [0, 0, 1, 1], [], []>} : vector<128x32xf32>, vector<32x128xf32>, vector<128x128xf32> -> vector<128x128xf32>
    %c0_58 = arith.constant 0 : index
    %c0_59 = arith.constant 0 : index
    %c0_60 = arith.constant 0 : index
    %c0_61 = arith.constant 0 : index
    %81 = vector.load %arg14[%c0_58, %c0_59, %c0_60, %c0_61] : memref<2x4x128x1xf32, #tpu.memory_space<vmem>>, vector<1x1x128x1xf32>
    %82 = vector.shape_cast %81 : vector<1x1x128x1xf32> to vector<128x1xf32>
    %83 = vector.broadcast %82 : vector<128x1xf32> to vector<128x128xf32>
    %84 = arith.addf %80, %83 : vector<128x128xf32>
    %c1_62 = arith.constant 1 : index
    %c0_63 = arith.constant 0 : index
    %c0_64 = arith.constant 0 : index
    %c0_65 = arith.constant 0 : index
    %85 = vector.load %arg13[%c1_62, %c0_63, %c0_64, %c0_65] : memref<2x4x128x32xf32, #tpu.memory_space<vmem>>, vector<1x1x128x32xf32>
    %86 = vector.shape_cast %85 : vector<1x1x128x32xf32> to vector<128x32xf32>
    %cst_66 = arith.constant dense<0.000000e+00> : vector<128x128xf32>
    %87 = tpu.matmul %86, %45, %cst_66 {dimension_numbers = #tpu.dot_dimension_numbers<[1], [0], [0], [1], [0, 0, 1, 1], [], []>} : vector<128x32xf32>, vector<32x128xf32>, vector<128x128xf32> -> vector<128x128xf32>
    %c1_67 = arith.constant 1 : index
    %c0_68 = arith.constant 0 : index
    %c0_69 = arith.constant 0 : index
    %c0_70 = arith.constant 0 : index
    %88 = vector.load %arg14[%c1_67, %c0_68, %c0_69, %c0_70] : memref<2x4x128x1xf32, #tpu.memory_space<vmem>>, vector<1x1x128x1xf32>
    %89 = vector.shape_cast %88 : vector<1x1x128x1xf32> to vector<128x1xf32>
    %90 = vector.broadcast %89 : vector<128x1xf32> to vector<128x128xf32>
    %91 = arith.addf %87, %90 : vector<128x128xf32>
    %92 = vector.extract_strided_slice %84 {offsets = [0, 0], sizes = [32, 128], strides = [1, 1]} : vector<128x128xf32> to vector<32x128xf32>
    %93 = vector.extract_strided_slice %84 {offsets = [32, 0], sizes = [32, 128], strides = [1, 1]} : vector<128x128xf32> to vector<32x128xf32>
    %94 = vector.extract_strided_slice %84 {offsets = [64, 0], sizes = [32, 128], strides = [1, 1]} : vector<128x128xf32> to vector<32x128xf32>
    %95 = vector.extract_strided_slice %84 {offsets = [96, 0], sizes = [32, 128], strides = [1, 1]} : vector<128x128xf32> to vector<32x128xf32>
    %96 = vector.extract_strided_slice %91 {offsets = [0, 0], sizes = [32, 128], strides = [1, 1]} : vector<128x128xf32> to vector<32x128xf32>
    %97 = vector.extract_strided_slice %91 {offsets = [32, 0], sizes = [32, 128], strides = [1, 1]} : vector<128x128xf32> to vector<32x128xf32>
    %98 = vector.extract_strided_slice %91 {offsets = [64, 0], sizes = [32, 128], strides = [1, 1]} : vector<128x128xf32> to vector<32x128xf32>
    %99 = vector.extract_strided_slice %91 {offsets = [96, 0], sizes = [32, 128], strides = [1, 1]} : vector<128x128xf32> to vector<32x128xf32>
    %c0_71 = arith.constant 0 : index
    %c0_72 = arith.constant 0 : index
    %c0_73 = arith.constant 0 : index
    %c0_74 = arith.constant 0 : index
    %100 = vector.load %arg15[%c0_71, %c0_72, %c0_73, %c0_74] : memref<2x4x32x32xf32, #tpu.memory_space<vmem>>, vector<1x1x32x32xf32>
    %101 = vector.shape_cast %100 : vector<1x1x32x32xf32> to vector<32x32xf32>
    %cst_75 = arith.constant dense<0.000000e+00> : vector<32x128xf32>
    %102 = tpu.matmul %101, %61, %cst_75 {dimension_numbers = #tpu.dot_dimension_numbers<[1], [0], [0], [1], [0, 0, 1, 1], [], []>} : vector<32x32xf32>, vector<32x128xf32>, vector<32x128xf32> -> vector<32x128xf32>
    %c0_76 = arith.constant 0 : index
    %c0_77 = arith.constant 0 : index
    %c0_78 = arith.constant 0 : index
    %c0_79 = arith.constant 0 : index
    %103 = vector.load %arg16[%c0_76, %c0_77, %c0_78, %c0_79] : memref<2x4x32x1xf32, #tpu.memory_space<vmem>>, vector<1x1x32x1xf32>
    %104 = vector.shape_cast %103 : vector<1x1x32x1xf32> to vector<32x1xf32>
    %105 = vector.broadcast %104 : vector<32x1xf32> to vector<32x128xf32>
    %106 = arith.addf %102, %105 : vector<32x128xf32>
    %c1_80 = arith.constant 1 : index
    %c0_81 = arith.constant 0 : index
    %c0_82 = arith.constant 0 : index
    %c0_83 = arith.constant 0 : index
    %107 = vector.load %arg15[%c1_80, %c0_81, %c0_82, %c0_83] : memref<2x4x32x32xf32, #tpu.memory_space<vmem>>, vector<1x1x32x32xf32>
    %108 = vector.shape_cast %107 : vector<1x1x32x32xf32> to vector<32x32xf32>
    %cst_84 = arith.constant dense<0.000000e+00> : vector<32x128xf32>
    %109 = tpu.matmul %108, %77, %cst_84 {dimension_numbers = #tpu.dot_dimension_numbers<[1], [0], [0], [1], [0, 0, 1, 1], [], []>} : vector<32x32xf32>, vector<32x128xf32>, vector<32x128xf32> -> vector<32x128xf32>
    %c1_85 = arith.constant 1 : index
    %c0_86 = arith.constant 0 : index
    %c0_87 = arith.constant 0 : index
    %c0_88 = arith.constant 0 : index
    %110 = vector.load %arg16[%c1_85, %c0_86, %c0_87, %c0_88] : memref<2x4x32x1xf32, #tpu.memory_space<vmem>>, vector<1x1x32x1xf32>
    %111 = vector.shape_cast %110 : vector<1x1x32x1xf32> to vector<32x1xf32>
    %112 = vector.broadcast %111 : vector<32x1xf32> to vector<32x128xf32>
    %113 = arith.addf %109, %112 : vector<32x128xf32>
    %114 = arith.negf %61 : vector<32x128xf32>
    %115 = math.exp %114 : vector<32x128xf32>
    %cst_89 = arith.constant 1.000000e+00 : f32
    %116 = vector.broadcast %cst_89 : f32 to vector<32x128xf32>
    %117 = arith.addf %116, %115 : vector<32x128xf32>
    %118 = arith.divf %116, %117 : vector<32x128xf32>
    %119 = arith.negf %77 : vector<32x128xf32>
    %120 = math.exp %119 : vector<32x128xf32>
    %cst_90 = arith.constant 1.000000e+00 : f32
    %121 = vector.broadcast %cst_90 : f32 to vector<32x128xf32>
    %122 = arith.addf %121, %120 : vector<32x128xf32>
    %123 = arith.divf %121, %122 : vector<32x128xf32>
    %124 = tpu.concatenate %93, %95, %97, %99 in 0 : vector<32x128xf32>, vector<32x128xf32>, vector<32x128xf32>, vector<32x128xf32> -> vector<128x128xf32>
    %125 = arith.truncf %124 : vector<128x128xf32> to vector<128x128xbf16>
    %cst_91 = arith.constant dense<0.000000e+00> : vector<128x128xf32>
    %126 = tpu.matmul %125, %1, %cst_91 {dimension_numbers = #tpu.dot_dimension_numbers<[1], [0], [0], [1], [0, 0, 1, 1], [], []>} : vector<128x128xbf16>, vector<128x128xbf16>, vector<128x128xf32> -> vector<128x128xf32>
    %127 = vector.extract_strided_slice %126 {offsets = [0, 0], sizes = [32, 128], strides = [1, 1]} : vector<128x128xf32> to vector<32x128xf32>
    %128 = vector.extract_strided_slice %126 {offsets = [32, 0], sizes = [32, 128], strides = [1, 1]} : vector<128x128xf32> to vector<32x128xf32>
    %129 = vector.extract_strided_slice %126 {offsets = [64, 0], sizes = [32, 128], strides = [1, 1]} : vector<128x128xf32> to vector<32x128xf32>
    %130 = vector.extract_strided_slice %126 {offsets = [96, 0], sizes = [32, 128], strides = [1, 1]} : vector<128x128xf32> to vector<32x128xf32>
    %131 = tpu.concatenate %94, %98 in 0 : vector<32x128xf32>, vector<32x128xf32> -> vector<64x128xf32>
    %132 = arith.truncf %131 : vector<64x128xf32> to vector<64x128xbf16>
    %cst_92 = arith.constant dense<0.000000e+00> : vector<64x128xf32>
    %133 = tpu.matmul %132, %0, %cst_92 {dimension_numbers = #tpu.dot_dimension_numbers<[1], [0], [0], [1], [0, 0, 1, 1], [], []>} : vector<64x128xbf16>, vector<128x128xbf16>, vector<64x128xf32> -> vector<64x128xf32>
    %134 = vector.extract_strided_slice %133 {offsets = [0, 0], sizes = [32, 128], strides = [1, 1]} : vector<64x128xf32> to vector<32x128xf32>
    %135 = vector.extract_strided_slice %133 {offsets = [32, 0], sizes = [32, 128], strides = [1, 1]} : vector<64x128xf32> to vector<32x128xf32>
    %136 = arith.mulf %118, %127 : vector<32x128xf32>
    %137 = arith.mulf %123, %129 : vector<32x128xf32>
    %138 = tpu.concatenate %136, %137 in 0 : vector<32x128xf32>, vector<32x128xf32> -> vector<64x128xf32>
    %139 = arith.truncf %138 : vector<64x128xf32> to vector<64x128xbf16>
    %cst_93 = arith.constant dense<0.000000e+00> : vector<64x128xf32>
    %140 = tpu.matmul %139, %2, %cst_93 {dimension_numbers = #tpu.dot_dimension_numbers<[1], [0], [0], [1], [0, 0, 1, 1], [], []>} : vector<64x128xbf16>, vector<128x128xbf16>, vector<64x128xf32> -> vector<64x128xf32>
    %141 = vector.broadcast %3 : vector<1x128xf32> to vector<64x128xf32>
    %142 = arith.mulf %140, %141 : vector<64x128xf32>
    %143 = vector.extract_strided_slice %142 {offsets = [0, 0], sizes = [32, 128], strides = [1, 1]} : vector<64x128xf32> to vector<32x128xf32>
    %144 = vector.extract_strided_slice %142 {offsets = [32, 0], sizes = [32, 128], strides = [1, 1]} : vector<64x128xf32> to vector<32x128xf32>
    %145 = arith.addf %92, %143 : vector<32x128xf32>
    %c0_94 = arith.constant 0 : index
    %c0_95 = arith.constant 0 : index
    %c0_96 = arith.constant 0 : index
    %c0_97 = arith.constant 0 : index
    %146 = vector.load %arg17[%c0_94, %c0_95, %c0_96, %c0_97] : memref<2x4x32x1xf32, #tpu.memory_space<vmem>>, vector<1x1x32x1xf32>
    %147 = vector.shape_cast %146 : vector<1x1x32x1xf32> to vector<32x1xf32>
    %c0_98 = arith.constant 0 : index
    %c0_99 = arith.constant 0 : index
    %c0_100 = arith.constant 0 : index
    %c0_101 = arith.constant 0 : index
    %148 = vector.load %arg18[%c0_98, %c0_99, %c0_100, %c0_101] : memref<2x4x32x1xf32, #tpu.memory_space<vmem>>, vector<1x1x32x1xf32>
    %149 = vector.shape_cast %148 : vector<1x1x32x1xf32> to vector<32x1xf32>
    %150 = vector.broadcast %4 : vector<1x128xf32> to vector<32x128xf32>
    %151 = arith.mulf %145, %150 : vector<32x128xf32>
    %cst_102 = arith.constant dense<0.000000e+00> : vector<32xf32>
    %152 = vector.multi_reduction <add>, %151, %cst_102 [1] : vector<32x128xf32> to vector<32xf32>
    %153 = vector.shape_cast %152 : vector<32xf32> to vector<32x1xf32>
    %154 = arith.mulf %151, %151 : vector<32x128xf32>
    %cst_103 = arith.constant dense<0.000000e+00> : vector<32xf32>
    %155 = vector.multi_reduction <add>, %154, %cst_103 [1] : vector<32x128xf32> to vector<32xf32>
    %156 = vector.shape_cast %155 : vector<32xf32> to vector<32x1xf32>
    %157 = vector.broadcast %9 : vector<1x1xf32> to vector<32x1xf32>
    %158 = arith.mulf %153, %157 : vector<32x1xf32>
    %159 = vector.broadcast %9 : vector<1x1xf32> to vector<32x1xf32>
    %160 = arith.mulf %156, %159 : vector<32x1xf32>
    %161 = arith.mulf %158, %158 : vector<32x1xf32>
    %162 = arith.subf %160, %161 : vector<32x1xf32>
    %163 = vector.broadcast %158 : vector<32x1xf32> to vector<32x128xf32>
    %164 = arith.subf %145, %163 : vector<32x128xf32>
    %cst_104 = arith.constant 9.99999974E-6 : f32
    %165 = vector.broadcast %cst_104 : f32 to vector<32x1xf32>
    %166 = arith.addf %162, %165 : vector<32x1xf32>
    %167 = math.rsqrt %166 : vector<32x1xf32>
    %168 = vector.broadcast %167 : vector<32x1xf32> to vector<32x128xf32>
    %169 = arith.mulf %164, %168 : vector<32x128xf32>
    %170 = vector.broadcast %147 : vector<32x1xf32> to vector<32x128xf32>
    %171 = arith.mulf %169, %170 : vector<32x128xf32>
    %172 = vector.broadcast %149 : vector<32x1xf32> to vector<32x128xf32>
    %173 = arith.addf %171, %172 : vector<32x128xf32>
    %174 = arith.negf %173 : vector<32x128xf32>
    %175 = math.exp %174 : vector<32x128xf32>
    %cst_105 = arith.constant 1.000000e+00 : f32
    %176 = vector.broadcast %cst_105 : f32 to vector<32x128xf32>
    %177 = arith.addf %176, %175 : vector<32x128xf32>
    %178 = arith.divf %176, %177 : vector<32x128xf32>
    %179 = arith.mulf %173, %178 : vector<32x128xf32>
    %180 = arith.addf %29, %179 : vector<32x128xf32>
    %181 = vector.broadcast %4 : vector<1x128xf32> to vector<32x128xf32>
    %182 = arith.mulf %180, %181 : vector<32x128xf32>
    %183 = arith.addf %96, %144 : vector<32x128xf32>
    %c1_106 = arith.constant 1 : index
    %c0_107 = arith.constant 0 : index
    %c0_108 = arith.constant 0 : index
    %c0_109 = arith.constant 0 : index
    %184 = vector.load %arg17[%c1_106, %c0_107, %c0_108, %c0_109] : memref<2x4x32x1xf32, #tpu.memory_space<vmem>>, vector<1x1x32x1xf32>
    %185 = vector.shape_cast %184 : vector<1x1x32x1xf32> to vector<32x1xf32>
    %c1_110 = arith.constant 1 : index
    %c0_111 = arith.constant 0 : index
    %c0_112 = arith.constant 0 : index
    %c0_113 = arith.constant 0 : index
    %186 = vector.load %arg18[%c1_110, %c0_111, %c0_112, %c0_113] : memref<2x4x32x1xf32, #tpu.memory_space<vmem>>, vector<1x1x32x1xf32>
    %187 = vector.shape_cast %186 : vector<1x1x32x1xf32> to vector<32x1xf32>
    %188 = vector.broadcast %4 : vector<1x128xf32> to vector<32x128xf32>
    %189 = arith.mulf %183, %188 : vector<32x128xf32>
    %cst_114 = arith.constant dense<0.000000e+00> : vector<32xf32>
    %190 = vector.multi_reduction <add>, %189, %cst_114 [1] : vector<32x128xf32> to vector<32xf32>
    %191 = vector.shape_cast %190 : vector<32xf32> to vector<32x1xf32>
    %192 = arith.mulf %189, %189 : vector<32x128xf32>
    %cst_115 = arith.constant dense<0.000000e+00> : vector<32xf32>
    %193 = vector.multi_reduction <add>, %192, %cst_115 [1] : vector<32x128xf32> to vector<32xf32>
    %194 = vector.shape_cast %193 : vector<32xf32> to vector<32x1xf32>
    %195 = vector.broadcast %9 : vector<1x1xf32> to vector<32x1xf32>
    %196 = arith.mulf %191, %195 : vector<32x1xf32>
    %197 = vector.broadcast %9 : vector<1x1xf32> to vector<32x1xf32>
    %198 = arith.mulf %194, %197 : vector<32x1xf32>
    %199 = arith.mulf %196, %196 : vector<32x1xf32>
    %200 = arith.subf %198, %199 : vector<32x1xf32>
    %201 = vector.broadcast %196 : vector<32x1xf32> to vector<32x128xf32>
    %202 = arith.subf %183, %201 : vector<32x128xf32>
    %cst_116 = arith.constant 9.99999974E-6 : f32
    %203 = vector.broadcast %cst_116 : f32 to vector<32x1xf32>
    %204 = arith.addf %200, %203 : vector<32x1xf32>
    %205 = math.rsqrt %204 : vector<32x1xf32>
    %206 = vector.broadcast %205 : vector<32x1xf32> to vector<32x128xf32>
    %207 = arith.mulf %202, %206 : vector<32x128xf32>
    %208 = vector.broadcast %185 : vector<32x1xf32> to vector<32x128xf32>
    %209 = arith.mulf %207, %208 : vector<32x128xf32>
    %210 = vector.broadcast %187 : vector<32x1xf32> to vector<32x128xf32>
    %211 = arith.addf %209, %210 : vector<32x128xf32>
    %212 = arith.negf %211 : vector<32x128xf32>
    %213 = math.exp %212 : vector<32x128xf32>
    %cst_117 = arith.constant 1.000000e+00 : f32
    %214 = vector.broadcast %cst_117 : f32 to vector<32x128xf32>
    %215 = arith.addf %214, %213 : vector<32x128xf32>
    %216 = arith.divf %214, %215 : vector<32x128xf32>
    %217 = arith.mulf %211, %216 : vector<32x128xf32>
    %218 = arith.addf %45, %217 : vector<32x128xf32>
    %219 = vector.broadcast %4 : vector<1x128xf32> to vector<32x128xf32>
    %220 = arith.mulf %218, %219 : vector<32x128xf32>
    %221 = arith.addf %106, %134 : vector<32x128xf32>
    %222 = arith.addf %221, %128 : vector<32x128xf32>
    %c0_118 = arith.constant 0 : index
    %c0_119 = arith.constant 0 : index
    %c0_120 = arith.constant 0 : index
    %c0_121 = arith.constant 0 : index
    %223 = vector.load %arg19[%c0_118, %c0_119, %c0_120, %c0_121] : memref<2x4x32x1xf32, #tpu.memory_space<vmem>>, vector<1x1x32x1xf32>
    %224 = vector.shape_cast %223 : vector<1x1x32x1xf32> to vector<32x1xf32>
    %c0_122 = arith.constant 0 : index
    %c0_123 = arith.constant 0 : index
    %c0_124 = arith.constant 0 : index
    %c0_125 = arith.constant 0 : index
    %225 = vector.load %arg20[%c0_122, %c0_123, %c0_124, %c0_125] : memref<2x4x32x1xf32, #tpu.memory_space<vmem>>, vector<1x1x32x1xf32>
    %226 = vector.shape_cast %225 : vector<1x1x32x1xf32> to vector<32x1xf32>
    %227 = vector.broadcast %5 : vector<1x128xf32> to vector<32x128xf32>
    %228 = arith.mulf %222, %227 : vector<32x128xf32>
    %cst_126 = arith.constant dense<0.000000e+00> : vector<32xf32>
    %229 = vector.multi_reduction <add>, %228, %cst_126 [1] : vector<32x128xf32> to vector<32xf32>
    %230 = vector.shape_cast %229 : vector<32xf32> to vector<32x1xf32>
    %231 = arith.mulf %228, %228 : vector<32x128xf32>
    %cst_127 = arith.constant dense<0.000000e+00> : vector<32xf32>
    %232 = vector.multi_reduction <add>, %231, %cst_127 [1] : vector<32x128xf32> to vector<32xf32>
    %233 = vector.shape_cast %232 : vector<32xf32> to vector<32x1xf32>
    %234 = vector.broadcast %13 : vector<1x1xf32> to vector<32x1xf32>
    %235 = arith.mulf %230, %234 : vector<32x1xf32>
    %236 = vector.broadcast %13 : vector<1x1xf32> to vector<32x1xf32>
    %237 = arith.mulf %233, %236 : vector<32x1xf32>
    %238 = arith.mulf %235, %235 : vector<32x1xf32>
    %239 = arith.subf %237, %238 : vector<32x1xf32>
    %240 = vector.broadcast %235 : vector<32x1xf32> to vector<32x128xf32>
    %241 = arith.subf %222, %240 : vector<32x128xf32>
    %cst_128 = arith.constant 9.99999974E-6 : f32
    %242 = vector.broadcast %cst_128 : f32 to vector<32x1xf32>
    %243 = arith.addf %239, %242 : vector<32x1xf32>
    %244 = math.rsqrt %243 : vector<32x1xf32>
    %245 = vector.broadcast %244 : vector<32x1xf32> to vector<32x128xf32>
    %246 = arith.mulf %241, %245 : vector<32x128xf32>
    %247 = vector.broadcast %224 : vector<32x1xf32> to vector<32x128xf32>
    %248 = arith.mulf %246, %247 : vector<32x128xf32>
    %249 = vector.broadcast %226 : vector<32x1xf32> to vector<32x128xf32>
    %250 = arith.addf %248, %249 : vector<32x128xf32>
    %251 = arith.negf %250 : vector<32x128xf32>
    %252 = math.exp %251 : vector<32x128xf32>
    %cst_129 = arith.constant 1.000000e+00 : f32
    %253 = vector.broadcast %cst_129 : f32 to vector<32x128xf32>
    %254 = arith.addf %253, %252 : vector<32x128xf32>
    %255 = arith.divf %253, %254 : vector<32x128xf32>
    %256 = arith.mulf %250, %255 : vector<32x128xf32>
    %257 = arith.addf %61, %256 : vector<32x128xf32>
    %258 = vector.broadcast %5 : vector<1x128xf32> to vector<32x128xf32>
    %259 = arith.mulf %257, %258 : vector<32x128xf32>
    %260 = arith.addf %113, %135 : vector<32x128xf32>
    %261 = arith.addf %260, %130 : vector<32x128xf32>
    %c1_130 = arith.constant 1 : index
    %c0_131 = arith.constant 0 : index
    %c0_132 = arith.constant 0 : index
    %c0_133 = arith.constant 0 : index
    %262 = vector.load %arg19[%c1_130, %c0_131, %c0_132, %c0_133] : memref<2x4x32x1xf32, #tpu.memory_space<vmem>>, vector<1x1x32x1xf32>
    %263 = vector.shape_cast %262 : vector<1x1x32x1xf32> to vector<32x1xf32>
    %c1_134 = arith.constant 1 : index
    %c0_135 = arith.constant 0 : index
    %c0_136 = arith.constant 0 : index
    %c0_137 = arith.constant 0 : index
    %264 = vector.load %arg20[%c1_134, %c0_135, %c0_136, %c0_137] : memref<2x4x32x1xf32, #tpu.memory_space<vmem>>, vector<1x1x32x1xf32>
    %265 = vector.shape_cast %264 : vector<1x1x32x1xf32> to vector<32x1xf32>
    %266 = vector.broadcast %5 : vector<1x128xf32> to vector<32x128xf32>
    %267 = arith.mulf %261, %266 : vector<32x128xf32>
    %cst_138 = arith.constant dense<0.000000e+00> : vector<32xf32>
    %268 = vector.multi_reduction <add>, %267, %cst_138 [1] : vector<32x128xf32> to vector<32xf32>
    %269 = vector.shape_cast %268 : vector<32xf32> to vector<32x1xf32>
    %270 = arith.mulf %267, %267 : vector<32x128xf32>
    %cst_139 = arith.constant dense<0.000000e+00> : vector<32xf32>
    %271 = vector.multi_reduction <add>, %270, %cst_139 [1] : vector<32x128xf32> to vector<32xf32>
    %272 = vector.shape_cast %271 : vector<32xf32> to vector<32x1xf32>
    %273 = vector.broadcast %13 : vector<1x1xf32> to vector<32x1xf32>
    %274 = arith.mulf %269, %273 : vector<32x1xf32>
    %275 = vector.broadcast %13 : vector<1x1xf32> to vector<32x1xf32>
    %276 = arith.mulf %272, %275 : vector<32x1xf32>
    %277 = arith.mulf %274, %274 : vector<32x1xf32>
    %278 = arith.subf %276, %277 : vector<32x1xf32>
    %279 = vector.broadcast %274 : vector<32x1xf32> to vector<32x128xf32>
    %280 = arith.subf %261, %279 : vector<32x128xf32>
    %cst_140 = arith.constant 9.99999974E-6 : f32
    %281 = vector.broadcast %cst_140 : f32 to vector<32x1xf32>
    %282 = arith.addf %278, %281 : vector<32x1xf32>
    %283 = math.rsqrt %282 : vector<32x1xf32>
    %284 = vector.broadcast %283 : vector<32x1xf32> to vector<32x128xf32>
    %285 = arith.mulf %280, %284 : vector<32x128xf32>
    %286 = vector.broadcast %263 : vector<32x1xf32> to vector<32x128xf32>
    %287 = arith.mulf %285, %286 : vector<32x128xf32>
    %288 = vector.broadcast %265 : vector<32x1xf32> to vector<32x128xf32>
    %289 = arith.addf %287, %288 : vector<32x128xf32>
    %290 = arith.negf %289 : vector<32x128xf32>
    %291 = math.exp %290 : vector<32x128xf32>
    %cst_141 = arith.constant 1.000000e+00 : f32
    %292 = vector.broadcast %cst_141 : f32 to vector<32x128xf32>
    %293 = arith.addf %292, %291 : vector<32x128xf32>
    %294 = arith.divf %292, %293 : vector<32x128xf32>
    %295 = arith.mulf %289, %294 : vector<32x128xf32>
    %296 = arith.addf %77, %295 : vector<32x128xf32>
    %297 = vector.broadcast %5 : vector<1x128xf32> to vector<32x128xf32>
    %298 = arith.mulf %296, %297 : vector<32x128xf32>
    %c0_142 = arith.constant 0 : index
    %c1_143 = arith.constant 1 : index
    %c0_144 = arith.constant 0 : index
    %c0_145 = arith.constant 0 : index
    %299 = vector.load %arg13[%c0_142, %c1_143, %c0_144, %c0_145] : memref<2x4x128x32xf32, #tpu.memory_space<vmem>>, vector<1x1x128x32xf32>
    %300 = vector.shape_cast %299 : vector<1x1x128x32xf32> to vector<128x32xf32>
    %cst_146 = arith.constant dense<0.000000e+00> : vector<128x128xf32>
    %301 = tpu.matmul %300, %182, %cst_146 {dimension_numbers = #tpu.dot_dimension_numbers<[1], [0], [0], [1], [0, 0, 1, 1], [], []>} : vector<128x32xf32>, vector<32x128xf32>, vector<128x128xf32> -> vector<128x128xf32>
    %c0_147 = arith.constant 0 : index
    %c1_148 = arith.constant 1 : index
    %c0_149 = arith.constant 0 : index
    %c0_150 = arith.constant 0 : index
    %302 = vector.load %arg14[%c0_147, %c1_148, %c0_149, %c0_150] : memref<2x4x128x1xf32, #tpu.memory_space<vmem>>, vector<1x1x128x1xf32>
    %303 = vector.shape_cast %302 : vector<1x1x128x1xf32> to vector<128x1xf32>
    %304 = vector.broadcast %303 : vector<128x1xf32> to vector<128x128xf32>
    %305 = arith.addf %301, %304 : vector<128x128xf32>
    %c1_151 = arith.constant 1 : index
    %c1_152 = arith.constant 1 : index
    %c0_153 = arith.constant 0 : index
    %c0_154 = arith.constant 0 : index
    %306 = vector.load %arg13[%c1_151, %c1_152, %c0_153, %c0_154] : memref<2x4x128x32xf32, #tpu.memory_space<vmem>>, vector<1x1x128x32xf32>
    %307 = vector.shape_cast %306 : vector<1x1x128x32xf32> to vector<128x32xf32>
    %cst_155 = arith.constant dense<0.000000e+00> : vector<128x128xf32>
    %308 = tpu.matmul %307, %220, %cst_155 {dimension_numbers = #tpu.dot_dimension_numbers<[1], [0], [0], [1], [0, 0, 1, 1], [], []>} : vector<128x32xf32>, vector<32x128xf32>, vector<128x128xf32> -> vector<128x128xf32>
    %c1_156 = arith.constant 1 : index
    %c1_157 = arith.constant 1 : index
    %c0_158 = arith.constant 0 : index
    %c0_159 = arith.constant 0 : index
    %309 = vector.load %arg14[%c1_156, %c1_157, %c0_158, %c0_159] : memref<2x4x128x1xf32, #tpu.memory_space<vmem>>, vector<1x1x128x1xf32>
    %310 = vector.shape_cast %309 : vector<1x1x128x1xf32> to vector<128x1xf32>
    %311 = vector.broadcast %310 : vector<128x1xf32> to vector<128x128xf32>
    %312 = arith.addf %308, %311 : vector<128x128xf32>
    %313 = vector.extract_strided_slice %305 {offsets = [0, 0], sizes = [32, 128], strides = [1, 1]} : vector<128x128xf32> to vector<32x128xf32>
    %314 = vector.extract_strided_slice %305 {offsets = [32, 0], sizes = [32, 128], strides = [1, 1]} : vector<128x128xf32> to vector<32x128xf32>
    %315 = vector.extract_strided_slice %305 {offsets = [64, 0], sizes = [32, 128], strides = [1, 1]} : vector<128x128xf32> to vector<32x128xf32>
    %316 = vector.extract_strided_slice %305 {offsets = [96, 0], sizes = [32, 128], strides = [1, 1]} : vector<128x128xf32> to vector<32x128xf32>
    %317 = vector.extract_strided_slice %312 {offsets = [0, 0], sizes = [32, 128], strides = [1, 1]} : vector<128x128xf32> to vector<32x128xf32>
    %318 = vector.extract_strided_slice %312 {offsets = [32, 0], sizes = [32, 128], strides = [1, 1]} : vector<128x128xf32> to vector<32x128xf32>
    %319 = vector.extract_strided_slice %312 {offsets = [64, 0], sizes = [32, 128], strides = [1, 1]} : vector<128x128xf32> to vector<32x128xf32>
    %320 = vector.extract_strided_slice %312 {offsets = [96, 0], sizes = [32, 128], strides = [1, 1]} : vector<128x128xf32> to vector<32x128xf32>
    %c0_160 = arith.constant 0 : index
    %c1_161 = arith.constant 1 : index
    %c0_162 = arith.constant 0 : index
    %c0_163 = arith.constant 0 : index
    %321 = vector.load %arg15[%c0_160, %c1_161, %c0_162, %c0_163] : memref<2x4x32x32xf32, #tpu.memory_space<vmem>>, vector<1x1x32x32xf32>
    %322 = vector.shape_cast %321 : vector<1x1x32x32xf32> to vector<32x32xf32>
    %cst_164 = arith.constant dense<0.000000e+00> : vector<32x128xf32>
    %323 = tpu.matmul %322, %259, %cst_164 {dimension_numbers = #tpu.dot_dimension_numbers<[1], [0], [0], [1], [0, 0, 1, 1], [], []>} : vector<32x32xf32>, vector<32x128xf32>, vector<32x128xf32> -> vector<32x128xf32>
    %c0_165 = arith.constant 0 : index
    %c1_166 = arith.constant 1 : index
    %c0_167 = arith.constant 0 : index
    %c0_168 = arith.constant 0 : index
    %324 = vector.load %arg16[%c0_165, %c1_166, %c0_167, %c0_168] : memref<2x4x32x1xf32, #tpu.memory_space<vmem>>, vector<1x1x32x1xf32>
    %325 = vector.shape_cast %324 : vector<1x1x32x1xf32> to vector<32x1xf32>
    %326 = vector.broadcast %325 : vector<32x1xf32> to vector<32x128xf32>
    %327 = arith.addf %323, %326 : vector<32x128xf32>
    %c1_169 = arith.constant 1 : index
    %c1_170 = arith.constant 1 : index
    %c0_171 = arith.constant 0 : index
    %c0_172 = arith.constant 0 : index
    %328 = vector.load %arg15[%c1_169, %c1_170, %c0_171, %c0_172] : memref<2x4x32x32xf32, #tpu.memory_space<vmem>>, vector<1x1x32x32xf32>
    %329 = vector.shape_cast %328 : vector<1x1x32x32xf32> to vector<32x32xf32>
    %cst_173 = arith.constant dense<0.000000e+00> : vector<32x128xf32>
    %330 = tpu.matmul %329, %298, %cst_173 {dimension_numbers = #tpu.dot_dimension_numbers<[1], [0], [0], [1], [0, 0, 1, 1], [], []>} : vector<32x32xf32>, vector<32x128xf32>, vector<32x128xf32> -> vector<32x128xf32>
    %c1_174 = arith.constant 1 : index
    %c1_175 = arith.constant 1 : index
    %c0_176 = arith.constant 0 : index
    %c0_177 = arith.constant 0 : index
    %331 = vector.load %arg16[%c1_174, %c1_175, %c0_176, %c0_177] : memref<2x4x32x1xf32, #tpu.memory_space<vmem>>, vector<1x1x32x1xf32>
    %332 = vector.shape_cast %331 : vector<1x1x32x1xf32> to vector<32x1xf32>
    %333 = vector.broadcast %332 : vector<32x1xf32> to vector<32x128xf32>
    %334 = arith.addf %330, %333 : vector<32x128xf32>
    %335 = arith.negf %259 : vector<32x128xf32>
    %336 = math.exp %335 : vector<32x128xf32>
    %cst_178 = arith.constant 1.000000e+00 : f32
    %337 = vector.broadcast %cst_178 : f32 to vector<32x128xf32>
    %338 = arith.addf %337, %336 : vector<32x128xf32>
    %339 = arith.divf %337, %338 : vector<32x128xf32>
    %340 = arith.negf %298 : vector<32x128xf32>
    %341 = math.exp %340 : vector<32x128xf32>
    %cst_179 = arith.constant 1.000000e+00 : f32
    %342 = vector.broadcast %cst_179 : f32 to vector<32x128xf32>
    %343 = arith.addf %342, %341 : vector<32x128xf32>
    %344 = arith.divf %342, %343 : vector<32x128xf32>
    %345 = tpu.concatenate %314, %316, %318, %320 in 0 : vector<32x128xf32>, vector<32x128xf32>, vector<32x128xf32>, vector<32x128xf32> -> vector<128x128xf32>
    %346 = arith.truncf %345 : vector<128x128xf32> to vector<128x128xbf16>
    %cst_180 = arith.constant dense<0.000000e+00> : vector<128x128xf32>
    %347 = tpu.matmul %346, %1, %cst_180 {dimension_numbers = #tpu.dot_dimension_numbers<[1], [0], [0], [1], [0, 0, 1, 1], [], []>} : vector<128x128xbf16>, vector<128x128xbf16>, vector<128x128xf32> -> vector<128x128xf32>
    %348 = vector.extract_strided_slice %347 {offsets = [0, 0], sizes = [32, 128], strides = [1, 1]} : vector<128x128xf32> to vector<32x128xf32>
    %349 = vector.extract_strided_slice %347 {offsets = [32, 0], sizes = [32, 128], strides = [1, 1]} : vector<128x128xf32> to vector<32x128xf32>
    %350 = vector.extract_strided_slice %347 {offsets = [64, 0], sizes = [32, 128], strides = [1, 1]} : vector<128x128xf32> to vector<32x128xf32>
    %351 = vector.extract_strided_slice %347 {offsets = [96, 0], sizes = [32, 128], strides = [1, 1]} : vector<128x128xf32> to vector<32x128xf32>
    %352 = tpu.concatenate %315, %319 in 0 : vector<32x128xf32>, vector<32x128xf32> -> vector<64x128xf32>
    %353 = arith.truncf %352 : vector<64x128xf32> to vector<64x128xbf16>
    %cst_181 = arith.constant dense<0.000000e+00> : vector<64x128xf32>
    %354 = tpu.matmul %353, %0, %cst_181 {dimension_numbers = #tpu.dot_dimension_numbers<[1], [0], [0], [1], [0, 0, 1, 1], [], []>} : vector<64x128xbf16>, vector<128x128xbf16>, vector<64x128xf32> -> vector<64x128xf32>
    %355 = vector.extract_strided_slice %354 {offsets = [0, 0], sizes = [32, 128], strides = [1, 1]} : vector<64x128xf32> to vector<32x128xf32>
    %356 = vector.extract_strided_slice %354 {offsets = [32, 0], sizes = [32, 128], strides = [1, 1]} : vector<64x128xf32> to vector<32x128xf32>
    %357 = arith.mulf %339, %348 : vector<32x128xf32>
    %358 = arith.mulf %344, %350 : vector<32x128xf32>
    %359 = tpu.concatenate %357, %358 in 0 : vector<32x128xf32>, vector<32x128xf32> -> vector<64x128xf32>
    %360 = arith.truncf %359 : vector<64x128xf32> to vector<64x128xbf16>
    %cst_182 = arith.constant dense<0.000000e+00> : vector<64x128xf32>
    %361 = tpu.matmul %360, %2, %cst_182 {dimension_numbers = #tpu.dot_dimension_numbers<[1], [0], [0], [1], [0, 0, 1, 1], [], []>} : vector<64x128xbf16>, vector<128x128xbf16>, vector<64x128xf32> -> vector<64x128xf32>
    %362 = vector.broadcast %3 : vector<1x128xf32> to vector<64x128xf32>
    %363 = arith.mulf %361, %362 : vector<64x128xf32>
    %364 = vector.extract_strided_slice %363 {offsets = [0, 0], sizes = [32, 128], strides = [1, 1]} : vector<64x128xf32> to vector<32x128xf32>
    %365 = vector.extract_strided_slice %363 {offsets = [32, 0], sizes = [32, 128], strides = [1, 1]} : vector<64x128xf32> to vector<32x128xf32>
    %366 = arith.addf %313, %364 : vector<32x128xf32>
    %c0_183 = arith.constant 0 : index
    %c1_184 = arith.constant 1 : index
    %c0_185 = arith.constant 0 : index
    %c0_186 = arith.constant 0 : index
    %367 = vector.load %arg17[%c0_183, %c1_184, %c0_185, %c0_186] : memref<2x4x32x1xf32, #tpu.memory_space<vmem>>, vector<1x1x32x1xf32>
    %368 = vector.shape_cast %367 : vector<1x1x32x1xf32> to vector<32x1xf32>
    %c0_187 = arith.constant 0 : index
    %c1_188 = arith.constant 1 : index
    %c0_189 = arith.constant 0 : index
    %c0_190 = arith.constant 0 : index
    %369 = vector.load %arg18[%c0_187, %c1_188, %c0_189, %c0_190] : memref<2x4x32x1xf32, #tpu.memory_space<vmem>>, vector<1x1x32x1xf32>
    %370 = vector.shape_cast %369 : vector<1x1x32x1xf32> to vector<32x1xf32>
    %371 = vector.broadcast %4 : vector<1x128xf32> to vector<32x128xf32>
    %372 = arith.mulf %366, %371 : vector<32x128xf32>
    %cst_191 = arith.constant dense<0.000000e+00> : vector<32xf32>
    %373 = vector.multi_reduction <add>, %372, %cst_191 [1] : vector<32x128xf32> to vector<32xf32>
    %374 = vector.shape_cast %373 : vector<32xf32> to vector<32x1xf32>
    %375 = arith.mulf %372, %372 : vector<32x128xf32>
    %cst_192 = arith.constant dense<0.000000e+00> : vector<32xf32>
    %376 = vector.multi_reduction <add>, %375, %cst_192 [1] : vector<32x128xf32> to vector<32xf32>
    %377 = vector.shape_cast %376 : vector<32xf32> to vector<32x1xf32>
    %378 = vector.broadcast %9 : vector<1x1xf32> to vector<32x1xf32>
    %379 = arith.mulf %374, %378 : vector<32x1xf32>
    %380 = vector.broadcast %9 : vector<1x1xf32> to vector<32x1xf32>
    %381 = arith.mulf %377, %380 : vector<32x1xf32>
    %382 = arith.mulf %379, %379 : vector<32x1xf32>
    %383 = arith.subf %381, %382 : vector<32x1xf32>
    %384 = vector.broadcast %379 : vector<32x1xf32> to vector<32x128xf32>
    %385 = arith.subf %366, %384 : vector<32x128xf32>
    %cst_193 = arith.constant 9.99999974E-6 : f32
    %386 = vector.broadcast %cst_193 : f32 to vector<32x1xf32>
    %387 = arith.addf %383, %386 : vector<32x1xf32>
    %388 = math.rsqrt %387 : vector<32x1xf32>
    %389 = vector.broadcast %388 : vector<32x1xf32> to vector<32x128xf32>
    %390 = arith.mulf %385, %389 : vector<32x128xf32>
    %391 = vector.broadcast %368 : vector<32x1xf32> to vector<32x128xf32>
    %392 = arith.mulf %390, %391 : vector<32x128xf32>
    %393 = vector.broadcast %370 : vector<32x1xf32> to vector<32x128xf32>
    %394 = arith.addf %392, %393 : vector<32x128xf32>
    %395 = arith.negf %394 : vector<32x128xf32>
    %396 = math.exp %395 : vector<32x128xf32>
    %cst_194 = arith.constant 1.000000e+00 : f32
    %397 = vector.broadcast %cst_194 : f32 to vector<32x128xf32>
    %398 = arith.addf %397, %396 : vector<32x128xf32>
    %399 = arith.divf %397, %398 : vector<32x128xf32>
    %400 = arith.mulf %394, %399 : vector<32x128xf32>
    %401 = arith.addf %182, %400 : vector<32x128xf32>
    %402 = vector.broadcast %4 : vector<1x128xf32> to vector<32x128xf32>
    %403 = arith.mulf %401, %402 : vector<32x128xf32>
    %404 = arith.addf %317, %365 : vector<32x128xf32>
    %c1_195 = arith.constant 1 : index
    %c1_196 = arith.constant 1 : index
    %c0_197 = arith.constant 0 : index
    %c0_198 = arith.constant 0 : index
    %405 = vector.load %arg17[%c1_195, %c1_196, %c0_197, %c0_198] : memref<2x4x32x1xf32, #tpu.memory_space<vmem>>, vector<1x1x32x1xf32>
    %406 = vector.shape_cast %405 : vector<1x1x32x1xf32> to vector<32x1xf32>
    %c1_199 = arith.constant 1 : index
    %c1_200 = arith.constant 1 : index
    %c0_201 = arith.constant 0 : index
    %c0_202 = arith.constant 0 : index
    %407 = vector.load %arg18[%c1_199, %c1_200, %c0_201, %c0_202] : memref<2x4x32x1xf32, #tpu.memory_space<vmem>>, vector<1x1x32x1xf32>
    %408 = vector.shape_cast %407 : vector<1x1x32x1xf32> to vector<32x1xf32>
    %409 = vector.broadcast %4 : vector<1x128xf32> to vector<32x128xf32>
    %410 = arith.mulf %404, %409 : vector<32x128xf32>
    %cst_203 = arith.constant dense<0.000000e+00> : vector<32xf32>
    %411 = vector.multi_reduction <add>, %410, %cst_203 [1] : vector<32x128xf32> to vector<32xf32>
    %412 = vector.shape_cast %411 : vector<32xf32> to vector<32x1xf32>
    %413 = arith.mulf %410, %410 : vector<32x128xf32>
    %cst_204 = arith.constant dense<0.000000e+00> : vector<32xf32>
    %414 = vector.multi_reduction <add>, %413, %cst_204 [1] : vector<32x128xf32> to vector<32xf32>
    %415 = vector.shape_cast %414 : vector<32xf32> to vector<32x1xf32>
    %416 = vector.broadcast %9 : vector<1x1xf32> to vector<32x1xf32>
    %417 = arith.mulf %412, %416 : vector<32x1xf32>
    %418 = vector.broadcast %9 : vector<1x1xf32> to vector<32x1xf32>
    %419 = arith.mulf %415, %418 : vector<32x1xf32>
    %420 = arith.mulf %417, %417 : vector<32x1xf32>
    %421 = arith.subf %419, %420 : vector<32x1xf32>
    %422 = vector.broadcast %417 : vector<32x1xf32> to vector<32x128xf32>
    %423 = arith.subf %404, %422 : vector<32x128xf32>
    %cst_205 = arith.constant 9.99999974E-6 : f32
    %424 = vector.broadcast %cst_205 : f32 to vector<32x1xf32>
    %425 = arith.addf %421, %424 : vector<32x1xf32>
    %426 = math.rsqrt %425 : vector<32x1xf32>
    %427 = vector.broadcast %426 : vector<32x1xf32> to vector<32x128xf32>
    %428 = arith.mulf %423, %427 : vector<32x128xf32>
    %429 = vector.broadcast %406 : vector<32x1xf32> to vector<32x128xf32>
    %430 = arith.mulf %428, %429 : vector<32x128xf32>
    %431 = vector.broadcast %408 : vector<32x1xf32> to vector<32x128xf32>
    %432 = arith.addf %430, %431 : vector<32x128xf32>
    %433 = arith.negf %432 : vector<32x128xf32>
    %434 = math.exp %433 : vector<32x128xf32>
    %cst_206 = arith.constant 1.000000e+00 : f32
    %435 = vector.broadcast %cst_206 : f32 to vector<32x128xf32>
    %436 = arith.addf %435, %434 : vector<32x128xf32>
    %437 = arith.divf %435, %436 : vector<32x128xf32>
    %438 = arith.mulf %432, %437 : vector<32x128xf32>
    %439 = arith.addf %220, %438 : vector<32x128xf32>
    %440 = vector.broadcast %4 : vector<1x128xf32> to vector<32x128xf32>
    %441 = arith.mulf %439, %440 : vector<32x128xf32>
    %442 = arith.addf %327, %355 : vector<32x128xf32>
    %443 = arith.addf %442, %349 : vector<32x128xf32>
    %c0_207 = arith.constant 0 : index
    %c1_208 = arith.constant 1 : index
    %c0_209 = arith.constant 0 : index
    %c0_210 = arith.constant 0 : index
    %444 = vector.load %arg19[%c0_207, %c1_208, %c0_209, %c0_210] : memref<2x4x32x1xf32, #tpu.memory_space<vmem>>, vector<1x1x32x1xf32>
    %445 = vector.shape_cast %444 : vector<1x1x32x1xf32> to vector<32x1xf32>
    %c0_211 = arith.constant 0 : index
    %c1_212 = arith.constant 1 : index
    %c0_213 = arith.constant 0 : index
    %c0_214 = arith.constant 0 : index
    %446 = vector.load %arg20[%c0_211, %c1_212, %c0_213, %c0_214] : memref<2x4x32x1xf32, #tpu.memory_space<vmem>>, vector<1x1x32x1xf32>
    %447 = vector.shape_cast %446 : vector<1x1x32x1xf32> to vector<32x1xf32>
    %448 = vector.broadcast %5 : vector<1x128xf32> to vector<32x128xf32>
    %449 = arith.mulf %443, %448 : vector<32x128xf32>
    %cst_215 = arith.constant dense<0.000000e+00> : vector<32xf32>
    %450 = vector.multi_reduction <add>, %449, %cst_215 [1] : vector<32x128xf32> to vector<32xf32>
    %451 = vector.shape_cast %450 : vector<32xf32> to vector<32x1xf32>
    %452 = arith.mulf %449, %449 : vector<32x128xf32>
    %cst_216 = arith.constant dense<0.000000e+00> : vector<32xf32>
    %453 = vector.multi_reduction <add>, %452, %cst_216 [1] : vector<32x128xf32> to vector<32xf32>
    %454 = vector.shape_cast %453 : vector<32xf32> to vector<32x1xf32>
    %455 = vector.broadcast %13 : vector<1x1xf32> to vector<32x1xf32>
    %456 = arith.mulf %451, %455 : vector<32x1xf32>
    %457 = vector.broadcast %13 : vector<1x1xf32> to vector<32x1xf32>
    %458 = arith.mulf %454, %457 : vector<32x1xf32>
    %459 = arith.mulf %456, %456 : vector<32x1xf32>
    %460 = arith.subf %458, %459 : vector<32x1xf32>
    %461 = vector.broadcast %456 : vector<32x1xf32> to vector<32x128xf32>
    %462 = arith.subf %443, %461 : vector<32x128xf32>
    %cst_217 = arith.constant 9.99999974E-6 : f32
    %463 = vector.broadcast %cst_217 : f32 to vector<32x1xf32>
    %464 = arith.addf %460, %463 : vector<32x1xf32>
    %465 = math.rsqrt %464 : vector<32x1xf32>
    %466 = vector.broadcast %465 : vector<32x1xf32> to vector<32x128xf32>
    %467 = arith.mulf %462, %466 : vector<32x128xf32>
    %468 = vector.broadcast %445 : vector<32x1xf32> to vector<32x128xf32>
    %469 = arith.mulf %467, %468 : vector<32x128xf32>
    %470 = vector.broadcast %447 : vector<32x1xf32> to vector<32x128xf32>
    %471 = arith.addf %469, %470 : vector<32x128xf32>
    %472 = arith.negf %471 : vector<32x128xf32>
    %473 = math.exp %472 : vector<32x128xf32>
    %cst_218 = arith.constant 1.000000e+00 : f32
    %474 = vector.broadcast %cst_218 : f32 to vector<32x128xf32>
    %475 = arith.addf %474, %473 : vector<32x128xf32>
    %476 = arith.divf %474, %475 : vector<32x128xf32>
    %477 = arith.mulf %471, %476 : vector<32x128xf32>
    %478 = arith.addf %259, %477 : vector<32x128xf32>
    %479 = vector.broadcast %5 : vector<1x128xf32> to vector<32x128xf32>
    %480 = arith.mulf %478, %479 : vector<32x128xf32>
    %481 = arith.addf %334, %356 : vector<32x128xf32>
    %482 = arith.addf %481, %351 : vector<32x128xf32>
    %c1_219 = arith.constant 1 : index
    %c1_220 = arith.constant 1 : index
    %c0_221 = arith.constant 0 : index
    %c0_222 = arith.constant 0 : index
    %483 = vector.load %arg19[%c1_219, %c1_220, %c0_221, %c0_222] : memref<2x4x32x1xf32, #tpu.memory_space<vmem>>, vector<1x1x32x1xf32>
    %484 = vector.shape_cast %483 : vector<1x1x32x1xf32> to vector<32x1xf32>
    %c1_223 = arith.constant 1 : index
    %c1_224 = arith.constant 1 : index
    %c0_225 = arith.constant 0 : index
    %c0_226 = arith.constant 0 : index
    %485 = vector.load %arg20[%c1_223, %c1_224, %c0_225, %c0_226] : memref<2x4x32x1xf32, #tpu.memory_space<vmem>>, vector<1x1x32x1xf32>
    %486 = vector.shape_cast %485 : vector<1x1x32x1xf32> to vector<32x1xf32>
    %487 = vector.broadcast %5 : vector<1x128xf32> to vector<32x128xf32>
    %488 = arith.mulf %482, %487 : vector<32x128xf32>
    %cst_227 = arith.constant dense<0.000000e+00> : vector<32xf32>
    %489 = vector.multi_reduction <add>, %488, %cst_227 [1] : vector<32x128xf32> to vector<32xf32>
    %490 = vector.shape_cast %489 : vector<32xf32> to vector<32x1xf32>
    %491 = arith.mulf %488, %488 : vector<32x128xf32>
    %cst_228 = arith.constant dense<0.000000e+00> : vector<32xf32>
    %492 = vector.multi_reduction <add>, %491, %cst_228 [1] : vector<32x128xf32> to vector<32xf32>
    %493 = vector.shape_cast %492 : vector<32xf32> to vector<32x1xf32>
    %494 = vector.broadcast %13 : vector<1x1xf32> to vector<32x1xf32>
    %495 = arith.mulf %490, %494 : vector<32x1xf32>
    %496 = vector.broadcast %13 : vector<1x1xf32> to vector<32x1xf32>
    %497 = arith.mulf %493, %496 : vector<32x1xf32>
    %498 = arith.mulf %495, %495 : vector<32x1xf32>
    %499 = arith.subf %497, %498 : vector<32x1xf32>
    %500 = vector.broadcast %495 : vector<32x1xf32> to vector<32x128xf32>
    %501 = arith.subf %482, %500 : vector<32x128xf32>
    %cst_229 = arith.constant 9.99999974E-6 : f32
    %502 = vector.broadcast %cst_229 : f32 to vector<32x1xf32>
    %503 = arith.addf %499, %502 : vector<32x1xf32>
    %504 = math.rsqrt %503 : vector<32x1xf32>
    %505 = vector.broadcast %504 : vector<32x1xf32> to vector<32x128xf32>
    %506 = arith.mulf %501, %505 : vector<32x128xf32>
    %507 = vector.broadcast %484 : vector<32x1xf32> to vector<32x128xf32>
    %508 = arith.mulf %506, %507 : vector<32x128xf32>
    %509 = vector.broadcast %486 : vector<32x1xf32> to vector<32x128xf32>
    %510 = arith.addf %508, %509 : vector<32x128xf32>
    %511 = arith.negf %510 : vector<32x128xf32>
    %512 = math.exp %511 : vector<32x128xf32>
    %cst_230 = arith.constant 1.000000e+00 : f32
    %513 = vector.broadcast %cst_230 : f32 to vector<32x128xf32>
    %514 = arith.addf %513, %512 : vector<32x128xf32>
    %515 = arith.divf %513, %514 : vector<32x128xf32>
    %516 = arith.mulf %510, %515 : vector<32x128xf32>
    %517 = arith.addf %298, %516 : vector<32x128xf32>
    %518 = vector.broadcast %5 : vector<1x128xf32> to vector<32x128xf32>
    %519 = arith.mulf %517, %518 : vector<32x128xf32>
    %c0_231 = arith.constant 0 : index
    %c2 = arith.constant 2 : index
    %c0_232 = arith.constant 0 : index
    %c0_233 = arith.constant 0 : index
    %520 = vector.load %arg13[%c0_231, %c2, %c0_232, %c0_233] : memref<2x4x128x32xf32, #tpu.memory_space<vmem>>, vector<1x1x128x32xf32>
    %521 = vector.shape_cast %520 : vector<1x1x128x32xf32> to vector<128x32xf32>
    %cst_234 = arith.constant dense<0.000000e+00> : vector<128x128xf32>
    %522 = tpu.matmul %521, %403, %cst_234 {dimension_numbers = #tpu.dot_dimension_numbers<[1], [0], [0], [1], [0, 0, 1, 1], [], []>} : vector<128x32xf32>, vector<32x128xf32>, vector<128x128xf32> -> vector<128x128xf32>
    %c0_235 = arith.constant 0 : index
    %c2_236 = arith.constant 2 : index
    %c0_237 = arith.constant 0 : index
    %c0_238 = arith.constant 0 : index
    %523 = vector.load %arg14[%c0_235, %c2_236, %c0_237, %c0_238] : memref<2x4x128x1xf32, #tpu.memory_space<vmem>>, vector<1x1x128x1xf32>
    %524 = vector.shape_cast %523 : vector<1x1x128x1xf32> to vector<128x1xf32>
    %525 = vector.broadcast %524 : vector<128x1xf32> to vector<128x128xf32>
    %526 = arith.addf %522, %525 : vector<128x128xf32>
    %c1_239 = arith.constant 1 : index
    %c2_240 = arith.constant 2 : index
    %c0_241 = arith.constant 0 : index
    %c0_242 = arith.constant 0 : index
    %527 = vector.load %arg13[%c1_239, %c2_240, %c0_241, %c0_242] : memref<2x4x128x32xf32, #tpu.memory_space<vmem>>, vector<1x1x128x32xf32>
    %528 = vector.shape_cast %527 : vector<1x1x128x32xf32> to vector<128x32xf32>
    %cst_243 = arith.constant dense<0.000000e+00> : vector<128x128xf32>
    %529 = tpu.matmul %528, %441, %cst_243 {dimension_numbers = #tpu.dot_dimension_numbers<[1], [0], [0], [1], [0, 0, 1, 1], [], []>} : vector<128x32xf32>, vector<32x128xf32>, vector<128x128xf32> -> vector<128x128xf32>
    %c1_244 = arith.constant 1 : index
    %c2_245 = arith.constant 2 : index
    %c0_246 = arith.constant 0 : index
    %c0_247 = arith.constant 0 : index
    %530 = vector.load %arg14[%c1_244, %c2_245, %c0_246, %c0_247] : memref<2x4x128x1xf32, #tpu.memory_space<vmem>>, vector<1x1x128x1xf32>
    %531 = vector.shape_cast %530 : vector<1x1x128x1xf32> to vector<128x1xf32>
    %532 = vector.broadcast %531 : vector<128x1xf32> to vector<128x128xf32>
    %533 = arith.addf %529, %532 : vector<128x128xf32>
    %534 = vector.extract_strided_slice %526 {offsets = [0, 0], sizes = [32, 128], strides = [1, 1]} : vector<128x128xf32> to vector<32x128xf32>
    %535 = vector.extract_strided_slice %526 {offsets = [32, 0], sizes = [32, 128], strides = [1, 1]} : vector<128x128xf32> to vector<32x128xf32>
    %536 = vector.extract_strided_slice %526 {offsets = [64, 0], sizes = [32, 128], strides = [1, 1]} : vector<128x128xf32> to vector<32x128xf32>
    %537 = vector.extract_strided_slice %526 {offsets = [96, 0], sizes = [32, 128], strides = [1, 1]} : vector<128x128xf32> to vector<32x128xf32>
    %538 = vector.extract_strided_slice %533 {offsets = [0, 0], sizes = [32, 128], strides = [1, 1]} : vector<128x128xf32> to vector<32x128xf32>
    %539 = vector.extract_strided_slice %533 {offsets = [32, 0], sizes = [32, 128], strides = [1, 1]} : vector<128x128xf32> to vector<32x128xf32>
    %540 = vector.extract_strided_slice %533 {offsets = [64, 0], sizes = [32, 128], strides = [1, 1]} : vector<128x128xf32> to vector<32x128xf32>
    %541 = vector.extract_strided_slice %533 {offsets = [96, 0], sizes = [32, 128], strides = [1, 1]} : vector<128x128xf32> to vector<32x128xf32>
    %c0_248 = arith.constant 0 : index
    %c2_249 = arith.constant 2 : index
    %c0_250 = arith.constant 0 : index
    %c0_251 = arith.constant 0 : index
    %542 = vector.load %arg15[%c0_248, %c2_249, %c0_250, %c0_251] : memref<2x4x32x32xf32, #tpu.memory_space<vmem>>, vector<1x1x32x32xf32>
    %543 = vector.shape_cast %542 : vector<1x1x32x32xf32> to vector<32x32xf32>
    %cst_252 = arith.constant dense<0.000000e+00> : vector<32x128xf32>
    %544 = tpu.matmul %543, %480, %cst_252 {dimension_numbers = #tpu.dot_dimension_numbers<[1], [0], [0], [1], [0, 0, 1, 1], [], []>} : vector<32x32xf32>, vector<32x128xf32>, vector<32x128xf32> -> vector<32x128xf32>
    %c0_253 = arith.constant 0 : index
    %c2_254 = arith.constant 2 : index
    %c0_255 = arith.constant 0 : index
    %c0_256 = arith.constant 0 : index
    %545 = vector.load %arg16[%c0_253, %c2_254, %c0_255, %c0_256] : memref<2x4x32x1xf32, #tpu.memory_space<vmem>>, vector<1x1x32x1xf32>
    %546 = vector.shape_cast %545 : vector<1x1x32x1xf32> to vector<32x1xf32>
    %547 = vector.broadcast %546 : vector<32x1xf32> to vector<32x128xf32>
    %548 = arith.addf %544, %547 : vector<32x128xf32>
    %c1_257 = arith.constant 1 : index
    %c2_258 = arith.constant 2 : index
    %c0_259 = arith.constant 0 : index
    %c0_260 = arith.constant 0 : index
    %549 = vector.load %arg15[%c1_257, %c2_258, %c0_259, %c0_260] : memref<2x4x32x32xf32, #tpu.memory_space<vmem>>, vector<1x1x32x32xf32>
    %550 = vector.shape_cast %549 : vector<1x1x32x32xf32> to vector<32x32xf32>
    %cst_261 = arith.constant dense<0.000000e+00> : vector<32x128xf32>
    %551 = tpu.matmul %550, %519, %cst_261 {dimension_numbers = #tpu.dot_dimension_numbers<[1], [0], [0], [1], [0, 0, 1, 1], [], []>} : vector<32x32xf32>, vector<32x128xf32>, vector<32x128xf32> -> vector<32x128xf32>
    %c1_262 = arith.constant 1 : index
    %c2_263 = arith.constant 2 : index
    %c0_264 = arith.constant 0 : index
    %c0_265 = arith.constant 0 : index
    %552 = vector.load %arg16[%c1_262, %c2_263, %c0_264, %c0_265] : memref<2x4x32x1xf32, #tpu.memory_space<vmem>>, vector<1x1x32x1xf32>
    %553 = vector.shape_cast %552 : vector<1x1x32x1xf32> to vector<32x1xf32>
    %554 = vector.broadcast %553 : vector<32x1xf32> to vector<32x128xf32>
    %555 = arith.addf %551, %554 : vector<32x128xf32>
    %556 = arith.negf %480 : vector<32x128xf32>
    %557 = math.exp %556 : vector<32x128xf32>
    %cst_266 = arith.constant 1.000000e+00 : f32
    %558 = vector.broadcast %cst_266 : f32 to vector<32x128xf32>
    %559 = arith.addf %558, %557 : vector<32x128xf32>
    %560 = arith.divf %558, %559 : vector<32x128xf32>
    %561 = arith.negf %519 : vector<32x128xf32>
    %562 = math.exp %561 : vector<32x128xf32>
    %cst_267 = arith.constant 1.000000e+00 : f32
    %563 = vector.broadcast %cst_267 : f32 to vector<32x128xf32>
    %564 = arith.addf %563, %562 : vector<32x128xf32>
    %565 = arith.divf %563, %564 : vector<32x128xf32>
    %566 = tpu.concatenate %535, %537, %539, %541 in 0 : vector<32x128xf32>, vector<32x128xf32>, vector<32x128xf32>, vector<32x128xf32> -> vector<128x128xf32>
    %567 = arith.truncf %566 : vector<128x128xf32> to vector<128x128xbf16>
    %cst_268 = arith.constant dense<0.000000e+00> : vector<128x128xf32>
    %568 = tpu.matmul %567, %1, %cst_268 {dimension_numbers = #tpu.dot_dimension_numbers<[1], [0], [0], [1], [0, 0, 1, 1], [], []>} : vector<128x128xbf16>, vector<128x128xbf16>, vector<128x128xf32> -> vector<128x128xf32>
    %569 = vector.extract_strided_slice %568 {offsets = [0, 0], sizes = [32, 128], strides = [1, 1]} : vector<128x128xf32> to vector<32x128xf32>
    %570 = vector.extract_strided_slice %568 {offsets = [32, 0], sizes = [32, 128], strides = [1, 1]} : vector<128x128xf32> to vector<32x128xf32>
    %571 = vector.extract_strided_slice %568 {offsets = [64, 0], sizes = [32, 128], strides = [1, 1]} : vector<128x128xf32> to vector<32x128xf32>
    %572 = vector.extract_strided_slice %568 {offsets = [96, 0], sizes = [32, 128], strides = [1, 1]} : vector<128x128xf32> to vector<32x128xf32>
    %573 = tpu.concatenate %536, %540 in 0 : vector<32x128xf32>, vector<32x128xf32> -> vector<64x128xf32>
    %574 = arith.truncf %573 : vector<64x128xf32> to vector<64x128xbf16>
    %cst_269 = arith.constant dense<0.000000e+00> : vector<64x128xf32>
    %575 = tpu.matmul %574, %0, %cst_269 {dimension_numbers = #tpu.dot_dimension_numbers<[1], [0], [0], [1], [0, 0, 1, 1], [], []>} : vector<64x128xbf16>, vector<128x128xbf16>, vector<64x128xf32> -> vector<64x128xf32>
    %576 = vector.extract_strided_slice %575 {offsets = [0, 0], sizes = [32, 128], strides = [1, 1]} : vector<64x128xf32> to vector<32x128xf32>
    %577 = vector.extract_strided_slice %575 {offsets = [32, 0], sizes = [32, 128], strides = [1, 1]} : vector<64x128xf32> to vector<32x128xf32>
    %578 = arith.mulf %560, %569 : vector<32x128xf32>
    %579 = arith.mulf %565, %571 : vector<32x128xf32>
    %580 = tpu.concatenate %578, %579 in 0 : vector<32x128xf32>, vector<32x128xf32> -> vector<64x128xf32>
    %581 = arith.truncf %580 : vector<64x128xf32> to vector<64x128xbf16>
    %cst_270 = arith.constant dense<0.000000e+00> : vector<64x128xf32>
    %582 = tpu.matmul %581, %2, %cst_270 {dimension_numbers = #tpu.dot_dimension_numbers<[1], [0], [0], [1], [0, 0, 1, 1], [], []>} : vector<64x128xbf16>, vector<128x128xbf16>, vector<64x128xf32> -> vector<64x128xf32>
    %583 = vector.broadcast %3 : vector<1x128xf32> to vector<64x128xf32>
    %584 = arith.mulf %582, %583 : vector<64x128xf32>
    %585 = vector.extract_strided_slice %584 {offsets = [0, 0], sizes = [32, 128], strides = [1, 1]} : vector<64x128xf32> to vector<32x128xf32>
    %586 = vector.extract_strided_slice %584 {offsets = [32, 0], sizes = [32, 128], strides = [1, 1]} : vector<64x128xf32> to vector<32x128xf32>
    %587 = arith.addf %534, %585 : vector<32x128xf32>
    %c0_271 = arith.constant 0 : index
    %c2_272 = arith.constant 2 : index
    %c0_273 = arith.constant 0 : index
    %c0_274 = arith.constant 0 : index
    %588 = vector.load %arg17[%c0_271, %c2_272, %c0_273, %c0_274] : memref<2x4x32x1xf32, #tpu.memory_space<vmem>>, vector<1x1x32x1xf32>
    %589 = vector.shape_cast %588 : vector<1x1x32x1xf32> to vector<32x1xf32>
    %c0_275 = arith.constant 0 : index
    %c2_276 = arith.constant 2 : index
    %c0_277 = arith.constant 0 : index
    %c0_278 = arith.constant 0 : index
    %590 = vector.load %arg18[%c0_275, %c2_276, %c0_277, %c0_278] : memref<2x4x32x1xf32, #tpu.memory_space<vmem>>, vector<1x1x32x1xf32>
    %591 = vector.shape_cast %590 : vector<1x1x32x1xf32> to vector<32x1xf32>
    %592 = vector.broadcast %4 : vector<1x128xf32> to vector<32x128xf32>
    %593 = arith.mulf %587, %592 : vector<32x128xf32>
    %cst_279 = arith.constant dense<0.000000e+00> : vector<32xf32>
    %594 = vector.multi_reduction <add>, %593, %cst_279 [1] : vector<32x128xf32> to vector<32xf32>
    %595 = vector.shape_cast %594 : vector<32xf32> to vector<32x1xf32>
    %596 = arith.mulf %593, %593 : vector<32x128xf32>
    %cst_280 = arith.constant dense<0.000000e+00> : vector<32xf32>
    %597 = vector.multi_reduction <add>, %596, %cst_280 [1] : vector<32x128xf32> to vector<32xf32>
    %598 = vector.shape_cast %597 : vector<32xf32> to vector<32x1xf32>
    %599 = vector.broadcast %9 : vector<1x1xf32> to vector<32x1xf32>
    %600 = arith.mulf %595, %599 : vector<32x1xf32>
    %601 = vector.broadcast %9 : vector<1x1xf32> to vector<32x1xf32>
    %602 = arith.mulf %598, %601 : vector<32x1xf32>
    %603 = arith.mulf %600, %600 : vector<32x1xf32>
    %604 = arith.subf %602, %603 : vector<32x1xf32>
    %605 = vector.broadcast %600 : vector<32x1xf32> to vector<32x128xf32>
    %606 = arith.subf %587, %605 : vector<32x128xf32>
    %cst_281 = arith.constant 9.99999974E-6 : f32
    %607 = vector.broadcast %cst_281 : f32 to vector<32x1xf32>
    %608 = arith.addf %604, %607 : vector<32x1xf32>
    %609 = math.rsqrt %608 : vector<32x1xf32>
    %610 = vector.broadcast %609 : vector<32x1xf32> to vector<32x128xf32>
    %611 = arith.mulf %606, %610 : vector<32x128xf32>
    %612 = vector.broadcast %589 : vector<32x1xf32> to vector<32x128xf32>
    %613 = arith.mulf %611, %612 : vector<32x128xf32>
    %614 = vector.broadcast %591 : vector<32x1xf32> to vector<32x128xf32>
    %615 = arith.addf %613, %614 : vector<32x128xf32>
    %616 = arith.negf %615 : vector<32x128xf32>
    %617 = math.exp %616 : vector<32x128xf32>
    %cst_282 = arith.constant 1.000000e+00 : f32
    %618 = vector.broadcast %cst_282 : f32 to vector<32x128xf32>
    %619 = arith.addf %618, %617 : vector<32x128xf32>
    %620 = arith.divf %618, %619 : vector<32x128xf32>
    %621 = arith.mulf %615, %620 : vector<32x128xf32>
    %622 = arith.addf %403, %621 : vector<32x128xf32>
    %623 = vector.broadcast %4 : vector<1x128xf32> to vector<32x128xf32>
    %624 = arith.mulf %622, %623 : vector<32x128xf32>
    %625 = arith.addf %538, %586 : vector<32x128xf32>
    %c1_283 = arith.constant 1 : index
    %c2_284 = arith.constant 2 : index
    %c0_285 = arith.constant 0 : index
    %c0_286 = arith.constant 0 : index
    %626 = vector.load %arg17[%c1_283, %c2_284, %c0_285, %c0_286] : memref<2x4x32x1xf32, #tpu.memory_space<vmem>>, vector<1x1x32x1xf32>
    %627 = vector.shape_cast %626 : vector<1x1x32x1xf32> to vector<32x1xf32>
    %c1_287 = arith.constant 1 : index
    %c2_288 = arith.constant 2 : index
    %c0_289 = arith.constant 0 : index
    %c0_290 = arith.constant 0 : index
    %628 = vector.load %arg18[%c1_287, %c2_288, %c0_289, %c0_290] : memref<2x4x32x1xf32, #tpu.memory_space<vmem>>, vector<1x1x32x1xf32>
    %629 = vector.shape_cast %628 : vector<1x1x32x1xf32> to vector<32x1xf32>
    %630 = vector.broadcast %4 : vector<1x128xf32> to vector<32x128xf32>
    %631 = arith.mulf %625, %630 : vector<32x128xf32>
    %cst_291 = arith.constant dense<0.000000e+00> : vector<32xf32>
    %632 = vector.multi_reduction <add>, %631, %cst_291 [1] : vector<32x128xf32> to vector<32xf32>
    %633 = vector.shape_cast %632 : vector<32xf32> to vector<32x1xf32>
    %634 = arith.mulf %631, %631 : vector<32x128xf32>
    %cst_292 = arith.constant dense<0.000000e+00> : vector<32xf32>
    %635 = vector.multi_reduction <add>, %634, %cst_292 [1] : vector<32x128xf32> to vector<32xf32>
    %636 = vector.shape_cast %635 : vector<32xf32> to vector<32x1xf32>
    %637 = vector.broadcast %9 : vector<1x1xf32> to vector<32x1xf32>
    %638 = arith.mulf %633, %637 : vector<32x1xf32>
    %639 = vector.broadcast %9 : vector<1x1xf32> to vector<32x1xf32>
    %640 = arith.mulf %636, %639 : vector<32x1xf32>
    %641 = arith.mulf %638, %638 : vector<32x1xf32>
    %642 = arith.subf %640, %641 : vector<32x1xf32>
    %643 = vector.broadcast %638 : vector<32x1xf32> to vector<32x128xf32>
    %644 = arith.subf %625, %643 : vector<32x128xf32>
    %cst_293 = arith.constant 9.99999974E-6 : f32
    %645 = vector.broadcast %cst_293 : f32 to vector<32x1xf32>
    %646 = arith.addf %642, %645 : vector<32x1xf32>
    %647 = math.rsqrt %646 : vector<32x1xf32>
    %648 = vector.broadcast %647 : vector<32x1xf32> to vector<32x128xf32>
    %649 = arith.mulf %644, %648 : vector<32x128xf32>
    %650 = vector.broadcast %627 : vector<32x1xf32> to vector<32x128xf32>
    %651 = arith.mulf %649, %650 : vector<32x128xf32>
    %652 = vector.broadcast %629 : vector<32x1xf32> to vector<32x128xf32>
    %653 = arith.addf %651, %652 : vector<32x128xf32>
    %654 = arith.negf %653 : vector<32x128xf32>
    %655 = math.exp %654 : vector<32x128xf32>
    %cst_294 = arith.constant 1.000000e+00 : f32
    %656 = vector.broadcast %cst_294 : f32 to vector<32x128xf32>
    %657 = arith.addf %656, %655 : vector<32x128xf32>
    %658 = arith.divf %656, %657 : vector<32x128xf32>
    %659 = arith.mulf %653, %658 : vector<32x128xf32>
    %660 = arith.addf %441, %659 : vector<32x128xf32>
    %661 = vector.broadcast %4 : vector<1x128xf32> to vector<32x128xf32>
    %662 = arith.mulf %660, %661 : vector<32x128xf32>
    %663 = arith.addf %548, %576 : vector<32x128xf32>
    %664 = arith.addf %663, %570 : vector<32x128xf32>
    %c0_295 = arith.constant 0 : index
    %c2_296 = arith.constant 2 : index
    %c0_297 = arith.constant 0 : index
    %c0_298 = arith.constant 0 : index
    %665 = vector.load %arg19[%c0_295, %c2_296, %c0_297, %c0_298] : memref<2x4x32x1xf32, #tpu.memory_space<vmem>>, vector<1x1x32x1xf32>
    %666 = vector.shape_cast %665 : vector<1x1x32x1xf32> to vector<32x1xf32>
    %c0_299 = arith.constant 0 : index
    %c2_300 = arith.constant 2 : index
    %c0_301 = arith.constant 0 : index
    %c0_302 = arith.constant 0 : index
    %667 = vector.load %arg20[%c0_299, %c2_300, %c0_301, %c0_302] : memref<2x4x32x1xf32, #tpu.memory_space<vmem>>, vector<1x1x32x1xf32>
    %668 = vector.shape_cast %667 : vector<1x1x32x1xf32> to vector<32x1xf32>
    %669 = vector.broadcast %5 : vector<1x128xf32> to vector<32x128xf32>
    %670 = arith.mulf %664, %669 : vector<32x128xf32>
    %cst_303 = arith.constant dense<0.000000e+00> : vector<32xf32>
    %671 = vector.multi_reduction <add>, %670, %cst_303 [1] : vector<32x128xf32> to vector<32xf32>
    %672 = vector.shape_cast %671 : vector<32xf32> to vector<32x1xf32>
    %673 = arith.mulf %670, %670 : vector<32x128xf32>
    %cst_304 = arith.constant dense<0.000000e+00> : vector<32xf32>
    %674 = vector.multi_reduction <add>, %673, %cst_304 [1] : vector<32x128xf32> to vector<32xf32>
    %675 = vector.shape_cast %674 : vector<32xf32> to vector<32x1xf32>
    %676 = vector.broadcast %13 : vector<1x1xf32> to vector<32x1xf32>
    %677 = arith.mulf %672, %676 : vector<32x1xf32>
    %678 = vector.broadcast %13 : vector<1x1xf32> to vector<32x1xf32>
    %679 = arith.mulf %675, %678 : vector<32x1xf32>
    %680 = arith.mulf %677, %677 : vector<32x1xf32>
    %681 = arith.subf %679, %680 : vector<32x1xf32>
    %682 = vector.broadcast %677 : vector<32x1xf32> to vector<32x128xf32>
    %683 = arith.subf %664, %682 : vector<32x128xf32>
    %cst_305 = arith.constant 9.99999974E-6 : f32
    %684 = vector.broadcast %cst_305 : f32 to vector<32x1xf32>
    %685 = arith.addf %681, %684 : vector<32x1xf32>
    %686 = math.rsqrt %685 : vector<32x1xf32>
    %687 = vector.broadcast %686 : vector<32x1xf32> to vector<32x128xf32>
    %688 = arith.mulf %683, %687 : vector<32x128xf32>
    %689 = vector.broadcast %666 : vector<32x1xf32> to vector<32x128xf32>
    %690 = arith.mulf %688, %689 : vector<32x128xf32>
    %691 = vector.broadcast %668 : vector<32x1xf32> to vector<32x128xf32>
    %692 = arith.addf %690, %691 : vector<32x128xf32>
    %693 = arith.negf %692 : vector<32x128xf32>
    %694 = math.exp %693 : vector<32x128xf32>
    %cst_306 = arith.constant 1.000000e+00 : f32
    %695 = vector.broadcast %cst_306 : f32 to vector<32x128xf32>
    %696 = arith.addf %695, %694 : vector<32x128xf32>
    %697 = arith.divf %695, %696 : vector<32x128xf32>
    %698 = arith.mulf %692, %697 : vector<32x128xf32>
    %699 = arith.addf %480, %698 : vector<32x128xf32>
    %700 = vector.broadcast %5 : vector<1x128xf32> to vector<32x128xf32>
    %701 = arith.mulf %699, %700 : vector<32x128xf32>
    %702 = arith.addf %555, %577 : vector<32x128xf32>
    %703 = arith.addf %702, %572 : vector<32x128xf32>
    %c1_307 = arith.constant 1 : index
    %c2_308 = arith.constant 2 : index
    %c0_309 = arith.constant 0 : index
    %c0_310 = arith.constant 0 : index
    %704 = vector.load %arg19[%c1_307, %c2_308, %c0_309, %c0_310] : memref<2x4x32x1xf32, #tpu.memory_space<vmem>>, vector<1x1x32x1xf32>
    %705 = vector.shape_cast %704 : vector<1x1x32x1xf32> to vector<32x1xf32>
    %c1_311 = arith.constant 1 : index
    %c2_312 = arith.constant 2 : index
    %c0_313 = arith.constant 0 : index
    %c0_314 = arith.constant 0 : index
    %706 = vector.load %arg20[%c1_311, %c2_312, %c0_313, %c0_314] : memref<2x4x32x1xf32, #tpu.memory_space<vmem>>, vector<1x1x32x1xf32>
    %707 = vector.shape_cast %706 : vector<1x1x32x1xf32> to vector<32x1xf32>
    %708 = vector.broadcast %5 : vector<1x128xf32> to vector<32x128xf32>
    %709 = arith.mulf %703, %708 : vector<32x128xf32>
    %cst_315 = arith.constant dense<0.000000e+00> : vector<32xf32>
    %710 = vector.multi_reduction <add>, %709, %cst_315 [1] : vector<32x128xf32> to vector<32xf32>
    %711 = vector.shape_cast %710 : vector<32xf32> to vector<32x1xf32>
    %712 = arith.mulf %709, %709 : vector<32x128xf32>
    %cst_316 = arith.constant dense<0.000000e+00> : vector<32xf32>
    %713 = vector.multi_reduction <add>, %712, %cst_316 [1] : vector<32x128xf32> to vector<32xf32>
    %714 = vector.shape_cast %713 : vector<32xf32> to vector<32x1xf32>
    %715 = vector.broadcast %13 : vector<1x1xf32> to vector<32x1xf32>
    %716 = arith.mulf %711, %715 : vector<32x1xf32>
    %717 = vector.broadcast %13 : vector<1x1xf32> to vector<32x1xf32>
    %718 = arith.mulf %714, %717 : vector<32x1xf32>
    %719 = arith.mulf %716, %716 : vector<32x1xf32>
    %720 = arith.subf %718, %719 : vector<32x1xf32>
    %721 = vector.broadcast %716 : vector<32x1xf32> to vector<32x128xf32>
    %722 = arith.subf %703, %721 : vector<32x128xf32>
    %cst_317 = arith.constant 9.99999974E-6 : f32
    %723 = vector.broadcast %cst_317 : f32 to vector<32x1xf32>
    %724 = arith.addf %720, %723 : vector<32x1xf32>
    %725 = math.rsqrt %724 : vector<32x1xf32>
    %726 = vector.broadcast %725 : vector<32x1xf32> to vector<32x128xf32>
    %727 = arith.mulf %722, %726 : vector<32x128xf32>
    %728 = vector.broadcast %705 : vector<32x1xf32> to vector<32x128xf32>
    %729 = arith.mulf %727, %728 : vector<32x128xf32>
    %730 = vector.broadcast %707 : vector<32x1xf32> to vector<32x128xf32>
    %731 = arith.addf %729, %730 : vector<32x128xf32>
    %732 = arith.negf %731 : vector<32x128xf32>
    %733 = math.exp %732 : vector<32x128xf32>
    %cst_318 = arith.constant 1.000000e+00 : f32
    %734 = vector.broadcast %cst_318 : f32 to vector<32x128xf32>
    %735 = arith.addf %734, %733 : vector<32x128xf32>
    %736 = arith.divf %734, %735 : vector<32x128xf32>
    %737 = arith.mulf %731, %736 : vector<32x128xf32>
    %738 = arith.addf %519, %737 : vector<32x128xf32>
    %739 = vector.broadcast %5 : vector<1x128xf32> to vector<32x128xf32>
    %740 = arith.mulf %738, %739 : vector<32x128xf32>
    %c0_319 = arith.constant 0 : index
    %c3 = arith.constant 3 : index
    %c0_320 = arith.constant 0 : index
    %c0_321 = arith.constant 0 : index
    %741 = vector.load %arg13[%c0_319, %c3, %c0_320, %c0_321] : memref<2x4x128x32xf32, #tpu.memory_space<vmem>>, vector<1x1x128x32xf32>
    %742 = vector.shape_cast %741 : vector<1x1x128x32xf32> to vector<128x32xf32>
    %cst_322 = arith.constant dense<0.000000e+00> : vector<128x128xf32>
    %743 = tpu.matmul %742, %624, %cst_322 {dimension_numbers = #tpu.dot_dimension_numbers<[1], [0], [0], [1], [0, 0, 1, 1], [], []>} : vector<128x32xf32>, vector<32x128xf32>, vector<128x128xf32> -> vector<128x128xf32>
    %c0_323 = arith.constant 0 : index
    %c3_324 = arith.constant 3 : index
    %c0_325 = arith.constant 0 : index
    %c0_326 = arith.constant 0 : index
    %744 = vector.load %arg14[%c0_323, %c3_324, %c0_325, %c0_326] : memref<2x4x128x1xf32, #tpu.memory_space<vmem>>, vector<1x1x128x1xf32>
    %745 = vector.shape_cast %744 : vector<1x1x128x1xf32> to vector<128x1xf32>
    %746 = vector.broadcast %745 : vector<128x1xf32> to vector<128x128xf32>
    %747 = arith.addf %743, %746 : vector<128x128xf32>
    %c1_327 = arith.constant 1 : index
    %c3_328 = arith.constant 3 : index
    %c0_329 = arith.constant 0 : index
    %c0_330 = arith.constant 0 : index
    %748 = vector.load %arg13[%c1_327, %c3_328, %c0_329, %c0_330] : memref<2x4x128x32xf32, #tpu.memory_space<vmem>>, vector<1x1x128x32xf32>
    %749 = vector.shape_cast %748 : vector<1x1x128x32xf32> to vector<128x32xf32>
    %cst_331 = arith.constant dense<0.000000e+00> : vector<128x128xf32>
    %750 = tpu.matmul %749, %662, %cst_331 {dimension_numbers = #tpu.dot_dimension_numbers<[1], [0], [0], [1], [0, 0, 1, 1], [], []>} : vector<128x32xf32>, vector<32x128xf32>, vector<128x128xf32> -> vector<128x128xf32>
    %c1_332 = arith.constant 1 : index
    %c3_333 = arith.constant 3 : index
    %c0_334 = arith.constant 0 : index
    %c0_335 = arith.constant 0 : index
    %751 = vector.load %arg14[%c1_332, %c3_333, %c0_334, %c0_335] : memref<2x4x128x1xf32, #tpu.memory_space<vmem>>, vector<1x1x128x1xf32>
    %752 = vector.shape_cast %751 : vector<1x1x128x1xf32> to vector<128x1xf32>
    %753 = vector.broadcast %752 : vector<128x1xf32> to vector<128x128xf32>
    %754 = arith.addf %750, %753 : vector<128x128xf32>
    %755 = vector.extract_strided_slice %747 {offsets = [32, 0], sizes = [32, 128], strides = [1, 1]} : vector<128x128xf32> to vector<32x128xf32>
    %756 = vector.extract_strided_slice %747 {offsets = [64, 0], sizes = [32, 128], strides = [1, 1]} : vector<128x128xf32> to vector<32x128xf32>
    %757 = vector.extract_strided_slice %747 {offsets = [96, 0], sizes = [32, 128], strides = [1, 1]} : vector<128x128xf32> to vector<32x128xf32>
    %758 = vector.extract_strided_slice %754 {offsets = [32, 0], sizes = [32, 128], strides = [1, 1]} : vector<128x128xf32> to vector<32x128xf32>
    %759 = vector.extract_strided_slice %754 {offsets = [64, 0], sizes = [32, 128], strides = [1, 1]} : vector<128x128xf32> to vector<32x128xf32>
    %760 = vector.extract_strided_slice %754 {offsets = [96, 0], sizes = [32, 128], strides = [1, 1]} : vector<128x128xf32> to vector<32x128xf32>
    %c0_336 = arith.constant 0 : index
    %c3_337 = arith.constant 3 : index
    %c0_338 = arith.constant 0 : index
    %c0_339 = arith.constant 0 : index
    %761 = vector.load %arg15[%c0_336, %c3_337, %c0_338, %c0_339] : memref<2x4x32x32xf32, #tpu.memory_space<vmem>>, vector<1x1x32x32xf32>
    %762 = vector.shape_cast %761 : vector<1x1x32x32xf32> to vector<32x32xf32>
    %cst_340 = arith.constant dense<0.000000e+00> : vector<32x128xf32>
    %763 = tpu.matmul %762, %701, %cst_340 {dimension_numbers = #tpu.dot_dimension_numbers<[1], [0], [0], [1], [0, 0, 1, 1], [], []>} : vector<32x32xf32>, vector<32x128xf32>, vector<32x128xf32> -> vector<32x128xf32>
    %c0_341 = arith.constant 0 : index
    %c3_342 = arith.constant 3 : index
    %c0_343 = arith.constant 0 : index
    %c0_344 = arith.constant 0 : index
    %764 = vector.load %arg16[%c0_341, %c3_342, %c0_343, %c0_344] : memref<2x4x32x1xf32, #tpu.memory_space<vmem>>, vector<1x1x32x1xf32>
    %765 = vector.shape_cast %764 : vector<1x1x32x1xf32> to vector<32x1xf32>
    %766 = vector.broadcast %765 : vector<32x1xf32> to vector<32x128xf32>
    %767 = arith.addf %763, %766 : vector<32x128xf32>
    %c1_345 = arith.constant 1 : index
    %c3_346 = arith.constant 3 : index
    %c0_347 = arith.constant 0 : index
    %c0_348 = arith.constant 0 : index
    %768 = vector.load %arg15[%c1_345, %c3_346, %c0_347, %c0_348] : memref<2x4x32x32xf32, #tpu.memory_space<vmem>>, vector<1x1x32x32xf32>
    %769 = vector.shape_cast %768 : vector<1x1x32x32xf32> to vector<32x32xf32>
    %cst_349 = arith.constant dense<0.000000e+00> : vector<32x128xf32>
    %770 = tpu.matmul %769, %740, %cst_349 {dimension_numbers = #tpu.dot_dimension_numbers<[1], [0], [0], [1], [0, 0, 1, 1], [], []>} : vector<32x32xf32>, vector<32x128xf32>, vector<32x128xf32> -> vector<32x128xf32>
    %c1_350 = arith.constant 1 : index
    %c3_351 = arith.constant 3 : index
    %c0_352 = arith.constant 0 : index
    %c0_353 = arith.constant 0 : index
    %771 = vector.load %arg16[%c1_350, %c3_351, %c0_352, %c0_353] : memref<2x4x32x1xf32, #tpu.memory_space<vmem>>, vector<1x1x32x1xf32>
    %772 = vector.shape_cast %771 : vector<1x1x32x1xf32> to vector<32x1xf32>
    %773 = vector.broadcast %772 : vector<32x1xf32> to vector<32x128xf32>
    %774 = arith.addf %770, %773 : vector<32x128xf32>
    %775 = tpu.concatenate %755, %757, %758, %760 in 0 : vector<32x128xf32>, vector<32x128xf32>, vector<32x128xf32>, vector<32x128xf32> -> vector<128x128xf32>
    %776 = arith.truncf %775 : vector<128x128xf32> to vector<128x128xbf16>
    %cst_354 = arith.constant dense<0.000000e+00> : vector<128x128xf32>
    %777 = tpu.matmul %776, %1, %cst_354 {dimension_numbers = #tpu.dot_dimension_numbers<[1], [0], [0], [1], [0, 0, 1, 1], [], []>} : vector<128x128xbf16>, vector<128x128xbf16>, vector<128x128xf32> -> vector<128x128xf32>
    %778 = vector.extract_strided_slice %777 {offsets = [32, 0], sizes = [32, 128], strides = [1, 1]} : vector<128x128xf32> to vector<32x128xf32>
    %779 = vector.extract_strided_slice %777 {offsets = [96, 0], sizes = [32, 128], strides = [1, 1]} : vector<128x128xf32> to vector<32x128xf32>
    %780 = tpu.concatenate %756, %759 in 0 : vector<32x128xf32>, vector<32x128xf32> -> vector<64x128xf32>
    %781 = arith.truncf %780 : vector<64x128xf32> to vector<64x128xbf16>
    %cst_355 = arith.constant dense<0.000000e+00> : vector<64x128xf32>
    %782 = tpu.matmul %781, %0, %cst_355 {dimension_numbers = #tpu.dot_dimension_numbers<[1], [0], [0], [1], [0, 0, 1, 1], [], []>} : vector<64x128xbf16>, vector<128x128xbf16>, vector<64x128xf32> -> vector<64x128xf32>
    %783 = vector.extract_strided_slice %782 {offsets = [0, 0], sizes = [32, 128], strides = [1, 1]} : vector<64x128xf32> to vector<32x128xf32>
    %784 = vector.extract_strided_slice %782 {offsets = [32, 0], sizes = [32, 128], strides = [1, 1]} : vector<64x128xf32> to vector<32x128xf32>
    %785 = arith.addf %767, %783 : vector<32x128xf32>
    %786 = arith.addf %785, %778 : vector<32x128xf32>
    %c0_356 = arith.constant 0 : index
    %c3_357 = arith.constant 3 : index
    %c0_358 = arith.constant 0 : index
    %c0_359 = arith.constant 0 : index
    %787 = vector.load %arg19[%c0_356, %c3_357, %c0_358, %c0_359] : memref<2x4x32x1xf32, #tpu.memory_space<vmem>>, vector<1x1x32x1xf32>
    %788 = vector.shape_cast %787 : vector<1x1x32x1xf32> to vector<32x1xf32>
    %c0_360 = arith.constant 0 : index
    %c3_361 = arith.constant 3 : index
    %c0_362 = arith.constant 0 : index
    %c0_363 = arith.constant 0 : index
    %789 = vector.load %arg20[%c0_360, %c3_361, %c0_362, %c0_363] : memref<2x4x32x1xf32, #tpu.memory_space<vmem>>, vector<1x1x32x1xf32>
    %790 = vector.shape_cast %789 : vector<1x1x32x1xf32> to vector<32x1xf32>
    %791 = vector.broadcast %5 : vector<1x128xf32> to vector<32x128xf32>
    %792 = arith.mulf %786, %791 : vector<32x128xf32>
    %cst_364 = arith.constant dense<0.000000e+00> : vector<32xf32>
    %793 = vector.multi_reduction <add>, %792, %cst_364 [1] : vector<32x128xf32> to vector<32xf32>
    %794 = vector.shape_cast %793 : vector<32xf32> to vector<32x1xf32>
    %795 = arith.mulf %792, %792 : vector<32x128xf32>
    %cst_365 = arith.constant dense<0.000000e+00> : vector<32xf32>
    %796 = vector.multi_reduction <add>, %795, %cst_365 [1] : vector<32x128xf32> to vector<32xf32>
    %797 = vector.shape_cast %796 : vector<32xf32> to vector<32x1xf32>
    %798 = vector.broadcast %13 : vector<1x1xf32> to vector<32x1xf32>
    %799 = arith.mulf %794, %798 : vector<32x1xf32>
    %800 = vector.broadcast %13 : vector<1x1xf32> to vector<32x1xf32>
    %801 = arith.mulf %797, %800 : vector<32x1xf32>
    %802 = arith.mulf %799, %799 : vector<32x1xf32>
    %803 = arith.subf %801, %802 : vector<32x1xf32>
    %804 = vector.broadcast %799 : vector<32x1xf32> to vector<32x128xf32>
    %805 = arith.subf %786, %804 : vector<32x128xf32>
    %cst_366 = arith.constant 9.99999974E-6 : f32
    %806 = vector.broadcast %cst_366 : f32 to vector<32x1xf32>
    %807 = arith.addf %803, %806 : vector<32x1xf32>
    %808 = math.rsqrt %807 : vector<32x1xf32>
    %809 = vector.broadcast %808 : vector<32x1xf32> to vector<32x128xf32>
    %810 = arith.mulf %805, %809 : vector<32x128xf32>
    %811 = vector.broadcast %788 : vector<32x1xf32> to vector<32x128xf32>
    %812 = arith.mulf %810, %811 : vector<32x128xf32>
    %813 = vector.broadcast %790 : vector<32x1xf32> to vector<32x128xf32>
    %814 = arith.addf %812, %813 : vector<32x128xf32>
    %815 = arith.negf %814 : vector<32x128xf32>
    %816 = math.exp %815 : vector<32x128xf32>
    %cst_367 = arith.constant 1.000000e+00 : f32
    %817 = vector.broadcast %cst_367 : f32 to vector<32x128xf32>
    %818 = arith.addf %817, %816 : vector<32x128xf32>
    %819 = arith.divf %817, %818 : vector<32x128xf32>
    %820 = arith.mulf %814, %819 : vector<32x128xf32>
    %821 = arith.addf %701, %820 : vector<32x128xf32>
    %822 = vector.broadcast %5 : vector<1x128xf32> to vector<32x128xf32>
    %823 = arith.mulf %821, %822 : vector<32x128xf32>
    %824 = arith.addf %774, %784 : vector<32x128xf32>
    %825 = arith.addf %824, %779 : vector<32x128xf32>
    %c1_368 = arith.constant 1 : index
    %c3_369 = arith.constant 3 : index
    %c0_370 = arith.constant 0 : index
    %c0_371 = arith.constant 0 : index
    %826 = vector.load %arg19[%c1_368, %c3_369, %c0_370, %c0_371] : memref<2x4x32x1xf32, #tpu.memory_space<vmem>>, vector<1x1x32x1xf32>
    %827 = vector.shape_cast %826 : vector<1x1x32x1xf32> to vector<32x1xf32>
    %c1_372 = arith.constant 1 : index
    %c3_373 = arith.constant 3 : index
    %c0_374 = arith.constant 0 : index
    %c0_375 = arith.constant 0 : index
    %828 = vector.load %arg20[%c1_372, %c3_373, %c0_374, %c0_375] : memref<2x4x32x1xf32, #tpu.memory_space<vmem>>, vector<1x1x32x1xf32>
    %829 = vector.shape_cast %828 : vector<1x1x32x1xf32> to vector<32x1xf32>
    %830 = vector.broadcast %5 : vector<1x128xf32> to vector<32x128xf32>
    %831 = arith.mulf %825, %830 : vector<32x128xf32>
    %cst_376 = arith.constant dense<0.000000e+00> : vector<32xf32>
    %832 = vector.multi_reduction <add>, %831, %cst_376 [1] : vector<32x128xf32> to vector<32xf32>
    %833 = vector.shape_cast %832 : vector<32xf32> to vector<32x1xf32>
    %834 = arith.mulf %831, %831 : vector<32x128xf32>
    %cst_377 = arith.constant dense<0.000000e+00> : vector<32xf32>
    %835 = vector.multi_reduction <add>, %834, %cst_377 [1] : vector<32x128xf32> to vector<32xf32>
    %836 = vector.shape_cast %835 : vector<32xf32> to vector<32x1xf32>
    %837 = vector.broadcast %13 : vector<1x1xf32> to vector<32x1xf32>
    %838 = arith.mulf %833, %837 : vector<32x1xf32>
    %839 = vector.broadcast %13 : vector<1x1xf32> to vector<32x1xf32>
    %840 = arith.mulf %836, %839 : vector<32x1xf32>
    %841 = arith.mulf %838, %838 : vector<32x1xf32>
    %842 = arith.subf %840, %841 : vector<32x1xf32>
    %843 = vector.broadcast %838 : vector<32x1xf32> to vector<32x128xf32>
    %844 = arith.subf %825, %843 : vector<32x128xf32>
    %cst_378 = arith.constant 9.99999974E-6 : f32
    %845 = vector.broadcast %cst_378 : f32 to vector<32x1xf32>
    %846 = arith.addf %842, %845 : vector<32x1xf32>
    %847 = math.rsqrt %846 : vector<32x1xf32>
    %848 = vector.broadcast %847 : vector<32x1xf32> to vector<32x128xf32>
    %849 = arith.mulf %844, %848 : vector<32x128xf32>
    %850 = vector.broadcast %827 : vector<32x1xf32> to vector<32x128xf32>
    %851 = arith.mulf %849, %850 : vector<32x128xf32>
    %852 = vector.broadcast %829 : vector<32x1xf32> to vector<32x128xf32>
    %853 = arith.addf %851, %852 : vector<32x128xf32>
    %854 = arith.negf %853 : vector<32x128xf32>
    %855 = math.exp %854 : vector<32x128xf32>
    %cst_379 = arith.constant 1.000000e+00 : f32
    %856 = vector.broadcast %cst_379 : f32 to vector<32x128xf32>
    %857 = arith.addf %856, %855 : vector<32x128xf32>
    %858 = arith.divf %856, %857 : vector<32x128xf32>
    %859 = arith.mulf %853, %858 : vector<32x128xf32>
    %860 = arith.addf %740, %859 : vector<32x128xf32>
    %861 = vector.broadcast %5 : vector<1x128xf32> to vector<32x128xf32>
    %862 = arith.mulf %860, %861 : vector<32x128xf32>
    %c0_380 = arith.constant 0 : index
    %c0_381 = arith.constant 0 : index
    %863 = vector.load %arg21[%c0_380, %c0_381] : memref<32x128xf32, #tpu.memory_space<vmem>>, vector<32x128xf32>
    tpu.vector_store %arg21[%c0_380, %c0_381], %823 {strides = array<i32>} : memref<32x128xf32, #tpu.memory_space<vmem>>, vector<32x128xf32>,
    %c0_382 = arith.constant 0 : index
    %c0_383 = arith.constant 0 : index
    %864 = vector.load %arg22[%c0_382, %c0_383] : memref<32x128xf32, #tpu.memory_space<vmem>>, vector<32x128xf32>
    tpu.vector_store %arg22[%c0_382, %c0_383], %862 {strides = array<i32>} : memref<32x128xf32, #tpu.memory_space<vmem>>, vector<32x128xf32>,
    return
  }
}

</mosaic_0001>

<bundles_post_ra>
// kernel: tpu_custom_call.1
= control target key start
LH: loop header
LB: loop body
LE: loop exit
PB: predicated region body
PF: predicated region fallthrough
CT: control target
= control target key end

     0   :  { %s14098_s0 = inlined_call_operand.vmem [shape: f32[8,128], index: 0, kind: input, shape index: {}]   ;;  %s14099_s1 = inlined_call_operand.vmem [shape: f32[8,128], index: 1, kind: input, shape index: {}]   ;;  %s14100_s2 = inlined_call_operand.vmem [shape: f32[8,128], index: 2, kind: input, shape index: {}]   ;;  %s14101_s3 = inlined_call_operand.vmem [shape: bf16[128,128], index: 3, kind: input, shape index: {}]   ;;  %s14102_s4 = inlined_call_operand.vmem [shape: bf16[128,128], index: 4, kind: input, shape index: {}]   ;;  %s14103_s5 = inlined_call_operand.vmem [shape: bf16[128,128], index: 5, kind: input, shape index: {}]   ;;  %s14104_s6 = inlined_call_operand.vmem [shape: f32[1,128], index: 6, kind: input, shape index: {}]   ;;  %s14105_s7 = inlined_call_operand.vmem [shape: f32[1,128], index: 7, kind: input, shape index: {}]   ;;  %s14106_s8 = inlined_call_operand.vmem [shape: f32[1,128], index: 8, kind: input, shape index: {}]   ;;  %s14107_s9 = inlined_call_operand.vmem [shape: f32[2,32,8], index: 9, kind: input, shape index: {}]   ;;  %s14108_s10 = inlined_call_operand.vmem [shape: f32[2,32,1], index: 10, kind: input, shape index: {}]   ;;  %s14109_s11 = inlined_call_operand.vmem [shape: f32[2,32,8], index: 11, kind: input, shape index: {}]   ;;  %s14110_s12 = inlined_call_operand.vmem [shape: f32[2,32,1], index: 12, kind: input, shape index: {}]   ;;  %s14111_s13 = inlined_call_operand.vmem [shape: f32[2,4,128,32], index: 13, kind: input, shape index: {}]   ;;  %s14112_s14 = inlined_call_operand.vmem [shape: f32[2,4,128,1], index: 14, kind: input, shape index: {}]   ;;  %s14113_s15 = inlined_call_operand.vmem [shape: f32[2,4,32,32], index: 15, kind: input, shape index: {}]   ;;  %s14114_s16 = inlined_call_operand.vmem [shape: f32[2,4,32,1], index: 16, kind: input, shape index: {}]   ;;  %s14115_s17 = inlined_call_operand.vmem [shape: f32[2,4,32,1], index: 17, kind: input, shape index: {}]   ;;  %s14116_s18 = inlined_call_operand.vmem [shape: f32[2,4,32,1], index: 18, kind: input, shape index: {}]   ;;  %s14117_s19 = inlined_call_operand.vmem [shape: f32[2,4,32,1], index: 19, kind: input, shape index: {}]   ;;  %s14118_s20 = inlined_call_operand.vmem [shape: f32[2,4,32,1], index: 20, kind: input, shape index: {}]   ;;  %s14119_s21 = inlined_call_operand.hbm [shape: f32[32,128], index: 21, kind: output, shape index: {0}]   ;;  %s14120_s22 = inlined_call_operand.hbm [shape: f32[32,128], index: 22, kind: output, shape index: {1}]  }
   0x1   :  { %14174 = sst [smem:[#allocation33_spill]] %s14098_s0 }
   0x2   :  { %14175 = sst [smem:[#allocation34_spill]] %s14099_s1 }
   0x3   :  { %14176 = sst [smem:[#allocation35_spill]] %s14100_s2 }
   0x4   :  { %14177 = sst [smem:[#allocation36_spill]] %s14101_s3 }
   0x5   :  { %14178 = sst [smem:[#allocation37_spill]] %s14102_s4 }
   0x6   :  { %14179 = sst [smem:[#allocation38_spill]] %s14103_s5 }
   0x7   :  { %14180 = sst [smem:[#allocation39_spill]] %s14104_s6 }
   0x8   :  { %28 = vsyncpa [#allocation3], 0  ;;  %s14181_s29 = sld [smem:[#allocation34_spill]]  ;;  %s14182_s0 = sld [smem:[#allocation33_spill]]  ;;  %vm164_vm0 = vcmask 64512   ;;  %v7715_v2 = vld [vmem:[%s14107_s9 + $0x30] sm:$0xff] }
   0x9   :  { %v10259_v3 = vmov 0   ;;  %v142_v4 = vld [vmem:[%s14108_s10 + $0x10] sm:$0xff]  ;;  %v140_v5 = vld [vmem:[%s14108_s10] sm:$0xff]  ;;  %8799 = vmatprep.mubr.msk.f32.mxu1 %vm164_vm0, %v7715_v2  ;;  %v136_v7 = vld [vmem:[%s14107_s9 + $0x8] sm:$0xff] }
   0xa   :  { %9618 = vset.pattern.permute.xlu1 %v10259_v3  ;;  %9617 = vset.pattern.permute.xlu0 %v10259_v3  ;;  %v135_v6 = vld [vmem:[%s14107_s9] sm:$0xff]  ;;  %v7716_v8 = vld [vmem:[%s14107_s9 + $0x38] sm:$0xff]  ;;  %v141_v12 = vld [vmem:[%s14108_s10 + $0x8] sm:$0xff] }
   0xb   :  { %156 = vperm.xlu1 %9618, %v142_v4   ;;  %146 = vperm.xlu0 %9617, %v140_v5   ;;  %v7737_v10 = vld [vmem:[%s14109_s11 + $0x20] sm:$0xff]  ;;  %v143_v11 = vld [vmem:[%s14108_s10 + $0x18] sm:$0xff]  ;;  %v137_v13 = vld [vmem:[%s14107_s9 + $0x10] sm:$0xff] }
   0xc   :  { %8788 = vmatprep.mubr.msk.f32.mxu0 %vm164_vm0, %v135_v6  ;;  %v138_v14 = vld [vmem:[%s14107_s9 + $0x18] sm:$0xff]  ;;  %v7738_v15 = vld [vmem:[%s14109_s11 + $0x28] sm:$0xff]  ;;  %v7739_v16 = vld [vmem:[%s14109_s11 + $0x30] sm:$0xff] }
   0xd   :  { %v7718_v17 = vld [vmem:[%s14108_s10 + $0x28] sm:$0xff]  ;;  %v7717_v18 = vld [vmem:[%s14108_s10 + $0x20] sm:$0xff]  ;;  %v7740_v21 = vld [vmem:[%s14109_s11 + $0x38] sm:$0xff] }
   0xe   :  { %v305_v0 = vld [vmem:[%s14181_s29] sm:$0xff]  ;;  %v7714_v20 = vld [vmem:[%s14107_s9 + $0x28] sm:$0xff]  ;;  %v7720_v23 = vld [vmem:[%s14108_s10 + $0x38] sm:$0xff] }
   0xf   :  { %v139_v1 = vld [vmem:[%s14182_s0] sm:$0xff]  ;;  %9610 = vmatprep.subr.mxu1 %v305_v0  ;;  %s14183_s0 = sld [smem:[#allocation35_spill]]  ;;  %161 = vperm.xlu1 %9618, %v143_v11   ;;  %v7719_v24 = vld [vmem:[%s14108_s10 + $0x30] sm:$0xff]  ;;  %v461_v25 = vld [vmem:[%s14109_s11 + $0x8] sm:$0xff] }
  0x10   :  { %8786 = vmatprep.subr.mxu0 %v139_v1  ;;  %9611 = vmatpush3.msra.mxu1 %v305_v0  ;;  %v7713_v19 = vld [vmem:[%s14107_s9 + $0x20] sm:$0xff]  ;;  %v462_v26 = vld [vmem:[%s14109_s11 + $0x10] sm:$0xff]  ;;  %v466_v27 = vld [vmem:[%s14110_s12 + $0x8] sm:$0xff] }
  0x11   :  { %8787 = vmatpush3.msra.mxu0 %v139_v1  ;;  %8800 = vmatmul.mubr.msk.f32.vlgmr.msra.gmra.mrb[0].mxu1 %vm164_vm0, %v7716_v8  ;;  %v460_v22 = vld [vmem:[%s14109_s11] sm:$0xff]  ;;  %v463_v29 = vld [vmem:[%s14109_s11 + $0x18] sm:$0xff]  ;;  %v467_v31 = vld [vmem:[%s14110_s12 + $0x10] sm:$0xff] }
  0x12   :  { %8789 = vmatmul.mubr.msk.f32.vlgmr.msra.gmra.mrb[0].mxu0 %vm164_vm0, %v136_v7  ;;  %8812 = vmatprep.mubr.msk.f32.mxu1 %vm164_vm0, %v7737_v10  ;;  %v465_v28 = vld [vmem:[%s14110_s12] sm:$0xff]  ;;  %v468_v30 = vld [vmem:[%s14110_s12 + $0x18] sm:$0xff]  ;;  %v804_v32 = vld [vmem:[%s14112_s14 + $0x28] sm:$0xff] }
  0x13   :  { %151 = vperm.xlu0 %9617, %v141_v12   ;;  %8791 = vmatprep.mubr.msk.f32.mxu0 %vm164_vm0, %v137_v13  ;;  %v803_v33 = vld [vmem:[%s14112_s14 + $0x20] sm:$0xff]  ;;  %v806_v34 = vld [vmem:[%s14112_s14 + $0x38] sm:$0xff]  ;;  %v805_v35 = vld [vmem:[%s14112_s14 + $0x30] sm:$0xff] }
  0x14   :  { %8794 = vmatprep.subr.mxu0 %v305_v0  ;;  %318 = vperm.xlu1 %9618, %v7718_v17   ;;  %v812_v36 = vld [vmem:[%s14112_s14 + $0x68] sm:$0xff]  ;;  %v811_v37 = vld [vmem:[%s14112_s14 + $0x60] sm:$0xff]  ;;  %v814_v38 = vld [vmem:[%s14112_s14 + $0x78] sm:$0xff] }
  0x15   :  { %v464_v9 = vld [vmem:[%s14183_s0] sm:$0xff]  ;;  %8795 = vmatpush3.msra.mxu0 %v305_v0  ;;  %v813_v39 = vld [vmem:[%s14112_s14 + $0x70] sm:$0xff]  ;;  %v7790_v40 = vld [vmem:[%s14112_s14 + $0x228] sm:$0xff] }
  0x16   :  { %8810 = vmatprep.subr.mxu1 %v464_v9  ;;  %8792 = vmatmul.mubr.msk.f32.gmra.mrb[2].mxu0 %vm164_vm0, %v138_v14  ;;  %v7789_v41 = vld [vmem:[%s14112_s14 + $0x220] sm:$0xff] }
  0x17   :  { %8811 = vmatpush3.msra.mxu1 %v464_v9  ;;  %313 = vperm.xlu0 %9617, %v7717_v18  }
  0x18   :  { %8813 = vmatmul.mubr.msk.f32.vlgmr.msra.gmra.mrb[2].mxu1 %vm164_vm0, %v7738_v15  ;;  %8796 = vmatprep.mubr.msk.f32.mxu0 %vm164_vm0, %v7713_v19 }
  0x19   :  { %8815 = vmatprep.mubr.msk.f32.mxu1 %vm164_vm0, %v7739_v16  ;;  %8802 = vmatprep.subr.mxu0 %v464_v9 }
  0x1a   :  { %8797 = vmatmul.mubr.msk.f32.vlgmr.msra.gmra.mrb[4].mxu0 %vm164_vm0, %v7714_v20  ;;  %328 = vperm.xlu1 %9618, %v7720_v23  }
  0x1b   :  { %8804 = vmatprep.mubr.msk.f32.mxu0 %vm164_vm0, %v460_v22  ;;  %8803 = vmatpush3.msra.mxu0 %v464_v9 }
  0x1c   :  { %8816 = vmatmul.mubr.msk.f32.gmra.mrb[4].mxu1 %vm164_vm0, %v7740_v21  ;;  %323 = vperm.xlu0 %9617, %v7719_v24  }
  0x1e   :  { %8805 = vmatmul.mubr.msk.f32.vlgmr.msra.gmra.mrb[6].mxu0 %vm164_vm0, %v461_v25  ;;  %476 = vperm.xlu1 %9618, %v466_v27  }
  0x1f   :  { %8807 = vmatprep.mubr.msk.f32.mxu0 %vm164_vm0, %v462_v26 }
  0x20   :  { %471 = vperm.xlu0 %9617, %v465_v28  }
  0x22   :  { %8808 = vmatmul.mubr.msk.f32.gmra.mrb[8].mxu0 %vm164_vm0, %v463_v29  ;;  %486 = vperm.xlu1 %9618, %v468_v30  }
  0x24   :  { %481 = vperm.xlu0 %9617, %v467_v31  }
  0x26   :  { %842 = vperm.xlu1 %9618, %v804_v32  }
  0x28   :  { %837 = vperm.xlu0 %9617, %v803_v33  }
  0x2a   :  { %852 = vperm.xlu1 %9618, %v806_v34  }
  0x2c   :  { %847 = vperm.xlu0 %9617, %v805_v35  }
  0x2e   :  { %882 = vperm.xlu1 %9618, %v812_v36  }
  0x30   :  { %877 = vperm.xlu0 %9617, %v811_v37  }
  0x32   :  { %892 = vperm.xlu1 %9618, %v814_v38  }
  0x34   :  { %887 = vperm.xlu0 %9617, %v813_v39  }
  0x35   :  { %29 = vsyncpa [#allocation5], 0  ;;  %v7792_v42 = vld [vmem:[%s14112_s14 + $0x238] sm:$0xff]  ;;  %v7791_v43 = vld [vmem:[%s14112_s14 + $0x230] sm:$0xff]  ;;  %vm124_vm1 = vcmask 1040384   ;;  %vm895_vm2 = vcmask 261120  }
  0x36   :  { %1150 = vperm.xlu1 %9618, %v7790_v40   ;;  %v7742_v44 = vld [vmem:[%s14110_s12 + $0x28] sm:$0xff]  ;;  %v7741_v45 = vld [vmem:[%s14110_s12 + $0x20] sm:$0xff]  ;;  %v7744_v46 = vld [vmem:[%s14110_s12 + $0x38] sm:$0xff]  ;;  %s14198_s6 = sld [smem:[#allocation36_spill]]  ;;  %s14203_s25 = sld [smem:[#allocation37_spill]] }
  0x37   :  { %v7743_v47 = vld [vmem:[%s14110_s12 + $0x30] sm:$0xff]  ;;  %v7798_v48 = vld [vmem:[%s14112_s14 + $0x268] sm:$0xff]  ;;  %v7797_v49 = vld [vmem:[%s14112_s14 + $0x260] sm:$0xff]  ;;  %s14204_s23 = sld [smem:[#allocation38_spill]]  ;;  %s14212_s0 = sld [smem:[#allocation39_spill]] }
  0x38   :  { %1145 = vperm.xlu0 %9617, %v7789_v41   ;;  %v7800_v50 = vld [vmem:[%s14112_s14 + $0x278] sm:$0xff]  ;;  %v7799_v51 = vld [vmem:[%s14112_s14 + $0x270] sm:$0xff]  ;;  %v800_v52 = vld [vmem:[%s14112_s14 + $0x8] sm:$0xff] }
  0x39   :  { %v802_v53 = vld [vmem:[%s14112_s14 + $0x18] sm:$0xff]  ;;  %v7786_v54 = vld [vmem:[%s14112_s14 + $0x208] sm:$0xff]  ;;  %v10572_v59 = vld [vmem:[%s14105_s7] sm:$0x1] }
  0x3a   :  { %1160 = vperm.xlu1 %9618, %v7792_v42   ;;  %v7788_v55 = vld [vmem:[%s14112_s14 + $0x218] sm:$0xff]  ;;  %v2110_v56 = vld [vmem:[%s14115_s17 + $0x8] sm:$0xff]  ;;  %v125_v60 = vsel %vm124_vm1, %v10572_v59, 0.0  ;;  %v2115_v61 = vld [vmem:[%s14116_s18 + $0x10] sm:$0xff] }
  0x3b   :  { %v2114_v57 = vld [vmem:[%s14116_s18 + $0x8] sm:$0xff]  ;;  %v2112_v58 = vld [vmem:[%s14115_s17 + $0x18] sm:$0xff]  ;;  %v7870_v62 = vld [vmem:[%s14115_s17 + $0x80] sm:$0xff] }
  0x3c   :  { %1155 = vperm.xlu0 %9617, %v7791_v43   ;;  %v807_v63 = vld [vmem:[%s14112_s14 + $0x40] sm:$0xff]  ;;  %v809_v0 = vld [vmem:[%s14112_s14 + $0x50] sm:$0xff]  ;;  %v2116_v11 = vld [vmem:[%s14116_s18 + $0x18] sm:$0xff] }
  0x3d   :  { %v7874_v1 = vld [vmem:[%s14116_s18 + $0x80] sm:$0xff]  ;;  %v7872_v2 = vld [vmem:[%s14115_s17 + $0x90] sm:$0xff]  ;;  %v7871_v15 = vld [vmem:[%s14115_s17 + $0x88] sm:$0xff] }
  0x3e   :  { %641 = vperm.xlu1 %9618, %v7742_v44   ;;  %v799_v3 = vld [vmem:[%s14112_s14] sm:$0xff]  ;;  %v7876_v4 = vld [vmem:[%s14116_s18 + $0x90] sm:$0xff]  ;;  %v808_v18 = vld [vmem:[%s14112_s14 + $0x48] sm:$0xff] }
  0x3f   :  { %v801_v5 = vld [vmem:[%s14112_s14 + $0x10] sm:$0xff]  ;;  %v7785_v6 = vld [vmem:[%s14112_s14 + $0x200] sm:$0xff]  ;;  %v810_v20 = vld [vmem:[%s14112_s14 + $0x58] sm:$0xff] }
  0x40   :  { %636 = vperm.xlu0 %9617, %v7741_v45   ;;  %v7787_v7 = vld [vmem:[%s14112_s14 + $0x210] sm:$0xff]  ;;  %v2109_v8 = vld [vmem:[%s14115_s17] sm:$0xff]  ;;  %v7875_v23 = vld [vmem:[%s14116_s18 + $0x88] sm:$0xff] }
  0x41   :  { %v2113_v9 = vld [vmem:[%s14116_s18] sm:$0xff]  ;;  %v2111_v10 = vld [vmem:[%s14115_s17 + $0x10] sm:$0xff]  ;;  %v7873_v26 = vld [vmem:[%s14115_s17 + $0x98] sm:$0xff] }
  0x42   :  { %651 = vperm.xlu1 %9618, %v7744_v46   ;;  %v783_v14 = vld [vmem:[%s14111_s13] sm:$0xff] }
  0x43   :  { %8826 = vmatprep.mubr.msk.f32.mxu0 %vm895_vm2, %v783_v14  ;;  %v7769_v19 = vld [vmem:[%s14111_s13 + $0x200] sm:$0xff] }
  0x44   :  { %646 = vperm.xlu0 %9617, %v7743_v47   ;;  %8858 = vmatprep.mubr.msk.f32.mxu1 %vm895_vm2, %v7769_v19 }
  0x46   :  { %1190 = vperm.xlu1 %9618, %v7798_v48  }
  0x48   :  { %1185 = vperm.xlu0 %9617, %v7797_v49  }
  0x4a   :  { %1200 = vperm.xlu1 %9618, %v7800_v50  }
  0x4c   :  { %1195 = vperm.xlu0 %9617, %v7799_v51  }
  0x4e   :  { %822 = vperm.xlu1 %9618, %v800_v52  }
  0x52   :  { %832 = vperm.xlu1 %9618, %v802_v53  }
  0x56   :  { %1130 = vperm.xlu1 %9618, %v7786_v54  }
  0x5a   :  { %1140 = vperm.xlu1 %9618, %v7788_v55  }
  0x5e   :  { %2184 = vperm.xlu1 %9618, %v2110_v56  }
  0x62   :  { %2208 = vperm.xlu1 %9618, %v2114_v57  }
  0x66   :  { %2194 = vperm.xlu1 %9618, %v2112_v58  }
  0x6a   :  { %2213 = vperm.xlu1 %9618, %v2115_v61  }
  0x6b   :  { %126 = vadd.xlane.f32.xlu0 %v125_v60 }
  0x6e   :  { %2333 = vperm.xlu1 %9618, %v7870_v62  }
  0x72   :  { %857 = vperm.xlu1 %9618, %v807_v63  }
  0x76   :  { %867 = vperm.xlu1 %9618, %v809_v0  }
  0x7a   :  { %2357 = vperm.xlu1 %9618, %v7874_v1  }
  0x7e   :  { %2343 = vperm.xlu1 %9618, %v7872_v2  }
  0x81   :  { %817 = vperm.xlu0 %9617, %v799_v3  }
  0x82   :  { %2367 = vperm.xlu1 %9618, %v7876_v4  }
  0x85   :  { %827 = vperm.xlu0 %9617, %v801_v5  }
  0x89   :  { %1125 = vperm.xlu0 %9617, %v7785_v6  }
  0x8a   :  { %v157_v12 = vpop.permute.xlu1 %156  ;;  %v147_v13 = vpop.permute.xlu0 %146 }
  0x8d   :  { %1135 = vperm.xlu0 %9617, %v7787_v7  }
  0x8e   :  { %v162_v16 = vpop.permute.xlu1 %161 }
  0x91   :  { %2179 = vperm.xlu0 %9617, %v2109_v8  }
  0x92   :  { %v152_v17 = vpop.permute.xlu0 %151 }
  0x93   :  { %v319_v21 = vpop.permute.xlu1 %318 }
  0x95   :  { %2203 = vperm.xlu0 %9617, %v2113_v9  }
  0x96   :  { %v10638_v22 = vpop.permute.xlu0 %313 }
  0x99   :  { %2189 = vperm.xlu0 %9617, %v2111_v10   ;;  %v329_v24 = vpop.permute.xlu1 %328 }
  0x9b   :  { %v324_v25 = vpop.permute.xlu0 %323 }
  0x9d   :  { %2218 = vperm.xlu0 %9617, %v2116_v11   ;;  %v10646_v27 = vpop.permute.xlu1 %476 }
  0x9f   :  { %v10648_v28 = vpop.permute.xlu0 %471 }
  0xa1   :  { %2338 = vperm.xlu0 %9617, %v7871_v15   ;;  %v10650_v29 = vpop.permute.xlu1 %486 }
  0xa3   :  { %v10652_v30 = vpop.permute.xlu0 %481 }
  0xa5   :  { %862 = vperm.xlu0 %9617, %v808_v18   ;;  %v10654_v31 = vpop.permute.xlu1 %842 }
  0xa7   :  { %v10656_v32 = vpop.permute.xlu0 %837 }
  0xa9   :  { %872 = vperm.xlu0 %9617, %v810_v20   ;;  %v10658_v33 = vpop.permute.xlu1 %852 }
  0xab   :  { %v10660_v34 = vpop.permute.xlu0 %847 }
  0xad   :  { %2362 = vperm.xlu0 %9617, %v7875_v23   ;;  %v10662_v35 = vpop.permute.xlu1 %882 }
  0xaf   :  { %v10664_v36 = vpop.permute.xlu0 %877 }
  0xb1   :  { %2348 = vperm.xlu0 %9617, %v7873_v26   ;;  %v10666_v37 = vpop.permute.xlu1 %892 }
  0xb3   :  { %v10668_v38 = vpop.permute.xlu0 %887 }
  0xb5   :  { %v10670_v39 = vpop.permute.xlu1 %1150 }
  0xb7   :  { %v10672_v40 = vpop.permute.xlu0 %1145 }
  0xb9   :  { %v10674_v41 = vpop.permute.xlu1 %1160 }
  0xbb   :  { %v10676_v42 = vpop.permute.xlu0 %1155 }
  0xbd   :  { %v642_v43 = vpop.permute.xlu1 %641 }
  0xbf   :  { %v637_v44 = vpop.permute.xlu0 %636 }
  0xc1   :  { %v652_v2 = vpop.permute.xlu1 %651 }
  0xc3   :  { %v647_v3 = vpop.permute.xlu0 %646 }
  0xe4   :  { %v8801_v46 = vpop.f32.mrb[0].mxu1 }
  0xe5   :  { %v8790_v45 = vpop.f32.mrb[0].mxu0  ;;  %v10680_v48 = vadd.f32 %v8801_v46, %v329_v24  ;;  %v419_v50 = vpop.f32.mrb[1].mxu1  ;;  %v291_v24 = vlaneseq }
  0xe6   :  { %v10678_v47 = vadd.f32 %v8790_v45, %v152_v17  ;;  %v243_v49 = vpop.f32.mrb[1].mxu0  ;;  %v10684_v52 = vadd.f32 %v419_v50, %v324_v25 }
  0xe7   :  { %v10682_v51 = vadd.f32 %v243_v49, %v147_v13  ;;  %v7728_v54 = vmul.f32 -1.442695, %v10680_v48 }
  0xe8   :  { %v7710_v53 = vmul.f32 -1.442695, %v10678_v47  ;;  %v7727_v56 = vmul.f32 -1.442695, %v10684_v52 }
  0xe9   :  { %v7709_v55 = vmul.f32 -1.442695, %v10682_v51  ;;  %v8793_v57 = vpop.f32.mrb[2].mxu0 }
  0xea   :  { %9643 = vpow2.f32 %v7710_v53  ;;  %v10690_v60 = vadd.f32 %v8793_v57, %v162_v16  ;;  %v253_v62 = vpop.f32.mrb[3].mxu0 }
  0xeb   :  { %v8814_v58 = vpop.f32.mrb[2].mxu1  ;;  %9645 = vpow2.f32 %v7728_v54  ;;  %v10694_v0 = vadd.f32 %v253_v62, %v157_v12 }
  0xec   :  { %v10692_v61 = vadd.f32 %v8814_v58, %v642_v43  ;;  %v732_v63 = vpop.f32.mrb[3].mxu1  ;;  %9647 = vpow2.f32 %v7709_v55  ;;  %v7712_v4 = vmul.f32 -1.442695, %v10690_v60 }
  0xed   :  { %v10696_v1 = vadd.f32 %v732_v63, %v637_v44  ;;  %9649 = vpow2.f32 %v7727_v56  ;;  %v7711_v6 = vmul.f32 -1.442695, %v10694_v0  ;;  %v8798_v8 = vpop.f32.mrb[4].mxu0 }
  0xee   :  { %v7750_v5 = vmul.f32 -1.442695, %v10692_v61  ;;  %9651 = vpow2.f32 %v7712_v4  ;;  %v10702_v10 = vadd.f32 %v8798_v8, %v319_v21  ;;  %v409_v12 = vpop.f32.mrb[5].mxu0 }
  0xef   :  { %v7749_v7 = vmul.f32 -1.442695, %v10696_v1  ;;  %v8817_v9 = vpop.f32.mrb[4].mxu1  ;;  %v10707_v14 = vadd.f32 %v409_v12, %v10638_v22 }
  0xf0   :  { %v10704_v11 = vadd.f32 %v8817_v9, %v652_v2  ;;  %v742_v13 = vpop.f32.mrb[5].mxu1  ;;  %9653 = vpow2.f32 %v7750_v5  ;;  %v7726_v16 = vmul.f32 -1.442695, %v10702_v10 }
  0xf1   :  { %v10709_v15 = vadd.f32 %v742_v13, %v647_v3  ;;  %9655 = vpow2.f32 %v7711_v6  ;;  %v7725_v18 = vmul.f32 -1.442695, %v10707_v14  ;;  %v8806_v20 = vpop.f32.mrb[6].mxu0 }
  0xf2   :  { %v7752_v17 = vmul.f32 -1.442695, %v10704_v11  ;;  %9657 = vpow2.f32 %v7749_v7  ;;  %v10716_v21 = vadd.f32 %v8806_v20, %v10646_v27  ;;  %v567_v23 = vpop.f32.mrb[7].mxu0  ;;  %v292_v27 = vshrl.u32 %v291_v24, 7 }
  0xf3   :  { %v7751_v19 = vmul.f32 -1.442695, %v10709_v15  ;;  %9659 = vpow2.f32 %v7726_v16  ;;  %v10722_v6 = vadd.f32 %v567_v23, %v10648_v28 }
  0xf4   :  { %9661 = vpow2.f32 %v7752_v17  ;;  %v9644_v22 = vpop.eup %9643  ;;  %v7734_v25 = vmul.f32 -1.442695, %v10716_v21  ;;  %v10719_v4 = vsub.s32 0, %v292_v27 }
  0xf5   :  { %9663 = vpow2.f32 %v7725_v18  ;;  %v9646_v26 = vpop.eup %9645  ;;  %v275_v43 = vadd.f32 1.0, %v9644_v22  ;;  %v8809_v44 = vpop.f32.mrb[8].mxu0  ;;  %v7733_v20 = vmul.f32 -1.442695, %v10722_v6 }
  0xf6   :  { %9665 = vpow2.f32 %v7751_v19  ;;  %v9648_v45 = vpop.eup %9647  ;;  %v443_v46 = vadd.f32 1.0, %v9646_v26  ;;  %v577_v49 = vpop.f32.mrb[9].mxu0  ;;  %14184 = vst [vmem:[#allocation8_spill] sm:$0xff] %v10719_v4  ;;  %v10725_v9 = vadd.f32 %v8809_v44, %v10650_v29  ;;  %v10732_v19 = vrot.slane %v10572_v59, %v10719_v4 }
  0xf7   :  { %v9650_v50 = vpop.eup %9649  ;;  %9667 = vrcp.f32 %v275_v43  ;;  %v274_v53 = vadd.f32 1.0, %v9648_v45  ;;  %v10728_v16 = vadd.f32 %v577_v49, %v10652_v30 }
  0xf8   :  { %v9652_v54 = vpop.eup %9651  ;;  %v442_v55 = vadd.f32 1.0, %v9650_v50  ;;  %9669 = vpow2.f32 %v7734_v25  ;;  %v7736_v29 = vmul.f32 -1.442695, %v10725_v9 }
  0xf9   :  { %9671 = vrcp.f32 %v274_v53  ;;  %v277_v57 = vadd.f32 1.0, %v9652_v54  ;;  %v7735_v30 = vmul.f32 -1.442695, %v10728_v16  ;;  %v10752_v54 = vld [vmem:[%s14106_s8] ss:$0 sm:$0xff] }
  0xfa   :  { %v9654_v56 = vpop.eup %9653  ;;  %9673 = vrcp.f32 %v443_v46  ;;  %14188 = vst [vmem:[#allocation12_spill] sm:$0xff] %v10752_v54 }
  0xfb   :  { %v9656_v58 = vpop.eup %9655  ;;  %v764_v62 = vadd.f32 1.0, %v9654_v56  ;;  %9675 = vrcp.f32 %v277_v57 }
  0xfc   :  { %v9658_v63 = vpop.eup %9657  ;;  %v276_v2 = vadd.f32 1.0, %v9656_v58  ;;  %9677 = vrcp.f32 %v442_v55 }
  0xfd   :  { %v9660_v3 = vpop.eup %9659  ;;  %v763_v5 = vadd.f32 1.0, %v9658_v63 }
  0xfe   :  { %v9662_v7 = vpop.eup %9661  ;;  %9679 = vrcp.f32 %v276_v2  ;;  %v441_v8 = vadd.f32 1.0, %v9660_v3 }
  0xff   :  { %v9664_v12 = vpop.eup %9663  ;;  %9681 = vrcp.f32 %v764_v62  ;;  %v766_v13 = vadd.f32 1.0, %v9662_v7 }
 0x100   :  { %v9666_v17 = vpop.eup %9665  ;;  %9683 = vrcp.f32 %v441_v8  ;;  %v440_v18 = vadd.f32 1.0, %v9664_v12 }
 0x101   :  { %9685 = vrcp.f32 %v763_v5  ;;  %v765_v28 = vadd.f32 1.0, %v9666_v17  ;;  %v9668_v23 = vpop.eup %9667 }
 0x102   :  { %9687 = vrcp.f32 %v440_v18  ;;  %v9670_v22 = vpop.eup %9669  ;;  %v287_v24 = vmul.f32 %v9668_v23, %v10678_v47 }
 0x103   :  { %9689 = vrcp.f32 %v766_v13  ;;  %v9672_v25 = vpop.eup %9671  ;;  %v599_v27 = vadd.f32 1.0, %v9670_v22 }
 0x104   :  { %9691 = vrcp.f32 %v765_v28  ;;  %v9674_v26 = vpop.eup %9673  ;;  %v10739_v59 = vmul.f32 %v10732_v19, %v287_v24  ;;  %v286_v43 = vmul.f32 %v9672_v25, %v10682_v51  ;;  %v784_v28 = vld [vmem:[%s14111_s13 + $0x8] sm:$0xff] }
 0x105   :  { %9693 = vpow2.f32 %v7733_v20  ;;  %v9676_v44 = vpop.eup %9675 }
 0x106   :  { %14185 = vst [vmem:[#allocation9_spill] sm:$0xff] %v10739_v59  ;;  %9695 = vpow2.f32 %v7736_v29  ;;  %v9678_v45 = vpop.eup %9677  ;;  %v10743_v46 = vmul.f32 %v10732_v19, %v286_v43  ;;  %v289_v47 = vmul.f32 %v9676_v44, %v10690_v60  ;;  %v455_v60 = vmul.f32 %v9674_v26, %v10680_v48  ;;  %v786_v43 = vld [vmem:[%s14111_s13 + $0x18] sm:$0xff]  ;;  %v787_v44 = vld [vmem:[%s14111_s13 + $0x20] sm:$0xff] }
 0x107   :  { %9697 = vpow2.f32 %v7735_v30  ;;  %v454_v57 = vmul.f32 %v9678_v45, %v10684_v52 }
 0x108   :  { %14186 = vst [vmem:[#allocation10_spill] sm:$0xff] %v10743_v46  ;;  %v9680_v49 = vpop.eup %9679  ;;  %v10747_v53 = vmul.f32 %v10732_v19, %v289_v47  ;;  %v9482_v55 = vpack.c.bf16 %v10739_v59, %v10743_v46  ;;  %9699 = vrcp.f32 %v599_v27  ;;  %v10770_v7 = vmul.f32 %v455_v60, %v10732_v19  ;;  %v790_v60 = vld [vmem:[%s14111_s13 + $0x38] sm:$0xff] }
 0x109   :  { %v9682_v50 = vpop.eup %9681  ;;  %v288_v51 = vmul.f32 %v9680_v49, %v10694_v0  ;;  %v10773_v8 = vmul.f32 %v454_v57, %v10732_v19  ;;  %v788_v49 = vld [vmem:[%s14111_s13 + $0x28] sm:$0xff] }
 0x10a   :  { %14187 = vst [vmem:[#allocation11_spill] sm:$0xff] %v10747_v53  ;;  %v9684_v56 = vpop.eup %9683  ;;  %9483 = vmatprep.subr.bf16.mxu0 %v9482_v55  ;;  %14191 = vst [vmem:[#allocation15_spill] sm:$0xff] %v10770_v7 }
 0x10b   :  { %v9686_v58 = vpop.eup %9685  ;;  %v10760_v62 = vmul.f32 %v10732_v19, %v288_v51  ;;  %v453_v63 = vmul.f32 %v9684_v56, %v10702_v10  ;;  %9485 = vmatpush3.bf16.msra.mxu0 %v9482_v55  ;;  %14192 = vst [vmem:[#allocation16_spill] sm:$0xff] %v10773_v8  ;;  %v776_v10 = vmul.f32 %v9682_v50, %v10692_v61  ;;  %v785_v61 = vld [vmem:[%s14111_s13 + $0x10] sm:$0xff]  ;;  %v7770_v50 = vld [vmem:[%s14111_s13 + $0x208] sm:$0xff] }
 0x10c   :  { %v9688_v2 = vpop.eup %9687  ;;  %v775_v12 = vmul.f32 %v9686_v58, %v10696_v1  ;;  %v9494_v24 = vpack.c.bf16 %v10770_v7, %v10773_v8  ;;  %v789_v51 = vld [vmem:[%s14111_s13 + $0x30] sm:$0xff]  ;;  %v791_v58 = vld [vmem:[%s14111_s13 + $0x40] sm:$0xff] }
 0x10d   :  { %14189 = vst [vmem:[#allocation13_spill] sm:$0xff] %v10760_v62  ;;  %v9690_v3 = vpop.eup %9689  ;;  %v10764_v0 = vmul.f32 %v453_v63, %v10732_v19  ;;  %v452_v5 = vmul.f32 %v9688_v2, %v10707_v14  ;;  %v9486_v48 = vpack.c.bf16 %v10747_v53, %v10760_v62  ;;  %v10789_v1 = vmul.f32 %v10752_v54, %v776_v10  ;;  %v7771_v55 = vld [vmem:[%s14111_s13 + $0x210] sm:$0xff]  ;;  %v10847_v63 = vld [vmem:[%s14198_s6] sm:$0xff]   ;;  %v792_v10 = vld [vmem:[%s14111_s13 + $0x48] sm:$0xff] }
 0x10e   :  { %v9692_v52 = vpop.eup %9691  ;;  %v10792_v29 = vmul.f32 %v10752_v54, %v775_v12  ;;  %v778_v30 = vmul.f32 %v9690_v3, %v10704_v11 }
 0x10f   :  { %14190 = vst [vmem:[#allocation14_spill] sm:$0xff] %v10764_v0  ;;  %v9694_v13 = vpop.eup %9693  ;;  %v10778_v17 = vmul.f32 %v452_v5, %v10732_v19  ;;  %9487 = vmatprep.subr.bf16.mxu0 %v9486_v48  ;;  %14194 = vst [vmem:[#allocation18_spill] sm:$0xff] %v10789_v1  ;;  %v777_v25 = vmul.f32 %v9692_v52, %v10709_v15  ;;  %v7773_v5 = vld [vmem:[%s14111_s13 + $0x220] sm:$0xff] }
 0x110   :  { %v9696_v14 = vpop.eup %9695  ;;  %v598_v18 = vadd.f32 1.0, %v9694_v13  ;;  %9489 = vmatpush3.bf16.msra.mxu0 %v9486_v48  ;;  %14195 = vst [vmem:[#allocation19_spill] sm:$0xff] %v10792_v29  ;;  %v10807_v15 = vmul.f32 %v10752_v54, %v778_v30  ;;  %v9506_v47 = vpack.c.bf16 %v10789_v1, %v10792_v29  ;;  %v7777_v30 = vld [vmem:[%s14111_s13 + $0x240] sm:$0xff] }
 0x111   :  { %14193 = vst [vmem:[#allocation17_spill] sm:$0xff] %v10778_v17  ;;  %v9698_v20 = vpop.eup %9697  ;;  %v9490_v23 = vpack.c.bf16 %v10764_v0, %v10778_v17  ;;  %v601_v22 = vadd.f32 1.0, %v9696_v14  ;;  %v10810_v45 = vmul.f32 %v10752_v54, %v777_v25  ;;  %v793_v14 = vld [vmem:[%s14111_s13 + $0x50] sm:$0xff]  ;;  %v9619_v25 = vld [vmem:[%s14203_s25] sm:$0xff]  }
 0x112   :  { %9701 = vrcp.f32 %v598_v18  ;;  %v600_v26 = vadd.f32 1.0, %v9698_v20  ;;  %v9700_v11 = vpop.eup %9699  ;;  %14196 = vst [vmem:[#allocation20_spill] sm:$0xff] %v10807_v15  ;;  %v7775_v20 = vld [vmem:[%s14111_s13 + $0x230] sm:$0xff] }
 0x113   :  { %8827 = vmatmul.mubr.msk.f32.vlgmr.msra.gmra.mrb[10].mxu0 %vm895_vm2, %v784_v28  ;;  %9491 = vmatprep.subr.bf16.mxu1 %v9490_v23  ;;  %9703 = vrcp.f32 %v601_v22  ;;  %14197 = vst [vmem:[#allocation21_spill] sm:$0xff] %v10810_v45  ;;  %v611_v27 = vmul.f32 %v9700_v11, %v10716_v21  ;;  %v9510_v56 = vpack.c.bf16 %v10807_v15, %v10810_v45  ;;  %v7772_v21 = vld [vmem:[%s14111_s13 + $0x218] sm:$0xff]  ;;  %v795_v22 = vld [vmem:[%s14111_s13 + $0x60] sm:$0xff]  ;;  %v7779_v11 = vld [vmem:[%s14111_s13 + $0x250] sm:$0xff] }
 0x114   :  { %9493 = vmatpush3.bf16.msra.mxu1 %v9490_v23  ;;  %8829 = vmatprep.mubr.msk.f32.mxu0 %vm895_vm2, %v785_v61  ;;  %9705 = vrcp.f32 %v600_v26  ;;  %v7776_v61 = vld [vmem:[%s14111_s13 + $0x238] sm:$0xff]  ;;  %v796_v26 = vld [vmem:[%s14111_s13 + $0x68] sm:$0xff] }
 0x115   :  { %9495 = vmatprep.subr.bf16.mxu1 %v9494_v24  ;;  %v10850_v2 = vmul.f32 %v10752_v54, %v611_v27  ;;  %v7782_v27 = vld [vmem:[%s14111_s13 + $0x268] sm:$0xff] }
 0x117   :  { %8830 = vmatmul.mubr.msk.f32.gmra.mrb[12].mxu0 %vm895_vm2, %v786_v43  ;;  %14199 = vst [vmem:[#allocation22_spill] sm:$0xff] %v10850_v2  ;;  %v7778_v43 = vld [vmem:[%s14111_s13 + $0x248] sm:$0xff] }
 0x118   :  { %9497 = vmatpush3.bf16.msra.mxu1 %v9494_v24  ;;  %8832 = vmatprep.mubr.msk.f32.mxu0 %vm895_vm2, %v787_v44  ;;  %v797_v44 = vld [vmem:[%s14111_s13 + $0x70] sm:$0xff] }
 0x119   :  { %9507 = vmatprep.subr.bf16.mxu1 %v9506_v47 }
 0x11b   :  { %8833 = vmatmul.mubr.msk.f32.gmra.mrb[14].mxu0 %vm895_vm2, %v788_v49  ;;  %8859 = vmatmul.mubr.msk.f32.vlgmr.msra.gmra.mrb[6].mxu1 %vm895_vm2, %v7770_v50  ;;  %v7780_v49 = vld [vmem:[%s14111_s13 + $0x258] sm:$0xff]  ;;  %v7781_v50 = vld [vmem:[%s14111_s13 + $0x260] sm:$0xff] }
 0x11c   :  { %9509 = vmatpush3.bf16.msra.mxu1 %v9506_v47  ;;  %8835 = vmatprep.mubr.msk.f32.mxu0 %vm895_vm2, %v789_v51  ;;  %v9702_v57 = vpop.eup %9701  ;;  %v798_v47 = vld [vmem:[%s14111_s13 + $0x78] sm:$0xff]  ;;  %v1396_v51 = vld [vmem:[%s14113_s15] sm:$0xff] }
 0x11d   :  { %9511 = vmatprep.subr.bf16.mxu1 %v9510_v56  ;;  %8861 = vmatprep.mubr.msk.f32.mxu1 %vm895_vm2, %v7771_v55  ;;  %v610_v3 = vmul.f32 %v9702_v57, %v10722_v6  ;;  %v9704_v48 = vpop.eup %9703  ;;  %v7774_v6 = vld [vmem:[%s14111_s13 + $0x228] sm:$0xff]  ;;  %v7821_v57 = vld [vmem:[%s14113_s15 + $0x80] sm:$0xff] }
 0x11e   :  { %v9706_v12 = vpop.eup %9705  ;;  %v613_v13 = vmul.f32 %v9704_v48, %v10725_v9  ;;  %v1397_v55 = vld [vmem:[%s14113_s15 + $0x8] sm:$0xff] }
 0x11f   :  { %8836 = vmatmul.mubr.msk.f32.gmra.mrb[16].mxu0 %vm895_vm2, %v790_v60  ;;  %8862 = vmatmul.mubr.msk.f32.gmra.mrb[8].mxu1 %vm895_vm2, %v7772_v21  ;;  %v10859_v52 = vmul.f32 %v10752_v54, %v610_v3  ;;  %v612_v18 = vmul.f32 %v9706_v12, %v10728_v16  ;;  %v794_v16 = vld [vmem:[%s14111_s13 + $0x58] sm:$0xff]  ;;  %v9620_v60 = vld [vmem:[%s14203_s25 + $0x8] sm:$0xff]  }
 0x120   :  { %9513 = vmatpush3.bf16.msra.mxu1 %v9510_v56  ;;  %8838 = vmatprep.mubr.msk.f32.mxu0 %vm895_vm2, %v791_v58  ;;  %v10881_v23 = vmul.f32 %v10752_v54, %v613_v13  ;;  %v7783_v56 = vld [vmem:[%s14111_s13 + $0x270] sm:$0xff]  ;;  %v7784_v21 = vld [vmem:[%s14111_s13 + $0x278] sm:$0xff]  ;;  %v7822_v3 = vld [vmem:[%s14113_s15 + $0x88] sm:$0xff] }
 0x121   :  { %14200 = vst [vmem:[#allocation23_spill] sm:$0xff] %v10859_v52  ;;  %8864 = vmatprep.mubr.msk.f32.mxu1 %vm895_vm2, %v7773_v5  ;;  %8942 = vmatprep.subr.bf16.mxu1 %v10847_v63  ;;  %v9498_v28 = vpack.c.bf16 %v10850_v2, %v10859_v52  ;;  %v10886_v9 = vmul.f32 %v10752_v54, %v612_v18  ;;  %v9621_v58 = vld [vmem:[%s14203_s25 + $0x10] sm:$0xff]   ;;  %v9623_v5 = vld [vmem:[%s14203_s25 + $0x18] sm:$0xff]   ;;  %v9624_v48 = vld [vmem:[%s14198_s6 + $0x8] sm:$0xff]  }
 0x122   :  { %14201 = vst [vmem:[#allocation24_spill] sm:$0xff] %v10881_v23  ;;  %v9628_v12 = vld [vmem:[%s14198_s6 + $0x18] sm:$0xff]   ;;  %v9629_v13 = vld [vmem:[%s14203_s25 + $0x30] sm:$0xff]  }
 0x123   :  { %8839 = vmatmul.mubr.msk.f32.gmra.mrb[18].mxu0 %vm895_vm2, %v792_v10  ;;  %8865 = vmatmul.mubr.msk.f32.gmra.mrb[10].mxu1 %vm895_vm2, %v7774_v6  ;;  %14202 = vst [vmem:[#allocation25_spill] sm:$0xff] %v10886_v9  ;;  %v9502_v24 = vpack.c.bf16 %v10881_v23, %v10886_v9  ;;  %v9625_v10 = vld [vmem:[%s14203_s25 + $0x20] sm:$0xff]   ;;  %v9626_v6 = vld [vmem:[%s14198_s6 + $0x10] sm:$0xff]  }
 0x124   :  { %9499 = vmatprep.subr.bf16.mxu0 %v9498_v28  ;;  %8841 = vmatprep.mubr.msk.f32.mxu0 %vm895_vm2, %v793_v14  ;;  %v9630_v14 = vld [vmem:[%s14198_s6 + $0x20] sm:$0xff]   ;;  %v1398_v18 = vld [vmem:[%s14113_s15 + $0x10] sm:$0xff] }
 0x125   :  { %9501 = vmatpush3.bf16.msra.mxu0 %v9498_v28  ;;  %8867 = vmatprep.mubr.msk.f32.mxu1 %vm895_vm2, %v7775_v20  ;;  %v1399_v28 = vld [vmem:[%s14113_s15 + $0x18] sm:$0xff] }
 0x126   :  { %9503 = vmatprep.subr.bf16.mxu0 %v9502_v24  ;;  %v9631_v20 = vld [vmem:[%s14203_s25 + $0x38] sm:$0xff]  }
 0x127   :  { %8842 = vmatmul.mubr.msk.f32.gmra.mrb[20].mxu0 %vm895_vm2, %v794_v16  ;;  %8868 = vmatmul.mubr.msk.f32.gmra.mrb[12].mxu1 %vm895_vm2, %v7776_v61  ;;  %v9632_v16 = vld [vmem:[%s14198_s6 + $0x28] sm:$0xff]   ;;  %v9633_v61 = vld [vmem:[%s14198_s6 + $0x30] sm:$0xff]  }
 0x128   :  { %8844 = vmatprep.mubr.msk.f32.mxu0 %vm895_vm2, %v795_v22  ;;  %8870 = vmatprep.mubr.msk.f32.mxu1 %vm895_vm2, %v7777_v30  ;;  %v7823_v22 = vld [vmem:[%s14113_s15 + $0x90] sm:$0xff]  ;;  %v9634_v30 = vld [vmem:[%s14198_s6 + $0x38] sm:$0xff]  }
 0x129   :  { %9505 = vmatpush3.bf16.msra.mxu0 %v9502_v24  ;;  %v7824_v24 = vld [vmem:[%s14113_s15 + $0x98] sm:$0xff] }
 0x12a   :  { %8910 = vmatprep.subr.bf16.mxu0 %v9619_v25 }
 0x12b   :  { %8845 = vmatmul.mubr.msk.f32.gmra.mrb[22].mxu0 %vm895_vm2, %v796_v26  ;;  %8871 = vmatmul.mubr.msk.f32.gmra.mrb[14].mxu1 %vm895_vm2, %v7778_v43  ;;  %v11029_v26 = vpop.permute.xlu0 %1185  ;;  %v11031_v43 = vpop.permute.xlu1 %1190 }
 0x12c   :  { %8847 = vmatprep.mubr.msk.f32.mxu0 %vm895_vm2, %v797_v44  ;;  %8873 = vmatprep.mubr.msk.f32.mxu1 %vm895_vm2, %v7779_v11 }
 0x12f   :  { %8848 = vmatmul.mubr.msk.f32.gmra.mrb[24].mxu0 %vm895_vm2, %v798_v47  ;;  %8874 = vmatmul.mubr.msk.f32.gmra.mrb[16].mxu1 %vm895_vm2, %v7780_v49  ;;  %v11033_v44 = vpop.permute.xlu0 %1195  ;;  %v11035_v11 = vpop.permute.xlu1 %1200 }
 0x130   :  { %8876 = vmatprep.mubr.msk.f32.mxu1 %vm895_vm2, %v7781_v50  ;;  %8890 = vmatprep.mubr.msk.f32.mxu0 %vm895_vm2, %v1396_v51 }
 0x133   :  { %8877 = vmatmul.mubr.msk.f32.gmra.mrb[18].mxu1 %vm895_vm2, %v7782_v27  ;;  %8891 = vmatmul.mubr.msk.f32.vlgmr.msra.gmra.mrb[26].mxu0 %vm895_vm2, %v1397_v55  ;;  %v11037_v47 = vpop.xlane.xlu0 %126  ;;  %v11039_v49 = vpop.permute.xlu1 %822 }
 0x134   :  { %8879 = vmatprep.mubr.msk.f32.mxu1 %vm895_vm2, %v7783_v56  ;;  %8911 = vmatpush3.bf16.msra.mxu0 %v9619_v25  ;;  %v9635_v25 = vld [vmem:[%s14204_s23] sm:$0xff]  }
 0x135   :  { %8912 = vmatprep.subr.bf16.mxu0 %v9620_v60  ;;  %8893 = vmatprep.mubr.msk.f32.mxu0 %vm895_vm2, %v1398_v18 }
 0x137   :  { %8880 = vmatmul.mubr.msk.f32.gmra.mrb[20].mxu1 %vm895_vm2, %v7784_v21  ;;  %8894 = vmatmul.mubr.msk.f32.gmra.mrb[28].mxu0 %vm895_vm2, %v1399_v28  ;;  %v11041_v50 = vpop.permute.xlu0 %817  ;;  %v11043_v51 = vpop.permute.xlu1 %832 }
 0x138   :  { %8913 = vmatpush3.bf16.msra.mxu0 %v9620_v60  ;;  %8904 = vmatprep.mubr.msk.f32.mxu1 %vm895_vm2, %v7821_v57 }
 0x139   :  { %8914 = vmatprep.subr.bf16.mxu0 %v9621_v58 }
 0x13b   :  { %8905 = vmatmul.mubr.msk.f32.vlgmr.msra.gmra.mrb[22].mxu1 %vm895_vm2, %v7822_v3  ;;  %v11045_v27 = vpop.permute.xlu0 %827  ;;  %v11047_v55 = vpop.permute.xlu1 %1130 }
 0x13c   :  { %8915 = vmatpush3.bf16.msra.mxu0 %v9621_v58  ;;  %8943 = vmatpush3.bf16.msra.mxu1 %v10847_v63  ;;  %v9627_v63 = vld [vmem:[%s14203_s25 + $0x28] sm:$0xff]  }
 0x13d   :  { %8916 = vmatprep.subr.bf16.mxu0 %v9623_v5  ;;  %8944 = vmatprep.subr.bf16.mxu1 %v9624_v48 }
 0x13e   :  { %8907 = vmatprep.mubr.msk.f32.mxu1 %vm895_vm2, %v7823_v22 }
 0x13f   :  { %8908 = vmatmul.mubr.msk.f32.gmra.mrb[24].mxu1 %vm895_vm2, %v7824_v24  ;;  %v11049_v56 = vpop.permute.xlu0 %1125  ;;  %v11051_v60 = vpop.permute.xlu1 %1140 }
 0x140   :  { %8917 = vmatpush3.bf16.msra.mxu0 %v9623_v5  ;;  %8945 = vmatpush3.bf16.msra.mxu1 %v9624_v48 }
 0x141   :  { %8918 = vmatprep.subr.bf16.mxu0 %v9625_v10  ;;  %8946 = vmatprep.subr.bf16.mxu1 %v9626_v6 }
 0x143   :  { %v11053_v21 = vpop.permute.xlu0 %1135  ;;  %v11055_v57 = vpop.permute.xlu1 %2184 }
 0x144   :  { %8919 = vmatpush3.bf16.msra.mxu0 %v9625_v10  ;;  %8947 = vmatpush3.bf16.msra.mxu1 %v9626_v6  ;;  %14205 = vst [vmem:[#allocation26_spill] sm:$0xff] %v11055_v57 }
 0x145   :  { %8920 = vmatprep.subr.bf16.mxu0 %v9627_v63  ;;  %8948 = vmatprep.subr.bf16.mxu1 %v9628_v12 }
 0x147   :  { %v11057_v58 = vpop.permute.xlu0 %2179  ;;  %v11059_v3 = vpop.permute.xlu1 %2208 }
 0x148   :  { %8921 = vmatpush3.bf16.msra.mxu0 %v9627_v63  ;;  %8949 = vmatpush3.bf16.msra.mxu1 %v9628_v12  ;;  %14206 = vst [vmem:[#allocation27_spill] sm:$0xff] %v11059_v3 }
 0x149   :  { %8922 = vmatprep.subr.bf16.mxu0 %v9629_v13  ;;  %8950 = vmatprep.subr.bf16.mxu1 %v9630_v14 }
 0x14b   :  { %v11061_v5 = vpop.permute.xlu0 %2203  ;;  %v11063_v48 = vpop.permute.xlu1 %2194 }
 0x14c   :  { %8923 = vmatpush3.bf16.msra.mxu0 %v9629_v13  ;;  %8951 = vmatpush3.bf16.msra.mxu1 %v9630_v14  ;;  %14207 = vst [vmem:[#allocation28_spill] sm:$0xff] %v11061_v5 }
 0x14d   :  { %8924 = vmatprep.subr.bf16.mxu0 %v9631_v20  ;;  %8952 = vmatprep.subr.bf16.mxu1 %v9632_v16 }
 0x14f   :  { %v11065_v10 = vpop.permute.xlu0 %2189  ;;  %v11067_v6 = vpop.permute.xlu1 %2213 }
 0x150   :  { %8925 = vmatpush3.bf16.msra.mxu0 %v9631_v20  ;;  %8953 = vmatpush3.bf16.msra.mxu1 %v9632_v16 }
 0x151   :  { %8954 = vmatprep.subr.bf16.mxu1 %v9633_v61  ;;  %8966 = vmatprep.subr.bf16.mxu0 %v9635_v25 }
 0x153   :  { %v11069_v63 = vpop.permute.xlu0 %2218  ;;  %v11075_v14 = vpop.permute.xlu1 %2333 }
 0x154   :  { %8955 = vmatpush3.bf16.msra.mxu1 %v9633_v61  ;;  %14208 = vst [vmem:[#allocation29_spill] sm:$0xff] %v11075_v14 }
 0x155   :  { %8956 = vmatprep.subr.bf16.mxu1 %v9634_v30 }
 0x157   :  { %v11079_v28 = vpop.permute.xlu0 %2338  ;;  %v858_v0 = vpop.permute.xlu1 %857 }
 0x158   :  { %8957 = vmatpush3.bf16.msra.mxu1 %v9634_v30  ;;  %14209 = vst [vmem:[#allocation30_spill] sm:$0xff] %v11079_v28 }
 0x15b   :  { %v863_v7 = vpop.permute.xlu0 %862 }
 0x15f   :  { %v873_v57 = vpop.permute.xlu0 %872 }
 0x1e6   :  { %v11071_v12 = vpop.f32.mrb[10].mxu0 }
 0x1e7   :  { %v11073_v13 = vpop.f32.mrb[11].mxu0 }
 0x1ea   :  { %v11077_v18 = vpop.f32.mrb[12].mxu0 }
 0x1eb   :  { %v11081_v20 = vpop.f32.mrb[13].mxu0 }
 0x1ee   :  { %v8834_v16 = vpop.f32.mrb[14].mxu0  ;;  %v11083_v61 = vpop.f32.mrb[6].mxu1 }
 0x1ef   :  { %v1036_v22 = vadd.f32 %v8834_v16, %v10654_v31  ;;  %v1030_v24 = vpop.f32.mrb[15].mxu0  ;;  %v11086_v30 = vpop.f32.mrb[7].mxu1 }
 0x1f0   :  { %v1031_v8 = vadd.f32 %v1030_v24, %v10656_v32  ;;  %v9636_v32 = vld [vmem:[%s14204_s23 + $0x8] sm:$0xff]  }
 0x1f2   :  { %v1696_v17 = vpack.c.bf16 %v1036_v22, %v1031_v8  ;;  %v8837_v54 = vpop.f32.mrb[16].mxu0  ;;  %v11089_v14 = vpop.f32.mrb[8].mxu1 }
 0x1f3   :  { %v1046_v28 = vadd.f32 %v8837_v54, %v10658_v33  ;;  %v1040_v62 = vpop.f32.mrb[17].mxu0  ;;  %v11092_v59 = vpop.f32.mrb[9].mxu1 }
 0x1f4   :  { %v1041_v46 = vadd.f32 %v1040_v62, %v10660_v34  ;;  %8926 = vmatprep.mubr.bf16.mxu0 %v1696_v17  ;;  %v868_v54 = vpop.permute.xlu1 %867 }
 0x1f6   :  { %v1697_v31 = vpack.c.bf16 %v1046_v28, %v1041_v46  ;;  %v8840_v16 = vpop.f32.mrb[18].mxu0  ;;  %v8866_v53 = vpop.f32.mrb[10].mxu1 }
 0x1f7   :  { %v1056_v24 = vadd.f32 %v8840_v16, %v863_v7  ;;  %v1343_v8 = vadd.f32 %v8866_v53, %v10670_v39  ;;  %v1050_v22 = vpop.f32.mrb[19].mxu0  ;;  %v1337_v3 = vpop.f32.mrb[11].mxu1  ;;  %v9637_v7 = vld [vmem:[%s14204_s23 + $0x10] sm:$0xff]  }
 0x1f8   :  { %v1051_v5 = vadd.f32 %v1050_v22, %v858_v0  ;;  %v1338_v33 = vadd.f32 %v1337_v3, %v10672_v40  ;;  %8927 = vmatmul.mubr.bf16.vlgmr.msra.gmra.mrb[32].mxu0 %v1697_v31 }
 0x1f9   :  { %8967 = vmatpush3.bf16.msra.mxu0 %v9635_v25 }
 0x1fa   :  { %v1849_v34 = vpack.c.bf16 %v1056_v24, %v1051_v5  ;;  %v1700_v46 = vpack.c.bf16 %v1343_v8, %v1338_v33  ;;  %v8843_v62 = vpop.f32.mrb[20].mxu0  ;;  %v8869_v17 = vpop.f32.mrb[12].mxu1  ;;  %8968 = vmatprep.subr.bf16.mxu0 %v9636_v32  ;;  %v9638_v24 = vld [vmem:[%s14204_s23 + $0x18] sm:$0xff]  }
 0x1fb   :  { %v1066_v28 = vadd.f32 %v8843_v62, %v873_v57  ;;  %v1353_v39 = vadd.f32 %v8869_v17, %v10674_v41  ;;  %v1060_v53 = vpop.f32.mrb[21].mxu0  ;;  %v1347_v0 = vpop.f32.mrb[13].mxu1 }
 0x1fc   :  { %v1061_v16 = vadd.f32 %v1060_v53, %v868_v54  ;;  %v1348_v40 = vadd.f32 %v1347_v0, %v10676_v42  ;;  %8958 = vmatprep.mubr.bf16.mxu1 %v1849_v34  ;;  %v9639_v54 = vld [vmem:[%s14204_s23 + $0x20] sm:$0xff]  }
 0x1fd   :  { %8969 = vmatpush3.bf16.msra.mxu0 %v9636_v32 }
 0x1fe   :  { %v1850_v25 = vpack.c.bf16 %v1066_v28, %v1061_v16  ;;  %v1701_v3 = vpack.c.bf16 %v1353_v39, %v1348_v40  ;;  %v8846_v5 = vpop.f32.mrb[22].mxu0  ;;  %v11105_v31 = vpop.f32.mrb[14].mxu1  ;;  %8970 = vmatprep.subr.bf16.mxu0 %v9637_v7  ;;  %v9640_v39 = vld [vmem:[%s14204_s23 + $0x28] sm:$0xff]  }
 0x1ff   :  { %v1076_v57 = vadd.f32 %v8846_v5, %v10662_v35  ;;  %v1070_v41 = vpop.f32.mrb[23].mxu0  ;;  %v11111_v8 = vpop.f32.mrb[15].mxu1 }
 0x200   :  { %v1071_v22 = vadd.f32 %v1070_v41, %v10664_v36  ;;  %8959 = vmatmul.mubr.bf16.vlgmr.msra.gmra.mrb[28].mxu1 %v1850_v25 }
 0x201   :  { %8971 = vmatpush3.bf16.msra.mxu0 %v9637_v7 }
 0x202   :  { %v1698_v42 = vpack.c.bf16 %v1076_v57, %v1071_v22  ;;  %v8849_v32 = vpop.f32.mrb[24].mxu0  ;;  %v11114_v33 = vpop.f32.mrb[16].mxu1  ;;  %8972 = vmatprep.subr.bf16.mxu0 %v9638_v24 }
 0x203   :  { %v1086_v34 = vadd.f32 %v8849_v32, %v10666_v37  ;;  %v1080_v62 = vpop.f32.mrb[25].mxu0  ;;  %v11120_v35 = vpop.f32.mrb[17].mxu1  ;;  %v7836_v32 = vmul.f32 -1.442695, %v10881_v23 }
 0x204   :  { %v1081_v17 = vadd.f32 %v1080_v62, %v10668_v38  ;;  %8930 = vmatprep.mubr.bf16.mxu0 %v1698_v42  ;;  %v7834_v42 = vmul.f32 -1.442695, %v10850_v2 }
 0x205   :  { %8973 = vmatpush3.bf16.msra.mxu0 %v9638_v24 }
 0x206   :  { %v1699_v36 = vpack.c.bf16 %v1086_v34, %v1081_v17  ;;  %v8878_v7 = vpop.f32.mrb[18].mxu1  ;;  %v11123_v28 = vpop.f32.mrb[26].mxu0  ;;  %8974 = vmatprep.subr.bf16.mxu0 %v9639_v54  ;;  %v7833_v34 = vmul.f32 -1.442695, %v10859_v52  ;;  %9707 = vpow2.f32 %v7834_v42 }
 0x207   :  { %v1383_v53 = vadd.f32 %v8878_v7, %v11031_v43  ;;  %v1377_v0 = vpop.f32.mrb[19].mxu1  ;;  %v11129_v37 = vpop.f32.mrb[27].mxu0  ;;  %9709 = vpow2.f32 %v7836_v32 }
 0x208   :  { %v1378_v16 = vadd.f32 %v1377_v0, %v11029_v26  ;;  %8931 = vmatmul.mubr.bf16.gmra.mrb[36].mxu0 %v1699_v36  ;;  %v9641_v26 = vld [vmem:[%s14204_s23 + $0x30] sm:$0xff]  }
 0x209   :  { %8934 = vmatprep.mubr.bf16.mxu0 %v1700_v46  ;;  %8975 = vmatpush3.bf16.msra.mxu0 %v9639_v54  ;;  %v7835_v54 = vmul.f32 -1.442695, %v10886_v9 }
 0x20a   :  { %v1702_v38 = vpack.c.bf16 %v1383_v53, %v1378_v16  ;;  %v8881_v40 = vpop.f32.mrb[20].mxu1  ;;  %8976 = vmatprep.subr.bf16.mxu0 %v9640_v39  ;;  %v11134_v43 = vpop.f32.mrb[28].mxu0 }
 0x20b   :  { %v1393_v25 = vadd.f32 %v8881_v40, %v11035_v11  ;;  %v1387_v5 = vpop.f32.mrb[21].mxu1  ;;  %v11136_v41 = vpop.f32.mrb[29].mxu0  ;;  %9711 = vpow2.f32 %v7835_v54  ;;  %v7840_v40 = vmul.f32 -1.442695, %v10807_v15 }
 0x20c   :  { %v1388_v24 = vadd.f32 %v1387_v5, %v11033_v44  ;;  %v9642_v44 = vld [vmem:[%s14204_s23 + $0x38] sm:$0xff]   ;;  %9713 = vpow2.f32 %v7833_v34  ;;  %v7837_v5 = vmul.f32 -1.442695, %v10792_v29 }
 0x20d   :  { %8977 = vmatpush3.bf16.msra.mxu0 %v9640_v39 }
 0x20e   :  { %v1703_v57 = vpack.c.bf16 %v1393_v25, %v1388_v24  ;;  %8978 = vmatprep.subr.bf16.mxu0 %v9641_v26  ;;  %v11141_v46 = vpop.f32.mrb[22].mxu1  ;;  %v7839_v25 = vmul.f32 -1.442695, %v10810_v45 }
 0x20f   :  { %v11146_v11 = vpop.f32.mrb[23].mxu1 }
 0x210   :  { %8935 = vmatmul.mubr.bf16.gmra.mrb[40].mxu0 %v1701_v3  ;;  %v9708_v62 = vpop.eup %9707 }
 0x211   :  { %8938 = vmatprep.mubr.bf16.mxu0 %v1702_v38  ;;  %8979 = vmatpush3.bf16.msra.mxu0 %v9641_v26  ;;  %v9710_v17 = vpop.eup %9709  ;;  %v1661_v39 = vadd.f32 1.0, %v9708_v62  ;;  %v7838_v38 = vmul.f32 -1.442695, %v10789_v1 }
 0x212   :  { %8980 = vmatprep.subr.bf16.mxu0 %v9642_v44  ;;  %v11148_v3 = vpop.f32.mrb[24].mxu1  ;;  %v1663_v53 = vadd.f32 1.0, %v9710_v17 }
 0x213   :  { %v11150_v22 = vpop.f32.mrb[25].mxu1  ;;  %9715 = vrcp.f32 %v1661_v39 }
 0x214   :  { %9717 = vrcp.f32 %v1663_v53 }
 0x215   :  { %8981 = vmatpush3.bf16.msra.mxu0 %v9642_v44  ;;  %v9712_v36 = vpop.eup %9711 }
 0x216   :  { %v9714_v7 = vpop.eup %9713  ;;  %v1662_v0 = vadd.f32 1.0, %v9712_v36 }
 0x217   :  { %v1660_v16 = vadd.f32 1.0, %v9714_v7 }
 0x218   :  { %8939 = vmatmul.mubr.bf16.gmra.mrb[44].mxu0 %v1703_v57  ;;  %9719 = vrcp.f32 %v1662_v0 }
 0x219   :  { %9721 = vrcp.f32 %v1660_v16 }
 0x21a   :  { %9723 = vpow2.f32 %v7838_v38 }
 0x21b   :  { %9725 = vpow2.f32 %v7840_v40 }
 0x21c   :  { %9727 = vpow2.f32 %v7839_v25 }
 0x21d   :  { %v9716_v24 = vpop.eup %9715  ;;  %9729 = vpow2.f32 %v7837_v5 }
 0x21e   :  { %v9718_v26 = vpop.eup %9717 }
 0x222   :  { %v9720_v42 = vpop.eup %9719 }
 0x223   :  { %v9722_v54 = vpop.eup %9721 }
 0x224   :  { %v9724_v0 = vpop.eup %9723 }
 0x225   :  { %v9726_v16 = vpop.eup %9725  ;;  %v1685_v45 = vadd.f32 1.0, %v9724_v0 }
 0x226   :  { %v9728_v40 = vpop.eup %9727 }
 0x227   :  { %v9730_v5 = vpop.eup %9729  ;;  %9731 = vrcp.f32 %v1685_v45 }
 0x2cb   :  { %v8928_v57 = vpop.f32.mrb[32].mxu0 }
 0x2cc   :  { %v1786_v44 = vpop.f32.mrb[33].mxu0  ;;  %v1968_v34 = vmul.f32 %v9720_v42, %v8928_v57 }
 0x2cd   :  { %v8929_v32 = vpop.f32.mrb[34].mxu0  ;;  %v1966_v36 = vmul.f32 %v9722_v54, %v1786_v44  ;;  %v1686_v44 = vadd.f32 1.0, %v9728_v40 }
 0x2ce   :  { %v1969_v62 = vmul.f32 %v9718_v26, %v8929_v32  ;;  %v1789_v17 = vpop.f32.mrb[35].mxu0  ;;  %v1687_v26 = vadd.f32 1.0, %v9726_v16 }
 0x2cf   :  { %v1967_v7 = vmul.f32 %v9716_v24, %v1789_v17  ;;  %v1684_v24 = vadd.f32 1.0, %v9730_v5 }
 0x2d0   :  { %v1975_v39 = vpack.c.bf16 %v1969_v62, %v1968_v34  ;;  %9733 = vrcp.f32 %v1687_v26  ;;  %v9732_v62 = vpop.eup %9731 }
 0x2d1   :  { %v1974_v53 = vpack.c.bf16 %v1967_v7, %v1966_v36  ;;  %9735 = vrcp.f32 %v1686_v44 }
 0x2d2   :  { %9737 = vrcp.f32 %v1684_v24 }
 0x2d3   :  { %v11160_v38 = vpop.f32.mrb[28].mxu1  ;;  %8982 = vmatprep.mubr.bf16.mxu0 %v1974_v53  ;;  %9739 = vrcp.f32 %v11037_v47  ;;  %v1403_v47 = vld [vmem:[%s14114_s16 + $0x18] sm:$0xff] }
 0x2d4   :  { %v11162_v25 = vpop.f32.mrb[29].mxu1  ;;  %8983 = vmatmul.mubr.bf16.vlgmr.msra.gmra.mrb[48].mxu0 %v1975_v39 }
 0x2d5   :  { %v11164_v15 = vpop.f32.mrb[30].mxu1 }
 0x2d6   :  { %v11166_v57 = vpop.f32.mrb[31].mxu1 }
 0x2da   :  { %v9734_v36 = vpop.eup %9733 }
 0x2db   :  { %v11168_v42 = vpop.f32.mrb[36].mxu0  ;;  %v9736_v39 = vpop.eup %9735 }
 0x2dc   :  { %v11170_v32 = vpop.f32.mrb[37].mxu0  ;;  %v9738_v0 = vpop.eup %9737 }
 0x2dd   :  { %v11172_v54 = vpop.f32.mrb[38].mxu0 }
 0x2de   :  { %v11174_v34 = vpop.f32.mrb[39].mxu0 }
 0x2e3   :  { %v8936_v17 = vpop.f32.mrb[40].mxu0 }
 0x2e4   :  { %v1818_v7 = vpop.f32.mrb[41].mxu0  ;;  %v1972_v16 = vmul.f32 %v9736_v39, %v8936_v17  ;;  %v7865_v17 = vld [vmem:[%s14212_s0] ss:$0 sm:$0xff] }
 0x2e5   :  { %v8937_v53 = vpop.f32.mrb[42].mxu0  ;;  %v1970_v5 = vmul.f32 %v9738_v0, %v1818_v7 }
 0x2e6   :  { %v1973_v45 = vmul.f32 %v9734_v36, %v8937_v53  ;;  %v1821_v40 = vpop.f32.mrb[43].mxu0 }
 0x2e7   :  { %v1971_v26 = vmul.f32 %v9732_v62, %v1821_v40  ;;  %v1021_v62 = vadd.f32 %v11081_v20, %v11045_v27 }
 0x2e8   :  { %v1977_v44 = vpack.c.bf16 %v1973_v45, %v1972_v16  ;;  %v1026_v16 = vadd.f32 %v11077_v18, %v11043_v51 }
 0x2e9   :  { %v1976_v1 = vpack.c.bf16 %v1971_v26, %v1970_v5  ;;  %v1016_v26 = vadd.f32 %v11071_v12, %v11039_v49 }
 0x2eb   :  { %v11176_v29 = vpop.f32.mrb[44].mxu0  ;;  %8986 = vmatprep.mubr.bf16.mxu0 %v1976_v1  ;;  %v1011_v1 = vadd.f32 %v11073_v13, %v11041_v50 }
 0x2ec   :  { %v11178_v24 = vpop.f32.mrb[45].mxu0  ;;  %8987 = vmatmul.mubr.bf16.gmra.mrb[52].mxu0 %v1977_v44 }
 0x2ed   :  { %v11180_v23 = vpop.f32.mrb[46].mxu0 }
 0x2ee   :  { %14210 = vst [vmem:[#allocation31_spill] sm:$0xff] %v11180_v23  ;;  %v11182_v9 = vpop.f32.mrb[47].mxu0 }
 0x2ef   :  { %14211 = vst [vmem:[#allocation32_spill] sm:$0xff] %v11182_v9 }
 0x3a7   :  { %v8984_v36 = vpop.f32.mrb[48].mxu0 }
 0x3a8   :  { %v2099_v7 = vmul.f32 %v8984_v36, %v7865_v17  ;;  %v2060_v39 = vpop.f32.mrb[49].mxu0 }
 0x3a9   :  { %v2097_v53 = vmul.f32 %v7865_v17, %v2060_v39  ;;  %v8985_v0 = vpop.f32.mrb[50].mxu0 }
 0x3aa   :  { %v11193_v45 = vadd.f32 %v2099_v7, %v1021_v62  ;;  %v2100_v40 = vmul.f32 %v8985_v0, %v7865_v17  ;;  %v2063_v5 = vpop.f32.mrb[51].mxu0 }
 0x3ab   :  { %v11197_v44 = vadd.f32 %v2097_v53, %v1011_v1  ;;  %v2098_v27 = vmul.f32 %v7865_v17, %v2063_v5  ;;  %v1328_v1 = vadd.f32 %v11092_v59, %v11053_v21 }
 0x3ac   :  { %v11199_v20 = vadd.f32 %v2100_v40, %v1026_v16  ;;  %v2119_v50 = vmul.f32 %v11193_v45, %v10732_v19  ;;  %v1318_v16 = vadd.f32 %v11086_v30, %v11049_v56  ;;  %v7793_v56 = vld [vmem:[%s14112_s14 + $0x240] sm:$0xff] }
 0x3ad   :  { %v11203_v13 = vadd.f32 %v2098_v27, %v1016_v26  ;;  %v2117_v51 = vmul.f32 %v11197_v44, %v10732_v19  ;;  %v1333_v26 = vadd.f32 %v11089_v14, %v11051_v60  ;;  %v7877_v60 = vld [vmem:[%s14116_s18 + $0x98] sm:$0xff] }
 0x3ae   :  { %2125 = vadd.xlane.f32.xlu0 %v2119_v50  ;;  %v2131_v18 = vmul.f32 %v2119_v50, %v2119_v50  ;;  %v2120_v36 = vmul.f32 %v11199_v20, %v10732_v19 }
 0x3af   :  { %2121 = vadd.xlane.f32.xlu1 %v2117_v51  ;;  %v2118_v49 = vmul.f32 %v11203_v13, %v10732_v19  ;;  %v2129_v62 = vmul.f32 %v2117_v51, %v2117_v51 }
 0x3b0   :  { %v2132_v12 = vmul.f32 %v2120_v36, %v2120_v36 }
 0x3b1   :  { %v2130_v7 = vmul.f32 %v2118_v49, %v2118_v49 }
 0x3b2   :  { %2137 = vadd.xlane.f32.xlu0 %v2131_v18  ;;  %v1323_v18 = vadd.f32 %v11083_v61, %v11047_v55 }
 0x3b3   :  { %2127 = vadd.xlane.f32.xlu1 %v2120_v36 }
 0x3b6   :  { %2123 = vadd.xlane.f32.xlu0 %v2118_v49 }
 0x3b7   :  { %2139 = vadd.xlane.f32.xlu1 %v2132_v12 }
 0x3ba   :  { %2133 = vadd.xlane.f32.xlu0 %v2129_v62 }
 0x3bb   :  { %2135 = vadd.xlane.f32.xlu1 %v2130_v7 }
 0x3bf   :  { %v8988_v39 = vpop.f32.mrb[52].mxu0 }
 0x3c0   :  { %v2103_v53 = vmul.f32 %v8988_v39, %v7865_v17  ;;  %v2076_v0 = vpop.f32.mrb[53].mxu0  ;;  %v7795_v39 = vld [vmem:[%s14112_s14 + $0x250] sm:$0xff] }
 0x3c1   :  { %v2101_v40 = vmul.f32 %v7865_v17, %v2076_v0  ;;  %v8989_v5 = vpop.f32.mrb[54].mxu0  ;;  %v7796_v0 = vld [vmem:[%s14112_s14 + $0x258] sm:$0xff] }
 0x3c2   :  { %v11217_v27 = vadd.f32 %v2103_v53, %v1328_v1  ;;  %v2104_v50 = vmul.f32 %v8989_v5, %v7865_v17  ;;  %v2079_v51 = vpop.f32.mrb[55].mxu0  ;;  %v7794_v1 = vld [vmem:[%s14112_s14 + $0x248] sm:$0xff]  ;;  %v7918_v53 = vld [vmem:[%s14112_s14 + $0xa0] sm:$0xff] }
 0x3c3   :  { %v11221_v36 = vadd.f32 %v2101_v40, %v1318_v16  ;;  %v2102_v59 = vmul.f32 %v7865_v17, %v2079_v51  ;;  %v7920_v16 = vld [vmem:[%s14112_s14 + $0xb0] sm:$0xff]  ;;  %v7919_v40 = vld [vmem:[%s14112_s14 + $0xa8] sm:$0xff]  ;;  %v7926_v5 = vld [vmem:[%s14112_s14 + $0xe0] sm:$0xff] }
 0x3c4   :  { %v11223_v21 = vadd.f32 %v2104_v50, %v1333_v26  ;;  %v2277_v14 = vmul.f32 %v11217_v27, %v10732_v19  ;;  %v7921_v26 = vld [vmem:[%s14112_s14 + $0xb8] sm:$0xff]  ;;  %v7928_v50 = vld [vmem:[%s14112_s14 + $0xf0] sm:$0xff]  ;;  %v7927_v51 = vld [vmem:[%s14112_s14 + $0xe8] sm:$0xff] }
 0x3c5   :  { %v11225_v49 = vadd.f32 %v2102_v59, %v1323_v18  ;;  %v2275_v55 = vmul.f32 %v11221_v36, %v10732_v19  ;;  %v7966_v18 = vld [vmem:[%s14112_s14 + $0x2a0] sm:$0xff]  ;;  %v7929_v59 = vld [vmem:[%s14112_s14 + $0xf8] sm:$0xff] }
 0x3c6   :  { %v2278_v61 = vmul.f32 %v11223_v21, %v10732_v19  ;;  %v2289_v30 = vmul.f32 %v2277_v14, %v2277_v14 }
 0x3c7   :  { %v2287_v17 = vmul.f32 %v2275_v55, %v2275_v55  ;;  %v2276_v12 = vmul.f32 %v11225_v49, %v10732_v19 }
 0x3c8   :  { %v2290_v62 = vmul.f32 %v2278_v61, %v2278_v61 }
 0x3c9   :  { %v2288_v7 = vmul.f32 %v2276_v12, %v2276_v12 }
 0x3cc   :  { %1165 = vperm.xlu1 %9618, %v7793_v56   ;;  %v7968_v56 = vld [vmem:[%s14112_s14 + $0x2b0] sm:$0xff] }
 0x3d0   :  { %2372 = vperm.xlu0 %9617, %v7877_v60   ;;  %v7967_v60 = vld [vmem:[%s14112_s14 + $0x2a8] sm:$0xff] }
 0x3ef   :  { %2279 = vadd.xlane.f32.xlu0 %v2275_v55  ;;  %v1400_v55 = vld [vmem:[%s14114_s16] sm:$0xff] }
 0x3f0   :  { %2283 = vadd.xlane.f32.xlu1 %v2277_v14  ;;  %v7969_v14 = vld [vmem:[%s14112_s14 + $0x2b8] sm:$0xff] }
 0x3f3   :  { %2285 = vadd.xlane.f32.xlu0 %v2278_v61  ;;  %v1402_v61 = vld [vmem:[%s14114_s16 + $0x10] sm:$0xff] }
 0x3f4   :  { %2295 = vadd.xlane.f32.xlu1 %v2289_v30  ;;  %v11292_v30 = vpop.permute.xlu1 %2357 }
 0x3f7   :  { %2291 = vadd.xlane.f32.xlu0 %v2287_v17  ;;  %v1401_v17 = vld [vmem:[%s14114_s16 + $0x8] sm:$0xff] }
 0x3f8   :  { %2281 = vadd.xlane.f32.xlu1 %v2276_v12  ;;  %v7825_v12 = vld [vmem:[%s14114_s16 + $0x80] sm:$0xff] }
 0x3fb   :  { %2297 = vadd.xlane.f32.xlu0 %v2290_v62  ;;  %v11301_v62 = vpop.permute.xlu0 %2362 }
 0x3fc   :  { %2293 = vadd.xlane.f32.xlu1 %v2288_v7  ;;  %v11303_v7 = vpop.permute.xlu1 %2343 }
 0x40d   :  { %1175 = vperm.xlu1 %9618, %v7795_v39   ;;  %v7827_v39 = vld [vmem:[%s14114_s16 + $0x90] sm:$0xff] }
 0x411   :  { %1170 = vperm.xlu0 %9617, %v7794_v1   ;;  %2789 = vperm.xlu1 %9618, %v7918_v53   ;;  %v7826_v1 = vld [vmem:[%s14114_s16 + $0x88] sm:$0xff]  ;;  %v9740_v53 = vpop.eup %9739 }
 0x415   :  { %1180 = vperm.xlu0 %9617, %v7796_v0   ;;  %2799 = vperm.xlu1 %9618, %v7920_v16   ;;  %v11314_v0 = vpop.permute.xlu0 %2348  ;;  %v11316_v16 = vpop.permute.xlu1 %2367 }
 0x419   :  { %2794 = vperm.xlu0 %9617, %v7919_v40   ;;  %2829 = vperm.xlu1 %9618, %v7926_v5   ;;  %v11319_v40 = vrot.slane %v9740_v53, %v10719_v4  ;;  %v7828_v5 = vld [vmem:[%s14114_s16 + $0x98] sm:$0xff] }
 0x41d   :  { %2804 = vperm.xlu0 %9617, %v7921_v26   ;;  %2839 = vperm.xlu1 %9618, %v7928_v50  }
 0x421   :  { %2834 = vperm.xlu0 %9617, %v7927_v51   ;;  %3096 = vperm.xlu1 %9618, %v7966_v18  }
 0x425   :  { %2844 = vperm.xlu0 %9617, %v7929_v59   ;;  %3106 = vperm.xlu1 %9618, %v7968_v56  }
 0x429   :  { %3101 = vperm.xlu0 %9617, %v7967_v60   ;;  %1406 = vperm.xlu1 %9618, %v1400_v55  }
 0x42d   :  { %3111 = vperm.xlu0 %9617, %v7969_v14   ;;  %1416 = vperm.xlu1 %9618, %v1402_v61  }
 0x431   :  { %1411 = vperm.xlu0 %9617, %v1401_v17   ;;  %1533 = vperm.xlu1 %9618, %v7825_v12  }
 0x435   :  { %1421 = vperm.xlu0 %9617, %v1403_v47   ;;  %1543 = vperm.xlu1 %9618, %v7827_v39  }
 0x439   :  { %1538 = vperm.xlu0 %9617, %v7826_v1  }
 0x43b   :  { %v2126_v26 = vpop.xlane.xlu0 %2125 }
 0x43c   :  { %v2147_v50 = vmul.f32 %v11319_v40, %v2126_v26  ;;  %v2122_v51 = vpop.xlane.xlu1 %2121 }
 0x43d   :  { %1548 = vperm.xlu0 %9617, %v7828_v5   ;;  %v2145_v17 = vmul.f32 %v11319_v40, %v2122_v51 }
 0x43e   :  { %v2155_v59 = vmul.f32 %v2147_v50, %v2147_v50 }
 0x43f   :  { %v2138_v18 = vpop.xlane.xlu0 %2137  ;;  %v2153_v2 = vmul.f32 %v2145_v17, %v2145_v17 }
 0x440   :  { %v2151_v56 = vmul.f32 %v11319_v40, %v2138_v18  ;;  %v2128_v60 = vpop.xlane.xlu1 %2127 }
 0x441   :  { %v2148_v55 = vmul.f32 %v11319_v40, %v2128_v60 }
 0x442   :  { %v2159_v14 = vsub.f32 %v2151_v56, %v2155_v59  ;;  %v7946_v59 = vld [vmem:[%s14111_s13 + $0x280] sm:$0xff] }
 0x443   :  { %v2124_v61 = vpop.xlane.xlu0 %2123  ;;  %v2156_v39 = vmul.f32 %v2148_v55, %v2148_v55  ;;  %9030 = vmatprep.mubr.msk.f32.mxu0 %vm895_vm2, %v7946_v59  ;;  %v2164_v9 = vsub.f32 %v11199_v20, %v2148_v55  ;;  %v2161_v59 = vsub.f32 %v11197_v44, %v2145_v17  ;;  %v14213_v55 = vld [vmem:[#allocation26_spill] sm:$0xff]  ;;  %v14215_v17 = vld [vmem:[#allocation27_spill] sm:$0xff] }
 0x444   :  { %v2167_v12 = vadd.f32 1e-05, %v2159_v14  ;;  %v2140_v47 = vpop.xlane.xlu1 %2139  ;;  %v2146_v1 = vmul.f32 %v11319_v40, %v2124_v61 }
 0x445   :  { %v2152_v53 = vmul.f32 %v11319_v40, %v2140_v47 }
 0x446   :  { %9741 = vrsqrt.f32 %v2167_v12  ;;  %v2154_v56 = vmul.f32 %v2146_v1, %v2146_v1 }
 0x447   :  { %v2160_v5 = vsub.f32 %v2152_v53, %v2156_v39  ;;  %v2134_v26 = vpop.xlane.xlu0 %2133  ;;  %v2163_v39 = vsub.f32 %v11193_v45, %v2147_v50 }
 0x448   :  { %v2149_v18 = vmul.f32 %v11319_v40, %v2134_v26  ;;  %v2136_v52 = vpop.xlane.xlu1 %2135 }
 0x449   :  { %v2168_v51 = vadd.f32 1e-05, %v2160_v5  ;;  %v2150_v60 = vmul.f32 %v11319_v40, %v2136_v52 }
 0x44a   :  { %v2157_v14 = vsub.f32 %v2149_v18, %v2153_v2  ;;  %v10143_v2 = vld [vmem:[%s14106_s8] sm:$0x1] }
 0x44b   :  { %9743 = vrsqrt.f32 %v2168_v51  ;;  %v2158_v61 = vsub.f32 %v2150_v60, %v2154_v56  ;;  %v130_v18 = vsel %vm124_vm1, %v10143_v2, 0.0  ;;  %v2162_v56 = vsub.f32 %v11203_v13, %v2146_v1 }
 0x44c   :  { %v2165_v12 = vadd.f32 1e-05, %v2157_v14 }
 0x44d   :  { %v2166_v47 = vadd.f32 1e-05, %v2158_v61  ;;  %v14214_v61 = vld [vmem:[#allocation28_spill] sm:$0xff] }
 0x44e   :  { %9745 = vrsqrt.f32 %v2165_v12 }
 0x44f   :  { %9747 = vrsqrt.f32 %v2166_v47 }
 0x450   :  { %v9742_v53 = vpop.eup %9741 }
 0x451   :  { %v2175_v26 = vmul.f32 %v9742_v53, %v2163_v39 }
 0x453   :  { %v2199_v4 = vmul.f32 %v11065_v10, %v2175_v26 }
 0x455   :  { %v9744_v5 = vpop.eup %9743  ;;  %v2223_v52 = vadd.f32 %v11067_v6, %v2199_v4 }
 0x456   :  { %v2176_v23 = vmul.f32 %v9744_v5, %v2164_v9 }
 0x457   :  { %v7868_v45 = vmul.f32 -1.442695, %v2223_v52 }
 0x458   :  { %v9746_v50 = vpop.eup %9745  ;;  %v2200_v10 = vmul.f32 %v11063_v48, %v2176_v23 }
 0x459   :  { %v9748_v51 = vpop.eup %9747  ;;  %v2173_v20 = vmul.f32 %v9746_v50, %v2161_v59  ;;  %9749 = vpow2.f32 %v7868_v45  ;;  %131 = vadd.xlane.f32.xlu1 %v130_v18  ;;  %v11352_v45 = vpop.permute.xlu0 %2372 }
 0x45a   :  { %v2174_v4 = vmul.f32 %v9748_v51, %v2162_v56  ;;  %v2224_v9 = vadd.f32 %v11069_v63, %v2200_v10  ;;  %v1166_v10 = vpop.permute.xlu1 %1165 }
 0x45b   :  { %v2197_v6 = vmul.f32 %v11057_v58, %v2173_v20 }
 0x45c   :  { %v2198_v60 = vmul.f32 %v14213_v55, %v2174_v4  ;;  %v7869_v14 = vmul.f32 -1.442695, %v2224_v9  ;;  %v14216_v4 = vld [vmem:[#allocation11_spill] sm:$0xff]  ;;  %v14217_v55 = vld [vmem:[#allocation10_spill] sm:$0xff] }
 0x45d   :  { %v2221_v44 = vadd.f32 %v14214_v61, %v2197_v6  ;;  %v14218_v61 = vld [vmem:[#allocation9_spill] sm:$0xff] }
 0x45e   :  { %v2222_v12 = vadd.f32 %v14215_v17, %v2198_v60  ;;  %9751 = vpow2.f32 %v7869_v14 }
 0x45f   :  { %v7866_v13 = vmul.f32 -1.442695, %v2221_v44 }
 0x460   :  { %v7867_v1 = vmul.f32 -1.442695, %v2222_v12 }
 0x461   :  { %9753 = vpow2.f32 %v7866_v13  ;;  %v14219_v13 = vld [vmem:[#allocation13_spill] sm:$0xff] }
 0x462   :  { %9755 = vpow2.f32 %v7867_v1 }
 0x463   :  { %v9750_v23 = vpop.eup %9749 }
 0x464   :  { %v2239_v48 = vadd.f32 1.0, %v9750_v23 }
 0x466   :  { %9757 = vrcp.f32 %v2239_v48 }
 0x468   :  { %v9752_v47 = vpop.eup %9751 }
 0x469   :  { %v2240_v39 = vadd.f32 1.0, %v9752_v47 }
 0x46b   :  { %v9754_v63 = vpop.eup %9753  ;;  %9759 = vrcp.f32 %v2240_v39 }
 0x46c   :  { %v9756_v58 = vpop.eup %9755  ;;  %v2237_v53 = vadd.f32 1.0, %v9754_v63 }
 0x46d   :  { %v2238_v26 = vadd.f32 1.0, %v9756_v58 }
 0x46e   :  { %9761 = vrcp.f32 %v2237_v53 }
 0x46f   :  { %9763 = vrcp.f32 %v2238_v26 }
 0x470   :  { %v9758_v5 = vpop.eup %9757 }
 0x471   :  { %v2251_v50 = vmul.f32 %v9758_v5, %v2223_v52 }
 0x473   :  { %v2255_v1 = vadd.f32 %v2251_v50, %v14219_v13 }
 0x475   :  { %v9760_v2 = vpop.eup %9759  ;;  %v11371_v39 = vmul.f32 %v2255_v1, %v10732_v19 }
 0x476   :  { %v2252_v18 = vmul.f32 %v9760_v2, %v2224_v9 }
 0x478   :  { %v9762_v59 = vpop.eup %9761  ;;  %v2256_v6 = vadd.f32 %v2252_v18, %v14216_v4 }
 0x479   :  { %v9764_v56 = vpop.eup %9763  ;;  %v2249_v51 = vmul.f32 %v9762_v59, %v2221_v44 }
 0x47a   :  { %v2250_v20 = vmul.f32 %v9764_v56, %v2222_v12  ;;  %v11366_v44 = vmul.f32 %v2256_v6, %v10732_v19 }
 0x47b   :  { %v2253_v60 = vadd.f32 %v2249_v51, %v14217_v55 }
 0x47c   :  { %v2280_v14 = vpop.xlane.xlu0 %2279  ;;  %v2254_v17 = vadd.f32 %v2250_v20, %v14218_v61  ;;  %v9518_v5 = vpack.c.bf16 %v11366_v44, %v11371_v39 }
 0x47d   :  { %v2284_v23 = vpop.xlane.xlu1 %2283  ;;  %v11359_v9 = vmul.f32 %v2253_v60, %v10732_v19  ;;  %v2299_v63 = vmul.f32 %v2280_v14, %v11319_v40 }
 0x47e   :  { %v2301_v48 = vmul.f32 %v2284_v23, %v11319_v40  ;;  %v11363_v52 = vmul.f32 %v2254_v17, %v10732_v19 }
 0x47f   :  { %v2307_v59 = vmul.f32 %v2299_v63, %v2299_v63 }
 0x480   :  { %v2286_v12 = vpop.xlane.xlu0 %2285  ;;  %v9514_v47 = vpack.c.bf16 %v11363_v52, %v11359_v9  ;;  %v2309_v53 = vmul.f32 %v2301_v48, %v2301_v48 }
 0x481   :  { %v2296_v58 = vpop.xlane.xlu1 %2295  ;;  %v2302_v50 = vmul.f32 %v2286_v12, %v11319_v40 }
 0x482   :  { %v2305_v26 = vmul.f32 %v2296_v58, %v11319_v40  ;;  %9515 = vmatprep.subr.bf16.mxu1 %v9514_v47 }
 0x483   :  { %9517 = vmatpush3.bf16.msra.mxu1 %v9514_v47  ;;  %v2310_v60 = vmul.f32 %v2302_v50, %v2302_v50 }
 0x484   :  { %v2313_v2 = vsub.f32 %v2305_v26, %v2309_v53  ;;  %v2292_v18 = vpop.xlane.xlu0 %2291  ;;  %9519 = vmatprep.subr.bf16.mxu1 %v9518_v5 }
 0x485   :  { %v2303_v56 = vmul.f32 %v2292_v18, %v11319_v40  ;;  %v2282_v51 = vpop.xlane.xlu1 %2281 }
 0x486   :  { %v2321_v20 = vadd.f32 1e-05, %v2313_v2  ;;  %v2300_v4 = vmul.f32 %v2282_v51, %v11319_v40  ;;  %v2317_v2 = vsub.f32 %v11217_v27, %v2301_v48 }
 0x487   :  { %v2311_v6 = vsub.f32 %v2303_v56, %v2307_v59  ;;  %9521 = vmatpush3.bf16.msra.mxu1 %v9518_v5  ;;  %v1358_v5 = vadd.f32 %v11111_v8, %v1166_v10  ;;  %v7898_v10 = vld [vmem:[%s14111_s13 + $0x80] sm:$0xff] }
 0x488   :  { %9765 = vrsqrt.f32 %v2321_v20  ;;  %v2298_v55 = vpop.xlane.xlu0 %2297  ;;  %v2308_v13 = vmul.f32 %v2300_v4, %v2300_v4 }
 0x489   :  { %v2319_v14 = vadd.f32 1e-05, %v2311_v6  ;;  %v2306_v61 = vmul.f32 %v2298_v55, %v11319_v40  ;;  %v2294_v17 = vpop.xlane.xlu1 %2293  ;;  %v2315_v6 = vsub.f32 %v11221_v36, %v2299_v63  ;;  %v2318_v36 = vsub.f32 %v11223_v21, %v2302_v50 }
 0x48a   :  { %v2304_v1 = vmul.f32 %v2294_v17, %v11319_v40 }
 0x48b   :  { %9767 = vrsqrt.f32 %v2319_v14  ;;  %v2314_v23 = vsub.f32 %v2306_v61, %v2310_v60 }
 0x48c   :  { %v2312_v12 = vsub.f32 %v2304_v1, %v2308_v13  ;;  %v2316_v1 = vsub.f32 %v11225_v49, %v2300_v4 }
 0x48d   :  { %v2322_v47 = vadd.f32 1e-05, %v2314_v23  ;;  %v1176_v58 = vpop.permute.xlu1 %1175 }
 0x48e   :  { %v2320_v53 = vadd.f32 1e-05, %v2312_v12  ;;  %v1368_v14 = vadd.f32 %v11120_v35, %v1176_v58  ;;  %v14220_v35 = vld [vmem:[#allocation29_spill] sm:$0xff] }
 0x48f   :  { %9769 = vrsqrt.f32 %v2322_v47 }
 0x490   :  { %9771 = vrsqrt.f32 %v2320_v53  ;;  %v1171_v26 = vpop.permute.xlu0 %1170  ;;  %v14221_v53 = vld [vmem:[#allocation30_spill] sm:$0xff] }
 0x491   :  { %v1363_v18 = vadd.f32 %v11105_v31, %v1171_v26  ;;  %v11385_v59 = vpop.permute.xlu1 %2789 }
 0x492   :  { %v9766_v56 = vpop.eup %9765 }
 0x493   :  { %v2329_v51 = vmul.f32 %v9766_v56, %v2317_v2  ;;  %v1851_v20 = vpack.c.bf16 %v1363_v18, %v1358_v5  ;;  %v7899_v5 = vld [vmem:[%s14111_s13 + $0x88] sm:$0xff]  ;;  %v7900_v2 = vld [vmem:[%s14111_s13 + $0x90] sm:$0xff] }
 0x494   :  { %v1181_v55 = vpop.permute.xlu0 %1180 }
 0x495   :  { %v9768_v60 = vpop.eup %9767  ;;  %v1373_v61 = vadd.f32 %v11114_v33, %v1181_v55  ;;  %v11390_v17 = vpop.permute.xlu1 %2799  ;;  %8962 = vmatprep.mubr.bf16.mxu1 %v1851_v20  ;;  %v2353_v8 = vmul.f32 %v11303_v7, %v2329_v51 }
 0x496   :  { %v2327_v27 = vmul.f32 %v9768_v60, %v2315_v6 }
 0x497   :  { %v1852_v31 = vpack.c.bf16 %v1373_v61, %v1368_v14  ;;  %v11397_v48 = vadd.f32 %v11316_v16, %v2353_v8  ;;  %v7903_v14 = vld [vmem:[%s14111_s13 + $0xa8] sm:$0xff]  ;;  %v7904_v61 = vld [vmem:[%s14111_s13 + $0xb0] sm:$0xff] }
 0x498   :  { %v11400_v63 = vpop.permute.xlu0 %2794  ;;  %v2351_v33 = vmul.f32 %v14220_v35, %v2327_v27 }
 0x499   :  { %v9770_v13 = vpop.eup %9769  ;;  %v11404_v23 = vpop.permute.xlu1 %2829  ;;  %8963 = vmatmul.mubr.bf16.gmra.mrb[32].mxu1 %v1852_v31  ;;  %v7880_v7 = vmul.f32 -1.442695, %v11397_v48 }
 0x49a   :  { %v9772_v12 = vpop.eup %9771  ;;  %v2330_v47 = vmul.f32 %v9770_v13, %v2318_v36  ;;  %8998 = vmatprep.mubr.msk.f32.mxu1 %vm895_vm2, %v7898_v10  ;;  %v11409_v16 = vadd.f32 %v11292_v30, %v2351_v33  ;;  %v7905_v33 = vld [vmem:[%s14111_s13 + $0xb8] sm:$0xff]  ;;  %v7906_v13 = vld [vmem:[%s14111_s13 + $0xc0] sm:$0xff] }
 0x49b   :  { %v2328_v21 = vmul.f32 %v9772_v12, %v2316_v1  ;;  %9773 = vpow2.f32 %v7880_v7 }
 0x49c   :  { %v11411_v50 = vpop.permute.xlu0 %2804  ;;  %v7878_v58 = vmul.f32 -1.442695, %v11409_v16  ;;  %v2354_v49 = vmul.f32 %v11314_v0, %v2330_v47 }
 0x49d   :  { %v11415_v4 = vpop.permute.xlu1 %2839  ;;  %v2352_v26 = vmul.f32 %v14221_v53, %v2328_v21  ;;  %v7907_v53 = vld [vmem:[%s14111_s13 + $0xc8] sm:$0xff] }
 0x49e   :  { %9775 = vpow2.f32 %v7878_v58  ;;  %v11422_v30 = vadd.f32 %v11352_v45, %v2354_v49  ;;  %v7901_v45 = vld [vmem:[%s14111_s13 + $0x98] sm:$0xff] }
 0x49f   :  { %v11428_v18 = vadd.f32 %v11301_v62, %v2352_v26  ;;  %v7902_v62 = vld [vmem:[%s14111_s13 + $0xa0] sm:$0xff]  ;;  %v7908_v26 = vld [vmem:[%s14111_s13 + $0xd0] sm:$0xff] }
 0x4a0   :  { %v11430_v0 = vpop.permute.xlu0 %2834  ;;  %v7881_v56 = vmul.f32 -1.442695, %v11422_v30 }
 0x4a1   :  { %v11433_v51 = vpop.permute.xlu1 %3096  ;;  %8999 = vmatmul.mubr.msk.f32.vlgmr.msra.gmra.mrb[26].mxu1 %vm895_vm2, %v7899_v5  ;;  %v7879_v20 = vmul.f32 -1.442695, %v11428_v18 }
 0x4a2   :  { %9001 = vmatprep.mubr.msk.f32.mxu1 %vm895_vm2, %v7900_v2  ;;  %9777 = vpow2.f32 %v7881_v56 }
 0x4a3   :  { %9779 = vpow2.f32 %v7879_v20 }
 0x4a4   :  { %v11444_v6 = vpop.permute.xlu0 %2844 }
 0x4a5   :  { %v9774_v55 = vpop.eup %9773  ;;  %v11446_v60 = vpop.permute.xlu1 %3106  ;;  %9002 = vmatmul.mubr.msk.f32.gmra.mrb[36].mxu1 %vm895_vm2, %v7901_v45  ;;  %v7909_v45 = vld [vmem:[%s14111_s13 + $0xd8] sm:$0xff] }
 0x4a6   :  { %9004 = vmatprep.mubr.msk.f32.mxu1 %vm895_vm2, %v7902_v62  ;;  %v2393_v31 = vadd.f32 1.0, %v9774_v55  ;;  %v7910_v62 = vld [vmem:[%s14111_s13 + $0xe0] sm:$0xff] }
 0x4a8   :  { %v9776_v8 = vpop.eup %9775  ;;  %v11456_v27 = vpop.permute.xlu0 %3101 }
 0x4a9   :  { %v1407_v10 = vpop.permute.xlu1 %1406  ;;  %9005 = vmatmul.mubr.msk.f32.gmra.mrb[38].mxu1 %vm895_vm2, %v7903_v14  ;;  %v2391_v36 = vadd.f32 1.0, %v9776_v8 }
 0x4aa   :  { %v1503_v35 = vadd.f32 %v11129_v37, %v1407_v10  ;;  %9007 = vmatprep.mubr.msk.f32.mxu1 %vm895_vm2, %v7904_v61 }
 0x4ab   :  { %9781 = vrcp.f32 %v2391_v36 }
 0x4ac   :  { %v9778_v1 = vpop.eup %9777  ;;  %v2415_v7 = vadd.f32 %v11162_v25, %v1503_v35  ;;  %v11468_v12 = vpop.permute.xlu0 %3111  ;;  %9783 = vrcp.f32 %v2393_v31 }
 0x4ad   :  { %v9780_v47 = vpop.eup %9779  ;;  %v1417_v21 = vpop.permute.xlu1 %1416  ;;  %9008 = vmatmul.mubr.msk.f32.gmra.mrb[40].mxu1 %vm895_vm2, %v7905_v33  ;;  %v2394_v37 = vadd.f32 1.0, %v9778_v1  ;;  %v7913_v1 = vld [vmem:[%s14111_s13 + $0xf8] sm:$0xff] }
 0x4ae   :  { %v11472_v58 = vadd.f32 %v2415_v7, %v11170_v32  ;;  %v1513_v49 = vadd.f32 %v11136_v41, %v1417_v21  ;;  %9010 = vmatprep.mubr.msk.f32.mxu1 %vm895_vm2, %v7906_v13  ;;  %v2392_v25 = vadd.f32 1.0, %v9780_v47  ;;  %v14222_v32 = vld [vmem:[#allocation12_spill] sm:$0xff]  ;;  %v14223_v47 = vld [vmem:[#allocation17_spill] sm:$0xff] }
 0x4af   :  { %9785 = vrcp.f32 %v2394_v37 }
 0x4b0   :  { %v2417_v5 = vadd.f32 %v11160_v38, %v1513_v49  ;;  %v1412_v2 = vpop.permute.xlu0 %1411  ;;  %v2431_v56 = vmul.f32 %v14222_v32, %v11472_v58  ;;  %9787 = vrcp.f32 %v2392_v25  ;;  %v14224_v49 = vld [vmem:[#allocation15_spill] sm:$0xff] }
 0x4b1   :  { %v1508_v41 = vadd.f32 %v11123_v28, %v1412_v2  ;;  %9011 = vmatmul.mubr.msk.f32.gmra.mrb[42].mxu1 %vm895_vm2, %v7907_v53  ;;  %v14225_v53 = vld [vmem:[#allocation14_spill] sm:$0xff] }
 0x4b2   :  { %v11488_v20 = vadd.f32 %v11168_v42, %v2417_v5  ;;  %2435 = vadd.xlane.f32.xlu0 %v2431_v56  ;;  %9013 = vmatprep.mubr.msk.f32.mxu1 %vm895_vm2, %v7908_v26  ;;  %v2443_v36 = vmul.f32 %v2431_v56, %v2431_v56  ;;  %v14226_v26 = vld [vmem:[#allocation16_spill] sm:$0xff] }
 0x4b3   :  { %v2416_v38 = vadd.f32 %v11166_v57, %v1508_v41  ;;  %v7911_v57 = vld [vmem:[%s14111_s13 + $0xe8] sm:$0xff] }
 0x4b4   :  { %v1422_v55 = vpop.permute.xlu0 %1421  ;;  %v2433_v28 = vmul.f32 %v14222_v32, %v11488_v20 }
 0x4b5   :  { %v9782_v14 = vpop.eup %9781  ;;  %v11501_v42 = vadd.f32 %v2416_v38, %v11174_v34  ;;  %v1518_v61 = vadd.f32 %v11134_v43, %v1422_v55  ;;  %9014 = vmatmul.mubr.msk.f32.gmra.mrb[44].mxu1 %vm895_vm2, %v7909_v45  ;;  %v7912_v34 = vld [vmem:[%s14111_s13 + $0xf0] sm:$0xff]  ;;  %v7947_v55 = vld [vmem:[%s14111_s13 + $0x288] sm:$0xff] }
 0x4b6   :  { %v9784_v8 = vpop.eup %9783  ;;  %2439 = vadd.xlane.f32.xlu1 %v2433_v28  ;;  %9016 = vmatprep.mubr.msk.f32.mxu1 %vm895_vm2, %v7910_v62  ;;  %v2403_v43 = vmul.f32 %v9782_v14, %v11409_v16  ;;  %v2445_v37 = vmul.f32 %v2433_v28, %v2433_v28  ;;  %v7948_v28 = vld [vmem:[%s14111_s13 + $0x290] sm:$0xff]  ;;  %v10144_v14 = vld [vmem:[%s14203_s25] sm:$0xff]  }
 0x4b7   :  { %v2418_v31 = vadd.f32 %v11164_v15, %v1518_v61  ;;  %v2432_v10 = vmul.f32 %v14222_v32, %v11501_v42  ;;  %v2405_v13 = vmul.f32 %v9784_v8, %v11397_v48  ;;  %v7949_v61 = vld [vmem:[%s14111_s13 + $0x298] sm:$0xff]  ;;  %v7950_v8 = vld [vmem:[%s14111_s13 + $0x2a0] sm:$0xff] }
 0x4b8   :  { %v2407_v21 = vadd.f32 %v2403_v43, %v14223_v47  ;;  %v7953_v43 = vld [vmem:[%s14111_s13 + $0x2b8] sm:$0xff]  ;;  %v7959_v47 = vld [vmem:[%s14111_s13 + $0x2e8] sm:$0xff] }
 0x4b9   :  { %v9786_v35 = vpop.eup %9785  ;;  %v11517_v33 = vadd.f32 %v11172_v54, %v2418_v31  ;;  %9017 = vmatmul.mubr.msk.f32.gmra.mrb[46].mxu1 %vm895_vm2, %v7911_v57  ;;  %2437 = vadd.xlane.f32.xlu0 %v2432_v10  ;;  %v2409_v5 = vadd.f32 %v2405_v13, %v14226_v26  ;;  %v2444_v2 = vmul.f32 %v2432_v10, %v2432_v10  ;;  %v10145_v57 = vld [vmem:[%s14203_s25 + $0x8] sm:$0xff]   ;;  %v7952_v10 = vld [vmem:[%s14111_s13 + $0x2b0] sm:$0xff]  ;;  %v1539_v26 = vpop.permute.xlu0 %1538 }
 0x4ba   :  { %v9788_v15 = vpop.eup %9787  ;;  %2447 = vadd.xlane.f32.xlu1 %v2443_v36  ;;  %9019 = vmatprep.mubr.msk.f32.mxu1 %vm895_vm2, %v7912_v34  ;;  %v2406_v16 = vmul.f32 %v9786_v35, %v11422_v30  ;;  %v11535_v30 = vmul.f32 %v2407_v21, %v10732_v19  ;;  %v7951_v31 = vld [vmem:[%s14111_s13 + $0x2a8] sm:$0xff]  ;;  %v10146_v34 = vld [vmem:[%s14203_s25 + $0x10] sm:$0xff]   ;;  %v10147_v36 = vld [vmem:[%s14203_s25 + $0x18] sm:$0xff]  }
 0x4bb   :  { %v2434_v7 = vmul.f32 %v14222_v32, %v11517_v33  ;;  %v2404_v54 = vmul.f32 %v9788_v15, %v11428_v18  ;;  %v11546_v45 = vmul.f32 %v2409_v5, %v10732_v19  ;;  %v7954_v35 = vld [vmem:[%s14111_s13 + $0x2c0] sm:$0xff]  ;;  %v7955_v13 = vld [vmem:[%s14111_s13 + $0x2c8] sm:$0xff]  ;;  %v7956_v15 = vld [vmem:[%s14111_s13 + $0x2d0] sm:$0xff] }
 0x4bc   :  { %v2410_v48 = vadd.f32 %v2406_v16, %v14224_v49  ;;  %14227 = vst [vmem:[#allocation26_spill] sm:$0xff] %v11535_v30  ;;  %v7957_v16 = vld [vmem:[%s14111_s13 + $0x2d8] sm:$0xff]  ;;  %v7960_v21 = vld [vmem:[%s14111_s13 + $0x2f0] sm:$0xff] }
 0x4bd   :  { %9020 = vmatmul.mubr.msk.f32.gmra.mrb[48].mxu1 %vm895_vm2, %v7913_v1  ;;  %2441 = vadd.xlane.f32.xlu0 %v2434_v7  ;;  %v2408_v25 = vadd.f32 %v2404_v54, %v14225_v53  ;;  %14230 = vst [vmem:[#allocation11_spill] sm:$0xff] %v11546_v45  ;;  %v2446_v62 = vmul.f32 %v2434_v7, %v2434_v7  ;;  %v10148_v1 = vld [vmem:[%s14203_s25 + $0x20] sm:$0xff]   ;;  %v10149_v54 = vld [vmem:[%s14203_s25 + $0x28] sm:$0xff]   ;;  %v7961_v49 = vld [vmem:[%s14111_s13 + $0x2f8] sm:$0xff] }
 0x4be   :  { %2451 = vadd.xlane.f32.xlu1 %v2445_v37  ;;  %v11541_v18 = vmul.f32 %v2410_v48, %v10732_v19  ;;  %v7958_v7 = vld [vmem:[%s14111_s13 + $0x2e0] sm:$0xff]  ;;  %v10150_v37 = vld [vmem:[%s14203_s25 + $0x30] sm:$0xff]   ;;  %v10151_v48 = vld [vmem:[%s14203_s25 + $0x38] sm:$0xff]  }
 0x4bf   :  { %v11538_v56 = vmul.f32 %v2408_v25, %v10732_v19  ;;  %v10152_v53 = vld [vmem:[%s14204_s23] sm:$0xff]   ;;  %v1534_v25 = vpop.permute.xlu1 %1533 }
 0x4c0   :  { %14229 = vst [vmem:[#allocation27_spill] sm:$0xff] %v11541_v18  ;;  %v9526_v38 = vpack.c.bf16 %v11541_v18, %v11546_v45 }
 0x4c1   :  { %14228 = vst [vmem:[#allocation28_spill] sm:$0xff] %v11538_v56  ;;  %2449 = vadd.xlane.f32.xlu0 %v2444_v2  ;;  %v9522_v41 = vpack.c.bf16 %v11538_v56, %v11535_v30  ;;  %v1549_v2 = vpop.permute.xlu0 %1548 }
 0x4c3   :  { %9523 = vmatprep.subr.bf16.mxu0 %v9522_v41  ;;  %v1544_v5 = vpop.permute.xlu1 %1543 }
 0x4c4   :  { %9525 = vmatpush3.bf16.msra.mxu0 %v9522_v41  ;;  %v1640_v41 = vadd.f32 %v11150_v22, %v1544_v5 }
 0x4c5   :  { %9527 = vmatprep.subr.bf16.mxu0 %v9526_v38  ;;  %2453 = vadd.xlane.f32.xlu0 %v2446_v62 }
 0x4c8   :  { %9529 = vmatpush3.bf16.msra.mxu0 %v9526_v38  ;;  %v1630_v38 = vadd.f32 %v11146_v11, %v1534_v25 }
 0x4c9   :  { %9082 = vmatprep.subr.bf16.mxu0 %v10144_v14 }
 0x4cb   :  { %9031 = vmatmul.mubr.msk.f32.vlgmr.msra.gmra.mrb[30].mxu0 %vm895_vm2, %v7947_v55  ;;  %v1645_v55 = vadd.f32 %v11148_v3, %v1549_v2 }
 0x4cc   :  { %9033 = vmatprep.mubr.msk.f32.mxu0 %vm895_vm2, %v7948_v28  ;;  %9083 = vmatpush3.bf16.msra.mxu0 %v10144_v14 }
 0x4cd   :  { %9084 = vmatprep.subr.bf16.mxu0 %v10145_v57 }
 0x4cf   :  { %9034 = vmatmul.mubr.msk.f32.gmra.mrb[56].mxu0 %vm895_vm2, %v7949_v61  ;;  %v1635_v61 = vadd.f32 %v11141_v46, %v1539_v26 }
 0x4d0   :  { %9036 = vmatprep.mubr.msk.f32.mxu0 %vm895_vm2, %v7950_v8  ;;  %9085 = vmatpush3.bf16.msra.mxu0 %v10145_v57 }
 0x4d1   :  { %9086 = vmatprep.subr.bf16.mxu0 %v10146_v34 }
 0x4d3   :  { %9037 = vmatmul.mubr.msk.f32.gmra.mrb[58].mxu0 %vm895_vm2, %v7951_v31 }
 0x4d4   :  { %9039 = vmatprep.mubr.msk.f32.mxu0 %vm895_vm2, %v7952_v10  ;;  %9087 = vmatpush3.bf16.msra.mxu0 %v10146_v34 }
 0x4d5   :  { %9088 = vmatprep.subr.bf16.mxu0 %v10147_v36 }
 0x4d7   :  { %9040 = vmatmul.mubr.msk.f32.gmra.mrb[60].mxu0 %vm895_vm2, %v7953_v43 }
 0x4d8   :  { %9089 = vmatpush3.bf16.msra.mxu0 %v10147_v36  ;;  %9042 = vmatprep.mubr.msk.f32.mxu0 %vm895_vm2, %v7954_v35  ;;  %v14231_v36 = vld [vmem:[#allocation31_spill] sm:$0xff]  ;;  %v14232_v35 = vld [vmem:[#allocation32_spill] sm:$0xff] }
 0x4d9   :  { %9090 = vmatprep.subr.bf16.mxu0 %v10148_v1 }
 0x4db   :  { %9043 = vmatmul.mubr.msk.f32.gmra.mrb[62].mxu0 %vm895_vm2, %v7955_v13 }
 0x4dc   :  { %9045 = vmatprep.mubr.msk.f32.mxu0 %vm895_vm2, %v7956_v15  ;;  %9091 = vmatpush3.bf16.msra.mxu0 %v10148_v1 }
 0x4dd   :  { %9092 = vmatprep.subr.bf16.mxu0 %v10149_v54 }
 0x4df   :  { %9046 = vmatmul.mubr.msk.f32.gmra.mrb[64].mxu0 %vm895_vm2, %v7957_v16 }
 0x4e0   :  { %9048 = vmatprep.mubr.msk.f32.mxu0 %vm895_vm2, %v7958_v7  ;;  %9093 = vmatpush3.bf16.msra.mxu0 %v10149_v54 }
 0x4e1   :  { %9094 = vmatprep.subr.bf16.mxu0 %v10150_v37 }
 0x4e3   :  { %9049 = vmatmul.mubr.msk.f32.gmra.mrb[66].mxu0 %vm895_vm2, %v7959_v47 }
 0x4e4   :  { %9051 = vmatprep.mubr.msk.f32.mxu0 %vm895_vm2, %v7960_v21  ;;  %9095 = vmatpush3.bf16.msra.mxu0 %v10150_v37 }
 0x4e5   :  { %9096 = vmatprep.subr.bf16.mxu0 %v10151_v48 }
 0x4e7   :  { %9052 = vmatmul.mubr.msk.f32.gmra.mrb[68].mxu0 %vm895_vm2, %v7961_v49 }
 0x4e8   :  { %9097 = vmatpush3.bf16.msra.mxu0 %v10151_v48 }
 0x4e9   :  { %9138 = vmatprep.subr.bf16.mxu0 %v10152_v53 }
 0x56c   :  { %v8964_v62 = vpop.f32.mrb[32].mxu1 }
 0x56d   :  { %v2577_v28 = vadd.f32 %v8964_v62, %v1640_v41  ;;  %v1951_v14 = vpop.f32.mrb[33].mxu1 }
 0x56e   :  { %v2575_v8 = vadd.f32 %v1951_v14, %v1630_v38  ;;  %v8965_v57 = vpop.f32.mrb[34].mxu1  ;;  %v10153_v14 = vld [vmem:[%s14204_s23 + $0x8] sm:$0xff]  }
 0x56f   :  { %v11642_v31 = vadd.f32 %v11176_v29, %v2577_v28  ;;  %v2578_v10 = vadd.f32 %v8965_v57, %v1645_v55  ;;  %v1954_v34 = vpop.f32.mrb[35].mxu1 }
 0x570   :  { %v11645_v43 = vadd.f32 %v2575_v8, %v11178_v24  ;;  %v2576_v22 = vadd.f32 %v1954_v34, %v1635_v61  ;;  %v10154_v61 = vld [vmem:[%s14204_s23 + $0x10] sm:$0xff]  }
 0x571   :  { %v11648_v11 = vadd.f32 %v14231_v36, %v2578_v10  ;;  %v2595_v24 = vmul.f32 %v14222_v32, %v11642_v31  ;;  %v2423_v10 = vld [vmem:[%s14117_s19] sm:$0xff]  ;;  %v10155_v36 = vld [vmem:[%s14204_s23 + $0x18] sm:$0xff]  }
 0x572   :  { %v11651_v3 = vadd.f32 %v2576_v22, %v14232_v35  ;;  %v2593_v46 = vmul.f32 %v14222_v32, %v11645_v43 }
 0x573   :  { %v2596_v16 = vmul.f32 %v14222_v32, %v11648_v11  ;;  %v2607_v25 = vmul.f32 %v2595_v24, %v2595_v24 }
 0x574   :  { %2597 = vadd.xlane.f32.xlu1 %v2593_v46  ;;  %v11655_v13 = vpop.f32.mrb[26].mxu1  ;;  %v2594_v29 = vmul.f32 %v14222_v32, %v11651_v3  ;;  %v2605_v54 = vmul.f32 %v2593_v46, %v2593_v46 }
 0x575   :  { %v11659_v15 = vpop.f32.mrb[27].mxu1  ;;  %v2608_v2 = vmul.f32 %v2596_v16, %v2596_v16 }
 0x576   :  { %2599 = vadd.xlane.f32.xlu0 %v2594_v29  ;;  %v2606_v21 = vmul.f32 %v2594_v29, %v2594_v29 }
 0x578   :  { %2601 = vadd.xlane.f32.xlu1 %v2595_v24  ;;  %v11663_v1 = vpop.f32.mrb[36].mxu1  ;;  %v10156_v24 = vld [vmem:[%s14204_s23 + $0x20] sm:$0xff]  }
 0x579   :  { %v11667_v7 = vpop.f32.mrb[37].mxu1 }
 0x57a   :  { %2603 = vadd.xlane.f32.xlu0 %v2596_v16  ;;  %v10157_v16 = vld [vmem:[%s14204_s23 + $0x28] sm:$0xff]  }
 0x57c   :  { %2609 = vadd.xlane.f32.xlu1 %v2605_v54  ;;  %v9006_v47 = vpop.f32.mrb[38].mxu1  ;;  %v2427_v54 = vld [vmem:[%s14118_s20] sm:$0xff] }
 0x57d   :  { %v2987_v37 = vadd.f32 %v9006_v47, %v11400_v63  ;;  %v2981_v49 = vpop.f32.mrb[39].mxu1  ;;  %v2428_v47 = vld [vmem:[%s14118_s20 + $0x8] sm:$0xff] }
 0x57e   :  { %v2982_v48 = vadd.f32 %v2981_v49, %v11385_v59  ;;  %2611 = vadd.xlane.f32.xlu0 %v2606_v21  ;;  %v10158_v21 = vld [vmem:[%s14204_s23 + $0x30] sm:$0xff]   ;;  %v2430_v49 = vld [vmem:[%s14118_s20 + $0x18] sm:$0xff] }
 0x580   :  { %v3649_v26 = vpack.c.bf16 %v2987_v37, %v2982_v48  ;;  %2613 = vadd.xlane.f32.xlu1 %v2607_v25  ;;  %v9009_v5 = vpop.f32.mrb[40].mxu1  ;;  %v2429_v37 = vld [vmem:[%s14118_s20 + $0x10] sm:$0xff] }
 0x581   :  { %v2997_v41 = vadd.f32 %v9009_v5, %v11411_v50  ;;  %v2991_v38 = vpop.f32.mrb[41].mxu1  ;;  %v7886_v5 = vld [vmem:[%s14117_s19 + $0x80] sm:$0xff] }
 0x582   :  { %v2992_v62 = vadd.f32 %v2991_v38, %v11390_v17  ;;  %9098 = vmatprep.mubr.bf16.mxu0 %v3649_v26  ;;  %2615 = vadd.xlane.f32.xlu0 %v2608_v2  ;;  %v10159_v26 = vld [vmem:[%s14204_s23 + $0x38] sm:$0xff]  }
 0x584   :  { %v3650_v55 = vpack.c.bf16 %v2997_v41, %v2992_v62  ;;  %v11673_v28 = vpop.f32.mrb[42].mxu1  ;;  %v7887_v41 = vld [vmem:[%s14117_s19 + $0x88] sm:$0xff]  ;;  %v7888_v62 = vld [vmem:[%s14117_s19 + $0x90] sm:$0xff] }
 0x585   :  { %v11675_v63 = vpop.f32.mrb[43].mxu1 }
 0x586   :  { %9099 = vmatmul.mubr.bf16.vlgmr.msra.gmra.mrb[72].mxu0 %v3650_v55 }
 0x587   :  { %9139 = vmatpush3.bf16.msra.mxu0 %v10152_v53 }
 0x588   :  { %v11677_v59 = vpop.f32.mrb[44].mxu1  ;;  %9140 = vmatprep.subr.bf16.mxu0 %v10153_v14 }
 0x589   :  { %v11682_v50 = vpop.f32.mrb[45].mxu1 }
 0x58b   :  { %9141 = vmatpush3.bf16.msra.mxu0 %v10153_v14  ;;  %v7889_v14 = vld [vmem:[%s14117_s19 + $0x98] sm:$0xff] }
 0x58c   :  { %v9018_v17 = vpop.f32.mrb[46].mxu1  ;;  %9142 = vmatprep.subr.bf16.mxu0 %v10154_v61 }
 0x58d   :  { %v3027_v8 = vadd.f32 %v9018_v17, %v11430_v0  ;;  %v3021_v57 = vpop.f32.mrb[47].mxu1 }
 0x58e   :  { %v3022_v53 = vadd.f32 %v3021_v57, %v11404_v23  ;;  %v2425_v23 = vld [vmem:[%s14117_s19 + $0x10] sm:$0xff]  ;;  %v7890_v57 = vld [vmem:[%s14118_s20 + $0x80] sm:$0xff] }
 0x58f   :  { %9143 = vmatpush3.bf16.msra.mxu0 %v10154_v61 }
 0x590   :  { %v3651_v34 = vpack.c.bf16 %v3027_v8, %v3022_v53  ;;  %v9021_v22 = vpop.f32.mrb[48].mxu1  ;;  %9144 = vmatprep.subr.bf16.mxu0 %v10155_v36 }
 0x591   :  { %v3037_v35 = vadd.f32 %v9021_v22, %v11444_v6  ;;  %2493 = vperm.xlu1 %9618, %v2423_v10   ;;  %v3031_v46 = vpop.f32.mrb[49].mxu1  ;;  %v2424_v6 = vld [vmem:[%s14117_s19 + $0x8] sm:$0xff] }
 0x592   :  { %v3032_v0 = vadd.f32 %v3031_v46, %v11415_v4  ;;  %9102 = vmatprep.mubr.bf16.mxu0 %v3651_v34  ;;  %v2426_v4 = vld [vmem:[%s14117_s19 + $0x18] sm:$0xff]  ;;  %v7891_v34 = vld [vmem:[%s14118_s20 + $0x88] sm:$0xff] }
 0x593   :  { %9145 = vmatpush3.bf16.msra.mxu0 %v10155_v36  ;;  %v7893_v46 = vld [vmem:[%s14118_s20 + $0x98] sm:$0xff] }
 0x594   :  { %v3652_v29 = vpack.c.bf16 %v3037_v35, %v3032_v0  ;;  %9146 = vmatprep.subr.bf16.mxu0 %v10156_v24  ;;  %v7976_v0 = vld [vmem:[%s14112_s14 + $0x2f0] sm:$0xff] }
 0x595   :  { %2503 = vperm.xlu1 %9618, %v2425_v23   ;;  %v7977_v23 = vld [vmem:[%s14112_s14 + $0x2f8] sm:$0xff] }
 0x596   :  { %9103 = vmatmul.mubr.bf16.gmra.mrb[76].mxu0 %v3652_v29  ;;  %v7914_v29 = vld [vmem:[%s14112_s14 + $0x80] sm:$0xff] }
 0x597   :  { %9147 = vmatpush3.bf16.msra.mxu0 %v10156_v24  ;;  %v7915_v24 = vld [vmem:[%s14112_s14 + $0x88] sm:$0xff] }
 0x598   :  { %2498 = vperm.xlu0 %9617, %v2424_v6   ;;  %9148 = vmatprep.subr.bf16.mxu0 %v10157_v16 }
 0x599   :  { %2508 = vperm.xlu1 %9618, %v2426_v4  }
 0x59b   :  { %9149 = vmatpush3.bf16.msra.mxu0 %v10157_v16  ;;  %v7916_v16 = vld [vmem:[%s14112_s14 + $0x90] sm:$0xff] }
 0x59c   :  { %2517 = vperm.xlu0 %9617, %v2427_v54   ;;  %9150 = vmatprep.subr.bf16.mxu0 %v10158_v21 }
 0x59d   :  { %2522 = vperm.xlu1 %9618, %v2428_v47   ;;  %v7917_v47 = vld [vmem:[%s14112_s14 + $0x98] sm:$0xff] }
 0x59e   :  { %v11727_v48 = vpop.f32.mrb[30].mxu0 }
 0x59f   :  { %v11729_v25 = vpop.f32.mrb[31].mxu0  ;;  %9151 = vmatpush3.bf16.msra.mxu0 %v10158_v21 }
 0x5a0   :  { %2527 = vperm.xlu0 %9617, %v2429_v37   ;;  %9152 = vmatprep.subr.bf16.mxu0 %v10159_v26 }
 0x5a1   :  { %2532 = vperm.xlu1 %9618, %v2430_v49  }
 0x5a2   :  { %v11737_v2 = vpop.f32.mrb[56].mxu0 }
 0x5a3   :  { %v11742_v38 = vpop.f32.mrb[57].mxu0  ;;  %9153 = vmatpush3.bf16.msra.mxu0 %v10159_v26  ;;  %v7962_v26 = vld [vmem:[%s14112_s14 + $0x280] sm:$0xff] }
 0x5a4   :  { %2651 = vperm.xlu0 %9617, %v7886_v5   ;;  %v7963_v5 = vld [vmem:[%s14112_s14 + $0x288] sm:$0xff] }
 0x5a5   :  { %2656 = vperm.xlu1 %9618, %v7887_v41  }
 0x5a6   :  { %v9038_v55 = vpop.f32.mrb[58].mxu0 }
 0x5a7   :  { %v3294_v17 = vadd.f32 %v9038_v55, %v11456_v27  ;;  %v3288_v61 = vpop.f32.mrb[59].mxu0  ;;  %v7964_v55 = vld [vmem:[%s14112_s14 + $0x290] sm:$0xff] }
 0x5a8   :  { %v3289_v8 = vadd.f32 %v3288_v61, %v11433_v51  ;;  %2661 = vperm.xlu0 %9617, %v7888_v62   ;;  %v7892_v51 = vld [vmem:[%s14118_s20 + $0x90] sm:$0xff]  ;;  %v8026_v61 = vld [vmem:[%s14115_s17 + $0x20] sm:$0xff] }
 0x5a9   :  { %2666 = vperm.xlu1 %9618, %v7889_v14   ;;  %v7965_v14 = vld [vmem:[%s14112_s14 + $0x298] sm:$0xff] }
 0x5aa   :  { %v3653_v53 = vpack.c.bf16 %v3294_v17, %v3289_v8  ;;  %v9041_v10 = vpop.f32.mrb[60].mxu0  ;;  %v8027_v17 = vld [vmem:[%s14115_s17 + $0x28] sm:$0xff] }
 0x5ab   :  { %v3304_v22 = vadd.f32 %v9041_v10, %v11468_v12  ;;  %v3298_v36 = vpop.f32.mrb[61].mxu0  ;;  %v7974_v12 = vld [vmem:[%s14112_s14 + $0x2e0] sm:$0xff]  ;;  %v8031_v8 = vld [vmem:[%s14116_s18 + $0x28] sm:$0xff]  ;;  %v8028_v10 = vld [vmem:[%s14115_s17 + $0x30] sm:$0xff] }
 0x5ac   :  { %v3299_v27 = vadd.f32 %v3298_v36, %v11446_v60  ;;  %9106 = vmatprep.mubr.bf16.mxu0 %v3653_v53  ;;  %2675 = vperm.xlu0 %9617, %v7890_v57   ;;  %v7975_v60 = vld [vmem:[%s14112_s14 + $0x2e8] sm:$0xff]  ;;  %v8030_v57 = vld [vmem:[%s14116_s18 + $0x20] sm:$0xff]  ;;  %v8029_v53 = vld [vmem:[%s14115_s17 + $0x38] sm:$0xff] }
 0x5ad   :  { %2680 = vperm.xlu1 %9618, %v7891_v34   ;;  %v8038_v34 = vld [vmem:[%s14115_s17 + $0xa0] sm:$0xff] }
 0x5ae   :  { %v3654_v35 = vpack.c.bf16 %v3304_v22, %v3299_v27  ;;  %v11784_v6 = vpop.f32.mrb[62].mxu0  ;;  %v8032_v22 = vld [vmem:[%s14116_s18 + $0x30] sm:$0xff]  ;;  %v7994_v36 = vld [vmem:[%s14113_s15 + $0x20] sm:$0xff] }
 0x5af   :  { %v11786_v4 = vpop.f32.mrb[63].mxu0  ;;  %9062 = vmatprep.mubr.msk.f32.mxu1 %vm895_vm2, %v7994_v36  ;;  %v7922_v27 = vld [vmem:[%s14112_s14 + $0xc0] sm:$0xff] }
 0x5b0   :  { %9107 = vmatmul.mubr.bf16.gmra.mrb[80].mxu0 %v3654_v35  ;;  %2685 = vperm.xlu0 %9617, %v7892_v51   ;;  %14233 = vst [vmem:[#allocation10_spill] sm:$0xff] %v11786_v4  ;;  %v8033_v51 = vld [vmem:[%s14116_s18 + $0x38] sm:$0xff]  ;;  %v7924_v35 = vld [vmem:[%s14112_s14 + $0xd0] sm:$0xff] }
 0x5b1   :  { %2690 = vperm.xlu1 %9618, %v7893_v46   ;;  %v8039_v46 = vld [vmem:[%s14115_s17 + $0xa8] sm:$0xff] }
 0x5b2   :  { %v11791_v54 = vpop.f32.mrb[64].mxu0 }
 0x5b3   :  { %14234 = vst [vmem:[#allocation9_spill] sm:$0xff] %v11791_v54  ;;  %v11796_v21 = vpop.f32.mrb[65].mxu0 }
 0x5b4   :  { %3136 = vperm.xlu0 %9617, %v7974_v12   ;;  %14235 = vst [vmem:[#allocation13_spill] sm:$0xff] %v11796_v21  ;;  %v8042_v12 = vld [vmem:[%s14116_s18 + $0xa0] sm:$0xff] }
 0x5b5   :  { %3141 = vperm.xlu1 %9618, %v7975_v60   ;;  %v7923_v60 = vld [vmem:[%s14112_s14 + $0xc8] sm:$0xff] }
 0x5b6   :  { %v11798_v37 = vpop.f32.mrb[66].mxu0 }
 0x5b7   :  { %v11800_v49 = vpop.f32.mrb[67].mxu0 }
 0x5b8   :  { %3146 = vperm.xlu0 %9617, %v7976_v0   ;;  %v7925_v0 = vld [vmem:[%s14112_s14 + $0xd8] sm:$0xff] }
 0x5b9   :  { %3151 = vperm.xlu1 %9618, %v7977_v23   ;;  %v132_v23 = vpop.xlane.xlu1 %131 }
 0x5ba   :  { %v11808_v41 = vpop.f32.mrb[68].mxu0  ;;  %9789 = vrcp.f32 %v132_v23 }
 0x5bb   :  { %v11810_v62 = vpop.f32.mrb[69].mxu0 }
 0x5bc   :  { %2769 = vperm.xlu0 %9617, %v7914_v29   ;;  %v2436_v29 = vpop.xlane.xlu0 %2435 }
 0x5bd   :  { %2774 = vperm.xlu1 %9618, %v7915_v24   ;;  %v8043_v24 = vld [vmem:[%s14116_s18 + $0xa8] sm:$0xff] }
 0x5c0   :  { %2779 = vperm.xlu0 %9617, %v7916_v16   ;;  %v2438_v16 = vpop.xlane.xlu0 %2437 }
 0x5c1   :  { %2784 = vperm.xlu1 %9618, %v7917_v47   ;;  %v2440_v47 = vpop.xlane.xlu1 %2439 }
 0x5c4   :  { %3076 = vperm.xlu0 %9617, %v7962_v26   ;;  %v2442_v26 = vpop.xlane.xlu0 %2441 }
 0x5c5   :  { %3081 = vperm.xlu1 %9618, %v7963_v5   ;;  %v9790_v5 = vpop.eup %9789 }
 0x5c8   :  { %3086 = vperm.xlu0 %9617, %v7964_v55   ;;  %v2448_v55 = vpop.xlane.xlu1 %2447 }
 0x5c9   :  { %3091 = vperm.xlu1 %9618, %v7965_v14   ;;  %v14236_v14 = vld [vmem:[#allocation8_spill] sm:$0xff] }
 0x5cc   :  { %3985 = vperm.xlu0 %9617, %v8027_v17   ;;  %v11871_v17 = vrot.slane %v9790_v5, %v14236_v14 }
 0x5cd   :  { %3980 = vperm.xlu1 %9618, %v8026_v61   ;;  %v2450_v61 = vpop.xlane.xlu0 %2449 }
 0x5ce   :  { %14237 = vst [vmem:[#allocation29_spill] sm:$0xff] %v11871_v17  ;;  %v11879_v36 = vmul.f32 %v11871_v17, %v2440_v47 }
 0x5d0   :  { %4009 = vperm.xlu0 %9617, %v8031_v8   ;;  %v2459_v8 = vmul.f32 %v11871_v17, %v2436_v29  ;;  %v2469_v23 = vmul.f32 %v11879_v36, %v11879_v36 }
 0x5d1   :  { %4004 = vperm.xlu1 %9618, %v8030_v57   ;;  %v2452_v57 = vpop.xlane.xlu1 %2451 }
 0x5d4   :  { %3995 = vperm.xlu0 %9617, %v8029_v53   ;;  %v11875_v53 = vmul.f32 %v11871_v17, %v2438_v16 }
 0x5d5   :  { %3990 = vperm.xlu1 %9618, %v8028_v10   ;;  %v2463_v10 = vmul.f32 %v11871_v17, %v2448_v55 }
 0x5d8   :  { %4134 = vperm.xlu0 %9617, %v8038_v34   ;;  %v2454_v34 = vpop.xlane.xlu0 %2453 }
 0x5d9   :  { %4014 = vperm.xlu1 %9618, %v8032_v22   ;;  %v2467_v22 = vmul.f32 %v2459_v8, %v2459_v8 }
 0x5dc   :  { %2809 = vperm.xlu0 %9617, %v7922_v27   ;;  %v2464_v27 = vmul.f32 %v11871_v17, %v2450_v61 }
 0x5dd   :  { %4019 = vperm.xlu1 %9618, %v8033_v51  }
 0x5e0   :  { %2819 = vperm.xlu0 %9617, %v7924_v35   ;;  %v2468_v35 = vmul.f32 %v11875_v53, %v11875_v53 }
 0x5e1   :  { %4139 = vperm.xlu1 %9618, %v8039_v46   ;;  %v2471_v46 = vsub.f32 %v2463_v10, %v2467_v22 }
 0x5e2   :  { %v2472_v29 = vsub.f32 %v2464_v27, %v2468_v35 }
 0x5e3   :  { %v2479_v47 = vadd.f32 1e-05, %v2471_v46 }
 0x5e4   :  { %4158 = vperm.xlu0 %9617, %v8042_v12   ;;  %v11885_v12 = vmul.f32 %v11871_v17, %v2442_v26  ;;  %v2480_v61 = vadd.f32 1e-05, %v2472_v29 }
 0x5e5   :  { %2814 = vperm.xlu1 %9618, %v7923_v60   ;;  %v2465_v60 = vmul.f32 %v11871_v17, %v2452_v57  ;;  %9791 = vrsqrt.f32 %v2479_v47 }
 0x5e6   :  { %v2470_v5 = vmul.f32 %v11885_v12, %v11885_v12  ;;  %9793 = vrsqrt.f32 %v2480_v61 }
 0x5e7   :  { %v2473_v55 = vsub.f32 %v2465_v60, %v2469_v23 }
 0x5e9   :  { %2824 = vperm.xlu1 %9618, %v7925_v0   ;;  %v2481_v22 = vadd.f32 1e-05, %v2473_v55 }
 0x5eb   :  { %9795 = vrsqrt.f32 %v2481_v22 }
 0x5ed   :  { %4163 = vperm.xlu1 %9618, %v8043_v24   ;;  %v2466_v24 = vmul.f32 %v11871_v17, %v2454_v34 }
 0x5ef   :  { %v2474_v10 = vsub.f32 %v2466_v24, %v2470_v5 }
 0x5f1   :  { %v2482_v56 = vadd.f32 1e-05, %v2474_v10 }
 0x5f3   :  { %9797 = vrsqrt.f32 %v2482_v56  ;;  %v9792_v56 = vpop.eup %9791 }
 0x5f4   :  { %v9794_v22 = vpop.eup %9793 }
 0x601   :  { %v2598_v51 = vpop.xlane.xlu1 %2597 }
 0x602   :  { %v11894_v45 = vmul.f32 %v2598_v51, %v11871_v17 }
 0x603   :  { %v2600_v0 = vpop.xlane.xlu0 %2599 }
 0x604   :  { %v11897_v34 = vmul.f32 %v2600_v0, %v11871_v17  ;;  %v2625_v46 = vmul.f32 %v11894_v45, %v11894_v45 }
 0x605   :  { %v2602_v16 = vpop.xlane.xlu1 %2601 }
 0x606   :  { %v11903_v60 = vmul.f32 %v2602_v16, %v11871_v17  ;;  %v2626_v51 = vmul.f32 %v11897_v34, %v11897_v34 }
 0x607   :  { %v2604_v14 = vpop.xlane.xlu0 %2603 }
 0x608   :  { %v11909_v47 = vmul.f32 %v2604_v14, %v11871_v17  ;;  %v2627_v55 = vmul.f32 %v11903_v60, %v11903_v60 }
 0x609   :  { %v2610_v26 = vpop.xlane.xlu1 %2609 }
 0x60a   :  { %v2621_v35 = vmul.f32 %v2610_v26, %v11871_v17  ;;  %v2475_v26 = vsub.f32 %v11472_v58, %v2459_v8 }
 0x60b   :  { %v2612_v57 = vpop.xlane.xlu0 %2611 }
 0x60c   :  { %v2622_v23 = vmul.f32 %v2612_v57, %v11871_v17  ;;  %v2629_v0 = vsub.f32 %v2621_v35, %v2625_v46  ;;  %v2628_v57 = vmul.f32 %v11909_v47, %v11909_v47  ;;  %v2487_v35 = vmul.f32 %v9792_v56, %v2475_v26  ;;  %v9796_v46 = vpop.eup %9795 }
 0x60d   :  { %v2614_v27 = vpop.xlane.xlu1 %2613  ;;  %v9798_v8 = vpop.eup %9797 }
 0x60e   :  { %v2623_v5 = vmul.f32 %v2614_v27, %v11871_v17  ;;  %v2630_v61 = vsub.f32 %v2622_v23, %v2626_v51  ;;  %v2637_v18 = vadd.f32 1e-05, %v2629_v0  ;;  %v2476_v27 = vsub.f32 %v11501_v42, %v11875_v53 }
 0x60f   :  { %v2616_v24 = vpop.xlane.xlu0 %2615  ;;  %v2478_v0 = vsub.f32 %v11517_v33, %v11885_v12 }
 0x610   :  { %v2624_v16 = vmul.f32 %v2616_v24, %v11871_v17  ;;  %v2631_v14 = vsub.f32 %v2623_v5, %v2627_v55  ;;  %v2638_v21 = vadd.f32 1e-05, %v2630_v61  ;;  %v2477_v24 = vsub.f32 %v11488_v20, %v11879_v36 }
 0x611   :  { %v2494_v29 = vpop.permute.xlu1 %2493  ;;  %v2488_v58 = vmul.f32 %v9794_v22, %v2476_v27  ;;  %9799 = vrsqrt.f32 %v2637_v18  ;;  %v2633_v22 = vsub.f32 %v11645_v43, %v11894_v45  ;;  %v2634_v27 = vsub.f32 %v11651_v3, %v11897_v34 }
 0x612   :  { %v2632_v54 = vsub.f32 %v2624_v16, %v2628_v57  ;;  %v2511_v51 = vmul.f32 %v2494_v29, %v2487_v35  ;;  %v2639_v17 = vadd.f32 1e-05, %v2631_v14  ;;  %v2489_v5 = vmul.f32 %v9796_v46, %v2477_v24 }
 0x613   :  { %9801 = vrsqrt.f32 %v2638_v21  ;;  %v2490_v16 = vmul.f32 %v9798_v8, %v2478_v0  ;;  %v2636_v45 = vsub.f32 %v11648_v11, %v11909_v47 }
 0x614   :  { %v2640_v53 = vadd.f32 1e-05, %v2632_v54  ;;  %9803 = vrsqrt.f32 %v2639_v17 }
 0x615   :  { %v2504_v10 = vpop.permute.xlu1 %2503 }
 0x616   :  { %v2513_v61 = vmul.f32 %v2504_v10, %v2489_v5 }
 0x617   :  { %v2499_v30 = vpop.permute.xlu0 %2498 }
 0x618   :  { %v2512_v55 = vmul.f32 %v2499_v30, %v2488_v58 }
 0x619   :  { %v2509_v23 = vpop.permute.xlu1 %2508 }
 0x61a   :  { %v2514_v29 = vmul.f32 %v2509_v23, %v2490_v16 }
 0x61b   :  { %v2518_v4 = vpop.permute.xlu0 %2517  ;;  %v9800_v10 = vpop.eup %9799 }
 0x61c   :  { %v11924_v42 = vadd.f32 %v2518_v4, %v2511_v51  ;;  %v2645_v35 = vmul.f32 %v9800_v10, %v2633_v22  ;;  %v2635_v51 = vsub.f32 %v11642_v31, %v11903_v60 }
 0x61d   :  { %v2523_v56 = vpop.permute.xlu1 %2522  ;;  %v9802_v57 = vpop.eup %9801 }
 0x61e   :  { %v7882_v20 = vmul.f32 -1.442695, %v11924_v42  ;;  %v11927_v36 = vadd.f32 %v2523_v56, %v2512_v55  ;;  %v9804_v46 = vpop.eup %9803  ;;  %v2646_v8 = vmul.f32 %v9802_v57, %v2634_v27 }
 0x61f   :  { %v2528_v18 = vpop.permute.xlu0 %2527  ;;  %v2647_v56 = vmul.f32 %v9804_v46, %v2635_v51 }
 0x620   :  { %9805 = vpow2.f32 %v7882_v20  ;;  %v7883_v26 = vmul.f32 -1.442695, %v11927_v36  ;;  %v11930_v33 = vadd.f32 %v2528_v18, %v2513_v61 }
 0x621   :  { %9807 = vrsqrt.f32 %v2640_v53  ;;  %v2533_v30 = vpop.permute.xlu1 %2532 }
 0x622   :  { %9809 = vpow2.f32 %v7883_v26  ;;  %v7884_v4 = vmul.f32 -1.442695, %v11930_v33  ;;  %v11933_v54 = vadd.f32 %v2533_v30, %v2514_v29 }
 0x623   :  { %v2652_v21 = vpop.permute.xlu0 %2651 }
 0x624   :  { %9811 = vpow2.f32 %v7884_v4  ;;  %v7885_v12 = vmul.f32 -1.442695, %v11933_v54  ;;  %v2669_v58 = vmul.f32 %v2652_v21, %v2645_v35 }
 0x625   :  { %v2657_v17 = vpop.permute.xlu1 %2656 }
 0x626   :  { %9813 = vpow2.f32 %v7885_v12  ;;  %v2670_v43 = vmul.f32 %v2657_v17, %v2646_v8 }
 0x627   :  { %v2662_v14 = vpop.permute.xlu0 %2661 }
 0x628   :  { %v2671_v20 = vmul.f32 %v2662_v14, %v2647_v56 }
 0x629   :  { %v2667_v23 = vpop.permute.xlu1 %2666 }
 0x62a   :  { %v9806_v24 = vpop.eup %9805 }
 0x62b   :  { %v9808_v0 = vpop.eup %9807  ;;  %v2551_v5 = vadd.f32 1.0, %v9806_v24  ;;  %v2676_v55 = vpop.permute.xlu0 %2675 }
 0x62c   :  { %v9810_v53 = vpop.eup %9809  ;;  %v11944_v61 = vadd.f32 %v2676_v55, %v2669_v58  ;;  %v2648_v18 = vmul.f32 %v9808_v0, %v2636_v45 }
 0x62d   :  { %9815 = vrcp.f32 %v2551_v5  ;;  %v2552_v3 = vadd.f32 1.0, %v9810_v53  ;;  %v2681_v34 = vpop.permute.xlu1 %2680  ;;  %v14238_v5 = vld [vmem:[#allocation23_spill] sm:$0xff] }
 0x62e   :  { %v9812_v16 = vpop.eup %9811  ;;  %v7894_v31 = vmul.f32 -1.442695, %v11944_v61  ;;  %v11947_v60 = vadd.f32 %v2681_v34, %v2670_v43  ;;  %v2672_v4 = vmul.f32 %v2667_v23, %v2648_v18  ;;  %v14240_v34 = vld [vmem:[#allocation22_spill] sm:$0xff] }
 0x62f   :  { %9817 = vrcp.f32 %v2552_v3  ;;  %v2553_v29 = vadd.f32 1.0, %v9812_v16  ;;  %v2686_v26 = vpop.permute.xlu0 %2685 }
 0x630   :  { %v9814_v30 = vpop.eup %9813  ;;  %9819 = vpow2.f32 %v7894_v31  ;;  %v7895_v11 = vmul.f32 -1.442695, %v11947_v60  ;;  %v11950_v47 = vadd.f32 %v2686_v26, %v2671_v20 }
 0x631   :  { %9821 = vrcp.f32 %v2553_v29  ;;  %v2554_v21 = vadd.f32 1.0, %v9814_v30  ;;  %v2691_v12 = vpop.permute.xlu1 %2690  ;;  %v14242_v30 = vld [vmem:[#allocation25_spill] sm:$0xff] }
 0x632   :  { %9823 = vpow2.f32 %v7895_v11  ;;  %v7896_v10 = vmul.f32 -1.442695, %v11950_v47  ;;  %v11953_v17 = vadd.f32 %v2691_v12, %v2672_v4 }
 0x633   :  { %9825 = vrcp.f32 %v2554_v21  ;;  %v3137_v22 = vpop.permute.xlu0 %3136 }
 0x634   :  { %9827 = vpow2.f32 %v7896_v10  ;;  %v7897_v57 = vmul.f32 -1.442695, %v11953_v17  ;;  %v3329_v27 = vadd.f32 %v11800_v49, %v3137_v22 }
 0x635   :  { %v3142_v14 = vpop.permute.xlu1 %3141 }
 0x636   :  { %9829 = vpow2.f32 %v7897_v57  ;;  %v3334_v35 = vadd.f32 %v11798_v37, %v3142_v14  ;;  %v14244_v57 = vld [vmem:[#allocation24_spill] sm:$0xff] }
 0x637   :  { %v9816_v46 = vpop.eup %9815  ;;  %v3147_v23 = vpop.permute.xlu0 %3146 }
 0x638   :  { %v2563_v24 = vmul.f32 %v9816_v46, %v11924_v42  ;;  %v3655_v51 = vpack.c.bf16 %v3334_v35, %v3329_v27  ;;  %v3339_v45 = vadd.f32 %v11810_v62, %v3147_v23 }
 0x639   :  { %v9818_v58 = vpop.eup %9817  ;;  %v3152_v8 = vpop.permute.xlu1 %3151 }
 0x63a   :  { %v9820_v0 = vpop.eup %9819  ;;  %v2567_v55 = vadd.f32 %v2563_v24, %v14238_v5  ;;  %v2564_v53 = vmul.f32 %v9818_v58, %v11927_v36  ;;  %v3344_v43 = vadd.f32 %v11808_v41, %v3152_v8  ;;  %9110 = vmatprep.mubr.bf16.mxu0 %v3655_v51 }
 0x63b   :  { %v9822_v49 = vpop.eup %9821  ;;  %v2709_v56 = vadd.f32 1.0, %v9820_v0  ;;  %v11963_v37 = vpop.permute.xlu0 %2769 }
 0x63c   :  { %v9824_v3 = vpop.eup %9823  ;;  %v11966_v42 = vmul.f32 %v14222_v32, %v2567_v55  ;;  %v2568_v16 = vadd.f32 %v2564_v53, %v14240_v34  ;;  %v2565_v20 = vmul.f32 %v9822_v49, %v11930_v33  ;;  %v3656_v18 = vpack.c.bf16 %v3344_v43, %v3339_v45  ;;  %v7995_v53 = vld [vmem:[%s14113_s15 + $0x28] sm:$0xff]  ;;  %v7996_v49 = vld [vmem:[%s14113_s15 + $0x30] sm:$0xff] }
 0x63d   :  { %v9826_v31 = vpop.eup %9825  ;;  %9831 = vrcp.f32 %v2709_v56  ;;  %v2710_v36 = vadd.f32 1.0, %v9824_v3  ;;  %v11970_v62 = vpop.permute.xlu1 %2774 }
 0x63e   :  { %14239 = vst [vmem:[#allocation30_spill] sm:$0xff] %v11966_v42  ;;  %v9828_v41 = vpop.eup %9827  ;;  %v8018_v29 = vmul.f32 -1.442695, %v11966_v42  ;;  %v11974_v26 = vmul.f32 %v14222_v32, %v2568_v16  ;;  %v2569_v4 = vadd.f32 %v2565_v20, %v14242_v30  ;;  %v2566_v11 = vmul.f32 %v9826_v31, %v11933_v54  ;;  %9111 = vmatmul.mubr.bf16.gmra.mrb[84].mxu0 %v3656_v18  ;;  %v14246_v16 = vld [vmem:[#allocation19_spill] sm:$0xff]  ;;  %v14247_v31 = vld [vmem:[#allocation18_spill] sm:$0xff] }
 0x63f   :  { %9833 = vrcp.f32 %v2710_v36  ;;  %v2711_v21 = vadd.f32 1.0, %v9828_v41  ;;  %v11978_v33 = vpop.permute.xlu0 %2779 }
 0x640   :  { %14241 = vst [vmem:[#allocation12_spill] sm:$0xff] %v11974_v26  ;;  %v9830_v12 = vpop.eup %9829  ;;  %9835 = vpow2.f32 %v8018_v29  ;;  %v8019_v10 = vmul.f32 -1.442695, %v11974_v26  ;;  %v11982_v22 = vmul.f32 %v14222_v32, %v2569_v4  ;;  %v2570_v14 = vadd.f32 %v2566_v11, %v14244_v57  ;;  %v7997_v29 = vld [vmem:[%s14113_s15 + $0x38] sm:$0xff]  ;;  %v8006_v11 = vld [vmem:[%s14113_s15 + $0xa0] sm:$0xff] }
 0x641   :  { %9837 = vrcp.f32 %v2711_v21  ;;  %v2712_v27 = vadd.f32 1.0, %v9830_v12  ;;  %v11985_v35 = vpop.permute.xlu1 %2784  ;;  %v9530_v54 = vpack.c.bf16 %v11974_v26, %v11966_v42 }
 0x642   :  { %14243 = vst [vmem:[#allocation17_spill] sm:$0xff] %v11982_v22  ;;  %9839 = vpow2.f32 %v8019_v10  ;;  %v8020_v46 = vmul.f32 -1.442695, %v11982_v22  ;;  %v11991_v23 = vmul.f32 %v14222_v32, %v2570_v14  ;;  %v14249_v10 = vld [vmem:[#allocation21_spill] sm:$0xff] }
 0x643   :  { %9841 = vrcp.f32 %v2712_v27  ;;  %9531 = vmatprep.subr.bf16.mxu1 %v9530_v54  ;;  %v11993_v24 = vpop.permute.xlu0 %3076 }
 0x644   :  { %14245 = vst [vmem:[#allocation15_spill] sm:$0xff] %v11991_v23  ;;  %9843 = vpow2.f32 %v8020_v46  ;;  %v8021_v51 = vmul.f32 -1.442695, %v11991_v23  ;;  %9533 = vmatpush3.bf16.msra.mxu1 %v9530_v54  ;;  %v9534_v58 = vpack.c.bf16 %v11991_v23, %v11982_v22 }
 0x645   :  { %v11998_v8 = vpop.permute.xlu1 %3081 }
 0x646   :  { %9845 = vpow2.f32 %v8021_v51  ;;  %9535 = vmatprep.subr.bf16.mxu1 %v9534_v58 }
 0x647   :  { %v9832_v0 = vpop.eup %9831  ;;  %v12000_v5 = vpop.permute.xlu0 %3086 }
 0x648   :  { %v2721_v55 = vmul.f32 %v9832_v0, %v11944_v61  ;;  %9537 = vmatpush3.bf16.msra.mxu1 %v9534_v58  ;;  %v14251_v58 = vld [vmem:[#allocation20_spill] sm:$0xff] }
 0x649   :  { %v9834_v45 = vpop.eup %9833  ;;  %v12006_v43 = vpop.permute.xlu1 %3091 }
 0x64a   :  { %v9836_v56 = vpop.eup %9835  ;;  %v2722_v3 = vmul.f32 %v9834_v45, %v11947_v60  ;;  %v2725_v20 = vadd.f32 %v2721_v55, %v14246_v16  ;;  %v8007_v16 = vld [vmem:[%s14113_s15 + $0xa8] sm:$0xff] }
 0x64b   :  { %v9838_v34 = vpop.eup %9837  ;;  %v12013_v18 = vpop.permute.xlu0 %3985  ;;  %9063 = vmatmul.mubr.msk.f32.vlgmr.msra.gmra.mrb[50].mxu1 %vm895_vm2, %v7995_v53  ;;  %v3613_v30 = vadd.f32 1.0, %v9836_v56 }
 0x64c   :  { %v9840_v61 = vpop.eup %9839  ;;  %v2726_v36 = vadd.f32 %v2722_v3, %v14247_v31  ;;  %v2723_v41 = vmul.f32 %v9838_v34, %v11950_v47  ;;  %9065 = vmatprep.mubr.msk.f32.mxu1 %vm895_vm2, %v7996_v49  ;;  %v12033_v27 = vmul.f32 %v14222_v32, %v2725_v20  ;;  %v10160_v31 = vld [vmem:[%s14198_s6] sm:$0xff]  }
 0x64d   :  { %v9842_v60 = vpop.eup %9841  ;;  %v12022_v4 = vpop.permute.xlu1 %3980  ;;  %v3614_v14 = vadd.f32 1.0, %v9840_v61  ;;  %9847 = vrcp.f32 %v3613_v30 }
 0x64e   :  { %v9844_v21 = vpop.eup %9843  ;;  %v12028_v12 = vmul.f32 %v14222_v32, %v2726_v36  ;;  %v2727_v47 = vadd.f32 %v2723_v41, %v14249_v10  ;;  %v2724_v57 = vmul.f32 %v9842_v60, %v11953_v17  ;;  %14250 = vst [vmem:[#allocation16_spill] sm:$0xff] %v12033_v27  ;;  %v8008_v36 = vld [vmem:[%s14113_s15 + $0xb0] sm:$0xff] }
 0x64f   :  { %v12035_v54 = vpop.permute.xlu0 %4009  ;;  %9066 = vmatmul.mubr.msk.f32.gmra.mrb[52].mxu1 %vm895_vm2, %v7997_v29  ;;  %v3615_v46 = vadd.f32 1.0, %v9844_v21 }
 0x650   :  { %14248 = vst [vmem:[#allocation14_spill] sm:$0xff] %v12028_v12  ;;  %v9846_v51 = vpop.eup %9845  ;;  %v2728_v0 = vadd.f32 %v2724_v57, %v14251_v58  ;;  %9076 = vmatprep.mubr.msk.f32.mxu1 %vm895_vm2, %v8006_v11  ;;  %v9538_v17 = vpack.c.bf16 %v12028_v12, %v12033_v27  ;;  %v12045_v45 = vmul.f32 %v14222_v32, %v2727_v47  ;;  %v8009_v47 = vld [vmem:[%s14113_s15 + $0xb8] sm:$0xff]  ;;  %v10161_v58 = vld [vmem:[%s14198_s6 + $0x8] sm:$0xff]  }
 0x651   :  { %v12040_v55 = vpop.permute.xlu1 %4004  ;;  %9849 = vrcp.f32 %v3615_v46  ;;  %v3616_v53 = vadd.f32 1.0, %v9846_v51 }
 0x652   :  { %14252 = vst [vmem:[#allocation31_spill] sm:$0xff] %v12045_v45  ;;  %v12048_v49 = vmul.f32 %v14222_v32, %v2728_v0  ;;  %9851 = vrcp.f32 %v3614_v14  ;;  %9539 = vmatprep.subr.bf16.mxu1 %v9538_v17 }
 0x653   :  { %9853 = vrcp.f32 %v3616_v53  ;;  %9541 = vmatpush3.bf16.msra.mxu1 %v9538_v17  ;;  %v12052_v3 = vpop.permute.xlu0 %3995 }
 0x654   :  { %14253 = vst [vmem:[#allocation32_spill] sm:$0xff] %v12048_v49  ;;  %v9542_v56 = vpack.c.bf16 %v12048_v49, %v12045_v45 }
 0x655   :  { %v12054_v34 = vpop.permute.xlu1 %3990 }
 0x656   :  { %9543 = vmatprep.subr.bf16.mxu1 %v9542_v56 }
 0x657   :  { %9545 = vmatpush3.bf16.msra.mxu1 %v9542_v56  ;;  %v9848_v41 = vpop.eup %9847  ;;  %v12067_v60 = vpop.permute.xlu0 %4134 }
 0x658   :  { %9114 = vmatprep.subr.bf16.mxu1 %v10160_v31 }
 0x659   :  { %v12059_v20 = vpop.permute.xlu1 %4014  ;;  %v9100_v61 = vpop.f32.mrb[72].mxu0 }
 0x65a   :  { %v3691_v29 = vpop.f32.mrb[73].mxu0  ;;  %9077 = vmatmul.mubr.msk.f32.vlgmr.msra.gmra.mrb[54].mxu1 %vm895_vm2, %v8007_v16 }
 0x65b   :  { %v9850_v30 = vpop.eup %9849  ;;  %v9101_v11 = vpop.f32.mrb[74].mxu0  ;;  %9115 = vmatpush3.bf16.msra.mxu1 %v10160_v31  ;;  %9079 = vmatprep.mubr.msk.f32.mxu1 %vm895_vm2, %v8008_v36  ;;  %v3823_v14 = vmul.f32 %v9848_v41, %v3691_v29  ;;  %v10162_v36 = vld [vmem:[%s14198_s6 + $0x10] sm:$0xff]   ;;  %v8022_v41 = vmul.f32 -1.442695, %v12033_v27 }
 0x65c   :  { %v9852_v21 = vpop.eup %9851  ;;  %v3694_v10 = vpop.f32.mrb[75].mxu0  ;;  %9116 = vmatprep.subr.bf16.mxu1 %v10161_v58  ;;  %v3825_v0 = vmul.f32 %v9850_v30, %v9100_v61  ;;  %v8024_v61 = vmul.f32 -1.442695, %v12045_v45  ;;  %v10163_v30 = vld [vmem:[%s14198_s6 + $0x18] sm:$0xff]  }
 0x65d   :  { %v9854_v57 = vpop.eup %9853  ;;  %v3824_v46 = vmul.f32 %v9852_v21, %v3694_v10  ;;  %v12074_v51 = vpop.permute.xlu1 %4019  ;;  %9855 = vpow2.f32 %v8022_v41 }
 0x65e   :  { %v3826_v17 = vmul.f32 %v9854_v57, %v9101_v11  ;;  %9080 = vmatmul.mubr.msk.f32.gmra.mrb[56].mxu1 %vm895_vm2, %v8009_v47  ;;  %v2810_v16 = vpop.permute.xlu0 %2809  ;;  %v8025_v11 = vmul.f32 -1.442695, %v12048_v49  ;;  %v8023_v47 = vmul.f32 -1.442695, %v12028_v12  ;;  %9857 = vpow2.f32 %v8024_v61 }
 0x65f   :  { %v3831_v53 = vpack.c.bf16 %v3824_v46, %v3823_v14  ;;  %9117 = vmatpush3.bf16.msra.mxu1 %v10161_v58  ;;  %v3002_v21 = vadd.f32 %v11675_v63, %v2810_v16  ;;  %v2977_v12 = vadd.f32 %v11663_v1, %v11985_v35 }
 0x660   :  { %v3832_v56 = vpack.c.bf16 %v3826_v17, %v3825_v0  ;;  %9118 = vmatprep.subr.bf16.mxu1 %v10162_v36  ;;  %v10164_v0 = vld [vmem:[%s14198_s6 + $0x20] sm:$0xff]   ;;  %9859 = vpow2.f32 %v8025_v11 }
 0x661   :  { %v12080_v31 = vpop.permute.xlu1 %4139  ;;  %9154 = vmatprep.mubr.bf16.mxu0 %v3831_v53  ;;  %9861 = vpow2.f32 %v8023_v47 }
 0x662   :  { %9155 = vmatmul.mubr.bf16.vlgmr.msra.gmra.mrb[88].mxu0 %v3832_v56  ;;  %v2820_v57 = vpop.permute.xlu0 %2819 }
 0x663   :  { %9119 = vmatpush3.bf16.msra.mxu1 %v10162_v36  ;;  %v3012_v63 = vadd.f32 %v11682_v50, %v2820_v57  ;;  %v10165_v36 = vld [vmem:[%s14198_s6 + $0x28] sm:$0xff]  }
 0x664   :  { %9120 = vmatprep.subr.bf16.mxu1 %v10163_v30 }
 0x665   :  { %v2815_v29 = vpop.permute.xlu1 %2814 }
 0x666   :  { %v3007_v10 = vadd.f32 %v11673_v28, %v2815_v29 }
 0x667   :  { %9121 = vmatpush3.bf16.msra.mxu1 %v10163_v30  ;;  %v9856_v50 = vpop.eup %9855  ;;  %v10167_v30 = vld [vmem:[%s14198_s6 + $0x38] sm:$0xff]  }
 0x668   :  { %v3754_v14 = vpack.c.bf16 %v3007_v10, %v3002_v21  ;;  %9122 = vmatprep.subr.bf16.mxu1 %v10164_v0  ;;  %v9858_v41 = vpop.eup %9857  ;;  %v3637_v11 = vadd.f32 1.0, %v9856_v50 }
 0x669   :  { %v2825_v46 = vpop.permute.xlu1 %2824  ;;  %v12094_v58 = vpop.f32.mrb[76].mxu0  ;;  %v3639_v21 = vadd.f32 1.0, %v9858_v41 }
 0x66a   :  { %v3017_v28 = vadd.f32 %v11677_v59, %v2825_v46  ;;  %v12101_v17 = vpop.f32.mrb[77].mxu0  ;;  %9130 = vmatprep.mubr.bf16.mxu1 %v3754_v14  ;;  %v10166_v59 = vld [vmem:[%s14198_s6 + $0x30] sm:$0xff]   ;;  %v9860_v61 = vpop.eup %9859  ;;  %9863 = vrcp.f32 %v3637_v11 }
 0x66b   :  { %v12103_v53 = vpop.f32.mrb[78].mxu0  ;;  %9123 = vmatpush3.bf16.msra.mxu1 %v10164_v0  ;;  %v9862_v29 = vpop.eup %9861  ;;  %v3640_v10 = vadd.f32 1.0, %v9860_v61  ;;  %9865 = vrcp.f32 %v3639_v21 }
 0x66c   :  { %v3755_v56 = vpack.c.bf16 %v3017_v28, %v3012_v63  ;;  %v12105_v16 = vpop.f32.mrb[79].mxu0  ;;  %9124 = vmatprep.subr.bf16.mxu1 %v10165_v36  ;;  %v3638_v47 = vadd.f32 1.0, %v9862_v29 }
 0x66d   :  { %9867 = vrcp.f32 %v3640_v10 }
 0x66e   :  { %9869 = vrcp.f32 %v3638_v47 }
 0x66f   :  { %9125 = vmatpush3.bf16.msra.mxu1 %v10165_v36 }
 0x670   :  { %9126 = vmatprep.subr.bf16.mxu1 %v10166_v59 }
 0x673   :  { %9127 = vmatpush3.bf16.msra.mxu1 %v10166_v59 }
 0x674   :  { %9128 = vmatprep.subr.bf16.mxu1 %v10167_v30  ;;  %v9864_v57 = vpop.eup %9863 }
 0x675   :  { %v9866_v46 = vpop.eup %9865 }
 0x677   :  { %9129 = vmatpush3.bf16.msra.mxu1 %v10167_v30  ;;  %v9868_v63 = vpop.eup %9867 }
 0x678   :  { %v9870_v36 = vpop.eup %9869 }
 0x67a   :  { %9131 = vmatmul.mubr.bf16.vlgmr.msra.gmra.mrb[60].mxu1 %v3755_v56 }
 0x683   :  { %v9108_v14 = vpop.f32.mrb[80].mxu0 }
 0x684   :  { %v3723_v0 = vpop.f32.mrb[81].mxu0  ;;  %v3829_v59 = vmul.f32 %v9866_v46, %v9108_v14 }
 0x685   :  { %v9109_v28 = vpop.f32.mrb[82].mxu0  ;;  %v3827_v50 = vmul.f32 %v9864_v57, %v3723_v0 }
 0x686   :  { %v3830_v49 = vmul.f32 %v9868_v63, %v9109_v28  ;;  %v3726_v45 = vpop.f32.mrb[83].mxu0  ;;  %v2972_v28 = vadd.f32 %v11667_v7, %v11978_v33  ;;  %v2967_v7 = vadd.f32 %v11655_v13, %v11970_v62 }
 0x687   :  { %v3828_v41 = vmul.f32 %v9870_v36, %v3726_v45  ;;  %v10168_v36 = vld [vmem:[%s14212_s0] ss:$0 sm:$0xff] }
 0x688   :  { %v3834_v61 = vpack.c.bf16 %v3830_v49, %v3829_v59 }
 0x689   :  { %v3833_v30 = vpack.c.bf16 %v3828_v41, %v3827_v50  ;;  %v2962_v41 = vadd.f32 %v11659_v15, %v11963_v37 }
 0x68b   :  { %9158 = vmatprep.mubr.bf16.mxu0 %v3833_v30 }
 0x68c   :  { %9159 = vmatmul.mubr.bf16.gmra.mrb[92].mxu0 %v3834_v61 }
 0x711   :  { %v12116_v29 = vpop.f32.mrb[84].mxu0 }
 0x712   :  { %14254 = vst [vmem:[#allocation8_spill] sm:$0xff] %v12116_v29  ;;  %v12118_v56 = vpop.f32.mrb[85].mxu0 }
 0x713   :  { %14255 = vst [vmem:[#allocation23_spill] sm:$0xff] %v12118_v56  ;;  %v12120_v11 = vpop.f32.mrb[86].mxu0 }
 0x714   :  { %14256 = vst [vmem:[#allocation22_spill] sm:$0xff] %v12120_v11  ;;  %v12122_v21 = vpop.f32.mrb[87].mxu0 }
 0x715   :  { %14257 = vst [vmem:[#allocation25_spill] sm:$0xff] %v12122_v21 }
 0x71e   :  { %v12124_v10 = vpop.f32.mrb[50].mxu1 }
 0x71f   :  { %v12126_v47 = vpop.f32.mrb[51].mxu1 }
 0x722   :  { %v12128_v14 = vpop.f32.mrb[52].mxu1 }
 0x723   :  { %v12130_v57 = vpop.f32.mrb[53].mxu1 }
 0x72d   :  { %v12132_v45 = vpop.f32.mrb[54].mxu1 }
 0x72e   :  { %v12134_v49 = vpop.f32.mrb[55].mxu1 }
 0x731   :  { %v12136_v46 = vpop.f32.mrb[56].mxu1 }
 0x732   :  { %v12138_v0 = vpop.f32.mrb[57].mxu1 }
 0x735   :  { %v9156_v63 = vpop.f32.mrb[88].mxu0 }
 0x736   :  { %v3902_v59 = vmul.f32 %v10168_v36, %v9156_v63  ;;  %v3869_v50 = vpop.f32.mrb[89].mxu0 }
 0x737   :  { %v3900_v61 = vmul.f32 %v10168_v36, %v3869_v50  ;;  %v9157_v30 = vpop.f32.mrb[90].mxu0 }
 0x738   :  { %v12149_v27 = vadd.f32 %v3902_v59, %v2972_v28  ;;  %v3903_v23 = vmul.f32 %v10168_v36, %v9157_v30  ;;  %v3872_v22 = vpop.f32.mrb[91].mxu0  ;;  %v3279_v30 = vadd.f32 %v11742_v38, %v12000_v5  ;;  %v3274_v38 = vadd.f32 %v11727_v48, %v11998_v8 }
 0x739   :  { %v12153_v33 = vadd.f32 %v3900_v61, %v2962_v41  ;;  %v3901_v26 = vmul.f32 %v10168_v36, %v3872_v22  ;;  %v8041_v41 = vld [vmem:[%s14115_s17 + $0xb8] sm:$0xff] }
 0x73a   :  { %v12155_v63 = vadd.f32 %v3903_v23, %v2977_v12  ;;  %v3924_v15 = vmul.f32 %v12149_v27, %v10732_v19 }
 0x73b   :  { %v12159_v37 = vadd.f32 %v3901_v26, %v2967_v7  ;;  %v3922_v1 = vmul.f32 %v12153_v33, %v10732_v19 }
 0x73c   :  { %3930 = vadd.xlane.f32.xlu1 %v3924_v15  ;;  %v3936_v35 = vmul.f32 %v3924_v15, %v3924_v15  ;;  %v3925_v28 = vmul.f32 %v12155_v63, %v10732_v19 }
 0x73d   :  { %3926 = vadd.xlane.f32.xlu0 %v3922_v1  ;;  %v3923_v13 = vmul.f32 %v12159_v37, %v10732_v19  ;;  %v3934_v62 = vmul.f32 %v3922_v1, %v3922_v1  ;;  %v8040_v1 = vld [vmem:[%s14115_s17 + $0xb0] sm:$0xff] }
 0x73e   :  { %v3937_v22 = vmul.f32 %v3925_v28, %v3925_v28 }
 0x73f   :  { %v3935_v26 = vmul.f32 %v3923_v13, %v3923_v13 }
 0x740   :  { %3942 = vadd.xlane.f32.xlu1 %v3936_v35  ;;  %v3269_v35 = vadd.f32 %v11729_v25, %v11993_v24 }
 0x741   :  { %3932 = vadd.xlane.f32.xlu0 %v3925_v28 }
 0x744   :  { %3928 = vadd.xlane.f32.xlu1 %v3923_v13 }
 0x745   :  { %3938 = vadd.xlane.f32.xlu0 %v3934_v62  ;;  %v3284_v62 = vadd.f32 %v11737_v2, %v12006_v43 }
 0x749   :  { %3944 = vadd.xlane.f32.xlu0 %v3937_v22 }
 0x74d   :  { %3940 = vadd.xlane.f32.xlu0 %v3935_v26  ;;  %v12167_v23 = vpop.f32.mrb[60].mxu1 }
 0x74e   :  { %v12169_v12 = vpop.f32.mrb[61].mxu1 }
 0x74f   :  { %v12171_v59 = vpop.f32.mrb[62].mxu1 }
 0x750   :  { %v12173_v50 = vpop.f32.mrb[63].mxu1 }
 0x755   :  { %4149 = vperm.xlu1 %9618, %v8041_v41  }
 0x75f   :  { %v9160_v61 = vpop.f32.mrb[92].mxu0 }
 0x760   :  { %v3906_v7 = vmul.f32 %v10168_v36, %v9160_v61  ;;  %v3885_v15 = vpop.f32.mrb[93].mxu0 }
 0x761   :  { %v3904_v28 = vmul.f32 %v10168_v36, %v3885_v15  ;;  %v9161_v13 = vpop.f32.mrb[94].mxu0  ;;  %v7971_v15 = vld [vmem:[%s14112_s14 + $0x2c8] sm:$0xff] }
 0x762   :  { %v12187_v22 = vadd.f32 %v3906_v7, %v3279_v30  ;;  %v3907_v26 = vmul.f32 %v10168_v36, %v9161_v13  ;;  %v3888_v41 = vpop.f32.mrb[95].mxu0  ;;  %v8045_v7 = vld [vmem:[%s14116_s18 + $0xb8] sm:$0xff] }
 0x763   :  { %v12191_v5 = vadd.f32 %v3904_v28, %v3269_v35  ;;  %v3905_v61 = vmul.f32 %v10168_v36, %v3888_v41  ;;  %4144 = vperm.xlu0 %9617, %v8040_v1   ;;  %v7973_v1 = vld [vmem:[%s14112_s14 + $0x2d8] sm:$0xff]  ;;  %v8095_v35 = vld [vmem:[%s14112_s14 + $0x128] sm:$0xff]  ;;  %v8044_v28 = vld [vmem:[%s14116_s18 + $0xb0] sm:$0xff] }
 0x764   :  { %v12193_v42 = vadd.f32 %v3907_v26, %v3284_v62  ;;  %v4078_v25 = vmul.f32 %v12187_v22, %v10732_v19  ;;  %v8097_v13 = vld [vmem:[%s14112_s14 + $0x138] sm:$0xff]  ;;  %v7970_v62 = vld [vmem:[%s14112_s14 + $0x2c0] sm:$0xff]  ;;  %v8103_v26 = vld [vmem:[%s14112_s14 + $0x168] sm:$0xff] }
 0x765   :  { %v12195_v21 = vadd.f32 %v3905_v61, %v3274_v38  ;;  %v4076_v2 = vmul.f32 %v12191_v5, %v10732_v19  ;;  %v7972_v41 = vld [vmem:[%s14112_s14 + $0x2d0] sm:$0xff]  ;;  %v8105_v38 = vld [vmem:[%s14112_s14 + $0x178] sm:$0xff]  ;;  %v8094_v61 = vld [vmem:[%s14112_s14 + $0x120] sm:$0xff] }
 0x766   :  { %v4090_v24 = vmul.f32 %v4078_v25, %v4078_v25  ;;  %v4079_v48 = vmul.f32 %v12193_v42, %v10732_v19 }
 0x767   :  { %v4088_v8 = vmul.f32 %v4076_v2, %v4076_v2  ;;  %v4077_v43 = vmul.f32 %v12195_v21, %v10732_v19 }
 0x768   :  { %v4091_v36 = vmul.f32 %v4079_v48, %v4079_v48 }
 0x769   :  { %v4089_v30 = vmul.f32 %v4077_v43, %v4077_v43 }
 0x779   :  { %4084 = vadd.xlane.f32.xlu1 %v4078_v25  ;;  %v8143_v25 = vld [vmem:[%s14112_s14 + $0x328] sm:$0xff] }
 0x77d   :  { %4080 = vadd.xlane.f32.xlu1 %v4076_v2  ;;  %v8096_v2 = vld [vmem:[%s14112_s14 + $0x130] sm:$0xff] }
 0x781   :  { %4096 = vadd.xlane.f32.xlu1 %v4090_v24  ;;  %v8145_v24 = vld [vmem:[%s14112_s14 + $0x338] sm:$0xff] }
 0x782   :  { %4086 = vadd.xlane.f32.xlu0 %v4079_v48  ;;  %v8102_v48 = vld [vmem:[%s14112_s14 + $0x160] sm:$0xff] }
 0x785   :  { %4092 = vadd.xlane.f32.xlu1 %v4088_v8  ;;  %v7999_v8 = vld [vmem:[%s14114_s16 + $0x28] sm:$0xff] }
 0x786   :  { %4082 = vadd.xlane.f32.xlu0 %v4077_v43  ;;  %v8104_v43 = vld [vmem:[%s14112_s14 + $0x170] sm:$0xff] }
 0x78a   :  { %4098 = vadd.xlane.f32.xlu0 %v4091_v36  ;;  %v8001_v36 = vld [vmem:[%s14114_s16 + $0x38] sm:$0xff] }
 0x78e   :  { %4094 = vadd.xlane.f32.xlu0 %v4089_v30  ;;  %v8142_v30 = vld [vmem:[%s14112_s14 + $0x320] sm:$0xff] }
 0x796   :  { %4173 = vperm.xlu1 %9618, %v8045_v7   ;;  %v8011_v7 = vld [vmem:[%s14114_s16 + $0xa8] sm:$0xff] }
 0x79a   :  { %3121 = vperm.xlu1 %9618, %v7971_v15   ;;  %v8144_v15 = vld [vmem:[%s14112_s14 + $0x330] sm:$0xff] }
 0x79e   :  { %3131 = vperm.xlu1 %9618, %v7973_v1   ;;  %v8013_v1 = vld [vmem:[%s14114_s16 + $0xb8] sm:$0xff] }
 0x7a2   :  { %4593 = vperm.xlu1 %9618, %v8095_v35   ;;  %v12271_v35 = vpop.permute.xlu1 %4163 }
 0x7a4   :  { %4168 = vperm.xlu0 %9617, %v8044_v28   ;;  %v7998_v28 = vld [vmem:[%s14114_s16 + $0x20] sm:$0xff] }
 0x7a6   :  { %4603 = vperm.xlu1 %9618, %v8097_v13   ;;  %v12276_v13 = vpop.permute.xlu0 %4158 }
 0x7a8   :  { %3116 = vperm.xlu0 %9617, %v7970_v62  }
 0x7aa   :  { %4633 = vperm.xlu1 %9618, %v8103_v26   ;;  %v8000_v26 = vld [vmem:[%s14114_s16 + $0x30] sm:$0xff] }
 0x7ac   :  { %3126 = vperm.xlu0 %9617, %v7972_v41  }
 0x7ae   :  { %4643 = vperm.xlu1 %9618, %v8105_v38  }
 0x7b0   :  { %4588 = vperm.xlu0 %9617, %v8094_v61  }
 0x7b2   :  { %4900 = vperm.xlu1 %9618, %v8143_v25   ;;  %v8010_v25 = vld [vmem:[%s14114_s16 + $0xa0] sm:$0xff] }
 0x7b4   :  { %4598 = vperm.xlu0 %9617, %v8096_v2  }
 0x7b6   :  { %4910 = vperm.xlu1 %9618, %v8145_v24  }
 0x7b8   :  { %4628 = vperm.xlu0 %9617, %v8102_v48  }
 0x7ba   :  { %3364 = vperm.xlu1 %9618, %v7999_v8  }
 0x7bc   :  { %4638 = vperm.xlu0 %9617, %v8104_v43  }
 0x7be   :  { %3374 = vperm.xlu1 %9618, %v8001_v36   ;;  %v8012_v36 = vld [vmem:[%s14114_s16 + $0xb0] sm:$0xff] }
 0x7c0   :  { %4895 = vperm.xlu0 %9617, %v8142_v30  }
 0x7c2   :  { %3491 = vperm.xlu1 %9618, %v8011_v7  }
 0x7c4   :  { %4905 = vperm.xlu0 %9617, %v8144_v15  }
 0x7c6   :  { %3501 = vperm.xlu1 %9618, %v8013_v1  }
 0x7c8   :  { %3359 = vperm.xlu0 %9617, %v7998_v28  }
 0x7c9   :  { %v3931_v62 = vpop.xlane.xlu1 %3930 }
 0x7ca   :  { %v3948_v41 = vmul.f32 %v3931_v62, %v11319_v40  ;;  %v3927_v38 = vpop.xlane.xlu0 %3926 }
 0x7cb   :  { %v3946_v8 = vmul.f32 %v3927_v38, %v11319_v40 }
 0x7cc   :  { %3369 = vperm.xlu0 %9617, %v8000_v26   ;;  %v3956_v2 = vmul.f32 %v3948_v41, %v3948_v41 }
 0x7cd   :  { %v3943_v61 = vpop.xlane.xlu1 %3942  ;;  %v3954_v15 = vmul.f32 %v3946_v8, %v3946_v8 }
 0x7ce   :  { %v3952_v24 = vmul.f32 %v3943_v61, %v11319_v40  ;;  %v3933_v48 = vpop.xlane.xlu0 %3932 }
 0x7cf   :  { %v3949_v1 = vmul.f32 %v3933_v48, %v11319_v40 }
 0x7d0   :  { %v3960_v43 = vsub.f32 %v3952_v24, %v3956_v2  ;;  %3486 = vperm.xlu0 %9617, %v8010_v25  }
 0x7d1   :  { %v3929_v62 = vpop.xlane.xlu1 %3928  ;;  %v3957_v11 = vmul.f32 %v3949_v1, %v3949_v1 }
 0x7d2   :  { %v3968_v30 = vadd.f32 1e-05, %v3960_v43  ;;  %v3939_v7 = vpop.xlane.xlu0 %3938  ;;  %v3947_v38 = vmul.f32 %v3929_v62, %v11319_v40 }
 0x7d3   :  { %v3950_v28 = vmul.f32 %v3939_v7, %v11319_v40 }
 0x7d4   :  { %9871 = vrsqrt.f32 %v3968_v30  ;;  %3496 = vperm.xlu0 %9617, %v8012_v36   ;;  %v3955_v56 = vmul.f32 %v3947_v38, %v3947_v38  ;;  %v8122_v30 = vld [vmem:[%s14111_s13 + $0x300] sm:$0xff]  ;;  %v3964_v36 = vsub.f32 %v12149_v27, %v3948_v41 }
 0x7d5   :  { %v3958_v26 = vsub.f32 %v3950_v28, %v3954_v15  ;;  %9202 = vmatprep.mubr.msk.f32.mxu0 %vm895_vm2, %v8122_v30 }
 0x7d6   :  { %v3945_v61 = vpop.xlane.xlu0 %3944 }
 0x7d7   :  { %v3966_v25 = vadd.f32 1e-05, %v3958_v26  ;;  %v3953_v2 = vmul.f32 %v3945_v61, %v11319_v40  ;;  %v3962_v26 = vsub.f32 %v12153_v33, %v3946_v8 }
 0x7d9   :  { %9873 = vrsqrt.f32 %v3966_v25  ;;  %v3961_v24 = vsub.f32 %v3953_v2, %v3957_v11 }
 0x7da   :  { %v3941_v43 = vpop.xlane.xlu0 %3940 }
 0x7db   :  { %v3969_v29 = vadd.f32 1e-05, %v3961_v24  ;;  %v3951_v48 = vmul.f32 %v3941_v43, %v11319_v40  ;;  %v3965_v24 = vsub.f32 %v12155_v63, %v3949_v1 }
 0x7dd   :  { %9875 = vrsqrt.f32 %v3969_v29  ;;  %v3959_v7 = vsub.f32 %v3951_v48, %v3955_v56  ;;  %v3963_v48 = vsub.f32 %v12159_v37, %v3947_v38 }
 0x7de   :  { %v9872_v15 = vpop.eup %9871 }
 0x7df   :  { %v3976_v28 = vmul.f32 %v9872_v15, %v3964_v36  ;;  %v3967_v62 = vadd.f32 1e-05, %v3959_v7 }
 0x7e1   :  { %9877 = vrsqrt.f32 %v3967_v62  ;;  %v4000_v11 = vmul.f32 %v12054_v34, %v3976_v28 }
 0x7e3   :  { %v9874_v61 = vpop.eup %9873  ;;  %v4024_v25 = vadd.f32 %v12059_v20, %v4000_v11 }
 0x7e4   :  { %v3974_v2 = vmul.f32 %v9874_v61, %v3962_v26 }
 0x7e5   :  { %v8036_v56 = vmul.f32 -1.442695, %v4024_v25 }
 0x7e6   :  { %v3998_v27 = vmul.f32 %v12022_v4, %v3974_v2 }
 0x7e7   :  { %v9876_v29 = vpop.eup %9875  ;;  %9879 = vpow2.f32 %v8036_v56  ;;  %v4145_v56 = vpop.permute.xlu0 %4144 }
 0x7e8   :  { %v3977_v41 = vmul.f32 %v9876_v29, %v3965_v24  ;;  %v4022_v43 = vadd.f32 %v12040_v55, %v3998_v27 }
 0x7ea   :  { %v8034_v30 = vmul.f32 -1.442695, %v4022_v43  ;;  %v4001_v34 = vmul.f32 %v12052_v3, %v3977_v41 }
 0x7eb   :  { %v9878_v36 = vpop.eup %9877 }
 0x7ec   :  { %v3975_v33 = vmul.f32 %v9878_v36, %v3963_v48  ;;  %9881 = vpow2.f32 %v8034_v30  ;;  %v4025_v20 = vadd.f32 %v12074_v51, %v4001_v34  ;;  %v12311_v51 = vpop.permute.xlu1 %4149 }
 0x7ee   :  { %v3999_v63 = vmul.f32 %v12013_v18, %v3975_v33  ;;  %v8037_v8 = vmul.f32 -1.442695, %v4025_v20 }
 0x7f0   :  { %v4023_v4 = vadd.f32 %v12035_v54, %v3999_v63  ;;  %9883 = vpow2.f32 %v8037_v8 }
 0x7f1   :  { %v9880_v55 = vpop.eup %9879 }
 0x7f2   :  { %v8035_v1 = vmul.f32 -1.442695, %v4023_v4  ;;  %v4040_v38 = vadd.f32 1.0, %v9880_v55 }
 0x7f4   :  { %9885 = vpow2.f32 %v8035_v1 }
 0x7f6   :  { %v9882_v7 = vpop.eup %9881 }
 0x7f7   :  { %v4038_v37 = vadd.f32 1.0, %v9882_v7 }
 0x7f9   :  { %9887 = vrcp.f32 %v4038_v37 }
 0x7fa   :  { %v9884_v15 = vpop.eup %9883  ;;  %9889 = vrcp.f32 %v4040_v38 }
 0x7fb   :  { %v4041_v3 = vadd.f32 1.0, %v9884_v15 }
 0x7fd   :  { %9891 = vrcp.f32 %v4041_v3 }
 0x7fe   :  { %v9886_v28 = vpop.eup %9885 }
 0x7ff   :  { %v4039_v62 = vadd.f32 1.0, %v9886_v28 }
 0x801   :  { %9893 = vrcp.f32 %v4039_v62 }
 0x803   :  { %v9888_v18 = vpop.eup %9887 }
 0x804   :  { %v9890_v11 = vpop.eup %9889  ;;  %v4050_v61 = vmul.f32 %v9888_v18, %v4022_v43 }
 0x805   :  { %v4052_v27 = vmul.f32 %v9890_v11, %v4024_v25 }
 0x806   :  { %v4085_v54 = vpop.xlane.xlu1 %4084  ;;  %v4054_v30 = vadd.f32 %v4050_v61, %v11359_v9 }
 0x807   :  { %v9892_v26 = vpop.eup %9891  ;;  %v4102_v41 = vmul.f32 %v4085_v54, %v11319_v40  ;;  %v4056_v63 = vadd.f32 %v4052_v27, %v11371_v39 }
 0x808   :  { %v4053_v2 = vmul.f32 %v9892_v26, %v4025_v20  ;;  %v12321_v1 = vmul.f32 %v4054_v30, %v10732_v19 }
 0x809   :  { %v4110_v8 = vmul.f32 %v4102_v41, %v4102_v41  ;;  %v12332_v39 = vmul.f32 %v4056_v63, %v10732_v19 }
 0x80a   :  { %v4081_v24 = vpop.xlane.xlu1 %4080  ;;  %v4057_v34 = vadd.f32 %v4053_v2, %v11366_v44  ;;  %14258 = vst [vmem:[#allocation24_spill] sm:$0xff] %v12321_v1 }
 0x80b   :  { %v9894_v29 = vpop.eup %9893  ;;  %v4100_v43 = vmul.f32 %v4081_v24, %v11319_v40 }
 0x80c   :  { %v4051_v48 = vmul.f32 %v9894_v29, %v4023_v4  ;;  %v12327_v9 = vmul.f32 %v4057_v34, %v10732_v19 }
 0x80d   :  { %v4108_v7 = vmul.f32 %v4100_v43, %v4100_v43 }
 0x80e   :  { %v4097_v36 = vpop.xlane.xlu1 %4096  ;;  %v4055_v33 = vadd.f32 %v4051_v48, %v11363_v52  ;;  %14260 = vst [vmem:[#allocation18_spill] sm:$0xff] %v12327_v9  ;;  %v9550_v28 = vpack.c.bf16 %v12327_v9, %v12332_v39 }
 0x80f   :  { %v4106_v20 = vmul.f32 %v4097_v36, %v11319_v40  ;;  %v4087_v25 = vpop.xlane.xlu0 %4086  ;;  %v4118_v36 = vsub.f32 %v12187_v22, %v4102_v41 }
 0x810   :  { %v12324_v4 = vmul.f32 %v4055_v33, %v10732_v19  ;;  %v4103_v3 = vmul.f32 %v4087_v25, %v11319_v40 }
 0x811   :  { %v4114_v44 = vsub.f32 %v4106_v20, %v4110_v8 }
 0x812   :  { %14259 = vst [vmem:[#allocation19_spill] sm:$0xff] %v12324_v4  ;;  %v4093_v55 = vpop.xlane.xlu1 %4092  ;;  %v9546_v52 = vpack.c.bf16 %v12324_v4, %v12321_v1  ;;  %v4111_v26 = vmul.f32 %v4103_v3, %v4103_v3  ;;  %v4119_v22 = vsub.f32 %v12193_v42, %v4103_v3 }
 0x813   :  { %v4122_v37 = vadd.f32 1e-05, %v4114_v44  ;;  %v4104_v38 = vmul.f32 %v4093_v55, %v11319_v40  ;;  %v4083_v15 = vpop.xlane.xlu0 %4082  ;;  %v4116_v44 = vsub.f32 %v12191_v5, %v4100_v43  ;;  %v14261_v5 = vld [vmem:[#allocation10_spill] sm:$0xff] }
 0x814   :  { %9547 = vmatprep.subr.bf16.mxu1 %v9546_v52  ;;  %v4101_v61 = vmul.f32 %v4083_v15, %v11319_v40 }
 0x815   :  { %9895 = vrsqrt.f32 %v4122_v37  ;;  %v4112_v62 = vsub.f32 %v4104_v38, %v4108_v7  ;;  %9549 = vmatpush3.bf16.msra.mxu1 %v9546_v52 }
 0x816   :  { %v4174_v18 = vpop.permute.xlu1 %4173  ;;  %9551 = vmatprep.subr.bf16.mxu1 %v9550_v28  ;;  %v4109_v48 = vmul.f32 %v4101_v61, %v4101_v61 }
 0x817   :  { %v4120_v11 = vadd.f32 1e-05, %v4112_v62  ;;  %v4099_v54 = vpop.xlane.xlu0 %4098 }
 0x818   :  { %v4107_v2 = vmul.f32 %v4099_v54, %v11319_v40 }
 0x819   :  { %9897 = vrsqrt.f32 %v4120_v11  ;;  %9553 = vmatpush3.bf16.msra.mxu1 %v9550_v28 }
 0x81a   :  { %v4115_v24 = vsub.f32 %v4107_v2, %v4111_v26  ;;  %v3122_v27 = vpop.permute.xlu1 %3121 }
 0x81b   :  { %v4095_v29 = vpop.xlane.xlu0 %4094  ;;  %v3314_v54 = vadd.f32 %v11784_v6, %v3122_v27  ;;  %v14262_v6 = vld [vmem:[#allocation9_spill] sm:$0xff] }
 0x81c   :  { %v4123_v30 = vadd.f32 1e-05, %v4115_v24  ;;  %v4105_v34 = vmul.f32 %v4095_v29, %v11319_v40 }
 0x81e   :  { %9899 = vrsqrt.f32 %v4123_v30  ;;  %v4113_v33 = vsub.f32 %v4105_v34, %v4109_v48  ;;  %v3132_v63 = vpop.permute.xlu1 %3131  ;;  %v14263_v34 = vld [vmem:[#allocation13_spill] sm:$0xff] }
 0x81f   :  { %v9896_v8 = vpop.eup %9895  ;;  %v3324_v27 = vadd.f32 %v14262_v6, %v3132_v63 }
 0x820   :  { %v4121_v20 = vadd.f32 1e-05, %v4113_v33  ;;  %v4130_v25 = vmul.f32 %v9896_v8, %v4118_v36 }
 0x822   :  { %9901 = vrsqrt.f32 %v4121_v20  ;;  %v12343_v55 = vpop.permute.xlu1 %4593  ;;  %v4154_v7 = vmul.f32 %v4145_v56, %v4130_v25 }
 0x823   :  { %v9898_v52 = vpop.eup %9897  ;;  %v4169_v37 = vpop.permute.xlu0 %4168 }
 0x824   :  { %v4128_v38 = vmul.f32 %v9898_v52, %v4116_v44  ;;  %v12349_v41 = vadd.f32 %v4169_v37, %v4154_v7  ;;  %v8075_v7 = vld [vmem:[%s14111_s13 + $0x108] sm:$0xff] }
 0x826   :  { %v12345_v15 = vpop.permute.xlu1 %4603  ;;  %v4152_v28 = vmul.f32 %v12067_v60, %v4128_v38  ;;  %v4117_v60 = vsub.f32 %v12195_v21, %v4101_v61  ;;  %v8048_v42 = vmul.f32 -1.442695, %v12349_v41  ;;  %v8074_v21 = vld [vmem:[%s14111_s13 + $0x100] sm:$0xff]  ;;  %v8076_v38 = vld [vmem:[%s14111_s13 + $0x110] sm:$0xff] }
 0x827   :  { %v3117_v62 = vpop.permute.xlu0 %3116 }
 0x828   :  { %v9900_v11 = vpop.eup %9899  ;;  %v3309_v43 = vadd.f32 %v14261_v5, %v3117_v62  ;;  %v12354_v26 = vadd.f32 %v12276_v13, %v4152_v28 }
 0x829   :  { %v4131_v56 = vmul.f32 %v9900_v11, %v4119_v22  ;;  %v8077_v22 = vld [vmem:[%s14111_s13 + $0x118] sm:$0xff] }
 0x82a   :  { %v3756_v2 = vpack.c.bf16 %v3314_v54, %v3309_v43  ;;  %v12356_v24 = vpop.permute.xlu1 %4633  ;;  %v8046_v29 = vmul.f32 -1.442695, %v12354_v26  ;;  %v8078_v54 = vld [vmem:[%s14111_s13 + $0x120] sm:$0xff] }
 0x82b   :  { %v3127_v3 = vpop.permute.xlu0 %3126  ;;  %v4155_v48 = vmul.f32 %v12311_v51, %v4131_v56 }
 0x82c   :  { %v9902_v30 = vpop.eup %9901  ;;  %v3319_v36 = vadd.f32 %v14263_v34, %v3127_v3  ;;  %9134 = vmatprep.mubr.bf16.mxu1 %v3756_v2  ;;  %9903 = vpow2.f32 %v8046_v29 }
 0x82d   :  { %v4129_v13 = vmul.f32 %v9902_v30, %v4117_v60  ;;  %v12364_v33 = vadd.f32 %v4174_v18, %v4155_v48  ;;  %9905 = vpow2.f32 %v8048_v42  ;;  %v8079_v42 = vld [vmem:[%s14111_s13 + $0x128] sm:$0xff] }
 0x82e   :  { %v3757_v8 = vpack.c.bf16 %v3324_v27, %v3319_v36  ;;  %v12366_v20 = vpop.permute.xlu1 %4643 }
 0x82f   :  { %v12371_v61 = vpop.permute.xlu0 %4588  ;;  %v4153_v51 = vmul.f32 %v12080_v31, %v4129_v13  ;;  %v8049_v63 = vmul.f32 -1.442695, %v12364_v33 }
 0x830   :  { %9135 = vmatmul.mubr.bf16.gmra.mrb[64].mxu1 %v3757_v8  ;;  %v8083_v8 = vld [vmem:[%s14111_s13 + $0x148] sm:$0xff] }
 0x831   :  { %9170 = vmatprep.mubr.msk.f32.mxu1 %vm895_vm2, %v8074_v21  ;;  %v12377_v18 = vadd.f32 %v12271_v35, %v4153_v51  ;;  %9907 = vpow2.f32 %v8049_v63  ;;  %v8084_v21 = vld [vmem:[%s14111_s13 + $0x150] sm:$0xff] }
 0x832   :  { %v12379_v25 = vpop.permute.xlu1 %4900 }
 0x833   :  { %v12381_v44 = vpop.permute.xlu0 %4598  ;;  %v8047_v52 = vmul.f32 -1.442695, %v12377_v18 }
 0x835   :  { %9909 = vpow2.f32 %v8047_v52 }
 0x836   :  { %v9904_v31 = vpop.eup %9903  ;;  %v12387_v37 = vpop.permute.xlu1 %4910 }
 0x837   :  { %v12392_v35 = vpop.permute.xlu0 %4628  ;;  %v9906_v28 = vpop.eup %9905  ;;  %v4192_v62 = vadd.f32 1.0, %v9904_v31 }
 0x838   :  { %9171 = vmatmul.mubr.msk.f32.vlgmr.msra.gmra.mrb[58].mxu1 %vm895_vm2, %v8075_v7  ;;  %v4194_v2 = vadd.f32 1.0, %v9906_v28  ;;  %v8085_v7 = vld [vmem:[%s14111_s13 + $0x158] sm:$0xff]  ;;  %v8086_v28 = vld [vmem:[%s14111_s13 + $0x160] sm:$0xff] }
 0x839   :  { %9173 = vmatprep.mubr.msk.f32.mxu1 %vm895_vm2, %v8076_v38  ;;  %9911 = vrcp.f32 %v4192_v62 }
 0x83a   :  { %v3365_v11 = vpop.permute.xlu1 %3364 }
 0x83b   :  { %v9908_v5 = vpop.eup %9907  ;;  %v3461_v43 = vadd.f32 %v12124_v10, %v3365_v11  ;;  %v12403_v56 = vpop.permute.xlu0 %4638  ;;  %v8080_v10 = vld [vmem:[%s14111_s13 + $0x130] sm:$0xff] }
 0x83c   :  { %9174 = vmatmul.mubr.msk.f32.gmra.mrb[68].mxu1 %vm895_vm2, %v8077_v22  ;;  %v4195_v29 = vadd.f32 1.0, %v9908_v5 }
 0x83d   :  { %v4217_v60 = vadd.f32 %v12173_v50, %v3461_v43  ;;  %9176 = vmatprep.mubr.msk.f32.mxu1 %vm895_vm2, %v8078_v54 }
 0x83e   :  { %v3375_v3 = vpop.permute.xlu1 %3374  ;;  %9913 = vrcp.f32 %v4195_v29 }
 0x83f   :  { %v12415_v48 = vadd.f32 %v4217_v60, %v12105_v16  ;;  %v3471_v30 = vadd.f32 %v12128_v14, %v3375_v3  ;;  %v12418_v6 = vpop.permute.xlu0 %4895  ;;  %v9910_v50 = vpop.eup %9909  ;;  %9915 = vrcp.f32 %v4194_v2  ;;  %v8081_v16 = vld [vmem:[%s14111_s13 + $0x138] sm:$0xff]  ;;  %v8082_v14 = vld [vmem:[%s14111_s13 + $0x140] sm:$0xff]  ;;  %v14264_v2 = vld [vmem:[#allocation26_spill] sm:$0xff] }
 0x840   :  { %9177 = vmatmul.mubr.msk.f32.gmra.mrb[70].mxu1 %vm895_vm2, %v8079_v42  ;;  %v4193_v36 = vadd.f32 1.0, %v9910_v50  ;;  %v14266_v3 = vld [vmem:[#allocation11_spill] sm:$0xff] }
 0x841   :  { %v4219_v27 = vadd.f32 %v12171_v59, %v3471_v30  ;;  %v12424_v34 = vmul.f32 %v14222_v32, %v12415_v48  ;;  %9179 = vmatprep.mubr.msk.f32.mxu1 %vm895_vm2, %v8080_v10  ;;  %v8089_v30 = vld [vmem:[%s14111_s13 + $0x178] sm:$0xff] }
 0x842   :  { %9917 = vrcp.f32 %v4193_v36 }
 0x843   :  { %v12434_v13 = vadd.f32 %v12103_v53, %v4219_v27  ;;  %4240 = vadd.xlane.f32.xlu1 %v12424_v34  ;;  %v12437_v59 = vpop.permute.xlu0 %4905  ;;  %v9912_v51 = vpop.eup %9911 }
 0x844   :  { %9180 = vmatmul.mubr.msk.f32.gmra.mrb[72].mxu1 %vm895_vm2, %v8081_v16  ;;  %v4204_v62 = vmul.f32 %v9912_v51, %v12354_v26 }
 0x845   :  { %9182 = vmatprep.mubr.msk.f32.mxu1 %vm895_vm2, %v8082_v14  ;;  %v4237_v51 = vmul.f32 %v14222_v32, %v12434_v13 }
 0x846   :  { %v4208_v29 = vadd.f32 %v4204_v62, %v14264_v2  ;;  %v8127_v62 = vld [vmem:[%s14111_s13 + $0x328] sm:$0xff]  ;;  %v8133_v2 = vld [vmem:[%s14111_s13 + $0x358] sm:$0xff] }
 0x847   :  { %v3360_v53 = vpop.permute.xlu0 %3359 }
 0x848   :  { %v9914_v63 = vpop.eup %9913  ;;  %v3456_v52 = vadd.f32 %v12126_v47, %v3360_v53  ;;  %9183 = vmatmul.mubr.msk.f32.gmra.mrb[74].mxu1 %vm895_vm2, %v8083_v8 }
 0x849   :  { %9185 = vmatprep.mubr.msk.f32.mxu1 %vm895_vm2, %v8084_v21  ;;  %v9916_v31 = vpop.eup %9915  ;;  %v4207_v47 = vmul.f32 %v9914_v63, %v12364_v33  ;;  %v4247_v63 = vmul.f32 %v12424_v34, %v12424_v34  ;;  %v8125_v34 = vld [vmem:[%s14111_s13 + $0x318] sm:$0xff] }
 0x84a   :  { %v4216_v38 = vadd.f32 %v12169_v12, %v3456_v52  ;;  %v4206_v43 = vmul.f32 %v9916_v31, %v12349_v41  ;;  %v8087_v12 = vld [vmem:[%s14111_s13 + $0x168] sm:$0xff]  ;;  %v14265_v41 = vld [vmem:[#allocation27_spill] sm:$0xff]  ;;  %v10169_v31 = vld [vmem:[%s14203_s25] sm:$0xff]  }
 0x84b   :  { %v3370_v22 = vpop.permute.xlu0 %3369  ;;  %v4211_v60 = vadd.f32 %v4207_v47, %v14265_v41  ;;  %v8123_v52 = vld [vmem:[%s14111_s13 + $0x308] sm:$0xff]  ;;  %v8128_v47 = vld [vmem:[%s14111_s13 + $0x330] sm:$0xff] }
 0x84c   :  { %v12460_v11 = vadd.f32 %v4216_v38, %v12101_v17  ;;  %v3466_v54 = vadd.f32 %v12130_v57, %v3370_v22  ;;  %9186 = vmatmul.mubr.msk.f32.gmra.mrb[76].mxu1 %vm895_vm2, %v8085_v7  ;;  %v9918_v5 = vpop.eup %9917  ;;  %v8088_v17 = vld [vmem:[%s14111_s13 + $0x170] sm:$0xff]  ;;  %v4210_v10 = vadd.f32 %v4206_v43, %v14266_v3  ;;  %v4249_v38 = vmul.f32 %v4237_v51, %v4237_v51  ;;  %v10170_v22 = vld [vmem:[%s14203_s25 + $0x8] sm:$0xff]   ;;  %v10172_v43 = vld [vmem:[%s14203_s25 + $0x18] sm:$0xff]  }
 0x84d   :  { %9188 = vmatprep.mubr.msk.f32.mxu1 %vm895_vm2, %v8086_v28  ;;  %v4205_v57 = vmul.f32 %v9918_v5, %v12377_v18  ;;  %v14267_v18 = vld [vmem:[#allocation28_spill] sm:$0xff]  ;;  %v12497_v36 = vmul.f32 %v4211_v60, %v10732_v19  ;;  %v8124_v7 = vld [vmem:[%s14111_s13 + $0x310] sm:$0xff]  ;;  %v8129_v5 = vld [vmem:[%s14111_s13 + $0x338] sm:$0xff] }
 0x84e   :  { %v4218_v26 = vadd.f32 %v12167_v23, %v3466_v54  ;;  %v4234_v33 = vmul.f32 %v14222_v32, %v12460_v11  ;;  %v12503_v21 = vmul.f32 %v4210_v10, %v10732_v19  ;;  %v8126_v28 = vld [vmem:[%s14111_s13 + $0x320] sm:$0xff]  ;;  %v10171_v54 = vld [vmem:[%s14203_s25 + $0x10] sm:$0xff]   ;;  %v8135_v60 = vld [vmem:[%s14111_s13 + $0x368] sm:$0xff] }
 0x84f   :  { %v4209_v50 = vadd.f32 %v4205_v57, %v14267_v18  ;;  %14270 = vst [vmem:[#allocation10_spill] sm:$0xff] %v12497_v36  ;;  %v8132_v57 = vld [vmem:[%s14111_s13 + $0x350] sm:$0xff]  ;;  %v10176_v3 = vld [vmem:[%s14203_s25 + $0x38] sm:$0xff]   ;;  %v3487_v18 = vpop.permute.xlu0 %3486 }
 0x850   :  { %v12479_v42 = vadd.f32 %v12094_v58, %v4218_v26  ;;  %9189 = vmatmul.mubr.msk.f32.gmra.mrb[78].mxu1 %vm895_vm2, %v8087_v12  ;;  %4238 = vadd.xlane.f32.xlu0 %v4234_v33  ;;  %v4246_v23 = vmul.f32 %v4234_v33, %v4234_v33  ;;  %v12491_v58 = vmul.f32 %v4208_v29, %v10732_v19  ;;  %v10173_v12 = vld [vmem:[%s14203_s25 + $0x20] sm:$0xff]   ;;  %v10174_v33 = vld [vmem:[%s14203_s25 + $0x28] sm:$0xff]   ;;  %v10175_v41 = vld [vmem:[%s14203_s25 + $0x30] sm:$0xff]  }
 0x851   :  { %9191 = vmatprep.mubr.msk.f32.mxu1 %vm895_vm2, %v8088_v17  ;;  %v12494_v16 = vmul.f32 %v4209_v50, %v10732_v19  ;;  %14271 = vst [vmem:[#allocation9_spill] sm:$0xff] %v12503_v21  ;;  %v9558_v53 = vpack.c.bf16 %v12497_v36, %v12503_v21  ;;  %v8130_v26 = vld [vmem:[%s14111_s13 + $0x340] sm:$0xff]  ;;  %v8131_v17 = vld [vmem:[%s14111_s13 + $0x348] sm:$0xff]  ;;  %v8137_v10 = vld [vmem:[%s14111_s13 + $0x378] sm:$0xff]  ;;  %v3492_v50 = vpop.permute.xlu1 %3491 }
 0x852   :  { %4250 = vadd.xlane.f32.xlu1 %v4246_v23  ;;  %v4236_v27 = vmul.f32 %v14222_v32, %v12479_v42  ;;  %14268 = vst [vmem:[#allocation21_spill] sm:$0xff] %v12491_v58  ;;  %v8134_v29 = vld [vmem:[%s14111_s13 + $0x360] sm:$0xff]  ;;  %v8136_v23 = vld [vmem:[%s14111_s13 + $0x370] sm:$0xff] }
 0x853   :  { %14269 = vst [vmem:[#allocation20_spill] sm:$0xff] %v12494_v16  ;;  %v9554_v8 = vpack.c.bf16 %v12494_v16, %v12491_v58 }
 0x854   :  { %9192 = vmatmul.mubr.msk.f32.gmra.mrb[80].mxu1 %vm895_vm2, %v8089_v30  ;;  %4242 = vadd.xlane.f32.xlu0 %v4236_v27  ;;  %v4248_v14 = vmul.f32 %v4236_v27, %v4236_v27  ;;  %v10177_v30 = vld [vmem:[%s14204_s23] sm:$0xff]   ;;  %v3497_v27 = vpop.permute.xlu0 %3496 }
 0x855   :  { %9555 = vmatprep.subr.bf16.mxu0 %v9554_v8 }
 0x856   :  { %4254 = vadd.xlane.f32.xlu1 %v4248_v14  ;;  %9557 = vmatpush3.bf16.msra.mxu0 %v9554_v8  ;;  %v3502_v14 = vpop.permute.xlu1 %3501  ;;  %v3593_v8 = vadd.f32 %v12138_v0, %v3497_v27 }
 0x857   :  { %9559 = vmatprep.subr.bf16.mxu0 %v9558_v53 }
 0x858   :  { %4244 = vadd.xlane.f32.xlu0 %v4237_v51  ;;  %v3583_v51 = vadd.f32 %v12134_v49, %v3487_v18 }
 0x85a   :  { %9561 = vmatpush3.bf16.msra.mxu0 %v9558_v53 }
 0x85b   :  { %9254 = vmatprep.subr.bf16.mxu0 %v10169_v31 }
 0x85c   :  { %4252 = vadd.xlane.f32.xlu0 %v4247_v63  ;;  %v3598_v63 = vadd.f32 %v12136_v46, %v3502_v14 }
 0x85d   :  { %9203 = vmatmul.mubr.msk.f32.vlgmr.msra.gmra.mrb[70].mxu0 %vm895_vm2, %v8123_v52 }
 0x85e   :  { %9205 = vmatprep.mubr.msk.f32.mxu0 %vm895_vm2, %v8124_v7  ;;  %9255 = vmatpush3.bf16.msra.mxu0 %v10169_v31  ;;  %v3588_v31 = vadd.f32 %v12132_v45, %v3492_v50 }
 0x85f   :  { %9256 = vmatprep.subr.bf16.mxu0 %v10170_v22 }
 0x860   :  { %4256 = vadd.xlane.f32.xlu0 %v4249_v38 }
 0x861   :  { %9206 = vmatmul.mubr.msk.f32.gmra.mrb[96].mxu0 %vm895_vm2, %v8125_v34 }
 0x862   :  { %9208 = vmatprep.mubr.msk.f32.mxu0 %vm895_vm2, %v8126_v28  ;;  %9257 = vmatpush3.bf16.msra.mxu0 %v10170_v22  ;;  %v14272_v28 = vld [vmem:[#allocation8_spill] sm:$0xff] }
 0x863   :  { %9258 = vmatprep.subr.bf16.mxu0 %v10171_v54 }
 0x865   :  { %9209 = vmatmul.mubr.msk.f32.gmra.mrb[98].mxu0 %vm895_vm2, %v8127_v62 }
 0x866   :  { %9211 = vmatprep.mubr.msk.f32.mxu0 %vm895_vm2, %v8128_v47  ;;  %9259 = vmatpush3.bf16.msra.mxu0 %v10171_v54  ;;  %v14273_v54 = vld [vmem:[#allocation23_spill] sm:$0xff] }
 0x867   :  { %9260 = vmatprep.subr.bf16.mxu0 %v10172_v43 }
 0x869   :  { %9212 = vmatmul.mubr.msk.f32.gmra.mrb[100].mxu0 %vm895_vm2, %v8129_v5 }
 0x86a   :  { %9261 = vmatpush3.bf16.msra.mxu0 %v10172_v43  ;;  %9214 = vmatprep.mubr.msk.f32.mxu0 %vm895_vm2, %v8130_v26  ;;  %v14274_v43 = vld [vmem:[#allocation22_spill] sm:$0xff] }
 0x86b   :  { %9262 = vmatprep.subr.bf16.mxu0 %v10173_v12 }
 0x86d   :  { %9215 = vmatmul.mubr.msk.f32.gmra.mrb[102].mxu0 %vm895_vm2, %v8131_v17 }
 0x86e   :  { %9263 = vmatpush3.bf16.msra.mxu0 %v10173_v12  ;;  %9217 = vmatprep.mubr.msk.f32.mxu0 %vm895_vm2, %v8132_v57  ;;  %v14275_v12 = vld [vmem:[#allocation25_spill] sm:$0xff] }
 0x86f   :  { %9264 = vmatprep.subr.bf16.mxu0 %v10174_v33 }
 0x871   :  { %9218 = vmatmul.mubr.msk.f32.gmra.mrb[104].mxu0 %vm895_vm2, %v8133_v2 }
 0x872   :  { %9265 = vmatpush3.bf16.msra.mxu0 %v10174_v33  ;;  %9220 = vmatprep.mubr.msk.f32.mxu0 %vm895_vm2, %v8134_v29 }
 0x873   :  { %9266 = vmatprep.subr.bf16.mxu0 %v10175_v41 }
 0x875   :  { %9221 = vmatmul.mubr.msk.f32.gmra.mrb[106].mxu0 %vm895_vm2, %v8135_v60 }
 0x876   :  { %9267 = vmatpush3.bf16.msra.mxu0 %v10175_v41  ;;  %9223 = vmatprep.mubr.msk.f32.mxu0 %vm895_vm2, %v8136_v23 }
 0x877   :  { %9268 = vmatprep.subr.bf16.mxu0 %v10176_v3 }
 0x879   :  { %9224 = vmatmul.mubr.msk.f32.gmra.mrb[108].mxu0 %vm895_vm2, %v8137_v10 }
 0x87a   :  { %9269 = vmatpush3.bf16.msra.mxu0 %v10176_v3 }
 0x87b   :  { %9310 = vmatprep.subr.bf16.mxu0 %v10177_v30 }
 0x903   :  { %v9136_v53 = vpop.f32.mrb[64].mxu1 }
 0x904   :  { %v4376_v52 = vadd.f32 %v9136_v53, %v3593_v8  ;;  %v3808_v7 = vpop.f32.mrb[65].mxu1 }
 0x905   :  { %v4374_v38 = vadd.f32 %v3808_v7, %v3583_v51  ;;  %v9137_v34 = vpop.f32.mrb[66].mxu1 }
 0x906   :  { %v12603_v22 = vadd.f32 %v14272_v28, %v4376_v52  ;;  %v4377_v62 = vadd.f32 %v9137_v34, %v3598_v63  ;;  %v3811_v47 = vpop.f32.mrb[67].mxu1  ;;  %v10179_v34 = vld [vmem:[%s14204_s23 + $0x10] sm:$0xff]  }
 0x907   :  { %v12606_v5 = vadd.f32 %v4374_v38, %v14273_v54  ;;  %v4375_v0 = vadd.f32 %v3811_v47, %v3588_v31  ;;  %v10178_v38 = vld [vmem:[%s14204_s23 + $0x8] sm:$0xff]   ;;  %v8050_v47 = vld [vmem:[%s14117_s19 + $0x20] sm:$0xff] }
 0x908   :  { %v12609_v49 = vadd.f32 %v14274_v43, %v4377_v62  ;;  %v4394_v57 = vmul.f32 %v14222_v32, %v12603_v22  ;;  %v10180_v43 = vld [vmem:[%s14204_s23 + $0x18] sm:$0xff]  }
 0x909   :  { %v12612_v46 = vadd.f32 %v4375_v0, %v14275_v12  ;;  %v4392_v45 = vmul.f32 %v14222_v32, %v12606_v5 }
 0x90a   :  { %v4395_v29 = vmul.f32 %v14222_v32, %v12609_v49  ;;  %v4406_v27 = vmul.f32 %v4394_v57, %v4394_v57 }
 0x90b   :  { %4396 = vadd.xlane.f32.xlu1 %v4392_v45  ;;  %v4393_v26 = vmul.f32 %v14222_v32, %v12612_v46  ;;  %v12618_v33 = vpop.f32.mrb[58].mxu1  ;;  %v4404_v60 = vmul.f32 %v4392_v45, %v4392_v45 }
 0x90c   :  { %v12620_v17 = vpop.f32.mrb[59].mxu1  ;;  %v4407_v51 = vmul.f32 %v4395_v29, %v4395_v29 }
 0x90d   :  { %4398 = vadd.xlane.f32.xlu0 %v4393_v26  ;;  %v4405_v3 = vmul.f32 %v4393_v26, %v4393_v26 }
 0x90f   :  { %4400 = vadd.xlane.f32.xlu1 %v4394_v57  ;;  %v12624_v2 = vpop.f32.mrb[68].mxu1  ;;  %v10181_v57 = vld [vmem:[%s14204_s23 + $0x20] sm:$0xff]  }
 0x910   :  { %v12628_v41 = vpop.f32.mrb[69].mxu1 }
 0x911   :  { %4402 = vadd.xlane.f32.xlu0 %v4395_v29  ;;  %v10182_v29 = vld [vmem:[%s14204_s23 + $0x28] sm:$0xff]  }
 0x913   :  { %v9178_v23 = vpop.f32.mrb[70].mxu1  ;;  %4408 = vadd.xlane.f32.xlu1 %v4404_v60  ;;  %v8054_v60 = vld [vmem:[%s14118_s20 + $0x20] sm:$0xff] }
 0x914   :  { %v4786_v10 = vadd.f32 %v9178_v23, %v12343_v55  ;;  %v4780_v18 = vpop.f32.mrb[71].mxu1  ;;  %v8055_v23 = vld [vmem:[%s14118_s20 + $0x28] sm:$0xff] }
 0x915   :  { %v4781_v50 = vadd.f32 %v4780_v18, %v12371_v61  ;;  %4410 = vadd.xlane.f32.xlu0 %v4405_v3  ;;  %v10183_v18 = vld [vmem:[%s14204_s23 + $0x30] sm:$0xff]  }
 0x917   :  { %v5448_v14 = vpack.c.bf16 %v4786_v10, %v4781_v50  ;;  %v9181_v8 = vpop.f32.mrb[72].mxu1  ;;  %4412 = vadd.xlane.f32.xlu1 %v4406_v27  ;;  %v8056_v50 = vld [vmem:[%s14118_s20 + $0x30] sm:$0xff]  ;;  %v8057_v27 = vld [vmem:[%s14118_s20 + $0x38] sm:$0xff] }
 0x918   :  { %v4796_v53 = vadd.f32 %v9181_v8, %v12345_v15  ;;  %v4790_v63 = vpop.f32.mrb[73].mxu1 }
 0x919   :  { %v4791_v52 = vadd.f32 %v4790_v63, %v12381_v44  ;;  %9270 = vmatprep.mubr.bf16.mxu0 %v5448_v14  ;;  %4414 = vadd.xlane.f32.xlu0 %v4407_v51  ;;  %v10184_v51 = vld [vmem:[%s14204_s23 + $0x38] sm:$0xff]   ;;  %v8063_v63 = vld [vmem:[%s14117_s19 + $0xa8] sm:$0xff] }
 0x91b   :  { %v5449_v7 = vpack.c.bf16 %v4796_v53, %v4791_v52  ;;  %v12634_v31 = vpop.f32.mrb[74].mxu1  ;;  %v8062_v53 = vld [vmem:[%s14117_s19 + $0xa0] sm:$0xff] }
 0x91c   :  { %v12636_v55 = vpop.f32.mrb[75].mxu1 }
 0x91d   :  { %9271 = vmatmul.mubr.bf16.vlgmr.msra.gmra.mrb[112].mxu0 %v5449_v7 }
 0x91e   :  { %9311 = vmatpush3.bf16.msra.mxu0 %v10177_v30 }
 0x91f   :  { %v12638_v61 = vpop.f32.mrb[76].mxu1  ;;  %9312 = vmatprep.subr.bf16.mxu0 %v10178_v38 }
 0x920   :  { %v12643_v15 = vpop.f32.mrb[77].mxu1 }
 0x922   :  { %9313 = vmatpush3.bf16.msra.mxu0 %v10178_v38 }
 0x923   :  { %v9190_v44 = vpop.f32.mrb[78].mxu1  ;;  %9314 = vmatprep.subr.bf16.mxu0 %v10179_v34 }
 0x924   :  { %v4826_v28 = vadd.f32 %v9190_v44, %v12356_v24  ;;  %v4820_v62 = vpop.f32.mrb[79].mxu1 }
 0x925   :  { %v4821_v30 = vadd.f32 %v4820_v62, %v12392_v35  ;;  %v8052_v35 = vld [vmem:[%s14117_s19 + $0x30] sm:$0xff] }
 0x926   :  { %9315 = vmatpush3.bf16.msra.mxu0 %v10179_v34  ;;  %v8064_v34 = vld [vmem:[%s14117_s19 + $0xb0] sm:$0xff] }
 0x927   :  { %v5450_v54 = vpack.c.bf16 %v4826_v28, %v4821_v30  ;;  %v9193_v0 = vpop.f32.mrb[80].mxu1  ;;  %9316 = vmatprep.subr.bf16.mxu0 %v10180_v43  ;;  %v8065_v28 = vld [vmem:[%s14117_s19 + $0xb8] sm:$0xff] }
 0x928   :  { %v4836_v12 = vadd.f32 %v9193_v0, %v12366_v20  ;;  %v4830_v45 = vpop.f32.mrb[81].mxu1  ;;  %4292 = vperm.xlu1 %9618, %v8050_v47   ;;  %v8051_v20 = vld [vmem:[%s14117_s19 + $0x28] sm:$0xff] }
 0x929   :  { %v4831_v24 = vadd.f32 %v4830_v45, %v12403_v56  ;;  %9274 = vmatprep.mubr.bf16.mxu0 %v5450_v54  ;;  %v8053_v56 = vld [vmem:[%s14117_s19 + $0x38] sm:$0xff]  ;;  %v8067_v0 = vld [vmem:[%s14118_s20 + $0xa8] sm:$0xff] }
 0x92a   :  { %9317 = vmatpush3.bf16.msra.mxu0 %v10180_v43  ;;  %v8151_v45 = vld [vmem:[%s14112_s14 + $0x368] sm:$0xff] }
 0x92b   :  { %v5451_v26 = vpack.c.bf16 %v4836_v12, %v4831_v24  ;;  %9318 = vmatprep.subr.bf16.mxu0 %v10181_v57  ;;  %v8150_v12 = vld [vmem:[%s14112_s14 + $0x360] sm:$0xff]  ;;  %v8152_v24 = vld [vmem:[%s14112_s14 + $0x370] sm:$0xff] }
 0x92c   :  { %4302 = vperm.xlu1 %9618, %v8052_v35   ;;  %v8153_v35 = vld [vmem:[%s14112_s14 + $0x378] sm:$0xff] }
 0x92d   :  { %9275 = vmatmul.mubr.bf16.gmra.mrb[116].mxu0 %v5451_v26  ;;  %v8098_v26 = vld [vmem:[%s14112_s14 + $0x140] sm:$0xff] }
 0x92e   :  { %9319 = vmatpush3.bf16.msra.mxu0 %v10181_v57  ;;  %v8099_v57 = vld [vmem:[%s14112_s14 + $0x148] sm:$0xff] }
 0x92f   :  { %4297 = vperm.xlu0 %9617, %v8051_v20   ;;  %9320 = vmatprep.subr.bf16.mxu0 %v10182_v29 }
 0x930   :  { %4307 = vperm.xlu1 %9618, %v8053_v56   ;;  %v12679_v3 = vpop.f32.mrb[70].mxu0 }
 0x931   :  { %v12681_v10 = vpop.f32.mrb[71].mxu0 }
 0x932   :  { %9321 = vmatpush3.bf16.msra.mxu0 %v10182_v29  ;;  %v8100_v29 = vld [vmem:[%s14112_s14 + $0x150] sm:$0xff] }
 0x933   :  { %4316 = vperm.xlu0 %9617, %v8054_v60   ;;  %9322 = vmatprep.subr.bf16.mxu0 %v10183_v18 }
 0x934   :  { %4321 = vperm.xlu1 %9618, %v8055_v23   ;;  %v12692_v14 = vpop.f32.mrb[96].mxu0  ;;  %v8101_v23 = vld [vmem:[%s14112_s14 + $0x158] sm:$0xff] }
 0x935   :  { %v12694_v8 = vpop.f32.mrb[97].mxu0 }
 0x936   :  { %9323 = vmatpush3.bf16.msra.mxu0 %v10183_v18 }
 0x937   :  { %4326 = vperm.xlu0 %9617, %v8056_v50   ;;  %9324 = vmatprep.subr.bf16.mxu0 %v10184_v51 }
 0x938   :  { %4331 = vperm.xlu1 %9618, %v8057_v27   ;;  %v9210_v52 = vpop.f32.mrb[98].mxu0 }
 0x939   :  { %v5093_v7 = vadd.f32 %v9210_v52, %v12379_v25  ;;  %v5087_v38 = vpop.f32.mrb[99].mxu0 }
 0x93a   :  { %9325 = vmatpush3.bf16.msra.mxu0 %v10184_v51  ;;  %v5088_v44 = vadd.f32 %v5087_v38, %v12418_v6  ;;  %v8066_v6 = vld [vmem:[%s14118_s20 + $0xa0] sm:$0xff]  ;;  %v8091_v38 = vld [vmem:[%s14112_s14 + $0x108] sm:$0xff] }
 0x93b   :  { %4450 = vperm.xlu0 %9617, %v8062_v53   ;;  %v8146_v51 = vld [vmem:[%s14112_s14 + $0x340] sm:$0xff]  ;;  %v8147_v53 = vld [vmem:[%s14112_s14 + $0x348] sm:$0xff] }
 0x93c   :  { %4455 = vperm.xlu1 %9618, %v8063_v63   ;;  %v5452_v62 = vpack.c.bf16 %v5093_v7, %v5088_v44  ;;  %v9213_v30 = vpop.f32.mrb[100].mxu0  ;;  %v8090_v7 = vld [vmem:[%s14112_s14 + $0x100] sm:$0xff]  ;;  %v8148_v44 = vld [vmem:[%s14112_s14 + $0x350] sm:$0xff] }
 0x93d   :  { %v5103_v47 = vadd.f32 %v9213_v30, %v12387_v37  ;;  %v5097_v54 = vpop.f32.mrb[101].mxu0  ;;  %v8068_v37 = vld [vmem:[%s14118_s20 + $0xb0] sm:$0xff]  ;;  %v8138_v30 = vld [vmem:[%s14112_s14 + $0x300] sm:$0xff] }
 0x93e   :  { %v5098_v25 = vadd.f32 %v5097_v54, %v12437_v59  ;;  %9278 = vmatprep.mubr.bf16.mxu0 %v5452_v62  ;;  %v8069_v59 = vld [vmem:[%s14118_s20 + $0xb8] sm:$0xff]  ;;  %v8140_v54 = vld [vmem:[%s14112_s14 + $0x310] sm:$0xff] }
 0x93f   :  { %4460 = vperm.xlu0 %9617, %v8064_v34   ;;  %v8149_v34 = vld [vmem:[%s14112_s14 + $0x358] sm:$0xff] }
 0x940   :  { %4465 = vperm.xlu1 %9618, %v8065_v28   ;;  %v5453_v43 = vpack.c.bf16 %v5103_v47, %v5098_v25  ;;  %v12745_v20 = vpop.f32.mrb[102].mxu0  ;;  %v8092_v28 = vld [vmem:[%s14112_s14 + $0x110] sm:$0xff]  ;;  %v8093_v62 = vld [vmem:[%s14112_s14 + $0x118] sm:$0xff]  ;;  %v8139_v47 = vld [vmem:[%s14112_s14 + $0x308] sm:$0xff] }
 0x941   :  { %v12747_v56 = vpop.f32.mrb[103].mxu0  ;;  %v8141_v25 = vld [vmem:[%s14112_s14 + $0x318] sm:$0xff] }
 0x942   :  { %9279 = vmatmul.mubr.bf16.gmra.mrb[120].mxu0 %v5453_v43  ;;  %v8202_v43 = vld [vmem:[%s14115_s17 + $0x40] sm:$0xff] }
 0x943   :  { %4474 = vperm.xlu0 %9617, %v8066_v6   ;;  %v8170_v6 = vld [vmem:[%s14113_s15 + $0x40] sm:$0xff] }
 0x944   :  { %4479 = vperm.xlu1 %9618, %v8067_v0   ;;  %v12752_v60 = vpop.f32.mrb[104].mxu0  ;;  %9234 = vmatprep.mubr.msk.f32.mxu1 %vm895_vm2, %v8170_v6  ;;  %v8203_v0 = vld [vmem:[%s14115_s17 + $0x48] sm:$0xff] }
 0x945   :  { %v12757_v18 = vpop.f32.mrb[105].mxu0 }
 0x947   :  { %4484 = vperm.xlu0 %9617, %v8068_v37   ;;  %v8204_v37 = vld [vmem:[%s14115_s17 + $0x50] sm:$0xff] }
 0x948   :  { %4489 = vperm.xlu1 %9618, %v8069_v59   ;;  %v12759_v50 = vpop.f32.mrb[106].mxu0  ;;  %v8206_v59 = vld [vmem:[%s14116_s18 + $0x40] sm:$0xff] }
 0x949   :  { %v12761_v27 = vpop.f32.mrb[107].mxu0 }
 0x94b   :  { %4935 = vperm.xlu0 %9617, %v8150_v12   ;;  %v8208_v12 = vld [vmem:[%s14116_s18 + $0x50] sm:$0xff] }
 0x94c   :  { %4940 = vperm.xlu1 %9618, %v8151_v45   ;;  %v12769_v63 = vpop.f32.mrb[108].mxu0  ;;  %v8207_v45 = vld [vmem:[%s14116_s18 + $0x48] sm:$0xff] }
 0x94d   :  { %v12771_v52 = vpop.f32.mrb[109].mxu0 }
 0x94f   :  { %4945 = vperm.xlu0 %9617, %v8152_v24   ;;  %v8214_v24 = vld [vmem:[%s14115_s17 + $0xc0] sm:$0xff] }
 0x950   :  { %4950 = vperm.xlu1 %9618, %v8153_v35   ;;  %v8205_v35 = vld [vmem:[%s14115_s17 + $0x58] sm:$0xff] }
 0x953   :  { %4608 = vperm.xlu0 %9617, %v8098_v26   ;;  %v4239_v26 = vpop.xlane.xlu0 %4238 }
 0x954   :  { %4613 = vperm.xlu1 %9618, %v8099_v57   ;;  %v8218_v57 = vld [vmem:[%s14116_s18 + $0xc0] sm:$0xff] }
 0x957   :  { %4618 = vperm.xlu0 %9617, %v8100_v29   ;;  %v8209_v29 = vld [vmem:[%s14116_s18 + $0x58] sm:$0xff] }
 0x958   :  { %4623 = vperm.xlu1 %9618, %v8101_v23   ;;  %v4243_v23 = vpop.xlane.xlu0 %4242 }
 0x95b   :  { %4915 = vperm.xlu0 %9617, %v8146_v51   ;;  %v8215_v51 = vld [vmem:[%s14115_s17 + $0xc8] sm:$0xff] }
 0x95c   :  { %4920 = vperm.xlu1 %9618, %v8147_v53   ;;  %v8219_v53 = vld [vmem:[%s14116_s18 + $0xc8] sm:$0xff] }
 0x95f   :  { %4568 = vperm.xlu0 %9617, %v8090_v7   ;;  %v4241_v7 = vpop.xlane.xlu1 %4240 }
 0x960   :  { %4573 = vperm.xlu1 %9618, %v8091_v38   ;;  %v4245_v38 = vpop.xlane.xlu0 %4244 }
 0x963   :  { %4925 = vperm.xlu0 %9617, %v8148_v44   ;;  %v4251_v44 = vpop.xlane.xlu1 %4250 }
 0x964   :  { %4930 = vperm.xlu1 %9618, %v8149_v34   ;;  %v4253_v34 = vpop.xlane.xlu0 %4252 }
 0x967   :  { %4578 = vperm.xlu0 %9617, %v8092_v28   ;;  %v14276_v28 = vld [vmem:[#allocation29_spill] sm:$0xff] }
 0x968   :  { %4583 = vperm.xlu1 %9618, %v8093_v62   ;;  %v4258_v62 = vmul.f32 %v4239_v26, %v14276_v28  ;;  %v12849_v6 = vmul.f32 %v4243_v23, %v14276_v28 }
 0x96b   :  { %4875 = vperm.xlu0 %9617, %v8138_v30   ;;  %v4255_v30 = vpop.xlane.xlu1 %4254 }
 0x96c   :  { %4880 = vperm.xlu1 %9618, %v8139_v47   ;;  %v12845_v47 = vmul.f32 %v4241_v7, %v14276_v28 }
 0x96f   :  { %4885 = vperm.xlu0 %9617, %v8140_v54   ;;  %v4266_v54 = vmul.f32 %v4258_v62, %v4258_v62 }
 0x970   :  { %4890 = vperm.xlu1 %9618, %v8141_v25   ;;  %v4262_v25 = vmul.f32 %v4251_v44, %v14276_v28 }
 0x973   :  { %5784 = vperm.xlu0 %9617, %v8203_v0   ;;  %v4257_v0 = vpop.xlane.xlu0 %4256 }
 0x974   :  { %5779 = vperm.xlu1 %9618, %v8202_v43   ;;  %v4263_v43 = vmul.f32 %v4253_v34, %v14276_v28 }
 0x977   :  { %5789 = vperm.xlu0 %9617, %v8204_v37  }
 0x978   :  { %5803 = vperm.xlu1 %9618, %v8206_v59   ;;  %v4267_v59 = vmul.f32 %v12845_v47, %v12845_v47 }
 0x97b   :  { %5813 = vperm.xlu0 %9617, %v8208_v12   ;;  %v4270_v12 = vsub.f32 %v4262_v25, %v4266_v54 }
 0x97c   :  { %5808 = vperm.xlu1 %9618, %v8207_v45   ;;  %v4268_v45 = vmul.f32 %v12849_v6, %v12849_v6 }
 0x97f   :  { %5933 = vperm.xlu0 %9617, %v8214_v24   ;;  %v4264_v24 = vmul.f32 %v4255_v30, %v14276_v28 }
 0x980   :  { %5794 = vperm.xlu1 %9618, %v8205_v35   ;;  %v12858_v35 = vmul.f32 %v4245_v38, %v14276_v28 }
 0x982   :  { %v4269_v7 = vmul.f32 %v12858_v35, %v12858_v35 }
 0x983   :  { %5957 = vperm.xlu0 %9617, %v8218_v57   ;;  %v4271_v57 = vsub.f32 %v4263_v43, %v4267_v59 }
 0x984   :  { %5818 = vperm.xlu1 %9618, %v8209_v29   ;;  %v4265_v29 = vmul.f32 %v4257_v0, %v14276_v28 }
 0x985   :  { %v4279_v34 = vadd.f32 1e-05, %v4271_v57 }
 0x986   :  { %v4273_v54 = vsub.f32 %v4265_v29, %v4269_v7 }
 0x988   :  { %5938 = vperm.xlu1 %9618, %v8215_v51   ;;  %v4278_v51 = vadd.f32 1e-05, %v4270_v12  ;;  %v4281_v38 = vadd.f32 1e-05, %v4273_v54 }
 0x98a   :  { %9919 = vrsqrt.f32 %v4278_v51 }
 0x98b   :  { %9921 = vrsqrt.f32 %v4279_v34 }
 0x98c   :  { %5962 = vperm.xlu1 %9618, %v8219_v53   ;;  %v4272_v53 = vsub.f32 %v4264_v24, %v4268_v45 }
 0x98e   :  { %v4280_v16 = vadd.f32 1e-05, %v4272_v53 }
 0x990   :  { %9923 = vrsqrt.f32 %v4280_v16 }
 0x991   :  { %9925 = vrsqrt.f32 %v4281_v38 }
 0x994   :  { %v9920_v53 = vpop.eup %9919 }
 0x998   :  { %v4397_v37 = vpop.xlane.xlu1 %4396 }
 0x999   :  { %v12864_v21 = vmul.f32 %v4397_v37, %v14276_v28 }
 0x99a   :  { %v4399_v26 = vpop.xlane.xlu0 %4398 }
 0x99b   :  { %v12867_v0 = vmul.f32 %v4399_v26, %v14276_v28  ;;  %v4424_v12 = vmul.f32 %v12864_v21, %v12864_v21 }
 0x99c   :  { %v4401_v23 = vpop.xlane.xlu1 %4400 }
 0x99d   :  { %v12873_v45 = vmul.f32 %v4401_v23, %v14276_v28  ;;  %v4425_v37 = vmul.f32 %v12867_v0, %v12867_v0 }
 0x99e   :  { %v4403_v44 = vpop.xlane.xlu0 %4402 }
 0x99f   :  { %v12879_v16 = vmul.f32 %v4403_v44, %v14276_v28  ;;  %v4426_v7 = vmul.f32 %v12873_v45, %v12873_v45 }
 0x9a0   :  { %v4409_v25 = vpop.xlane.xlu1 %4408 }
 0x9a1   :  { %v4420_v59 = vmul.f32 %v4409_v25, %v14276_v28  ;;  %v4274_v25 = vsub.f32 %v12460_v11, %v4258_v62  ;;  %v4427_v38 = vmul.f32 %v12879_v16, %v12879_v16 }
 0x9a2   :  { %v4411_v30 = vpop.xlane.xlu0 %4410 }
 0x9a3   :  { %v4421_v24 = vmul.f32 %v4411_v30, %v14276_v28  ;;  %v4428_v26 = vsub.f32 %v4420_v59, %v4424_v12  ;;  %v9922_v30 = vpop.eup %9921  ;;  %v4286_v59 = vmul.f32 %v9920_v53, %v4274_v25 }
 0x9a4   :  { %v4413_v43 = vpop.xlane.xlu1 %4412  ;;  %v9924_v12 = vpop.eup %9923 }
 0x9a5   :  { %v4422_v51 = vmul.f32 %v4413_v43, %v14276_v28  ;;  %v4429_v34 = vsub.f32 %v4421_v24, %v4425_v37  ;;  %v4436_v58 = vadd.f32 1e-05, %v4428_v26  ;;  %v4275_v43 = vsub.f32 %v12415_v48, %v12845_v47  ;;  %v9926_v62 = vpop.eup %9925 }
 0x9a6   :  { %v4415_v29 = vpop.xlane.xlu0 %4414  ;;  %v4277_v26 = vsub.f32 %v12434_v13, %v12858_v35 }
 0x9a7   :  { %v4423_v23 = vmul.f32 %v4415_v29, %v14276_v28  ;;  %v4430_v44 = vsub.f32 %v4422_v51, %v4426_v7  ;;  %v4437_v4 = vadd.f32 1e-05, %v4429_v34  ;;  %v4276_v29 = vsub.f32 %v12479_v42, %v12849_v6 }
 0x9a8   :  { %v4293_v57 = vpop.permute.xlu1 %4292  ;;  %v4287_v11 = vmul.f32 %v9922_v30, %v4275_v43  ;;  %9927 = vrsqrt.f32 %v4436_v58  ;;  %v4432_v30 = vsub.f32 %v12606_v5, %v12864_v21  ;;  %v4433_v43 = vsub.f32 %v12612_v46, %v12867_v0 }
 0x9a9   :  { %v4431_v9 = vsub.f32 %v4423_v23, %v4427_v38  ;;  %v4310_v37 = vmul.f32 %v4293_v57, %v4286_v59  ;;  %v4438_v28 = vadd.f32 1e-05, %v4430_v44  ;;  %v4288_v51 = vmul.f32 %v9924_v12, %v4276_v29 }
 0x9aa   :  { %9929 = vrsqrt.f32 %v4437_v4  ;;  %v4289_v23 = vmul.f32 %v9926_v62, %v4277_v26  ;;  %v4435_v21 = vsub.f32 %v12609_v49, %v12879_v16 }
 0x9ab   :  { %v4439_v47 = vadd.f32 1e-05, %v4431_v9  ;;  %9931 = vrsqrt.f32 %v4438_v28 }
 0x9ac   :  { %v4303_v54 = vpop.permute.xlu1 %4302 }
 0x9ad   :  { %v4312_v34 = vmul.f32 %v4303_v54, %v4288_v51 }
 0x9ae   :  { %v4298_v36 = vpop.permute.xlu0 %4297 }
 0x9af   :  { %v4311_v7 = vmul.f32 %v4298_v36, %v4287_v11 }
 0x9b0   :  { %v4308_v24 = vpop.permute.xlu1 %4307 }
 0x9b1   :  { %v4313_v57 = vmul.f32 %v4308_v24, %v4289_v23 }
 0x9b2   :  { %v4317_v1 = vpop.permute.xlu0 %4316  ;;  %v9928_v54 = vpop.eup %9927 }
 0x9b3   :  { %v12894_v48 = vadd.f32 %v4317_v1, %v4310_v37  ;;  %v4444_v59 = vmul.f32 %v9928_v54, %v4432_v30  ;;  %v4434_v37 = vsub.f32 %v12603_v22, %v12873_v45 }
 0x9b4   :  { %v4322_v53 = vpop.permute.xlu1 %4321  ;;  %v9930_v38 = vpop.eup %9929 }
 0x9b5   :  { %v8058_v42 = vmul.f32 -1.442695, %v12894_v48  ;;  %v12897_v6 = vadd.f32 %v4322_v53, %v4311_v7  ;;  %v9932_v12 = vpop.eup %9931  ;;  %v4445_v62 = vmul.f32 %v9930_v38, %v4433_v43 }
 0x9b6   :  { %v4327_v58 = vpop.permute.xlu0 %4326  ;;  %v4446_v53 = vmul.f32 %v9932_v12, %v4434_v37 }
 0x9b7   :  { %9933 = vpow2.f32 %v8058_v42  ;;  %v8059_v25 = vmul.f32 -1.442695, %v12897_v6  ;;  %v12900_v13 = vadd.f32 %v4327_v58, %v4312_v34 }
 0x9b8   :  { %9935 = vrsqrt.f32 %v4439_v47  ;;  %v4332_v1 = vpop.permute.xlu1 %4331 }
 0x9b9   :  { %9937 = vpow2.f32 %v8059_v25  ;;  %v8060_v4 = vmul.f32 -1.442695, %v12900_v13  ;;  %v12903_v9 = vadd.f32 %v4332_v1, %v4313_v57 }
 0x9ba   :  { %v4451_v36 = vpop.permute.xlu0 %4450 }
 0x9bb   :  { %9939 = vpow2.f32 %v8060_v4  ;;  %v8061_v35 = vmul.f32 -1.442695, %v12903_v9  ;;  %v4468_v11 = vmul.f32 %v4451_v36, %v4444_v59 }
 0x9bc   :  { %v4456_v28 = vpop.permute.xlu1 %4455 }
 0x9bd   :  { %9941 = vpow2.f32 %v8061_v35  ;;  %v4469_v5 = vmul.f32 %v4456_v28, %v4445_v62 }
 0x9be   :  { %v4461_v44 = vpop.permute.xlu0 %4460 }
 0x9bf   :  { %v4470_v42 = vmul.f32 %v4461_v44, %v4446_v53 }
 0x9c0   :  { %v4466_v24 = vpop.permute.xlu1 %4465 }
 0x9c1   :  { %v9934_v29 = vpop.eup %9933 }
 0x9c2   :  { %v9936_v26 = vpop.eup %9935  ;;  %v4350_v51 = vadd.f32 1.0, %v9934_v29  ;;  %v4475_v7 = vpop.permute.xlu0 %4474 }
 0x9c3   :  { %v9938_v47 = vpop.eup %9937  ;;  %v12914_v34 = vadd.f32 %v4475_v7, %v4468_v11  ;;  %v4447_v58 = vmul.f32 %v9936_v26, %v4435_v21 }
 0x9c4   :  { %9943 = vrcp.f32 %v4350_v51  ;;  %v4351_v46 = vadd.f32 1.0, %v9938_v47  ;;  %v4480_v0 = vpop.permute.xlu1 %4479  ;;  %v14277_v51 = vld [vmem:[#allocation30_spill] sm:$0xff] }
 0x9c5   :  { %v9940_v23 = vpop.eup %9939  ;;  %v8070_v22 = vmul.f32 -1.442695, %v12914_v34  ;;  %v12917_v45 = vadd.f32 %v4480_v0, %v4469_v5  ;;  %v4471_v4 = vmul.f32 %v4466_v24, %v4447_v58 }
 0x9c6   :  { %9945 = vrcp.f32 %v4351_v46  ;;  %v4352_v57 = vadd.f32 1.0, %v9940_v23  ;;  %v4485_v25 = vpop.permute.xlu0 %4484 }
 0x9c7   :  { %v9942_v1 = vpop.eup %9941  ;;  %9947 = vpow2.f32 %v8070_v22  ;;  %v8071_v49 = vmul.f32 -1.442695, %v12917_v45  ;;  %v12920_v16 = vadd.f32 %v4485_v25, %v4470_v42 }
 0x9c8   :  { %9949 = vrcp.f32 %v4352_v57  ;;  %v4353_v36 = vadd.f32 1.0, %v9942_v1  ;;  %v4490_v35 = vpop.permute.xlu1 %4489  ;;  %v14281_v1 = vld [vmem:[#allocation17_spill] sm:$0xff] }
 0x9c9   :  { %9951 = vpow2.f32 %v8071_v49  ;;  %v8072_v54 = vmul.f32 -1.442695, %v12920_v16  ;;  %v12923_v28 = vadd.f32 %v4490_v35, %v4471_v4 }
 0x9ca   :  { %9953 = vrcp.f32 %v4353_v36  ;;  %v4936_v30 = vpop.permute.xlu0 %4935 }
 0x9cb   :  { %9955 = vpow2.f32 %v8072_v54  ;;  %v8073_v38 = vmul.f32 -1.442695, %v12923_v28  ;;  %v5128_v43 = vadd.f32 %v12761_v27, %v4936_v30 }
 0x9cc   :  { %v4941_v44 = vpop.permute.xlu1 %4940 }
 0x9cd   :  { %9957 = vpow2.f32 %v8073_v38  ;;  %v5133_v59 = vadd.f32 %v12759_v50, %v4941_v44 }
 0x9ce   :  { %v9944_v12 = vpop.eup %9943  ;;  %v4946_v24 = vpop.permute.xlu0 %4945 }
 0x9cf   :  { %v4362_v29 = vmul.f32 %v9944_v12, %v12894_v48  ;;  %v5454_v37 = vpack.c.bf16 %v5133_v59, %v5128_v43  ;;  %v5138_v21 = vadd.f32 %v12771_v52, %v4946_v24  ;;  %v14279_v48 = vld [vmem:[#allocation12_spill] sm:$0xff]  ;;  %v14283_v43 = vld [vmem:[#allocation15_spill] sm:$0xff] }
 0x9d0   :  { %v9946_v11 = vpop.eup %9945  ;;  %v4951_v62 = vpop.permute.xlu1 %4950 }
 0x9d1   :  { %v9948_v26 = vpop.eup %9947  ;;  %v4366_v7 = vadd.f32 %v4362_v29, %v14277_v51  ;;  %v4363_v47 = vmul.f32 %v9946_v11, %v12897_v6  ;;  %v5143_v5 = vadd.f32 %v12769_v63, %v4951_v62  ;;  %9282 = vmatprep.mubr.bf16.mxu0 %v5454_v37 }
 0x9d2   :  { %v9950_v27 = vpop.eup %9949  ;;  %v4508_v53 = vadd.f32 1.0, %v9948_v26  ;;  %v4609_v50 = vpop.permute.xlu0 %4608 }
 0x9d3   :  { %v9952_v46 = vpop.eup %9951  ;;  %v12934_v0 = vmul.f32 %v14222_v32, %v4366_v7  ;;  %v4367_v23 = vadd.f32 %v4363_v47, %v14279_v48  ;;  %v4364_v42 = vmul.f32 %v9950_v27, %v12900_v13  ;;  %v5455_v58 = vpack.c.bf16 %v5143_v5, %v5138_v21 }
 0x9d4   :  { %v9954_v22 = vpop.eup %9953  ;;  %9959 = vrcp.f32 %v4508_v53  ;;  %v4509_v6 = vadd.f32 1.0, %v9952_v46  ;;  %v4614_v57 = vpop.permute.xlu1 %4613  ;;  %v12945_v13 = vadd.f32 %v12636_v55, %v4609_v50 }
 0x9d5   :  { %14278 = vst [vmem:[#allocation13_spill] sm:$0xff] %v12934_v0  ;;  %v9956_v52 = vpop.eup %9955  ;;  %v8194_v63 = vmul.f32 -1.442695, %v12934_v0  ;;  %v12940_v25 = vmul.f32 %v14222_v32, %v4367_v23  ;;  %v4368_v4 = vadd.f32 %v4364_v42, %v14281_v1  ;;  %v4365_v49 = vmul.f32 %v9954_v22, %v12903_v9  ;;  %9283 = vmatmul.mubr.bf16.gmra.mrb[124].mxu0 %v5455_v58  ;;  %v14285_v42 = vld [vmem:[#allocation16_spill] sm:$0xff] }
 0x9d6   :  { %9961 = vrcp.f32 %v4509_v6  ;;  %v4510_v36 = vadd.f32 1.0, %v9956_v52  ;;  %v12948_v35 = vadd.f32 %v12634_v31, %v4614_v57  ;;  %v4619_v54 = vpop.permute.xlu0 %4618  ;;  %v14286_v6 = vld [vmem:[#allocation14_spill] sm:$0xff] }
 0x9d7   :  { %14280 = vst [vmem:[#allocation26_spill] sm:$0xff] %v12940_v25  ;;  %v9958_v30 = vpop.eup %9957  ;;  %9963 = vpow2.f32 %v8194_v63  ;;  %v8195_v38 = vmul.f32 -1.442695, %v12940_v25  ;;  %v12952_v44 = vmul.f32 %v14222_v32, %v4368_v4  ;;  %v4369_v59 = vadd.f32 %v4365_v49, %v14283_v43 }
 0x9d8   :  { %9965 = vrcp.f32 %v4510_v36  ;;  %v4511_v9 = vadd.f32 1.0, %v9958_v30  ;;  %v5553_v12 = vpack.c.bf16 %v12948_v35, %v12945_v13  ;;  %v12958_v55 = vadd.f32 %v12643_v15, %v4619_v54  ;;  %v4624_v31 = vpop.permute.xlu1 %4623  ;;  %v14288_v54 = vld [vmem:[#allocation31_spill] sm:$0xff] }
 0x9d9   :  { %14282 = vst [vmem:[#allocation27_spill] sm:$0xff] %v12952_v44  ;;  %9967 = vpow2.f32 %v8195_v38  ;;  %v8196_v24 = vmul.f32 -1.442695, %v12952_v44  ;;  %v12962_v29 = vmul.f32 %v14222_v32, %v4369_v59  ;;  %v12965_v37 = vadd.f32 %v12638_v61, %v4624_v31  ;;  %v10188_v13 = vld [vmem:[%s14198_s6 + $0x18] sm:$0xff]  }
 0x9da   :  { %9969 = vrcp.f32 %v4511_v9  ;;  %v9562_v11 = vpack.c.bf16 %v12940_v25, %v12934_v0  ;;  %v4916_v62 = vpop.permute.xlu0 %4915 }
 0x9db   :  { %14284 = vst [vmem:[#allocation11_spill] sm:$0xff] %v12962_v29  ;;  %9971 = vpow2.f32 %v8196_v24  ;;  %v8197_v26 = vmul.f32 -1.442695, %v12962_v29  ;;  %v5554_v15 = vpack.c.bf16 %v12965_v37, %v12958_v55  ;;  %v9566_v7 = vpack.c.bf16 %v12962_v29, %v12952_v44 }
 0x9dc   :  { %9563 = vmatprep.subr.bf16.mxu1 %v9562_v11  ;;  %v4921_v51 = vpop.permute.xlu1 %4920  ;;  %v12975_v61 = vadd.f32 %v12747_v56, %v4916_v62  ;;  %v14290_v62 = vld [vmem:[#allocation32_spill] sm:$0xff] }
 0x9dd   :  { %9973 = vpow2.f32 %v8197_v26  ;;  %9565 = vmatpush3.bf16.msra.mxu1 %v9562_v11  ;;  %v12978_v47 = vadd.f32 %v12745_v20, %v4921_v51  ;;  %v8171_v20 = vld [vmem:[%s14113_s15 + $0x48] sm:$0xff] }
 0x9de   :  { %v9960_v21 = vpop.eup %9959  ;;  %9567 = vmatprep.subr.bf16.mxu1 %v9566_v7  ;;  %v12980_v5 = vpop.permute.xlu0 %4568 }
 0x9df   :  { %v4520_v27 = vmul.f32 %v9960_v21, %v12914_v34  ;;  %v5555_v53 = vpack.c.bf16 %v12978_v47, %v12975_v61  ;;  %v8172_v34 = vld [vmem:[%s14113_s15 + $0x50] sm:$0xff] }
 0x9e0   :  { %v9962_v50 = vpop.eup %9961  ;;  %v12985_v46 = vpop.permute.xlu1 %4573 }
 0x9e1   :  { %v9964_v48 = vpop.eup %9963  ;;  %v4521_v23 = vmul.f32 %v9962_v50, %v12917_v45  ;;  %9569 = vmatpush3.bf16.msra.mxu1 %v9566_v7  ;;  %v4524_v58 = vadd.f32 %v4520_v27, %v14285_v42  ;;  %v8183_v50 = vld [vmem:[%s14113_s15 + $0xc8] sm:$0xff] }
 0x9e2   :  { %v9966_v56 = vpop.eup %9965  ;;  %v4926_v63 = vpop.permute.xlu0 %4925  ;;  %v5412_v4 = vadd.f32 1.0, %v9964_v48 }
 0x9e3   :  { %v9968_v22 = vpop.eup %9967  ;;  %v4525_v57 = vadd.f32 %v4521_v23, %v14286_v6  ;;  %v4522_v52 = vmul.f32 %v9966_v56, %v12920_v16  ;;  %v8173_v16 = vld [vmem:[%s14113_s15 + $0x58] sm:$0xff]  ;;  %v13008_v59 = vmul.f32 %v14222_v32, %v4524_v58  ;;  %v13011_v9 = vadd.f32 %v12757_v18, %v4926_v63  ;;  %v10185_v23 = vld [vmem:[%s14198_s6] sm:$0xff]  }
 0x9e4   :  { %v9970_v1 = vpop.eup %9969  ;;  %v4931_v45 = vpop.permute.xlu1 %4930  ;;  %9235 = vmatmul.mubr.msk.f32.vlgmr.msra.gmra.mrb[82].mxu1 %vm895_vm2, %v8171_v20  ;;  %v5413_v43 = vadd.f32 1.0, %v9968_v22  ;;  %9975 = vrcp.f32 %v5412_v4  ;;  %v8184_v20 = vld [vmem:[%s14113_s15 + $0xd0] sm:$0xff]  ;;  %v8185_v6 = vld [vmem:[%s14113_s15 + $0xd8] sm:$0xff] }
 0x9e5   :  { %v9972_v49 = vpop.eup %9971  ;;  %v12999_v36 = vmul.f32 %v14222_v32, %v4525_v57  ;;  %v4526_v30 = vadd.f32 %v4522_v52, %v14288_v54  ;;  %v4523_v38 = vmul.f32 %v9970_v1, %v12923_v28  ;;  %9237 = vmatprep.mubr.msk.f32.mxu1 %vm895_vm2, %v8172_v34  ;;  %14289 = vst [vmem:[#allocation8_spill] sm:$0xff] %v13008_v59  ;;  %v8182_v28 = vld [vmem:[%s14113_s15 + $0xc0] sm:$0xff]  ;;  %v10186_v1 = vld [vmem:[%s14198_s6 + $0x8] sm:$0xff]  }
 0x9e6   :  { %v13014_v31 = vadd.f32 %v12752_v60, %v4931_v45  ;;  %v5414_v24 = vadd.f32 1.0, %v9972_v49  ;;  %9977 = vrcp.f32 %v5413_v43 }
 0x9e7   :  { %14287 = vst [vmem:[#allocation28_spill] sm:$0xff] %v12999_v36  ;;  %v9974_v11 = vpop.eup %9973  ;;  %v4527_v26 = vadd.f32 %v4523_v38, %v14290_v62  ;;  %v9570_v7 = vpack.c.bf16 %v12999_v36, %v13008_v59  ;;  %v13026_v60 = vmul.f32 %v14222_v32, %v4526_v30  ;;  %v8198_v30 = vmul.f32 -1.442695, %v13008_v59  ;;  %v10187_v38 = vld [vmem:[%s14198_s6 + $0x10] sm:$0xff]  }
 0x9e8   :  { %v5556_v51 = vpack.c.bf16 %v13014_v31, %v13011_v9  ;;  %9238 = vmatmul.mubr.msk.f32.gmra.mrb[84].mxu1 %vm895_vm2, %v8173_v16  ;;  %9979 = vrcp.f32 %v5414_v24  ;;  %v5415_v21 = vadd.f32 1.0, %v9974_v11 }
 0x9e9   :  { %14291 = vst [vmem:[#allocation23_spill] sm:$0xff] %v13026_v60  ;;  %v13029_v18 = vmul.f32 %v14222_v32, %v4527_v26  ;;  %9248 = vmatprep.mubr.msk.f32.mxu1 %vm895_vm2, %v8182_v28  ;;  %9571 = vmatprep.subr.bf16.mxu1 %v9570_v7  ;;  %v8200_v16 = vmul.f32 -1.442695, %v13026_v60  ;;  %v8199_v28 = vmul.f32 -1.442695, %v12999_v36 }
 0x9ea   :  { %9573 = vmatpush3.bf16.msra.mxu1 %v9570_v7  ;;  %9981 = vrcp.f32 %v5415_v21  ;;  %v10190_v7 = vld [vmem:[%s14198_s6 + $0x28] sm:$0xff]  }
 0x9eb   :  { %14292 = vst [vmem:[#allocation22_spill] sm:$0xff] %v13029_v18  ;;  %v9574_v27 = vpack.c.bf16 %v13029_v18, %v13026_v60  ;;  %v8201_v24 = vmul.f32 -1.442695, %v13029_v18  ;;  %9983 = vpow2.f32 %v8198_v30 }
 0x9ec   :  { %9985 = vpow2.f32 %v8200_v16 }
 0x9ed   :  { %9575 = vmatprep.subr.bf16.mxu1 %v9574_v27  ;;  %9987 = vpow2.f32 %v8201_v24 }
 0x9ee   :  { %9577 = vmatpush3.bf16.msra.mxu1 %v9574_v27  ;;  %v9976_v42 = vpop.eup %9975  ;;  %9989 = vpow2.f32 %v8199_v28 }
 0x9ef   :  { %9286 = vmatprep.subr.bf16.mxu1 %v10185_v23 }
 0x9f0   :  { %v9272_v48 = vpop.f32.mrb[112].mxu0  ;;  %v9978_v34 = vpop.eup %9977 }
 0x9f1   :  { %v5490_v56 = vpop.f32.mrb[113].mxu0  ;;  %9249 = vmatmul.mubr.msk.f32.vlgmr.msra.gmra.mrb[86].mxu1 %vm895_vm2, %v8183_v50 }
 0x9f2   :  { %v9273_v58 = vpop.f32.mrb[114].mxu0  ;;  %9287 = vmatpush3.bf16.msra.mxu1 %v10185_v23  ;;  %9251 = vmatprep.mubr.msk.f32.mxu1 %vm895_vm2, %v8184_v20  ;;  %v9980_v57 = vpop.eup %9979  ;;  %v5622_v52 = vmul.f32 %v9976_v42, %v5490_v56 }
 0x9f3   :  { %v5493_v22 = vpop.f32.mrb[115].mxu0  ;;  %9288 = vmatprep.subr.bf16.mxu1 %v10186_v1  ;;  %v5624_v49 = vmul.f32 %v9980_v57, %v9272_v48  ;;  %v10191_v48 = vld [vmem:[%s14198_s6 + $0x30] sm:$0xff]  }
 0x9f4   :  { %v5623_v63 = vmul.f32 %v9978_v34, %v5493_v22  ;;  %v9982_v45 = vpop.eup %9981 }
 0x9f5   :  { %9252 = vmatmul.mubr.msk.f32.gmra.mrb[88].mxu1 %vm895_vm2, %v8185_v6  ;;  %v5625_v54 = vmul.f32 %v9982_v45, %v9273_v58  ;;  %v9984_v21 = vpop.eup %9983  ;;  %v10192_v58 = vld [vmem:[%s14198_s6 + $0x38] sm:$0xff]  }
 0x9f6   :  { %v5630_v4 = vpack.c.bf16 %v5623_v63, %v5622_v52  ;;  %9289 = vmatpush3.bf16.msra.mxu1 %v10186_v1  ;;  %9302 = vmatprep.mubr.bf16.mxu1 %v5553_v12  ;;  %v10189_v12 = vld [vmem:[%s14198_s6 + $0x20] sm:$0xff]   ;;  %v9986_v27 = vpop.eup %9985  ;;  %v5436_v20 = vadd.f32 1.0, %v9984_v21 }
 0x9f7   :  { %9290 = vmatprep.subr.bf16.mxu1 %v10187_v38  ;;  %v5631_v43 = vpack.c.bf16 %v5625_v54, %v5624_v49  ;;  %v9988_v50 = vpop.eup %9987  ;;  %v5438_v56 = vadd.f32 1.0, %v9986_v27 }
 0x9f8   :  { %9326 = vmatprep.mubr.bf16.mxu0 %v5630_v4  ;;  %v9990_v23 = vpop.eup %9989  ;;  %v5439_v42 = vadd.f32 1.0, %v9988_v50  ;;  %9991 = vrcp.f32 %v5436_v20  ;;  %v10193_v50 = vld [vmem:[%s14212_s0] ss:$0 sm:$0xff]  ;;  %v4761_v20 = vadd.f32 %v12620_v17, %v12980_v5 }
 0x9f9   :  { %9327 = vmatmul.mubr.bf16.vlgmr.msra.gmra.mrb[128].mxu0 %v5631_v43  ;;  %v5437_v34 = vadd.f32 1.0, %v9990_v23  ;;  %9993 = vrcp.f32 %v5438_v56 }
 0x9fa   :  { %9291 = vmatpush3.bf16.msra.mxu1 %v10187_v38  ;;  %9995 = vrcp.f32 %v5439_v42 }
 0x9fb   :  { %9292 = vmatprep.subr.bf16.mxu1 %v10188_v13  ;;  %9997 = vrcp.f32 %v5437_v34 }
 0x9fe   :  { %9293 = vmatpush3.bf16.msra.mxu1 %v10188_v13 }
 0x9ff   :  { %9294 = vmatprep.subr.bf16.mxu1 %v10189_v12 }
 0xa00   :  { %v13065_v35 = vpop.f32.mrb[116].mxu0 }
 0xa01   :  { %v13070_v11 = vpop.f32.mrb[117].mxu0 }
 0xa02   :  { %v13072_v62 = vpop.f32.mrb[118].mxu0  ;;  %9295 = vmatpush3.bf16.msra.mxu1 %v10189_v12  ;;  %v9992_v22 = vpop.eup %9991 }
 0xa03   :  { %v13074_v26 = vpop.f32.mrb[119].mxu0  ;;  %9296 = vmatprep.subr.bf16.mxu1 %v10190_v7  ;;  %v9994_v57 = vpop.eup %9993 }
 0xa04   :  { %v9996_v63 = vpop.eup %9995  ;;  %v4579_v12 = vpop.permute.xlu0 %4578 }
 0xa05   :  { %v9998_v45 = vpop.eup %9997  ;;  %v4771_v27 = vadd.f32 %v12628_v41, %v4579_v12  ;;  %v4766_v41 = vadd.f32 %v12618_v33, %v12985_v46 }
 0xa06   :  { %9297 = vmatpush3.bf16.msra.mxu1 %v10190_v7  ;;  %v4584_v7 = vpop.permute.xlu1 %4583 }
 0xa07   :  { %9298 = vmatprep.subr.bf16.mxu1 %v10191_v48 }
 0xa0a   :  { %9299 = vmatpush3.bf16.msra.mxu1 %v10191_v48  ;;  %v4881_v12 = vpop.permute.xlu1 %4880 }
 0xa0b   :  { %9300 = vmatprep.subr.bf16.mxu1 %v10192_v58 }
 0xa0e   :  { %9301 = vmatpush3.bf16.msra.mxu1 %v10192_v58  ;;  %v4776_v58 = vadd.f32 %v12624_v2, %v4584_v7 }
 0xa11   :  { %9303 = vmatmul.mubr.bf16.vlgmr.msra.gmra.mrb[92].mxu1 %v5554_v15 }
 0xa12   :  { %9306 = vmatprep.mubr.bf16.mxu1 %v5555_v53 }
 0xa15   :  { %v9280_v6 = vpop.f32.mrb[120].mxu0 }
 0xa16   :  { %v5522_v52 = vpop.f32.mrb[121].mxu0  ;;  %v5628_v4 = vmul.f32 %v9994_v57, %v9280_v6 }
 0xa17   :  { %v9281_v1 = vpop.f32.mrb[122].mxu0  ;;  %v5626_v55 = vmul.f32 %v9992_v22, %v5522_v52 }
 0xa18   :  { %v5629_v49 = vmul.f32 %v9996_v63, %v9281_v1  ;;  %v5525_v54 = vpop.f32.mrb[123].mxu0 }
 0xa19   :  { %9307 = vmatmul.mubr.bf16.gmra.mrb[96].mxu1 %v5556_v51  ;;  %v5627_v37 = vmul.f32 %v9998_v45, %v5525_v54 }
 0xa1a   :  { %v5633_v15 = vpack.c.bf16 %v5629_v49, %v5628_v4 }
 0xa1b   :  { %v5632_v30 = vpack.c.bf16 %v5627_v37, %v5626_v55 }
 0xa1d   :  { %9330 = vmatprep.mubr.bf16.mxu0 %v5632_v30  ;;  %v4876_v30 = vpop.permute.xlu0 %4875 }
 0xa1e   :  { %9331 = vmatmul.mubr.bf16.gmra.mrb[132].mxu0 %v5633_v15 }
 0xaa8   :  { %v13094_v61 = vpop.f32.mrb[124].mxu0 }
 0xaa9   :  { %14293 = vst [vmem:[#allocation25_spill] sm:$0xff] %v13094_v61  ;;  %v13096_v47 = vpop.f32.mrb[125].mxu0 }
 0xaaa   :  { %14294 = vst [vmem:[#allocation30_spill] sm:$0xff] %v13096_v47  ;;  %v13098_v53 = vpop.f32.mrb[126].mxu0 }
 0xaab   :  { %v13100_v38 = vpop.f32.mrb[127].mxu0 }
 0xab7   :  { %v13102_v16 = vpop.f32.mrb[82].mxu1 }
 0xab8   :  { %v13104_v43 = vpop.f32.mrb[83].mxu1 }
 0xabb   :  { %v13106_v9 = vpop.f32.mrb[84].mxu1 }
 0xabc   :  { %v13108_v31 = vpop.f32.mrb[85].mxu1 }
 0xac4   :  { %v13110_v51 = vpop.f32.mrb[86].mxu1 }
 0xac5   :  { %v13112_v24 = vpop.f32.mrb[87].mxu1 }
 0xac8   :  { %v13114_v28 = vpop.f32.mrb[88].mxu1 }
 0xac9   :  { %v13116_v13 = vpop.f32.mrb[89].mxu1 }
 0xaca   :  { %14295 = vst [vmem:[#allocation12_spill] sm:$0xff] %v13116_v13 }
 0xacc   :  { %v9328_v21 = vpop.f32.mrb[128].mxu0 }
 0xacd   :  { %v5701_v48 = vmul.f32 %v10193_v50, %v9328_v21  ;;  %v5668_v23 = vpop.f32.mrb[129].mxu0 }
 0xace   :  { %v5699_v56 = vmul.f32 %v10193_v50, %v5668_v23  ;;  %v9329_v42 = vpop.f32.mrb[130].mxu0  ;;  %v4886_v23 = vpop.permute.xlu0 %4885 }
 0xacf   :  { %v13125_v34 = vadd.f32 %v5701_v48, %v4771_v27  ;;  %v5702_v22 = vmul.f32 %v10193_v50, %v9329_v42  ;;  %v5671_v6 = vpop.f32.mrb[131].mxu0  ;;  %v5078_v42 = vadd.f32 %v12694_v8, %v4886_v23 }
 0xad0   :  { %v13129_v57 = vadd.f32 %v5699_v56, %v4761_v20  ;;  %v5700_v52 = vmul.f32 %v10193_v50, %v5671_v6  ;;  %v4891_v20 = vpop.permute.xlu1 %4890  ;;  %v5068_v6 = vadd.f32 %v12681_v10, %v4876_v30 }
 0xad1   :  { %v13131_v63 = vadd.f32 %v5702_v22, %v4776_v58  ;;  %v5723_v1 = vmul.f32 %v13125_v34, %v10732_v19 }
 0xad2   :  { %v13135_v17 = vadd.f32 %v5700_v52, %v4766_v41  ;;  %v5721_v2 = vmul.f32 %v13129_v57, %v10732_v19 }
 0xad3   :  { %5729 = vadd.xlane.f32.xlu1 %v5723_v1  ;;  %v5735_v5 = vmul.f32 %v5723_v1, %v5723_v1  ;;  %v5724_v45 = vmul.f32 %v13131_v63, %v10732_v19  ;;  %v5083_v1 = vadd.f32 %v12692_v14, %v4891_v20 }
 0xad4   :  { %5725 = vadd.xlane.f32.xlu0 %v5721_v2  ;;  %v5722_v33 = vmul.f32 %v13135_v17, %v10732_v19  ;;  %v5733_v46 = vmul.f32 %v5721_v2, %v5721_v2 }
 0xad5   :  { %v5736_v4 = vmul.f32 %v5724_v45, %v5724_v45 }
 0xad6   :  { %v5734_v49 = vmul.f32 %v5722_v33, %v5722_v33 }
 0xad7   :  { %5741 = vadd.xlane.f32.xlu1 %v5735_v5 }
 0xad8   :  { %5731 = vadd.xlane.f32.xlu0 %v5724_v45 }
 0xadb   :  { %5727 = vadd.xlane.f32.xlu1 %v5722_v33  ;;  %v5073_v33 = vadd.f32 %v12679_v3, %v4881_v12 }
 0xadc   :  { %5737 = vadd.xlane.f32.xlu0 %v5733_v46 }
 0xae0   :  { %5743 = vadd.xlane.f32.xlu0 %v5736_v4 }
 0xae4   :  { %v13143_v54 = vpop.f32.mrb[92].mxu1  ;;  %5739 = vadd.xlane.f32.xlu0 %v5734_v49 }
 0xae5   :  { %v13145_v55 = vpop.f32.mrb[93].mxu1 }
 0xae6   :  { %v13147_v37 = vpop.f32.mrb[94].mxu1 }
 0xae7   :  { %v13149_v15 = vpop.f32.mrb[95].mxu1 }
 0xaec   :  { %v13151_v7 = vpop.f32.mrb[96].mxu1 }
 0xaed   :  { %14296 = vst [vmem:[#allocation17_spill] sm:$0xff] %v13151_v7  ;;  %v13153_v21 = vpop.f32.mrb[97].mxu1 }
 0xaee   :  { %14297 = vst [vmem:[#allocation15_spill] sm:$0xff] %v13153_v21  ;;  %v13155_v27 = vpop.f32.mrb[98].mxu1 }
 0xaef   :  { %v13157_v48 = vpop.f32.mrb[99].mxu1 }
 0xaf1   :  { %v9332_v56 = vpop.f32.mrb[132].mxu0 }
 0xaf2   :  { %v5705_v58 = vmul.f32 %v10193_v50, %v9332_v56  ;;  %v5684_v22 = vpop.f32.mrb[133].mxu0  ;;  %v8217_v56 = vld [vmem:[%s14115_s17 + $0xd8] sm:$0xff] }
 0xaf3   :  { %v5703_v41 = vmul.f32 %v10193_v50, %v5684_v22  ;;  %v9333_v52 = vpop.f32.mrb[134].mxu0  ;;  %v8175_v22 = vld [vmem:[%s14114_s16 + $0x48] sm:$0xff] }
 0xaf4   :  { %v13162_v2 = vadd.f32 %v5705_v58, %v5078_v42  ;;  %v5706_v5 = vmul.f32 %v10193_v50, %v9333_v52  ;;  %v5687_v45 = vpop.f32.mrb[135].mxu0  ;;  %v8221_v42 = vld [vmem:[%s14116_s18 + $0xd8] sm:$0xff]  ;;  %v8216_v58 = vld [vmem:[%s14115_s17 + $0xd0] sm:$0xff]  ;;  %v8174_v52 = vld [vmem:[%s14114_s16 + $0x40] sm:$0xff] }
 0xaf5   :  { %v13165_v46 = vadd.f32 %v5703_v41, %v5068_v6  ;;  %v5704_v4 = vmul.f32 %v10193_v50, %v5687_v45  ;;  %v8220_v6 = vld [vmem:[%s14116_s18 + $0xd0] sm:$0xff]  ;;  %v8177_v41 = vld [vmem:[%s14114_s16 + $0x58] sm:$0xff] }
 0xaf6   :  { %v13167_v49 = vadd.f32 %v5706_v5, %v5083_v1  ;;  %v5877_v8 = vmul.f32 %v13162_v2, %v10732_v19  ;;  %v8187_v1 = vld [vmem:[%s14114_s16 + $0xc8] sm:$0xff]  ;;  %v8176_v5 = vld [vmem:[%s14114_s16 + $0x50] sm:$0xff]  ;;  %v8189_v45 = vld [vmem:[%s14114_s16 + $0xd8] sm:$0xff] }
 0xaf7   :  { %v13171_v23 = vadd.f32 %v5704_v4, %v5073_v33  ;;  %v5875_v14 = vmul.f32 %v13165_v46, %v10732_v19  ;;  %v8186_v33 = vld [vmem:[%s14114_s16 + $0xc0] sm:$0xff]  ;;  %v8188_v4 = vld [vmem:[%s14114_s16 + $0xd0] sm:$0xff] }
 0xaf8   :  { %5883 = vadd.xlane.f32.xlu1 %v5877_v8  ;;  %v5878_v10 = vmul.f32 %v13167_v49, %v10732_v19  ;;  %v5889_v50 = vmul.f32 %v5877_v8, %v5877_v8  ;;  %v5780_v8 = vpop.permute.xlu1 %5779 }
 0xaf9   :  { %v5876_v3 = vmul.f32 %v13171_v23, %v10732_v19  ;;  %v5887_v12 = vmul.f32 %v5875_v14, %v5875_v14 }
 0xafa   :  { %5885 = vadd.xlane.f32.xlu0 %v5878_v10  ;;  %v5890_v30 = vmul.f32 %v5878_v10, %v5878_v10  ;;  %v8250_v10 = vld [vmem:[%s14111_s13 + $0x180] sm:$0xff] }
 0xafb   :  { %v5888_v20 = vmul.f32 %v5876_v3, %v5876_v3  ;;  %9342 = vmatprep.mubr.msk.f32.mxu1 %vm895_vm2, %v8250_v10 }
 0xafc   :  { %5879 = vadd.xlane.f32.xlu1 %v5875_v14  ;;  %v5804_v14 = vpop.permute.xlu1 %5803 }
 0xafe   :  { %5881 = vadd.xlane.f32.xlu0 %v5876_v3 }
 0xb00   :  { %5895 = vadd.xlane.f32.xlu1 %v5889_v50  ;;  %v13219_v3 = vpop.permute.xlu1 %5808  ;;  %v13221_v50 = vpop.permute.xlu0 %5784 }
 0xb02   :  { %5897 = vadd.xlane.f32.xlu0 %v5890_v30 }
 0xb04   :  { %5891 = vadd.xlane.f32.xlu1 %v5887_v12  ;;  %v5795_v30 = vpop.permute.xlu1 %5794  ;;  %v5790_v12 = vpop.permute.xlu0 %5789 }
 0xb06   :  { %5893 = vadd.xlane.f32.xlu0 %v5888_v20 }
 0xb08   :  { %v5819_v20 = vpop.permute.xlu1 %5818 }
 0xb15   :  { %5948 = vperm.xlu1 %9618, %v8217_v56   ;;  %v5814_v56 = vpop.permute.xlu0 %5813 }
 0xb19   :  { %5972 = vperm.xlu1 %9618, %v8221_v42   ;;  %v13223_v42 = vpop.permute.xlu1 %5938 }
 0xb1c   :  { %5943 = vperm.xlu0 %9617, %v8216_v58   ;;  %v8298_v58 = vld [vmem:[%s14111_s13 + $0x380] sm:$0xff] }
 0xb1d   :  { %5163 = vperm.xlu1 %9618, %v8175_v22   ;;  %v13228_v22 = vpop.permute.xlu0 %5933  ;;  %9374 = vmatprep.mubr.msk.f32.mxu0 %vm895_vm2, %v8298_v58 }
 0xb20   :  { %5967 = vperm.xlu0 %9617, %v8220_v6   ;;  %v13231_v6 = vpop.permute.xlu1 %5962 }
 0xb21   :  { %5173 = vperm.xlu1 %9618, %v8177_v41   ;;  %v13233_v41 = vpop.permute.xlu0 %5957 }
 0xb24   :  { %5158 = vperm.xlu0 %9617, %v8174_v52  }
 0xb25   :  { %5290 = vperm.xlu1 %9618, %v8187_v1  }
 0xb28   :  { %5168 = vperm.xlu0 %9617, %v8176_v5  }
 0xb29   :  { %5300 = vperm.xlu1 %9618, %v8189_v45  }
 0xb2c   :  { %5285 = vperm.xlu0 %9617, %v8186_v33  }
 0xb30   :  { %5295 = vperm.xlu0 %9617, %v8188_v4  }
 0xb60   :  { %v5730_v52 = vpop.xlane.xlu1 %5729 }
 0xb61   :  { %v5747_v1 = vmul.f32 %v5730_v52, %v11319_v40  ;;  %v5726_v5 = vpop.xlane.xlu0 %5725 }
 0xb62   :  { %v5745_v60 = vmul.f32 %v5726_v5, %v11319_v40 }
 0xb63   :  { %v5755_v33 = vmul.f32 %v5747_v1, %v5747_v1 }
 0xb64   :  { %v5742_v45 = vpop.xlane.xlu1 %5741  ;;  %v5753_v44 = vmul.f32 %v5745_v60, %v5745_v60 }
 0xb65   :  { %v5751_v4 = vmul.f32 %v5742_v45, %v11319_v40  ;;  %v5732_v10 = vpop.xlane.xlu0 %5731 }
 0xb66   :  { %v5748_v58 = vmul.f32 %v5732_v10, %v11319_v40  ;;  %v5763_v10 = vsub.f32 %v13125_v34, %v5747_v1 }
 0xb67   :  { %v5759_v18 = vsub.f32 %v5751_v4, %v5755_v33 }
 0xb68   :  { %v5728_v25 = vpop.xlane.xlu1 %5727  ;;  %v5756_v61 = vmul.f32 %v5748_v58, %v5748_v58 }
 0xb69   :  { %v5767_v59 = vadd.f32 1e-05, %v5759_v18  ;;  %v5738_v36 = vpop.xlane.xlu0 %5737  ;;  %v5746_v7 = vmul.f32 %v5728_v25, %v11319_v40 }
 0xb6a   :  { %v5749_v29 = vmul.f32 %v5738_v36, %v11319_v40 }
 0xb6b   :  { %9999 = vrsqrt.f32 %v5767_v59  ;;  %v5754_v18 = vmul.f32 %v5746_v7, %v5746_v7 }
 0xb6c   :  { %v5757_v0 = vsub.f32 %v5749_v29, %v5753_v44 }
 0xb6d   :  { %v5744_v52 = vpop.xlane.xlu0 %5743 }
 0xb6e   :  { %v5765_v13 = vadd.f32 1e-05, %v5757_v0  ;;  %v5752_v45 = vmul.f32 %v5744_v52, %v11319_v40  ;;  %v5761_v0 = vsub.f32 %v13129_v57, %v5745_v60 }
 0xb70   :  { %10001 = vrsqrt.f32 %v5765_v13  ;;  %v5760_v5 = vsub.f32 %v5752_v45, %v5756_v61  ;;  %v5764_v45 = vsub.f32 %v13131_v63, %v5748_v58 }
 0xb71   :  { %v5740_v33 = vpop.xlane.xlu0 %5739 }
 0xb72   :  { %v5768_v4 = vadd.f32 1e-05, %v5760_v5  ;;  %v5750_v47 = vmul.f32 %v5740_v33, %v11319_v40 }
 0xb74   :  { %10003 = vrsqrt.f32 %v5768_v4  ;;  %v5758_v36 = vsub.f32 %v5750_v47, %v5754_v18  ;;  %v5762_v47 = vsub.f32 %v13135_v17, %v5746_v7 }
 0xb75   :  { %v10000_v59 = vpop.eup %9999 }
 0xb76   :  { %v5775_v44 = vmul.f32 %v10000_v59, %v5763_v10  ;;  %v5766_v29 = vadd.f32 1e-05, %v5758_v36 }
 0xb78   :  { %10005 = vrsqrt.f32 %v5766_v29  ;;  %v5799_v21 = vmul.f32 %v5790_v12, %v5775_v44 }
 0xb7a   :  { %v10002_v25 = vpop.eup %10001  ;;  %v13245_v52 = vadd.f32 %v5814_v56, %v5799_v21 }
 0xb7b   :  { %v5773_v61 = vmul.f32 %v10002_v25, %v5761_v0 }
 0xb7c   :  { %v8212_v13 = vmul.f32 -1.442695, %v13245_v52 }
 0xb7d   :  { %v5797_v5 = vmul.f32 %v5780_v8, %v5773_v61 }
 0xb7e   :  { %v10004_v33 = vpop.eup %10003  ;;  %10007 = vpow2.f32 %v8212_v13 }
 0xb7f   :  { %v5776_v34 = vmul.f32 %v10004_v33, %v5764_v45  ;;  %v13249_v1 = vadd.f32 %v5804_v14, %v5797_v5 }
 0xb81   :  { %v8210_v12 = vmul.f32 -1.442695, %v13249_v1  ;;  %v5800_v18 = vmul.f32 %v5795_v30, %v5776_v34 }
 0xb82   :  { %v10006_v60 = vpop.eup %10005 }
 0xb83   :  { %v5774_v57 = vmul.f32 %v10006_v60, %v5762_v47  ;;  %10009 = vpow2.f32 %v8210_v12  ;;  %v13253_v21 = vadd.f32 %v5819_v20, %v5800_v18 }
 0xb85   :  { %v5884_v56 = vpop.xlane.xlu1 %5883  ;;  %v5798_v4 = vmul.f32 %v13221_v50, %v5774_v57  ;;  %v8213_v63 = vmul.f32 -1.442695, %v13253_v21 }
 0xb86   :  { %v5901_v30 = vmul.f32 %v5884_v56, %v11319_v40 }
 0xb87   :  { %v5886_v8 = vpop.xlane.xlu0 %5885  ;;  %v13258_v14 = vadd.f32 %v13219_v3, %v5798_v4  ;;  %10011 = vpow2.f32 %v8213_v63 }
 0xb88   :  { %v10008_v58 = vpop.eup %10007  ;;  %v5902_v20 = vmul.f32 %v5886_v8, %v11319_v40  ;;  %v5909_v29 = vmul.f32 %v5901_v30, %v5901_v30 }
 0xb89   :  { %v5880_v17 = vpop.xlane.xlu1 %5879  ;;  %v8211_v7 = vmul.f32 -1.442695, %v13258_v14  ;;  %v5839_v36 = vadd.f32 1.0, %v10008_v58 }
 0xb8a   :  { %v13264_v50 = vmul.f32 %v5880_v17, %v11319_v40  ;;  %v5910_v13 = vmul.f32 %v5902_v20, %v5902_v20 }
 0xb8b   :  { %v5882_v10 = vpop.xlane.xlu0 %5881  ;;  %10013 = vpow2.f32 %v8211_v7 }
 0xb8c   :  { %v13268_v25 = vmul.f32 %v5882_v10, %v11319_v40  ;;  %10015 = vrcp.f32 %v5839_v36  ;;  %v5907_v34 = vmul.f32 %v13264_v50, %v13264_v50 }
 0xb8d   :  { %v10010_v59 = vpop.eup %10009  ;;  %v5896_v44 = vpop.xlane.xlu1 %5895 }
 0xb8e   :  { %v5905_v3 = vmul.f32 %v5896_v44, %v11319_v40  ;;  %v5837_v0 = vadd.f32 1.0, %v10010_v59  ;;  %v5908_v56 = vmul.f32 %v13268_v25, %v13268_v25 }
 0xb8f   :  { %v5898_v61 = vpop.xlane.xlu0 %5897 }
 0xb90   :  { %v5913_v45 = vsub.f32 %v5905_v3, %v5909_v29  ;;  %v5906_v5 = vmul.f32 %v5898_v61, %v11319_v40  ;;  %10017 = vrcp.f32 %v5837_v0 }
 0xb91   :  { %v10012_v33 = vpop.eup %10011  ;;  %v5892_v47 = vpop.xlane.xlu1 %5891 }
 0xb92   :  { %v5921_v12 = vadd.f32 1e-05, %v5913_v45  ;;  %v5914_v18 = vsub.f32 %v5906_v5, %v5910_v13  ;;  %v5903_v60 = vmul.f32 %v5892_v47, %v11319_v40  ;;  %v5840_v57 = vadd.f32 1.0, %v10012_v33 }
 0xb93   :  { %v5894_v4 = vpop.xlane.xlu0 %5893  ;;  %v5917_v13 = vsub.f32 %v13162_v2, %v5901_v30  ;;  %v5918_v47 = vsub.f32 %v13167_v49, %v5902_v20  ;;  %v5915_v2 = vsub.f32 %v13165_v46, %v13264_v50  ;;  %v14298_v46 = vld [vmem:[#allocation24_spill] sm:$0xff] }
 0xb94   :  { %10019 = vrsqrt.f32 %v5921_v12  ;;  %v5922_v63 = vadd.f32 1e-05, %v5914_v18  ;;  %v5911_v8 = vsub.f32 %v5903_v60, %v5907_v34  ;;  %v5904_v58 = vmul.f32 %v5894_v4, %v11319_v40 }
 0xb95   :  { %v10014_v17 = vpop.eup %10013  ;;  %v5949_v7 = vpop.permute.xlu1 %5948  ;;  %10021 = vrcp.f32 %v5840_v57 }
 0xb96   :  { %10023 = vrsqrt.f32 %v5922_v63  ;;  %v5919_v10 = vadd.f32 1e-05, %v5911_v8  ;;  %v5912_v36 = vsub.f32 %v5904_v58, %v5908_v56  ;;  %v5838_v59 = vadd.f32 1.0, %v10014_v17  ;;  %v10016_v3 = vpop.eup %10015 }
 0xb97   :  { %v5851_v33 = vmul.f32 %v10016_v3, %v13245_v52  ;;  %v5916_v52 = vsub.f32 %v13171_v23, %v13268_v25 }
 0xb98   :  { %10025 = vrsqrt.f32 %v5919_v10  ;;  %v5920_v44 = vadd.f32 1e-05, %v5912_v36  ;;  %v14299_v10 = vld [vmem:[#allocation18_spill] sm:$0xff] }
 0xb99   :  { %v5973_v29 = vpop.permute.xlu1 %5972  ;;  %10027 = vrcp.f32 %v5838_v59  ;;  %v5855_v20 = vadd.f32 %v5851_v33, %v12332_v39 }
 0xb9a   :  { %10029 = vrsqrt.f32 %v5920_v44  ;;  %v10018_v0 = vpop.eup %10017 }
 0xb9b   :  { %v5944_v61 = vpop.permute.xlu0 %5943  ;;  %v5849_v60 = vmul.f32 %v10018_v0, %v13249_v1 }
 0xb9d   :  { %v5164_v45 = vpop.permute.xlu1 %5163  ;;  %v5853_v50 = vadd.f32 %v5849_v60, %v14298_v46  ;;  %v8252_v46 = vld [vmem:[%s14111_s13 + $0x190] sm:$0xff] }
 0xb9e   :  { %v10020_v5 = vpop.eup %10019  ;;  %v5260_v40 = vadd.f32 %v13102_v16, %v5164_v45 }
 0xb9f   :  { %v10022_v34 = vpop.eup %10021  ;;  %v5929_v12 = vmul.f32 %v10020_v5, %v5917_v13  ;;  %v5968_v18 = vpop.permute.xlu0 %5967 }
 0xba0   :  { %v10024_v57 = vpop.eup %10023  ;;  %v6016_v56 = vadd.f32 %v13149_v15, %v5260_v40  ;;  %v5852_v4 = vmul.f32 %v10022_v34, %v13253_v21 }
 0xba1   :  { %v5930_v30 = vmul.f32 %v10024_v57, %v5918_v47  ;;  %v5953_v63 = vmul.f32 %v5944_v61, %v5929_v12  ;;  %v5174_v16 = vpop.permute.xlu1 %5173  ;;  %v5859_v47 = vmul.f32 %v5855_v20, %v10732_v19 }
 0xba2   :  { %v10026_v8 = vpop.eup %10025  ;;  %v13289_v49 = vadd.f32 %v6016_v56, %v13074_v26  ;;  %v5270_v1 = vadd.f32 %v13106_v9, %v5174_v16  ;;  %v5856_v36 = vadd.f32 %v5852_v4, %v14299_v10 }
 0xba3   :  { %v10028_v15 = vpop.eup %10027  ;;  %v5954_v58 = vmul.f32 %v5949_v7, %v5930_v30  ;;  %v13293_v21 = vadd.f32 %v5968_v18, %v5953_v63  ;;  %v5159_v17 = vpop.permute.xlu0 %5158  ;;  %v5927_v39 = vmul.f32 %v10026_v8, %v5915_v2 }
 0xba4   :  { %v10030_v59 = vpop.eup %10029  ;;  %v6018_v44 = vadd.f32 %v13147_v37, %v5270_v1  ;;  %v5255_v23 = vadd.f32 %v13104_v43, %v5159_v17  ;;  %v6034_v26 = vmul.f32 %v14222_v32, %v13289_v49  ;;  %v5850_v9 = vmul.f32 %v10028_v15, %v13258_v14  ;;  %v14300_v43 = vld [vmem:[#allocation19_spill] sm:$0xff]  ;;  %v14304_v15 = vld [vmem:[#allocation17_spill] sm:$0xff] }
 0xba5   :  { %v5928_v25 = vmul.f32 %v10030_v59, %v5916_v52  ;;  %v13302_v7 = vadd.f32 %v5973_v29, %v5954_v58  ;;  %v8224_v3 = vmul.f32 -1.442695, %v13293_v21  ;;  %v5291_v0 = vpop.permute.xlu1 %5290  ;;  %v5857_v29 = vmul.f32 %v5853_v50, %v10732_v19  ;;  %v14303_v52 = vld [vmem:[#allocation12_spill] sm:$0xff]  ;;  %v14305_v59 = vld [vmem:[#allocation25_spill] sm:$0xff] }
 0xba6   :  { %v13306_v61 = vadd.f32 %v13072_v62, %v6018_v44  ;;  %v6015_v13 = vadd.f32 %v13145_v55, %v5255_v23  ;;  %v5387_v37 = vadd.f32 %v13110_v51, %v5291_v0  ;;  %6039 = vadd.xlane.f32.xlu1 %v6034_v26  ;;  %v5854_v45 = vadd.f32 %v5850_v9, %v14300_v43  ;;  %v8253_v23 = vld [vmem:[%s14111_s13 + $0x198] sm:$0xff]  ;;  %v8255_v0 = vld [vmem:[%s14111_s13 + $0x1a8] sm:$0xff] }
 0xba7   :  { %v8225_v5 = vmul.f32 -1.442695, %v13302_v7  ;;  %10031 = vpow2.f32 %v8224_v3  ;;  %v5169_v14 = vpop.permute.xlu0 %5168  ;;  %v5860_v40 = vmul.f32 %v5856_v36, %v10732_v19  ;;  %v5951_v12 = vmul.f32 %v13228_v22, %v5927_v39 }
 0xba8   :  { %v13315_v33 = vadd.f32 %v6015_v13, %v13070_v11  ;;  %v6174_v62 = vadd.f32 %v13157_v48, %v5387_v37  ;;  %v5265_v55 = vadd.f32 %v13108_v31, %v5169_v14  ;;  %v5858_v51 = vmul.f32 %v5854_v45, %v10732_v19  ;;  %v8256_v37 = vld [vmem:[%s14111_s13 + $0x1b0] sm:$0xff] }
 0xba9   :  { %10033 = vpow2.f32 %v8225_v5  ;;  %v5301_v34 = vpop.permute.xlu1 %5300  ;;  %v5952_v18 = vmul.f32 %v13223_v42, %v5928_v25  ;;  %v13331_v4 = vadd.f32 %v13233_v41, %v5951_v12  ;;  %v6046_v10 = vmul.f32 %v6034_v26, %v6034_v26  ;;  %v8254_v26 = vld [vmem:[%s14111_s13 + $0x1a0] sm:$0xff]  ;;  %v8260_v12 = vld [vmem:[%s14111_s13 + $0x1d0] sm:$0xff] }
 0xbaa   :  { %v13324_v60 = vadd.f32 %v6174_v62, %v13100_v38  ;;  %v6017_v11 = vadd.f32 %v13143_v54, %v5265_v55  ;;  %v5397_v57 = vadd.f32 %v13114_v28, %v5301_v34  ;;  %v9578_v48 = vpack.c.bf16 %v5858_v51, %v5857_v29  ;;  %v8257_v29 = vld [vmem:[%s14111_s13 + $0x1b8] sm:$0xff]  ;;  %v8258_v62 = vld [vmem:[%s14111_s13 + $0x1c0] sm:$0xff]  ;;  %v8259_v51 = vld [vmem:[%s14111_s13 + $0x1c8] sm:$0xff] }
 0xbab   :  { %v5286_v56 = vpop.permute.xlu0 %5285  ;;  %v6033_v31 = vmul.f32 %v14222_v32, %v13315_v33  ;;  %v13334_v2 = vadd.f32 %v13231_v6, %v5952_v18  ;;  %v9582_v28 = vpack.c.bf16 %v5860_v40, %v5859_v47  ;;  %v8222_v22 = vmul.f32 -1.442695, %v13331_v4  ;;  %v14301_v6 = vld [vmem:[#allocation15_spill] sm:$0xff] }
 0xbac   :  { %v13337_v42 = vadd.f32 %v13065_v35, %v6017_v11  ;;  %v6176_v38 = vadd.f32 %v13155_v27, %v5397_v57  ;;  %9579 = vmatprep.subr.bf16.mxu1 %v9578_v48  ;;  %v5382_v54 = vadd.f32 %v13112_v24, %v5286_v56  ;;  %v14302_v24 = vld [vmem:[#allocation30_spill] sm:$0xff]  ;;  %v6036_v25 = vmul.f32 %v14222_v32, %v13306_v61 }
 0xbad   :  { %9581 = vmatpush3.bf16.msra.mxu1 %v9578_v48  ;;  %6037 = vadd.xlane.f32.xlu0 %v6033_v31  ;;  %v8223_v30 = vmul.f32 -1.442695, %v13334_v2  ;;  %v6045_v16 = vmul.f32 %v6033_v31, %v6033_v31  ;;  %10035 = vpow2.f32 %v8222_v22  ;;  %v6192_v55 = vmul.f32 %v14222_v32, %v13324_v60  ;;  %v8261_v48 = vld [vmem:[%s14111_s13 + $0x1d8] sm:$0xff]  ;;  %v8262_v31 = vld [vmem:[%s14111_s13 + $0x1e0] sm:$0xff]  ;;  %v14306_v22 = vld [vmem:[#allocation10_spill] sm:$0xff] }
 0xbae   :  { %v13344_v41 = vadd.f32 %v13098_v53, %v6176_v38  ;;  %v6173_v63 = vadd.f32 %v14301_v6, %v5382_v54  ;;  %9583 = vmatprep.subr.bf16.mxu1 %v9582_v28  ;;  %v6035_v35 = vmul.f32 %v14222_v32, %v13337_v42  ;;  %v8251_v53 = vld [vmem:[%s14111_s13 + $0x188] sm:$0xff]  ;;  %v6048_v5 = vmul.f32 %v6036_v25, %v6036_v25 }
 0xbaf   :  { %v5296_v27 = vpop.permute.xlu0 %5295  ;;  %10037 = vpow2.f32 %v8223_v30  ;;  %v6204_v18 = vmul.f32 %v6192_v55, %v6192_v55  ;;  %v8263_v6 = vld [vmem:[%s14111_s13 + $0x1e8] sm:$0xff] }
 0xbb0   :  { %v13350_v8 = vadd.f32 %v6173_v63, %v14302_v24  ;;  %v5392_v1 = vadd.f32 %v14303_v52, %v5296_v27  ;;  %6041 = vadd.xlane.f32.xlu1 %v6035_v35  ;;  %v6047_v17 = vmul.f32 %v6035_v35, %v6035_v35  ;;  %v6194_v54 = vmul.f32 %v14222_v32, %v13344_v41  ;;  %v14308_v27 = vld [vmem:[#allocation9_spill] sm:$0xff]  ;;  %v14309_v52 = vld [vmem:[#allocation20_spill] sm:$0xff] }
 0xbb1   :  { %v10032_v20 = vpop.eup %10031  ;;  %9585 = vmatpush3.bf16.msra.mxu1 %v9582_v28  ;;  %6049 = vadd.xlane.f32.xlu0 %v6045_v16 }
 0xbb2   :  { %v6175_v58 = vadd.f32 %v14304_v15, %v5392_v1  ;;  %v5993_v9 = vadd.f32 1.0, %v10032_v20  ;;  %v6191_v39 = vmul.f32 %v14222_v32, %v13350_v8  ;;  %v6206_v24 = vmul.f32 %v6194_v54, %v6194_v54 }
 0xbb3   :  { %v10034_v50 = vpop.eup %10033 }
 0xbb4   :  { %v5994_v36 = vadd.f32 1.0, %v10034_v50  ;;  %v13361_v44 = vadd.f32 %v14305_v59, %v6175_v58  ;;  %9343 = vmatmul.mubr.msk.f32.vlgmr.msra.gmra.mrb[90].mxu1 %vm895_vm2, %v8251_v53  ;;  %6053 = vadd.xlane.f32.xlu1 %v6047_v17  ;;  %v6203_v13 = vmul.f32 %v6191_v39, %v6191_v39  ;;  %v8226_v50 = vld [vmem:[%s14117_s19 + $0x40] sm:$0xff] }
 0xbb5   :  { %6051 = vadd.xlane.f32.xlu0 %v6046_v10  ;;  %9345 = vmatprep.mubr.msk.f32.mxu1 %vm895_vm2, %v8252_v46  ;;  %v8299_v10 = vld [vmem:[%s14111_s13 + $0x388] sm:$0xff]  ;;  %v10194_v59 = vld [vmem:[%s14203_s25] sm:$0xff]  }
 0xbb6   :  { %10039 = vrcp.f32 %v5994_v36  ;;  %v6193_v40 = vmul.f32 %v14222_v32, %v13361_v44  ;;  %v8300_v36 = vld [vmem:[%s14111_s13 + $0x390] sm:$0xff] }
 0xbb7   :  { %v10036_v3 = vpop.eup %10035  ;;  %10041 = vrcp.f32 %v5993_v9  ;;  %v8231_v9 = vld [vmem:[%s14118_s20 + $0x48] sm:$0xff] }
 0xbb8   :  { %9346 = vmatmul.mubr.msk.f32.gmra.mrb[100].mxu1 %vm895_vm2, %v8253_v23  ;;  %6195 = vadd.xlane.f32.xlu1 %v6191_v39  ;;  %v5991_v43 = vadd.f32 1.0, %v10036_v3  ;;  %v6205_v47 = vmul.f32 %v6193_v40, %v6193_v40  ;;  %v8301_v23 = vld [vmem:[%s14111_s13 + $0x398] sm:$0xff]  ;;  %v8302_v39 = vld [vmem:[%s14111_s13 + $0x3a0] sm:$0xff] }
 0xbb9   :  { %6043 = vadd.xlane.f32.xlu0 %v6036_v25  ;;  %9348 = vmatprep.mubr.msk.f32.mxu1 %vm895_vm2, %v8254_v26  ;;  %v10038_v45 = vpop.eup %10037  ;;  %v10195_v26 = vld [vmem:[%s14203_s25 + $0x8] sm:$0xff]   ;;  %v8229_v3 = vld [vmem:[%s14117_s19 + $0x58] sm:$0xff] }
 0xbba   :  { %v5992_v14 = vadd.f32 1.0, %v10038_v45  ;;  %10043 = vrcp.f32 %v5991_v43  ;;  %v8303_v25 = vld [vmem:[%s14111_s13 + $0x3a8] sm:$0xff]  ;;  %v8305_v43 = vld [vmem:[%s14111_s13 + $0x3b8] sm:$0xff] }
 0xbbb   :  { %v8233_v45 = vld [vmem:[%s14118_s20 + $0x58] sm:$0xff] }
 0xbbc   :  { %9349 = vmatmul.mubr.msk.f32.gmra.mrb[102].mxu1 %vm895_vm2, %v8255_v0  ;;  %6207 = vadd.xlane.f32.xlu1 %v6203_v13  ;;  %10045 = vrcp.f32 %v5992_v14  ;;  %v8304_v0 = vld [vmem:[%s14111_s13 + $0x3b0] sm:$0xff]  ;;  %v10197_v14 = vld [vmem:[%s14203_s25 + $0x18] sm:$0xff]  }
 0xbbd   :  { %6055 = vadd.xlane.f32.xlu0 %v6048_v5  ;;  %9351 = vmatprep.mubr.msk.f32.mxu1 %vm895_vm2, %v8256_v37  ;;  %v10196_v13 = vld [vmem:[%s14203_s25 + $0x10] sm:$0xff]   ;;  %v8227_v37 = vld [vmem:[%s14117_s19 + $0x48] sm:$0xff]  ;;  %v8306_v5 = vld [vmem:[%s14111_s13 + $0x3c0] sm:$0xff] }
 0xbc0   :  { %9352 = vmatmul.mubr.msk.f32.gmra.mrb[104].mxu1 %vm895_vm2, %v8257_v29  ;;  %6199 = vadd.xlane.f32.xlu1 %v6193_v40  ;;  %v10040_v34 = vpop.eup %10039  ;;  %v8228_v29 = vld [vmem:[%s14117_s19 + $0x50] sm:$0xff]  ;;  %v8307_v40 = vld [vmem:[%s14111_s13 + $0x3c8] sm:$0xff] }
 0xbc1   :  { %6197 = vadd.xlane.f32.xlu0 %v6192_v55  ;;  %9354 = vmatprep.mubr.msk.f32.mxu1 %vm895_vm2, %v8258_v62  ;;  %v10042_v11 = vpop.eup %10041  ;;  %v6006_v57 = vmul.f32 %v10040_v34, %v13302_v7  ;;  %v8239_v62 = vld [vmem:[%s14117_s19 + $0xc8] sm:$0xff]  ;;  %v8308_v55 = vld [vmem:[%s14111_s13 + $0x3d0] sm:$0xff] }
 0xbc2   :  { %v6005_v38 = vmul.f32 %v10042_v11, %v13293_v21  ;;  %v14307_v21 = vld [vmem:[#allocation21_spill] sm:$0xff]  ;;  %v8232_v34 = vld [vmem:[%s14118_s20 + $0x50] sm:$0xff] }
 0xbc3   :  { %v6010_v30 = vadd.f32 %v6006_v57, %v14306_v22  ;;  %v10199_v11 = vld [vmem:[%s14203_s25 + $0x28] sm:$0xff]   ;;  %v8238_v57 = vld [vmem:[%s14117_s19 + $0xc0] sm:$0xff]  ;;  %v10201_v22 = vld [vmem:[%s14203_s25 + $0x38] sm:$0xff]  }
 0xbc4   :  { %9355 = vmatmul.mubr.msk.f32.gmra.mrb[106].mxu1 %vm895_vm2, %v8259_v51  ;;  %6211 = vadd.xlane.f32.xlu1 %v6205_v47  ;;  %v10044_v56 = vpop.eup %10043  ;;  %v6009_v16 = vadd.f32 %v6005_v38, %v14308_v27  ;;  %v10198_v51 = vld [vmem:[%s14203_s25 + $0x20] sm:$0xff]   ;;  %v8309_v47 = vld [vmem:[%s14111_s13 + $0x3d8] sm:$0xff]  ;;  %v10200_v38 = vld [vmem:[%s14203_s25 + $0x30] sm:$0xff]  }
 0xbc5   :  { %6209 = vadd.xlane.f32.xlu0 %v6204_v18  ;;  %9357 = vmatprep.mubr.msk.f32.mxu1 %vm895_vm2, %v8260_v12  ;;  %v6003_v28 = vmul.f32 %v10044_v56, %v13331_v4  ;;  %v8264_v4 = vld [vmem:[%s14111_s13 + $0x1f0] sm:$0xff]  ;;  %v6014_v15 = vmul.f32 %v6010_v30, %v10732_v19  ;;  %v8243_v12 = vld [vmem:[%s14118_s20 + $0xc8] sm:$0xff]  ;;  %v8310_v18 = vld [vmem:[%s14111_s13 + $0x3e0] sm:$0xff] }
 0xbc6   :  { %v10046_v7 = vpop.eup %10045  ;;  %v6013_v17 = vmul.f32 %v6009_v16, %v10732_v19  ;;  %v8241_v56 = vld [vmem:[%s14117_s19 + $0xd8] sm:$0xff]  ;;  %v8240_v30 = vld [vmem:[%s14117_s19 + $0xd0] sm:$0xff] }
 0xbc7   :  { %v6004_v63 = vmul.f32 %v10046_v7, %v13334_v2  ;;  %v6007_v35 = vadd.f32 %v6003_v28, %v14307_v21  ;;  %v8265_v2 = vld [vmem:[%s14111_s13 + $0x1f8] sm:$0xff]  ;;  %v8272_v27 = vld [vmem:[%s14112_s14 + $0x1b0] sm:$0xff] }
 0xbc8   :  { %9358 = vmatmul.mubr.msk.f32.gmra.mrb[108].mxu1 %vm895_vm2, %v8261_v48  ;;  %v9590_v46 = vpack.c.bf16 %v6014_v15, %v6013_v17  ;;  %v8311_v48 = vld [vmem:[%s14111_s13 + $0x3e8] sm:$0xff]  ;;  %v8313_v28 = vld [vmem:[%s14111_s13 + $0x3f8] sm:$0xff]  ;;  %v8276_v15 = vld [vmem:[%s14112_s14 + $0x1d0] sm:$0xff] }
 0xbc9   :  { %6201 = vadd.xlane.f32.xlu0 %v6194_v54  ;;  %9360 = vmatprep.mubr.msk.f32.mxu1 %vm895_vm2, %v8262_v31  ;;  %v6008_v1 = vadd.f32 %v6004_v63, %v14309_v52  ;;  %v6011_v20 = vmul.f32 %v6007_v35, %v10732_v19  ;;  %v8312_v31 = vld [vmem:[%s14111_s13 + $0x3f0] sm:$0xff]  ;;  %v8242_v54 = vld [vmem:[%s14118_s20 + $0xc0] sm:$0xff]  ;;  %v8245_v7 = vld [vmem:[%s14118_s20 + $0xd8] sm:$0xff] }
 0xbca   :  { %v8244_v63 = vld [vmem:[%s14118_s20 + $0xd0] sm:$0xff]  ;;  %v8273_v21 = vld [vmem:[%s14112_s14 + $0x1b8] sm:$0xff]  ;;  %v8270_v35 = vld [vmem:[%s14112_s14 + $0x1a0] sm:$0xff] }
 0xbcb   :  { %v6012_v53 = vmul.f32 %v6008_v1, %v10732_v19  ;;  %v8230_v19 = vld [vmem:[%s14118_s20 + $0x40] sm:$0xff]  ;;  %v8281_v16 = vld [vmem:[%s14112_s14 + $0x1f8] sm:$0xff]  ;;  %v8275_v52 = vld [vmem:[%s14112_s14 + $0x1c8] sm:$0xff] }
 0xbcc   :  { %9361 = vmatmul.mubr.msk.f32.gmra.mrb[110].mxu1 %vm895_vm2, %v8263_v6  ;;  %v8271_v6 = vld [vmem:[%s14112_s14 + $0x1a8] sm:$0xff]  ;;  %v8280_v1 = vld [vmem:[%s14112_s14 + $0x1f0] sm:$0xff]  ;;  %v8318_v17 = vld [vmem:[%s14112_s14 + $0x3a0] sm:$0xff] }
 0xbcd   :  { %6213 = vadd.xlane.f32.xlu0 %v6206_v24  ;;  %9363 = vmatprep.mubr.msk.f32.mxu1 %vm895_vm2, %v8264_v4  ;;  %v9586_v58 = vpack.c.bf16 %v6012_v53, %v6011_v20  ;;  %v8279_v4 = vld [vmem:[%s14112_s14 + $0x1e8] sm:$0xff]  ;;  %v8278_v24 = vld [vmem:[%s14112_s14 + $0x1e0] sm:$0xff]  ;;  %v8277_v20 = vld [vmem:[%s14112_s14 + $0x1d8] sm:$0xff] }
 0xbce   :  { %v8274_v53 = vld [vmem:[%s14112_s14 + $0x1c0] sm:$0xff] }
 0xbcf   :  { %9587 = vmatprep.subr.bf16.mxu0 %v9586_v58 }
 0xbd0   :  { %9364 = vmatmul.mubr.msk.f32.gmra.mrb[112].mxu1 %vm895_vm2, %v8265_v2  ;;  %9589 = vmatpush3.bf16.msra.mxu0 %v9586_v58  ;;  %v8319_v2 = vld [vmem:[%s14112_s14 + $0x3a8] sm:$0xff]  ;;  %v8321_v58 = vld [vmem:[%s14112_s14 + $0x3b8] sm:$0xff] }
 0xbd1   :  { %9591 = vmatprep.subr.bf16.mxu0 %v9590_v46 }
 0xbd4   :  { %9593 = vmatpush3.bf16.msra.mxu0 %v9590_v46  ;;  %v8323_v46 = vld [vmem:[%s14112_s14 + $0x3c8] sm:$0xff] }
 0xbd5   :  { %6091 = vperm.xlu1 %9618, %v8226_v50   ;;  %9426 = vmatprep.subr.bf16.mxu0 %v10194_v59  ;;  %v8320_v50 = vld [vmem:[%s14112_s14 + $0x3b0] sm:$0xff] }
 0xbd7   :  { %9375 = vmatmul.mubr.msk.f32.vlgmr.msra.gmra.mrb[110].mxu0 %vm895_vm2, %v8299_v10  ;;  %v8325_v10 = vld [vmem:[%s14112_s14 + $0x3d8] sm:$0xff] }
 0xbd8   :  { %9377 = vmatprep.mubr.msk.f32.mxu0 %vm895_vm2, %v8300_v36  ;;  %9427 = vmatpush3.bf16.msra.mxu0 %v10194_v59  ;;  %v8322_v36 = vld [vmem:[%s14112_s14 + $0x3c0] sm:$0xff]  ;;  %v8327_v59 = vld [vmem:[%s14112_s14 + $0x3e8] sm:$0xff] }
 0xbd9   :  { %6115 = vperm.xlu1 %9618, %v8230_v19   ;;  %9428 = vmatprep.subr.bf16.mxu0 %v10195_v26  ;;  %v8346_v19 = vld [vmem:[%s14113_s15 + $0x60] sm:$0xff] }
 0xbda   :  { %9406 = vmatprep.mubr.msk.f32.mxu1 %vm895_vm2, %v8346_v19 }
 0xbdb   :  { %9378 = vmatmul.mubr.msk.f32.gmra.mrb[136].mxu0 %vm895_vm2, %v8301_v23  ;;  %v8324_v23 = vld [vmem:[%s14112_s14 + $0x3d0] sm:$0xff] }
 0xbdc   :  { %9380 = vmatprep.mubr.msk.f32.mxu0 %vm895_vm2, %v8302_v39  ;;  %9429 = vmatpush3.bf16.msra.mxu0 %v10195_v26  ;;  %v8326_v39 = vld [vmem:[%s14112_s14 + $0x3e0] sm:$0xff]  ;;  %v8351_v26 = vld [vmem:[%s14114_s16 + $0x68] sm:$0xff] }
 0xbdd   :  { %6120 = vperm.xlu1 %9618, %v8231_v9   ;;  %9430 = vmatprep.subr.bf16.mxu0 %v10196_v13  ;;  %v8329_v9 = vld [vmem:[%s14112_s14 + $0x3f8] sm:$0xff] }
 0xbdf   :  { %9381 = vmatmul.mubr.msk.f32.gmra.mrb[138].mxu0 %vm895_vm2, %v8303_v25  ;;  %v8328_v25 = vld [vmem:[%s14112_s14 + $0x3f0] sm:$0xff] }
 0xbe0   :  { %9383 = vmatprep.mubr.msk.f32.mxu0 %vm895_vm2, %v8304_v0  ;;  %9431 = vmatpush3.bf16.msra.mxu0 %v10196_v13  ;;  %v8350_v0 = vld [vmem:[%s14114_s16 + $0x60] sm:$0xff]  ;;  %v8363_v13 = vld [vmem:[%s14114_s16 + $0xe8] sm:$0xff] }
 0xbe1   :  { %6106 = vperm.xlu1 %9618, %v8229_v3   ;;  %9432 = vmatprep.subr.bf16.mxu0 %v10197_v14  ;;  %v8353_v3 = vld [vmem:[%s14114_s16 + $0x78] sm:$0xff] }
 0xbe3   :  { %6096 = vperm.xlu0 %9617, %v8227_v37   ;;  %9384 = vmatmul.mubr.msk.f32.gmra.mrb[140].mxu0 %vm895_vm2, %v8305_v43  ;;  %v8352_v37 = vld [vmem:[%s14114_s16 + $0x70] sm:$0xff]  ;;  %v8365_v43 = vld [vmem:[%s14114_s16 + $0xf8] sm:$0xff] }
 0xbe4   :  { %9386 = vmatprep.mubr.msk.f32.mxu0 %vm895_vm2, %v8306_v5  ;;  %9433 = vmatpush3.bf16.msra.mxu0 %v10197_v14  ;;  %v8370_v5 = vld [vmem:[%s14117_s19 + $0x60] sm:$0xff]  ;;  %v8364_v14 = vld [vmem:[%s14114_s16 + $0xf0] sm:$0xff] }
 0xbe5   :  { %6130 = vperm.xlu1 %9618, %v8233_v45   ;;  %9434 = vmatprep.subr.bf16.mxu0 %v10198_v51  ;;  %v8362_v45 = vld [vmem:[%s14114_s16 + $0xe0] sm:$0xff] }
 0xbe7   :  { %6101 = vperm.xlu0 %9617, %v8228_v29   ;;  %9387 = vmatmul.mubr.msk.f32.gmra.mrb[142].mxu0 %vm895_vm2, %v8307_v40 }
 0xbe8   :  { %9389 = vmatprep.mubr.msk.f32.mxu0 %vm895_vm2, %v8308_v55  ;;  %9435 = vmatpush3.bf16.msra.mxu0 %v10198_v51  ;;  %v14310_v55 = vld [vmem:[#allocation29_spill] sm:$0xff] }
 0xbe9   :  { %6254 = vperm.xlu1 %9618, %v8239_v62   ;;  %9436 = vmatprep.subr.bf16.mxu0 %v10199_v11  ;;  %v8372_v62 = vld [vmem:[%s14117_s19 + $0x70] sm:$0xff] }
 0xbeb   :  { %6125 = vperm.xlu0 %9617, %v8232_v34   ;;  %9390 = vmatmul.mubr.msk.f32.gmra.mrb[144].mxu0 %vm895_vm2, %v8309_v47  ;;  %v8371_v34 = vld [vmem:[%s14117_s19 + $0x68] sm:$0xff] }
 0xbec   :  { %9392 = vmatprep.mubr.msk.f32.mxu0 %vm895_vm2, %v8310_v18  ;;  %9437 = vmatpush3.bf16.msra.mxu0 %v10199_v11  ;;  %v8373_v18 = vld [vmem:[%s14117_s19 + $0x78] sm:$0xff] }
 0xbed   :  { %6278 = vperm.xlu1 %9618, %v8243_v12   ;;  %9438 = vmatprep.subr.bf16.mxu0 %v10200_v38 }
 0xbef   :  { %6249 = vperm.xlu0 %9617, %v8238_v57   ;;  %9393 = vmatmul.mubr.msk.f32.gmra.mrb[146].mxu0 %vm895_vm2, %v8311_v48  ;;  %v8374_v48 = vld [vmem:[%s14118_s20 + $0x60] sm:$0xff] }
 0xbf0   :  { %9395 = vmatprep.mubr.msk.f32.mxu0 %vm895_vm2, %v8312_v31  ;;  %9439 = vmatpush3.bf16.msra.mxu0 %v10200_v38 }
 0xbf1   :  { %6264 = vperm.xlu1 %9618, %v8241_v56   ;;  %9440 = vmatprep.subr.bf16.mxu0 %v10201_v22 }
 0xbf3   :  { %6273 = vperm.xlu0 %9617, %v8242_v54   ;;  %9396 = vmatmul.mubr.msk.f32.gmra.mrb[148].mxu0 %vm895_vm2, %v8313_v28  ;;  %v8375_v54 = vld [vmem:[%s14118_s20 + $0x68] sm:$0xff]  ;;  %v8376_v28 = vld [vmem:[%s14118_s20 + $0x70] sm:$0xff] }
 0xbf4   :  { %9441 = vmatpush3.bf16.msra.mxu0 %v10201_v22 }
 0xbf5   :  { %6288 = vperm.xlu1 %9618, %v8245_v7  }
 0xbf7   :  { %6259 = vperm.xlu0 %9617, %v8240_v30  }
 0xbf9   :  { %6388 = vperm.xlu1 %9618, %v8271_v6  }
 0xbfb   :  { %6283 = vperm.xlu0 %9617, %v8244_v63   ;;  %v8377_v63 = vld [vmem:[%s14118_s20 + $0x78] sm:$0xff] }
 0xbfd   :  { %6398 = vperm.xlu1 %9618, %v8273_v21  }
 0xbff   :  { %6383 = vperm.xlu0 %9617, %v8270_v35  }
 0xc01   :  { %6428 = vperm.xlu1 %9618, %v8279_v4   ;;  %v8383_v4 = vld [vmem:[%s14117_s19 + $0xe8] sm:$0xff] }
 0xc03   :  { %6393 = vperm.xlu0 %9617, %v8272_v27  }
 0xc05   :  { %6438 = vperm.xlu1 %9618, %v8281_v16  }
 0xc07   :  { %6423 = vperm.xlu0 %9617, %v8278_v24  }
 0xc09   :  { %6408 = vperm.xlu1 %9618, %v8275_v52   ;;  %v8382_v52 = vld [vmem:[%s14117_s19 + $0xe0] sm:$0xff] }
 0xc0b   :  { %6433 = vperm.xlu0 %9617, %v8280_v1  }
 0xc0d   :  { %6418 = vperm.xlu1 %9618, %v8277_v20  }
 0xc0f   :  { %6403 = vperm.xlu0 %9617, %v8274_v53  }
 0xc11   :  { %6687 = vperm.xlu1 %9618, %v8319_v2  }
 0xc13   :  { %6413 = vperm.xlu0 %9617, %v8276_v15   ;;  %v8386_v15 = vld [vmem:[%s14118_s20 + $0xe0] sm:$0xff] }
 0xc15   :  { %6697 = vperm.xlu1 %9618, %v8321_v58  }
 0xc17   :  { %6682 = vperm.xlu0 %9617, %v8318_v17  }
 0xc19   :  { %6707 = vperm.xlu1 %9618, %v8323_v46  }
 0xc1b   :  { %6692 = vperm.xlu0 %9617, %v8320_v50  }
 0xc1d   :  { %6717 = vperm.xlu1 %9618, %v8325_v10   ;;  %v8384_v10 = vld [vmem:[%s14117_s19 + $0xf0] sm:$0xff] }
 0xc1f   :  { %6702 = vperm.xlu0 %9617, %v8322_v36  }
 0xc21   :  { %6727 = vperm.xlu1 %9618, %v8327_v59  }
 0xc23   :  { %6712 = vperm.xlu0 %9617, %v8324_v23  }
 0xc25   :  { %6737 = vperm.xlu1 %9618, %v8329_v9  }
 0xc27   :  { %6722 = vperm.xlu0 %9617, %v8326_v39  }
 0xc29   :  { %6946 = vperm.xlu1 %9618, %v8351_v26  }
 0xc2b   :  { %6732 = vperm.xlu0 %9617, %v8328_v25   ;;  %v8385_v25 = vld [vmem:[%s14117_s19 + $0xf8] sm:$0xff] }
 0xc2d   :  { %6956 = vperm.xlu1 %9618, %v8353_v3  }
 0xc2f   :  { %6941 = vperm.xlu0 %9617, %v8350_v0  }
 0xc31   :  { %7073 = vperm.xlu1 %9618, %v8363_v13  }
 0xc33   :  { %6951 = vperm.xlu0 %9617, %v8352_v37   ;;  %v6040_v29 = vpop.xlane.xlu1 %6039 }
 0xc34   :  { %v13699_v30 = vmul.f32 %v6040_v29, %v14310_v55 }
 0xc35   :  { %7083 = vperm.xlu1 %9618, %v8365_v43  }
 0xc36   :  { %v6066_v16 = vmul.f32 %v13699_v30, %v13699_v30 }
 0xc37   :  { %7068 = vperm.xlu0 %9617, %v8362_v45  }
 0xc39   :  { %7425 = vperm.xlu1 %9618, %v8370_v5  }
 0xc3a   :  { %v6038_v40 = vpop.xlane.xlu0 %6037 }
 0xc3b   :  { %v13678_v51 = vmul.f32 %v6038_v40, %v14310_v55  ;;  %7078 = vperm.xlu0 %9617, %v8364_v14  }
 0xc3d   :  { %v6042_v47 = vpop.xlane.xlu1 %6041  ;;  %7435 = vperm.xlu1 %9618, %v8372_v62   ;;  %v6065_v11 = vmul.f32 %v13678_v51, %v13678_v51  ;;  %v6073_v37 = vsub.f32 %v13315_v33, %v13678_v51 }
 0xc3e   :  { %v6050_v12 = vpop.xlane.xlu0 %6049  ;;  %v13720_v53 = vmul.f32 %v6042_v47, %v14310_v55 }
 0xc3f   :  { %v6061_v57 = vmul.f32 %v6050_v12, %v14310_v55  ;;  %7430 = vperm.xlu0 %9617, %v8371_v34   ;;  %v8387_v34 = vld [vmem:[%s14118_s20 + $0xe8] sm:$0xff] }
 0xc40   :  { %v6067_v36 = vmul.f32 %v13720_v53, %v13720_v53 }
 0xc41   :  { %v6069_v56 = vsub.f32 %v6061_v57, %v6065_v11  ;;  %v6054_v31 = vpop.xlane.xlu1 %6053  ;;  %7440 = vperm.xlu1 %9618, %v8373_v18  }
 0xc42   :  { %v6052_v38 = vpop.xlane.xlu0 %6051  ;;  %v6063_v46 = vmul.f32 %v6054_v31, %v14310_v55 }
 0xc43   :  { %7449 = vperm.xlu0 %9617, %v8374_v48   ;;  %v6077_v7 = vadd.f32 1e-05, %v6069_v56  ;;  %v6062_v35 = vmul.f32 %v6052_v38, %v14310_v55 }
 0xc44   :  { %v6071_v39 = vsub.f32 %v6063_v46, %v6067_v36 }
 0xc45   :  { %v6196_v22 = vpop.xlane.xlu1 %6195  ;;  %7454 = vperm.xlu1 %9618, %v8375_v54   ;;  %10047 = vrsqrt.f32 %v6077_v7  ;;  %v6070_v2 = vsub.f32 %v6062_v35, %v6066_v16 }
 0xc46   :  { %v6044_v6 = vpop.xlane.xlu0 %6043  ;;  %v13743_v43 = vmul.f32 %v6196_v22, %v14310_v55  ;;  %v6079_v14 = vadd.f32 1e-05, %v6071_v39 }
 0xc47   :  { %v13705_v21 = vmul.f32 %v6044_v6, %v14310_v55  ;;  %7459 = vperm.xlu0 %9617, %v8376_v28   ;;  %v6078_v59 = vadd.f32 1e-05, %v6070_v2 }
 0xc48   :  { %v6223_v33 = vmul.f32 %v13743_v43, %v13743_v43 }
 0xc49   :  { %v6208_v27 = vpop.xlane.xlu1 %6207  ;;  %7464 = vperm.xlu1 %9618, %v8377_v63   ;;  %v6068_v1 = vmul.f32 %v13705_v21, %v13705_v21  ;;  %10049 = vrsqrt.f32 %v6078_v59  ;;  %v6076_v16 = vsub.f32 %v13306_v61, %v13705_v21 }
 0xc4a   :  { %v6056_v24 = vpop.xlane.xlu0 %6055  ;;  %v6219_v29 = vmul.f32 %v6208_v27, %v14310_v55  ;;  %v6074_v27 = vsub.f32 %v13289_v49, %v13699_v30 }
 0xc4b   :  { %v6064_v20 = vmul.f32 %v6056_v24, %v14310_v55  ;;  %7588 = vperm.xlu0 %9617, %v8383_v4  }
 0xc4c   :  { %v6227_v11 = vsub.f32 %v6219_v29, %v6223_v33 }
 0xc4d   :  { %v6072_v58 = vsub.f32 %v6064_v20, %v6068_v1  ;;  %v6200_v17 = vpop.xlane.xlu1 %6199  ;;  %7583 = vperm.xlu1 %9618, %v8382_v52  }
 0xc4e   :  { %v6198_v50 = vpop.xlane.xlu0 %6197  ;;  %v13755_v57 = vmul.f32 %v6200_v17, %v14310_v55  ;;  %v6235_v63 = vadd.f32 1e-05, %v6227_v11 }
 0xc4f   :  { %v13730_v19 = vmul.f32 %v6198_v50, %v14310_v55  ;;  %7607 = vperm.xlu0 %9617, %v8386_v15   ;;  %v6080_v23 = vadd.f32 1e-05, %v6072_v58  ;;  %v10048_v3 = vpop.eup %10047 }
 0xc50   :  { %v6085_v40 = vmul.f32 %v10048_v3, %v6073_v37  ;;  %v6225_v35 = vmul.f32 %v13755_v57, %v13755_v57 }
 0xc51   :  { %7593 = vperm.xlu1 %9618, %v8384_v10   ;;  %v6212_v9 = vpop.xlane.xlu1 %6211  ;;  %v6224_v0 = vmul.f32 %v13730_v19, %v13730_v19  ;;  %10051 = vrsqrt.f32 %v6080_v23  ;;  %v6075_v10 = vsub.f32 %v13337_v42, %v13720_v53 }
 0xc52   :  { %v6210_v26 = vpop.xlane.xlu0 %6209  ;;  %10053 = vrsqrt.f32 %v6079_v14  ;;  %v6221_v54 = vmul.f32 %v6212_v9, %v14310_v55  ;;  %v6232_v9 = vsub.f32 %v13324_v60, %v13730_v19 }
 0xc53   :  { %v6220_v13 = vmul.f32 %v6210_v26, %v14310_v55  ;;  %v10050_v6 = vpop.eup %10049 }
 0xc54   :  { %v6229_v24 = vsub.f32 %v6221_v54, %v6225_v35  ;;  %v6086_v20 = vmul.f32 %v10050_v6, %v6074_v27 }
 0xc55   :  { %v6228_v45 = vsub.f32 %v6220_v13, %v6224_v0  ;;  %7598 = vperm.xlu1 %9618, %v8385_v25   ;;  %v6092_v5 = vpop.permute.xlu1 %6091 }
 0xc56   :  { %v6202_v62 = vpop.xlane.xlu0 %6201  ;;  %v6109_v51 = vmul.f32 %v6092_v5, %v6085_v40  ;;  %v6237_v46 = vadd.f32 1e-05, %v6229_v24  ;;  %v6231_v5 = vsub.f32 %v13350_v8, %v13743_v43 }
 0xc57   :  { %v13750_v47 = vmul.f32 %v6202_v62, %v14310_v55  ;;  %v6236_v12 = vadd.f32 1e-05, %v6228_v45 }
 0xc59   :  { %7612 = vperm.xlu1 %9618, %v8387_v34   ;;  %v6116_v18 = vpop.permute.xlu1 %6115  ;;  %v6226_v31 = vmul.f32 %v13750_v47, %v13750_v47  ;;  %10055 = vrsqrt.f32 %v6236_v12  ;;  %v6234_v34 = vsub.f32 %v13344_v41, %v13750_v47 }
 0xc5a   :  { %v13757_v48 = vadd.f32 %v6116_v18, %v6109_v51  ;;  %v6214_v56 = vpop.xlane.xlu0 %6213 }
 0xc5b   :  { %v6222_v38 = vmul.f32 %v6214_v56, %v14310_v55  ;;  %v10052_v4 = vpop.eup %10051 }
 0xc5c   :  { %v8234_v28 = vmul.f32 -1.442695, %v13757_v48  ;;  %v6088_v2 = vmul.f32 %v10052_v4, %v6076_v16  ;;  %v10054_v17 = vpop.eup %10053 }
 0xc5d   :  { %v6230_v7 = vsub.f32 %v6222_v38, %v6226_v31  ;;  %v6121_v22 = vpop.permute.xlu1 %6120  ;;  %v6087_v23 = vmul.f32 %v10054_v17, %v6075_v10 }
 0xc5e   :  { %10057 = vpow2.f32 %v8234_v28  ;;  %v6233_v28 = vsub.f32 %v13361_v44, %v13755_v57 }
 0xc5f   :  { %v6238_v52 = vadd.f32 1e-05, %v6230_v7  ;;  %10059 = vrsqrt.f32 %v6235_v63 }
 0xc61   :  { %v6107_v1 = vpop.permute.xlu1 %6106  ;;  %10061 = vrsqrt.f32 %v6238_v52 }
 0xc62   :  { %v6097_v15 = vpop.permute.xlu0 %6096  ;;  %v6112_v50 = vmul.f32 %v6107_v1, %v6088_v2  ;;  %10063 = vrsqrt.f32 %v6237_v46 }
 0xc63   :  { %v6110_v58 = vmul.f32 %v6097_v15, %v6086_v20  ;;  %v10056_v21 = vpop.eup %10055 }
 0xc64   :  { %v6244_v25 = vmul.f32 %v10056_v21, %v6232_v9  ;;  %v14312_v21 = vld [vmem:[#allocation26_spill] sm:$0xff] }
 0xc65   :  { %v13772_v49 = vadd.f32 %v6121_v22, %v6110_v58  ;;  %v6131_v30 = vpop.permute.xlu1 %6130 }
 0xc66   :  { %v13774_v36 = vadd.f32 %v6131_v30, %v6112_v50  ;;  %v6102_v61 = vpop.permute.xlu0 %6101  ;;  %v14311_v50 = vld [vmem:[#allocation13_spill] sm:$0xff] }
 0xc67   :  { %v8235_v59 = vmul.f32 -1.442695, %v13772_v49  ;;  %v6111_v42 = vmul.f32 %v6102_v61, %v6087_v23 }
 0xc68   :  { %v8237_v39 = vmul.f32 -1.442695, %v13774_v36  ;;  %v10058_v26 = vpop.eup %10057 }
 0xc69   :  { %10065 = vpow2.f32 %v8235_v59  ;;  %v6255_v53 = vpop.permute.xlu1 %6254  ;;  %v10060_v13 = vpop.eup %10059  ;;  %v6149_v37 = vadd.f32 1.0, %v10058_v26 }
 0xc6a   :  { %10067 = vpow2.f32 %v8237_v39  ;;  %v6126_v3 = vpop.permute.xlu0 %6125  ;;  %v6268_v45 = vmul.f32 %v6255_v53, %v6244_v25  ;;  %v6243_v62 = vmul.f32 %v10060_v13, %v6231_v5  ;;  %v14313_v13 = vld [vmem:[#allocation11_spill] sm:$0xff] }
 0xc6b   :  { %v13780_v0 = vadd.f32 %v6126_v3, %v6111_v42  ;;  %v10062_v40 = vpop.eup %10061 }
 0xc6c   :  { %v10064_v18 = vpop.eup %10063  ;;  %v6246_v8 = vmul.f32 %v10062_v40, %v6234_v34 }
 0xc6d   :  { %v8236_v60 = vmul.f32 -1.442695, %v13780_v0  ;;  %v6279_v19 = vpop.permute.xlu1 %6278  ;;  %v6245_v63 = vmul.f32 %v10064_v18, %v6233_v28 }
 0xc6e   :  { %v13785_v14 = vadd.f32 %v6279_v19, %v6268_v45  ;;  %v6250_v29 = vpop.permute.xlu0 %6249  ;;  %v14314_v19 = vld [vmem:[#allocation27_spill] sm:$0xff] }
 0xc6f   :  { %10069 = vpow2.f32 %v8236_v60  ;;  %v6267_v51 = vmul.f32 %v6250_v29, %v6243_v62 }
 0xc70   :  { %10071 = vrcp.f32 %v6149_v37  ;;  %v8247_v33 = vmul.f32 -1.442695, %v13785_v14 }
 0xc71   :  { %v6265_v12 = vpop.permute.xlu1 %6264 }
 0xc72   :  { %10073 = vpow2.f32 %v8247_v33  ;;  %v6274_v43 = vpop.permute.xlu0 %6273  ;;  %v6270_v54 = vmul.f32 %v6265_v12, %v6246_v8 }
 0xc73   :  { %v10066_v11 = vpop.eup %10065  ;;  %v13790_v56 = vadd.f32 %v6274_v43, %v6267_v51 }
 0xc74   :  { %v10068_v31 = vpop.eup %10067  ;;  %v6150_v38 = vadd.f32 1.0, %v10066_v11 }
 0xc75   :  { %v6152_v7 = vadd.f32 1.0, %v10068_v31  ;;  %v8246_v41 = vmul.f32 -1.442695, %v13790_v56  ;;  %v6289_v47 = vpop.permute.xlu1 %6288 }
 0xc76   :  { %10075 = vrcp.f32 %v6150_v38  ;;  %v13795_v22 = vadd.f32 %v6289_v47, %v6270_v54  ;;  %v6260_v6 = vpop.permute.xlu0 %6259  ;;  %v14315_v54 = vld [vmem:[#allocation28_spill] sm:$0xff] }
 0xc77   :  { %10077 = vrcp.f32 %v6152_v7  ;;  %v6269_v27 = vmul.f32 %v6260_v6, %v6245_v63 }
 0xc78   :  { %10079 = vpow2.f32 %v8246_v41  ;;  %v8249_v35 = vmul.f32 -1.442695, %v13795_v22 }
 0xc79   :  { %v10070_v4 = vpop.eup %10069  ;;  %v6389_v2 = vpop.permute.xlu1 %6388 }
 0xc7a   :  { %v10072_v16 = vpop.eup %10071  ;;  %v6151_v24 = vadd.f32 1.0, %v10070_v4  ;;  %10081 = vpow2.f32 %v8249_v35  ;;  %v6284_v52 = vpop.permute.xlu0 %6283  ;;  %v8348_v4 = vld [vmem:[%s14113_s15 + $0x70] sm:$0xff] }
 0xc7b   :  { %v13798_v44 = vadd.f32 %v6284_v52, %v6269_v27  ;;  %v6161_v1 = vmul.f32 %v10072_v16, %v13757_v48  ;;  %v14316_v27 = vld [vmem:[#allocation8_spill] sm:$0xff] }
 0xc7c   :  { %v10074_v57 = vpop.eup %10073  ;;  %10083 = vrcp.f32 %v6151_v24 }
 0xc7d   :  { %v6308_v20 = vadd.f32 1.0, %v10074_v57  ;;  %v8248_v15 = vmul.f32 -1.442695, %v13798_v44  ;;  %v6165_v10 = vadd.f32 %v6161_v1, %v14311_v50  ;;  %v6399_v48 = vpop.permute.xlu1 %6398 }
 0xc7e   :  { %v6384_v58 = vpop.permute.xlu0 %6383 }
 0xc7f   :  { %10085 = vrcp.f32 %v6308_v20  ;;  %v13807_v53 = vmul.f32 %v14222_v32, %v6165_v10  ;;  %v8349_v20 = vld [vmem:[%s14113_s15 + $0x78] sm:$0xff] }
 0xc80   :  { %v10076_v17 = vpop.eup %10075  ;;  %10087 = vpow2.f32 %v8248_v15 }
 0xc81   :  { %v10078_v46 = vpop.eup %10077  ;;  %v6162_v30 = vmul.f32 %v10076_v17, %v13772_v49  ;;  %v13817_v40 = vpop.permute.xlu1 %6428 }
 0xc82   :  { %v10080_v61 = vpop.eup %10079  ;;  %v6164_v23 = vmul.f32 %v10078_v46, %v13774_v36  ;;  %v6394_v26 = vpop.permute.xlu0 %6393 }
 0xc83   :  { %v6166_v59 = vadd.f32 %v6162_v30, %v14312_v21  ;;  %v6307_v9 = vadd.f32 1.0, %v10080_v61  ;;  %v14317_v21 = vld [vmem:[#allocation22_spill] sm:$0xff] }
 0xc84   :  { %v10082_v39 = vpop.eup %10081  ;;  %v6168_v49 = vadd.f32 %v6164_v23, %v14313_v13 }
 0xc85   :  { %10089 = vrcp.f32 %v6307_v9  ;;  %v6310_v42 = vadd.f32 1.0, %v10082_v39  ;;  %v13810_v25 = vmul.f32 %v14222_v32, %v6166_v59  ;;  %v13830_v31 = vpop.permute.xlu1 %6438 }
 0xc86   :  { %v10084_v3 = vpop.eup %10083  ;;  %v13819_v34 = vpop.permute.xlu0 %6423  ;;  %v13825_v12 = vmul.f32 %v14222_v32, %v6168_v49 }
 0xc87   :  { %v6163_v37 = vmul.f32 %v10084_v3, %v13780_v0  ;;  %10091 = vrcp.f32 %v6310_v42  ;;  %v9594_v36 = vpack.c.bf16 %v13810_v25, %v13807_v53  ;;  %v9344_v45 = vpop.f32.mrb[90].mxu1 }
 0xc88   :  { %v6555_v5 = vpop.f32.mrb[91].mxu1 }
 0xc89   :  { %v10086_v60 = vpop.eup %10085  ;;  %v6167_v29 = vadd.f32 %v6163_v37, %v14314_v19  ;;  %9595 = vmatprep.subr.bf16.mxu1 %v9594_v36 }
 0xc8a   :  { %v10088_v62 = vpop.eup %10087  ;;  %9597 = vmatpush3.bf16.msra.mxu1 %v9594_v36  ;;  %v6320_v18 = vmul.f32 %v10086_v60, %v13785_v14  ;;  %v13834_v41 = vpop.permute.xlu0 %6433  ;;  %v8347_v14 = vld [vmem:[%s14113_s15 + $0x68] sm:$0xff] }
 0xc8b   :  { %v6309_v33 = vadd.f32 1.0, %v10088_v62  ;;  %v9347_v51 = vpop.f32.mrb[100].mxu1  ;;  %v13822_v0 = vmul.f32 %v14222_v32, %v6167_v29 }
 0xc8c   :  { %v6563_v8 = vpop.f32.mrb[101].mxu1  ;;  %v6324_v28 = vadd.f32 %v6320_v18, %v14315_v54 }
 0xc8d   :  { %10093 = vrcp.f32 %v6309_v33  ;;  %v9598_v43 = vpack.c.bf16 %v13825_v12, %v13822_v0  ;;  %v8359_v8 = vld [vmem:[%s14113_s15 + $0xe8] sm:$0xff] }
 0xc8e   :  { %v13853_v15 = vmul.f32 %v14222_v32, %v6324_v28  ;;  %v6404_v46 = vpop.permute.xlu0 %6403 }
 0xc8f   :  { %v10090_v11 = vpop.eup %10089  ;;  %v9350_v38 = vpop.f32.mrb[102].mxu1  ;;  %9599 = vmatprep.subr.bf16.mxu1 %v9598_v43 }
 0xc90   :  { %v6319_v7 = vmul.f32 %v10090_v11, %v13790_v56  ;;  %v6577_v47 = vadd.f32 %v9350_v38, %v6389_v2  ;;  %v6571_v6 = vpop.f32.mrb[103].mxu1  ;;  %9601 = vmatpush3.bf16.msra.mxu1 %v9598_v43  ;;  %v10202_v43 = vld [vmem:[%s14198_s6] sm:$0xff]  }
 0xc91   :  { %v10092_v63 = vpop.eup %10091  ;;  %v6572_v35 = vadd.f32 %v6571_v6, %v6384_v58  ;;  %v6409_v58 = vpop.permute.xlu1 %6408 }
 0xc92   :  { %v6323_v16 = vadd.f32 %v6319_v7, %v14316_v27  ;;  %v6322_v56 = vmul.f32 %v10092_v63, %v13795_v22  ;;  %v8358_v22 = vld [vmem:[%s14113_s15 + $0xe0] sm:$0xff]  ;;  %v6414_v37 = vpop.permute.xlu0 %6413  ;;  %v8361_v7 = vld [vmem:[%s14113_s15 + $0xf8] sm:$0xff] }
 0xc93   :  { %v7183_v24 = vpack.c.bf16 %v6577_v47, %v6572_v35  ;;  %v9353_v52 = vpop.f32.mrb[104].mxu1  ;;  %9407 = vmatmul.mubr.msk.f32.vlgmr.msra.gmra.mrb[114].mxu1 %vm895_vm2, %v8347_v14  ;;  %v10203_v47 = vld [vmem:[%s14198_s6 + $0x8] sm:$0xff]  }
 0xc94   :  { %v6587_v57 = vadd.f32 %v9353_v52, %v6399_v48  ;;  %v6581_v1 = vpop.f32.mrb[105].mxu1  ;;  %9409 = vmatprep.mubr.msk.f32.mxu1 %vm895_vm2, %v8348_v4  ;;  %v13850_v2 = vmul.f32 %v14222_v32, %v6323_v16  ;;  %v6326_v59 = vadd.f32 %v6322_v56, %v14317_v21  ;;  %v10205_v4 = vld [vmem:[%s14198_s6 + $0x18] sm:$0xff]   ;;  %v10206_v56 = vld [vmem:[%s14198_s6 + $0x20] sm:$0xff]  }
 0xc95   :  { %v6582_v17 = vadd.f32 %v6581_v1, %v6394_v26  ;;  %9442 = vmatprep.mubr.bf16.mxu0 %v7183_v24  ;;  %v14318_v26 = vld [vmem:[#allocation23_spill] sm:$0xff]  ;;  %v6419_v3 = vpop.permute.xlu1 %6418 }
 0xc96   :  { %v9602_v50 = vpack.c.bf16 %v13853_v15, %v13850_v2  ;;  %v6683_v14 = vpop.permute.xlu0 %6682 }
 0xc97   :  { %v10094_v10 = vpop.eup %10093  ;;  %v7184_v30 = vpack.c.bf16 %v6587_v57, %v6582_v17  ;;  %v9356_v61 = vpop.f32.mrb[106].mxu1  ;;  %9410 = vmatmul.mubr.msk.f32.gmra.mrb[116].mxu1 %vm895_vm2, %v8349_v20 }
 0xc98   :  { %v6321_v23 = vmul.f32 %v10094_v10, %v13798_v44  ;;  %v6597_v9 = vadd.f32 %v9356_v61, %v6409_v58  ;;  %9603 = vmatprep.subr.bf16.mxu1 %v9602_v50  ;;  %v6591_v48 = vpop.f32.mrb[107].mxu1  ;;  %9420 = vmatprep.mubr.msk.f32.mxu1 %vm895_vm2, %v8358_v22  ;;  %v13871_v44 = vmul.f32 %v14222_v32, %v6326_v59  ;;  %v10207_v22 = vld [vmem:[%s14198_s6 + $0x28] sm:$0xff]   ;;  %v10208_v59 = vld [vmem:[%s14198_s6 + $0x30] sm:$0xff]  }
 0xc99   :  { %v6592_v39 = vadd.f32 %v6591_v48, %v6404_v46  ;;  %9605 = vmatpush3.bf16.msra.mxu1 %v9602_v50  ;;  %9443 = vmatmul.mubr.bf16.vlgmr.msra.gmra.mrb[152].mxu0 %v7184_v30 }
 0xc9a   :  { %v6325_v42 = vadd.f32 %v6321_v23, %v14318_v26  ;;  %v6693_v24 = vpop.permute.xlu0 %6692 }
 0xc9b   :  { %v7280_v13 = vpack.c.bf16 %v6597_v9, %v6592_v39  ;;  %v9359_v49 = vpop.f32.mrb[108].mxu1 }
 0xc9c   :  { %v13865_v36 = vadd.f32 %v9359_v49, %v6419_v3  ;;  %v6601_v45 = vpop.f32.mrb[109].mxu1  ;;  %v13868_v5 = vmul.f32 %v14222_v32, %v6325_v42 }
 0xc9d   :  { %v13873_v60 = vadd.f32 %v6601_v45, %v6414_v37 }
 0xc9e   :  { %v9606_v19 = vpack.c.bf16 %v13871_v44, %v13868_v5  ;;  %v6703_v46 = vpop.permute.xlu0 %6702 }
 0xc9f   :  { %v7281_v29 = vpack.c.bf16 %v13865_v36, %v13873_v60  ;;  %v9362_v62 = vpop.f32.mrb[110].mxu1 }
 0xca0   :  { %v6617_v33 = vadd.f32 %v9362_v62, %v13817_v40  ;;  %9607 = vmatprep.subr.bf16.mxu1 %v9606_v19  ;;  %v6611_v51 = vpop.f32.mrb[111].mxu1  ;;  %v8360_v40 = vld [vmem:[%s14113_s15 + $0xf0] sm:$0xff] }
 0xca1   :  { %v6612_v18 = vadd.f32 %v6611_v51, %v13819_v34  ;;  %9609 = vmatpush3.bf16.msra.mxu1 %v9606_v19 }
 0xca2   :  { %9458 = vmatprep.subr.bf16.mxu1 %v10202_v43  ;;  %v6713_v39 = vpop.permute.xlu0 %6712 }
 0xca3   :  { %v7185_v11 = vpack.c.bf16 %v6617_v33, %v6612_v18  ;;  %v9365_v38 = vpop.f32.mrb[112].mxu1 }
 0xca4   :  { %v6627_v54 = vadd.f32 %v9365_v38, %v13830_v31  ;;  %9421 = vmatmul.mubr.msk.f32.vlgmr.msra.gmra.mrb[118].mxu1 %vm895_vm2, %v8359_v8  ;;  %v6621_v34 = vpop.f32.mrb[113].mxu1  ;;  %v6688_v31 = vpop.permute.xlu1 %6687 }
 0xca5   :  { %v6622_v28 = vadd.f32 %v6621_v34, %v13834_v41  ;;  %9459 = vmatpush3.bf16.msra.mxu1 %v10202_v43  ;;  %9446 = vmatprep.mubr.bf16.mxu0 %v7185_v11  ;;  %v10204_v41 = vld [vmem:[%s14198_s6 + $0x10] sm:$0xff]  }
 0xca6   :  { %9423 = vmatprep.mubr.msk.f32.mxu1 %vm895_vm2, %v8360_v40  ;;  %9460 = vmatprep.subr.bf16.mxu1 %v10203_v47  ;;  %v6723_v51 = vpop.permute.xlu0 %6722 }
 0xca7   :  { %v7186_v6 = vpack.c.bf16 %v6627_v54, %v6622_v28 }
 0xca8   :  { %9424 = vmatmul.mubr.msk.f32.gmra.mrb[120].mxu1 %vm895_vm2, %v8361_v7  ;;  %v6698_v27 = vpop.permute.xlu1 %6697 }
 0xca9   :  { %9461 = vmatpush3.bf16.msra.mxu1 %v10203_v47  ;;  %9474 = vmatprep.mubr.bf16.mxu1 %v7280_v13  ;;  %v10209_v13 = vld [vmem:[%s14198_s6 + $0x38] sm:$0xff]  }
 0xcaa   :  { %9447 = vmatmul.mubr.bf16.gmra.mrb[156].mxu0 %v7186_v6  ;;  %9462 = vmatprep.subr.bf16.mxu1 %v10204_v41  ;;  %v9376_v63 = vpop.f32.mrb[110].mxu0  ;;  %v6733_v28 = vpop.permute.xlu0 %6732 }
 0xcab   :  { %v6854_v35 = vpop.f32.mrb[111].mxu0 }
 0xcac   :  { %v6708_v58 = vpop.permute.xlu1 %6707 }
 0xcad   :  { %9463 = vmatpush3.bf16.msra.mxu1 %v10204_v41 }
 0xcae   :  { %9464 = vmatprep.subr.bf16.mxu1 %v10205_v4  ;;  %v9379_v16 = vpop.f32.mrb[136].mxu0 }
 0xcaf   :  { %v6862_v52 = vpop.f32.mrb[137].mxu0 }
 0xcb0   :  { %v6718_v23 = vpop.permute.xlu1 %6717 }
 0xcb1   :  { %9465 = vmatpush3.bf16.msra.mxu1 %v10205_v4 }
 0xcb2   :  { %9466 = vmatprep.subr.bf16.mxu1 %v10206_v56  ;;  %v9382_v57 = vpop.f32.mrb[138].mxu0 }
 0xcb3   :  { %v6876_v1 = vadd.f32 %v9382_v57, %v6688_v31  ;;  %v6870_v20 = vpop.f32.mrb[139].mxu0 }
 0xcb4   :  { %v6871_v17 = vadd.f32 %v6870_v20, %v6683_v14  ;;  %v6728_v62 = vpop.permute.xlu1 %6727 }
 0xcb5   :  { %9467 = vmatpush3.bf16.msra.mxu1 %v10206_v56 }
 0xcb6   :  { %9468 = vmatprep.subr.bf16.mxu1 %v10207_v22  ;;  %v7187_v50 = vpack.c.bf16 %v6876_v1, %v6871_v17  ;;  %v9385_v10 = vpop.f32.mrb[140].mxu0 }
 0xcb7   :  { %v6886_v30 = vadd.f32 %v9385_v10, %v6698_v27  ;;  %v6880_v61 = vpop.f32.mrb[141].mxu0 }
 0xcb8   :  { %v6881_v21 = vadd.f32 %v6880_v61, %v6693_v24  ;;  %9450 = vmatprep.mubr.bf16.mxu0 %v7187_v50  ;;  %v6738_v40 = vpop.permute.xlu1 %6737 }
 0xcb9   :  { %9469 = vmatpush3.bf16.msra.mxu1 %v10207_v22 }
 0xcba   :  { %9470 = vmatprep.subr.bf16.mxu1 %v10208_v59  ;;  %v7188_v9 = vpack.c.bf16 %v6886_v30, %v6881_v21  ;;  %v9388_v48 = vpop.f32.mrb[142].mxu0 }
 0xcbb   :  { %v6896_v26 = vadd.f32 %v9388_v48, %v6708_v58  ;;  %v6890_v42 = vpop.f32.mrb[143].mxu0  ;;  %v6942_v58 = vpop.permute.xlu0 %6941 }
 0xcbc   :  { %v6891_v3 = vadd.f32 %v6890_v42, %v6703_v46  ;;  %9451 = vmatmul.mubr.bf16.gmra.mrb[160].mxu0 %v7188_v9  ;;  %v6947_v17 = vpop.permute.xlu1 %6946 }
 0xcbd   :  { %9471 = vmatpush3.bf16.msra.mxu1 %v10208_v59 }
 0xcbe   :  { %9472 = vmatprep.subr.bf16.mxu1 %v10209_v13  ;;  %v7282_v49 = vpack.c.bf16 %v6896_v26, %v6891_v3  ;;  %v9391_v37 = vpop.f32.mrb[144].mxu0 }
 0xcbf   :  { %v6906_v45 = vadd.f32 %v9391_v37, %v6718_v23  ;;  %v6900_v19 = vpop.f32.mrb[145].mxu0  ;;  %v6952_v22 = vpop.permute.xlu0 %6951 }
 0xcc0   :  { %v6901_v33 = vadd.f32 %v6900_v19, %v6713_v39  ;;  %v6957_v10 = vpop.permute.xlu1 %6956 }
 0xcc1   :  { %9473 = vmatpush3.bf16.msra.mxu1 %v10209_v13 }
 0xcc2   :  { %v7283_v18 = vpack.c.bf16 %v6906_v45, %v6901_v33  ;;  %v9394_v8 = vpop.f32.mrb[146].mxu0 }
 0xcc3   :  { %v6916_v43 = vadd.f32 %v9394_v8, %v6728_v62  ;;  %v6910_v11 = vpop.f32.mrb[147].mxu0  ;;  %v7069_v59 = vpop.permute.xlu0 %7068 }
 0xcc4   :  { %9475 = vmatmul.mubr.bf16.vlgmr.msra.gmra.mrb[124].mxu1 %v7281_v29  ;;  %v6911_v38 = vadd.f32 %v6910_v11, %v6723_v51  ;;  %v7074_v42 = vpop.permute.xlu1 %7073 }
 0xcc5   :  { %9478 = vmatprep.mubr.bf16.mxu1 %v7282_v49 }
 0xcc6   :  { %v7189_v54 = vpack.c.bf16 %v6916_v43, %v6911_v38  ;;  %v9397_v34 = vpop.f32.mrb[148].mxu0 }
 0xcc7   :  { %v6926_v7 = vadd.f32 %v9397_v34, %v6738_v40  ;;  %v6920_v47 = vpop.f32.mrb[149].mxu0  ;;  %v7079_v8 = vpop.permute.xlu0 %7078 }
 0xcc8   :  { %v6921_v6 = vadd.f32 %v6920_v47, %v6733_v28  ;;  %9454 = vmatprep.mubr.bf16.mxu0 %v7189_v54  ;;  %v7084_v40 = vpop.permute.xlu1 %7083 }
 0xcca   :  { %v7190_v31 = vpack.c.bf16 %v6926_v7, %v6921_v6 }
 0xccc   :  { %9479 = vmatmul.mubr.bf16.gmra.mrb[128].mxu1 %v7283_v18  ;;  %9455 = vmatmul.mubr.bf16.gmra.mrb[164].mxu0 %v7190_v31 }
 0xd66   :  { %v9408_v41 = vpop.f32.mrb[114].mxu1 }
 0xd67   :  { %v7037_v14 = vpop.f32.mrb[115].mxu1  ;;  %v7043_v3 = vadd.f32 %v9408_v41, %v6947_v17 }
 0xd68   :  { %v7038_v23 = vadd.f32 %v7037_v14, %v6942_v58 }
 0xd6a   :  { %v9411_v63 = vpop.f32.mrb[116].mxu1 }
 0xd6b   :  { %v7047_v36 = vpop.f32.mrb[117].mxu1  ;;  %v7053_v48 = vadd.f32 %v9411_v63, %v6957_v10 }
 0xd6c   :  { %v9444_v60 = vpop.f32.mrb[152].mxu0  ;;  %v7048_v21 = vadd.f32 %v7047_v36, %v6952_v22 }
 0xd6d   :  { %v7225_v29 = vpop.f32.mrb[153].mxu0 }
 0xd6e   :  { %v9445_v35 = vpop.f32.mrb[154].mxu0 }
 0xd6f   :  { %v7227_v4 = vpop.f32.mrb[155].mxu0 }
 0xd77   :  { %v9422_v27 = vpop.f32.mrb[118].mxu1 }
 0xd78   :  { %v7164_v16 = vpop.f32.mrb[119].mxu1  ;;  %v7170_v31 = vadd.f32 %v9422_v27, %v7074_v42 }
 0xd79   :  { %v7165_v54 = vadd.f32 %v7164_v16, %v7069_v59 }
 0xd7b   :  { %v9425_v24 = vpop.f32.mrb[120].mxu1 }
 0xd7c   :  { %v7174_v52 = vpop.f32.mrb[121].mxu1  ;;  %v7180_v28 = vadd.f32 %v9425_v24, %v7084_v40 }
 0xd7d   :  { %v9448_v56 = vpop.f32.mrb[156].mxu0  ;;  %v7175_v11 = vadd.f32 %v7174_v52, %v7079_v8 }
 0xd7e   :  { %v7237_v57 = vpop.f32.mrb[157].mxu0 }
 0xd7f   :  { %v9449_v1 = vpop.f32.mrb[158].mxu0 }
 0xd80   :  { %v7240_v20 = vpop.f32.mrb[159].mxu0 }
 0xd8f   :  { %v9452_v46 = vpop.f32.mrb[160].mxu0 }
 0xd90   :  { %v7253_v50 = vpop.f32.mrb[161].mxu0 }
 0xd91   :  { %v9453_v30 = vpop.f32.mrb[162].mxu0 }
 0xd92   :  { %v7255_v61 = vpop.f32.mrb[163].mxu0 }
 0xd97   :  { %v9476_v9 = vpop.f32.mrb[124].mxu1 }
 0xd98   :  { %v7351_v39 = vadd.f32 %v9476_v9, %v7048_v21  ;;  %v7318_v26 = vpop.f32.mrb[125].mxu1  ;;  %v8388_v9 = vld [vmem:[%s14118_s20 + $0xf0] sm:$0xff] }
 0xd99   :  { %v7349_v13 = vadd.f32 %v7318_v26, %v7038_v23  ;;  %v9477_v49 = vpop.f32.mrb[126].mxu1  ;;  %v8389_v23 = vld [vmem:[%s14118_s20 + $0xf8] sm:$0xff]  ;;  %s10260_s20 = smov [#allocation2]  }
 0xd9a   :  { %v13922_v37 = vadd.f32 %v9448_v56, %v7351_v39  ;;  %v7352_v45 = vadd.f32 %v9477_v49, %v7053_v48  ;;  %v7321_v19 = vpop.f32.mrb[127].mxu1  ;;  %v13960_v48 = vpop.permute.xlu1 %7425  ;;  %s7678_s4 = sshll.u32 %s10260_s20, 4  ;;  %s7679_s4 = int_to_ptr.vmem [resolvable:$true] %s7678_s4 }
 0xd9b   :  { %v13924_v62 = vadd.f32 %v7349_v13, %v7237_v57  ;;  %v7350_v33 = vadd.f32 %v7321_v19, %v7043_v3  ;;  %v13966_v3 = vpop.permute.xlu0 %7430  ;;  %s10211_s11 = scalar_lea.vmem %s7679_s4, 512  ;;  %p10216_p1 = scmp.lt.s32.totalorder %s7679_s4, %s7679_s4 }
 0xd9c   :  { %v13926_v51 = vadd.f32 %v9449_v1, %v7352_v45  ;;  %v7369_v18 = vmul.f32 %v14222_v32, %v13922_v37  ;;  %p10212_p0 = scmp.ne.s32.totalorder %s7679_s4, %s10211_s11  ;;  %p10217_p2 = scmp.lt.s32.totalorder %s10211_s11, %s10211_s11 }
 0xd9d   :  { %v13930_v43 = vadd.f32 %v7350_v33, %v7240_v20  ;;  %v7367_v6 = vmul.f32 %v14222_v32, %v13924_v62 }
 0xd9e   :  { %7375 = vadd.xlane.f32.xlu0 %v7369_v18  ;;  %v7381_v38 = vmul.f32 %v7369_v18, %v7369_v18  ;;  %v7370_v27 = vmul.f32 %v14222_v32, %v13926_v51  ;;  %v7436_v39 = vpop.permute.xlu1 %7435  ;;  %p10218_p3 = por %p10217_p2, %p10216_p1 }
 0xd9f   :  { %v9480_v34 = vpop.f32.mrb[128].mxu1  ;;  %v9456_v41 = vpop.f32.mrb[164].mxu0  ;;  %v7368_v4 = vmul.f32 %v14222_v32, %v13930_v43  ;;  %v7379_v58 = vmul.f32 %v7367_v6, %v7367_v6 }
 0xda0   :  { %v7509_v7 = vadd.f32 %v9480_v34, %v7175_v11  ;;  %v7334_v47 = vpop.f32.mrb[129].mxu1  ;;  %7387 = vadd.xlane.f32.xlu1 %v7381_v38  ;;  %v7265_v60 = vpop.f32.mrb[165].mxu0  ;;  %v7382_v17 = vmul.f32 %v7370_v27, %v7370_v27  ;;  %p10219_p4 = pnand %p10218_p3, %p10212_p0 }
 0xda1   :  { %v7507_v14 = vadd.f32 %v7334_v47, %v7165_v54  ;;  %v9481_v63 = vpop.f32.mrb[130].mxu1  ;;  %v9457_v24 = vpop.f32.mrb[166].mxu0  ;;  %v7380_v46 = vmul.f32 %v7368_v4, %v7368_v4 }
 0xda2   :  { %v13934_v36 = vadd.f32 %v9456_v41, %v7509_v7  ;;  %v7510_v29 = vadd.f32 %v9481_v63, %v7180_v28  ;;  %v7337_v35 = vpop.f32.mrb[131].mxu1  ;;  %7371 = vadd.xlane.f32.xlu0 %v7367_v6  ;;  %v7268_v57 = vpop.f32.mrb[167].mxu0 }
 0xda3   :  { %v13938_v16 = vadd.f32 %v7507_v14, %v7265_v60  ;;  %v7508_v52 = vadd.f32 %v7337_v35, %v7170_v31  ;;  %v13962_v26 = vpop.permute.xlu1 %7440  ;;  %v13970_v49 = vpop.permute.xlu0 %7449 }
 0xda4   :  { %v13940_v56 = vadd.f32 %v9457_v24, %v7510_v29  ;;  %7373 = vadd.xlane.f32.xlu1 %v7368_v4  ;;  %v7527_v20 = vmul.f32 %v14222_v32, %v13934_v36 }
 0xda5   :  { %v13944_v1 = vadd.f32 %v7508_v52, %v7268_v57  ;;  %v7525_v50 = vmul.f32 %v14222_v32, %v13938_v16 }
 0xda6   :  { %7377 = vadd.xlane.f32.xlu0 %v7370_v27  ;;  %v7539_v22 = vmul.f32 %v7527_v20, %v7527_v20  ;;  %v7528_v61 = vmul.f32 %v14222_v32, %v13940_v56 }
 0xda7   :  { %v7526_v10 = vmul.f32 %v14222_v32, %v13944_v1  ;;  %v7537_v30 = vmul.f32 %v7525_v50, %v7525_v50  ;;  %v13964_v42 = vpop.permute.xlu1 %7454  ;;  %v7460_v19 = vpop.permute.xlu0 %7459 }
 0xda8   :  { %7383 = vadd.xlane.f32.xlu1 %v7379_v58  ;;  %v7540_v21 = vmul.f32 %v7528_v61, %v7528_v61 }
 0xda9   :  { %v7538_v59 = vmul.f32 %v7526_v10, %v7526_v10 }
 0xdaa   :  { %7389 = vadd.xlane.f32.xlu0 %v7382_v17 }
 0xdab   :  { %v13968_v13 = vpop.permute.xlu1 %7464  ;;  %v13976_v18 = vpop.permute.xlu0 %7588 }
 0xdac   :  { %7545 = vadd.xlane.f32.xlu1 %v7539_v22 }
 0xdae   :  { %7385 = vadd.xlane.f32.xlu0 %v7380_v46 }
 0xdaf   :  { %v13972_v45 = vpop.permute.xlu1 %7583  ;;  %v13980_v11 = vpop.permute.xlu0 %7607 }
 0xdb0   :  { %7531 = vadd.xlane.f32.xlu1 %v7526_v10 }
 0xdb2   :  { %7533 = vadd.xlane.f32.xlu0 %v7527_v20 }
 0xdb3   :  { %v13974_v33 = vpop.permute.xlu1 %7593 }
 0xdb4   :  { %7541 = vadd.xlane.f32.xlu1 %v7537_v30 }
 0xdb6   :  { %7529 = vadd.xlane.f32.xlu0 %v7525_v50 }
 0xdb7   :  { %v13978_v8 = vpop.permute.xlu1 %7598 }
 0xdba   :  { %7535 = vadd.xlane.f32.xlu0 %v7528_v61 }
 0xdbb   :  { %v13982_v38 = vpop.permute.xlu1 %7612 }
 0xdbe   :  { %7547 = vadd.xlane.f32.xlu0 %v7540_v21 }
 0xdc2   :  { %7543 = vadd.xlane.f32.xlu0 %v7538_v59 }
 0xdc5   :  { %7622 = vperm.xlu1 %9618, %v8389_v23  }
 0xdd8   :  { %7617 = vperm.xlu0 %9617, %v8388_v9  }
 0xe2b   :  { %v7376_v40 = vpop.xlane.xlu0 %7375 }
 0xe2c   :  { %v7393_v54 = vmul.f32 %v7376_v40, %v14310_v55 }
 0xe2d   :  { %v7388_v34 = vpop.xlane.xlu1 %7387 }
 0xe2e   :  { %v7401_v28 = vmul.f32 %v7393_v54, %v7393_v54  ;;  %v7397_v7 = vmul.f32 %v7388_v34, %v14310_v55  ;;  %v7409_v61 = vsub.f32 %v13922_v37, %v7393_v54 }
 0xe2f   :  { %v7372_v47 = vpop.xlane.xlu0 %7371 }
 0xe30   :  { %v7405_v6 = vsub.f32 %v7397_v7, %v7401_v28  ;;  %v7391_v14 = vmul.f32 %v7372_v47, %v14310_v55 }
 0xe31   :  { %v7374_v31 = vpop.xlane.xlu1 %7373 }
 0xe32   :  { %v7413_v41 = vadd.f32 1e-05, %v7405_v6  ;;  %v7399_v35 = vmul.f32 %v7391_v14, %v7391_v14  ;;  %v7392_v52 = vmul.f32 %v7374_v31, %v14310_v55  ;;  %v7407_v54 = vsub.f32 %v13924_v62, %v7391_v14 }
 0xe33   :  { %v7378_v63 = vpop.xlane.xlu0 %7377 }
 0xe34   :  { %10095 = vrsqrt.f32 %v7413_v41  ;;  %v7394_v60 = vmul.f32 %v7378_v63, %v14310_v55  ;;  %v7400_v50 = vmul.f32 %v7392_v52, %v7392_v52 }
 0xe35   :  { %v7384_v29 = vpop.xlane.xlu1 %7383 }
 0xe36   :  { %v7395_v4 = vmul.f32 %v7384_v29, %v14310_v55  ;;  %v7402_v57 = vmul.f32 %v7394_v60, %v7394_v60 }
 0xe37   :  { %v7390_v24 = vpop.xlane.xlu0 %7389 }
 0xe38   :  { %v7403_v27 = vsub.f32 %v7395_v4, %v7399_v35  ;;  %v7398_v20 = vmul.f32 %v7390_v24, %v14310_v55 }
 0xe39   :  { %v7546_v58 = vpop.xlane.xlu1 %7545 }
 0xe3a   :  { %v7411_v17 = vadd.f32 1e-05, %v7403_v27  ;;  %v7406_v22 = vsub.f32 %v7398_v20, %v7402_v57  ;;  %v7555_v47 = vmul.f32 %v7546_v58, %v14310_v55  ;;  %v7410_v27 = vsub.f32 %v13926_v51, %v7394_v60 }
 0xe3b   :  { %v7386_v46 = vpop.xlane.xlu0 %7385 }
 0xe3c   :  { %10097 = vrsqrt.f32 %v7411_v17  ;;  %v7414_v10 = vadd.f32 1e-05, %v7406_v22  ;;  %v7396_v30 = vmul.f32 %v7386_v46, %v14310_v55 }
 0xe3d   :  { %v7532_v21 = vpop.xlane.xlu1 %7531 }
 0xe3e   :  { %v10096_v59 = vpop.eup %10095  ;;  %10099 = vrsqrt.f32 %v7414_v10  ;;  %v7404_v23 = vsub.f32 %v7396_v30, %v7400_v50  ;;  %v7408_v50 = vsub.f32 %v13930_v43, %v7392_v52  ;;  %v7550_v60 = vmul.f32 %v7532_v21, %v14310_v55 }
 0xe3f   :  { %v7421_v9 = vmul.f32 %v10096_v59, %v7409_v61  ;;  %v7534_v40 = vpop.xlane.xlu0 %7533 }
 0xe40   :  { %v7412_v34 = vadd.f32 1e-05, %v7404_v23  ;;  %v7551_v28 = vmul.f32 %v7534_v40, %v14310_v55 }
 0xe41   :  { %v7445_v7 = vmul.f32 %v7436_v39, %v7421_v9  ;;  %v7542_v31 = vpop.xlane.xlu1 %7541 }
 0xe42   :  { %10101 = vrsqrt.f32 %v7412_v34  ;;  %v7559_v6 = vmul.f32 %v7551_v28, %v7551_v28  ;;  %v7553_v57 = vmul.f32 %v7542_v31, %v14310_v55  ;;  %v7558_v34 = vmul.f32 %v7550_v60, %v7550_v60 }
 0xe43   :  { %v7530_v41 = vpop.xlane.xlu0 %7529  ;;  %v13995_v63 = vadd.f32 %v7460_v19, %v7445_v7 }
 0xe44   :  { %v7563_v29 = vsub.f32 %v7555_v47, %v7559_v6  ;;  %v7549_v37 = vmul.f32 %v7530_v41, %v14310_v55  ;;  %v7567_v6 = vsub.f32 %v13934_v36, %v7551_v28 }
 0xe45   :  { %v8380_v35 = vmul.f32 -1.442695, %v13995_v63 }
 0xe46   :  { %v10098_v4 = vpop.eup %10097  ;;  %v7571_v24 = vadd.f32 1e-05, %v7563_v29  ;;  %v7557_v39 = vmul.f32 %v7549_v37, %v7549_v37 }
 0xe47   :  { %v7419_v20 = vmul.f32 %v10098_v4, %v7407_v54  ;;  %v7536_v58 = vpop.xlane.xlu0 %7535  ;;  %10103 = vpow2.f32 %v8380_v35  ;;  %v7565_v4 = vsub.f32 %v13938_v16, %v7549_v37 }
 0xe48   :  { %v10100_v17 = vpop.eup %10099  ;;  %10105 = vrsqrt.f32 %v7571_v24  ;;  %v7561_v19 = vsub.f32 %v7553_v57, %v7557_v39  ;;  %v7552_v22 = vmul.f32 %v7536_v58, %v14310_v55 }
 0xe49   :  { %v7443_v46 = vmul.f32 %v13960_v48, %v7419_v20  ;;  %v7422_v62 = vmul.f32 %v10100_v17, %v7410_v27 }
 0xe4a   :  { %v7569_v14 = vadd.f32 1e-05, %v7561_v19  ;;  %v7560_v59 = vmul.f32 %v7552_v22, %v7552_v22  ;;  %v7568_v16 = vsub.f32 %v13940_v56, %v7552_v22 }
 0xe4b   :  { %v7446_v10 = vmul.f32 %v13962_v26, %v7422_v62  ;;  %v7548_v30 = vpop.xlane.xlu0 %7547  ;;  %v14007_v61 = vadd.f32 %v13970_v49, %v7443_v46 }
 0xe4c   :  { %v10102_v51 = vpop.eup %10101  ;;  %10107 = vrsqrt.f32 %v7569_v14  ;;  %v7556_v23 = vmul.f32 %v7548_v30, %v14310_v55  ;;  %v7623_v30 = vpop.permute.xlu1 %7622 }
 0xe4d   :  { %v7420_v9 = vmul.f32 %v10102_v51, %v7408_v50  ;;  %v14012_v48 = vadd.f32 %v13968_v13, %v7446_v10  ;;  %v8378_v40 = vmul.f32 -1.442695, %v14007_v61 }
 0xe4e   :  { %v7564_v43 = vsub.f32 %v7556_v23, %v7560_v59 }
 0xe4f   :  { %v7444_v26 = vmul.f32 %v13966_v3, %v7420_v9  ;;  %v7544_v52 = vpop.xlane.xlu0 %7543  ;;  %10109 = vpow2.f32 %v8378_v40  ;;  %v8381_v49 = vmul.f32 -1.442695, %v14012_v48 }
 0xe50   :  { %v7572_v7 = vadd.f32 1e-05, %v7564_v43  ;;  %v7554_v21 = vmul.f32 %v7544_v52, %v14310_v55 }
 0xe51   :  { %v10104_v47 = vpop.eup %10103  ;;  %v14020_v31 = vadd.f32 %v13964_v42, %v7444_v26  ;;  %10111 = vpow2.f32 %v8381_v49 }
 0xe52   :  { %v10106_v13 = vpop.eup %10105  ;;  %10113 = vrsqrt.f32 %v7572_v7  ;;  %v7562_v41 = vsub.f32 %v7554_v21, %v7558_v34  ;;  %v7485_v29 = vadd.f32 1.0, %v10104_v47 }
 0xe53   :  { %v7579_v3 = vmul.f32 %v10106_v13, %v7567_v6  ;;  %v8379_v54 = vmul.f32 -1.442695, %v14020_v31 }
 0xe54   :  { %v7570_v35 = vadd.f32 1e-05, %v7562_v41  ;;  %10115 = vrcp.f32 %v7485_v29 }
 0xe55   :  { %v7603_v55 = vmul.f32 %v13974_v33, %v7579_v3  ;;  %10117 = vpow2.f32 %v8379_v54 }
 0xe56   :  { %v10108_v24 = vpop.eup %10107  ;;  %10119 = vrsqrt.f32 %v7570_v35 }
 0xe57   :  { %v7577_v36 = vmul.f32 %v10108_v24, %v7565_v4  ;;  %v7618_v42 = vpop.permute.xlu0 %7617 }
 0xe58   :  { %v14025_v28 = vadd.f32 %v7618_v42, %v7603_v55 }
 0xe59   :  { %v10110_v57 = vpop.eup %10109  ;;  %v7601_v39 = vmul.f32 %v13972_v45, %v7577_v36  ;;  %v7566_v45 = vsub.f32 %v13944_v1, %v7550_v60 }
 0xe5a   :  { %v8392_v27 = vmul.f32 -1.442695, %v14025_v28  ;;  %v7483_v20 = vadd.f32 1.0, %v10110_v57 }
 0xe5b   :  { %v10112_v58 = vpop.eup %10111  ;;  %v14030_v17 = vadd.f32 %v13980_v11, %v7601_v39 }
 0xe5c   :  { %v10114_v33 = vpop.eup %10113  ;;  %10121 = vpow2.f32 %v8392_v27  ;;  %v7486_v37 = vadd.f32 1.0, %v10112_v58 }
 0xe5d   :  { %v8390_v19 = vmul.f32 -1.442695, %v14030_v17  ;;  %v7580_v46 = vmul.f32 %v10114_v33, %v7568_v16  ;;  %10123 = vrcp.f32 %v7483_v20 }
 0xe5e   :  { %v10116_v62 = vpop.eup %10115  ;;  %10125 = vrcp.f32 %v7486_v37 }
 0xe5f   :  { %v10118_v14 = vpop.eup %10117  ;;  %10127 = vpow2.f32 %v8390_v19  ;;  %v7604_v50 = vmul.f32 %v13978_v8, %v7580_v46  ;;  %v7497_v11 = vmul.f32 %v10116_v62, %v13995_v63 }
 0xe60   :  { %v10120_v10 = vpop.eup %10119  ;;  %v7484_v56 = vadd.f32 1.0, %v10118_v14 }
 0xe61   :  { %v14037_v22 = vadd.f32 %v7623_v30, %v7604_v50  ;;  %v7578_v51 = vmul.f32 %v10120_v10, %v7566_v45  ;;  %v7501_v59 = vadd.f32 %v7497_v11, %v13822_v0 }
 0xe62   :  { %10129 = vrcp.f32 %v7484_v56 }
 0xe63   :  { %v8393_v23 = vmul.f32 -1.442695, %v14037_v22  ;;  %v7602_v9 = vmul.f32 %v13976_v18, %v7578_v51  ;;  %v7505_v1 = vmul.f32 %v14222_v32, %v7501_v59 }
 0xe65   :  { %10131 = vpow2.f32 %v8393_v23  ;;  %v14044_v8 = vadd.f32 %v13982_v38, %v7602_v9  ;;  %7667 = vst [vmem:[#allocation2 + $0x10] sm:$0xff] %v7505_v1 }
 0xe66   :  { %v10122_v63 = vpop.eup %10121 }
 0xe67   :  { %v10124_v60 = vpop.eup %10123  ;;  %v8391_v40 = vmul.f32 -1.442695, %v14044_v8  ;;  %v7643_v43 = vadd.f32 1.0, %v10122_v63 }
 0xe68   :  { %v10126_v26 = vpop.eup %10125  ;;  %v7495_v0 = vmul.f32 %v10124_v60, %v14007_v61 }
 0xe69   :  { %v10128_v52 = vpop.eup %10127  ;;  %10133 = vpow2.f32 %v8391_v40  ;;  %v7498_v49 = vmul.f32 %v10126_v26, %v14012_v48 }
 0xe6a   :  { %v7641_v18 = vadd.f32 1.0, %v10128_v52  ;;  %10135 = vrcp.f32 %v7643_v43  ;;  %v7499_v34 = vadd.f32 %v7495_v0, %v13807_v53 }
 0xe6b   :  { %v7502_v38 = vadd.f32 %v7498_v49, %v13825_v12 }
 0xe6c   :  { %v10130_v7 = vpop.eup %10129  ;;  %10137 = vrcp.f32 %v7641_v18  ;;  %v7503_v21 = vmul.f32 %v14222_v32, %v7499_v34 }
 0xe6d   :  { %v7496_v47 = vmul.f32 %v10130_v7, %v14020_v31  ;;  %v7506_v6 = vmul.f32 %v14222_v32, %v7502_v38 }
 0xe6e   :  { %7665 = vst [vmem:[#allocation2] sm:$0xff] %v7503_v21 }
 0xe6f   :  { %v10132_v61 = vpop.eup %10131  ;;  %v7500_v48 = vadd.f32 %v7496_v47, %v13810_v25  ;;  %7668 = vst [vmem:[#allocation2 + $0x18] sm:$0xff] %v7506_v6 }
 0xe70   :  { %v7644_v13 = vadd.f32 1.0, %v10132_v61 }
 0xe71   :  { %v7504_v53 = vmul.f32 %v14222_v32, %v7500_v48 }
 0xe72   :  { %10139 = vrcp.f32 %v7644_v13 }
 0xe73   :  { %v10134_v12 = vpop.eup %10133  ;;  %7666 = vst [vmem:[#allocation2 + $0x8] sm:$0xff] %v7504_v53 }
 0xe74   :  { %v10136_v41 = vpop.eup %10135  ;;  %v7642_v29 = vadd.f32 1.0, %v10134_v12 }
 0xe75   :  { %10222 = shalt.err (!%p10219_p4)
}
 0xe76   :  { %s10223_s7 = scalar_lea.hbm %s14119_s21, 512 }
 0xe77   :  { %p10224_p5 = scmp.ne.s32.totalorder %s14119_s21, %s10223_s7  ;;  %p10227_p6 = scmp.lt.u32.totalorder %s10223_s7, %s14119_s21 }
 0xe79   :  { %p10229_p7 = pnand %p10227_p6, %p10224_p5 }
 0xe7b   :  { %10232 = shalt.err (!%p10229_p7)
}
 0xe7c   :  { %s10261_s24 = smov 128   ;;  %s10262_s0 = smov 8   ;;  %v7655_v25 = vmul.f32 %v10136_v41, %v14025_v28  ;;  %v10138_v31 = vpop.eup %10137  ;;  %10141 = vrcp.f32 %v7642_v29 }
 0xe7d   :  { %7684 = dma.vmem_to_hbm [thread:$0]  %s7679_s4, 512, %s14119_s21, [#allocation3], %s10261_s24, %s10261_s24, %s10262_s0   ;;  %v7653_v3 = vmul.f32 %v10138_v31, %v14030_v17  ;;  %v10140_v24 = vpop.eup %10139 }
 0xe7e   :  { %v7659_v54 = vadd.f32 %v7655_v25, %v13868_v5  ;;  %v7656_v36 = vmul.f32 %v10140_v24, %v14037_v22  ;;  %s10263_s21 = smov [#allocation4]  }
 0xe7f   :  { %v7657_v35 = vadd.f32 %v7653_v3, %v13850_v2  ;;  %s7690_s26 = sshll.u32 %s10263_s21, 4  ;;  %s7691_s26 = int_to_ptr.vmem [resolvable:$true] %s7690_s26 }
 0xe80   :  { %v7663_v4 = vmul.f32 %v14222_v32, %v7659_v54  ;;  %v7660_v42 = vadd.f32 %v7656_v36, %v13871_v44  ;;  %s10233_s15 = scalar_lea.vmem %s7691_s26, 512  ;;  %p10238_p9 = scmp.lt.s32.totalorder %s7691_s26, %s7691_s26 }
 0xe81   :  { %v7661_v55 = vmul.f32 %v14222_v32, %v7657_v35  ;;  %p10234_p8 = scmp.ne.s32.totalorder %s7691_s26, %s10233_s15  ;;  %p10239_p10 = scmp.lt.s32.totalorder %s10233_s15, %s10233_s15 }
 0xe82   :  { %7671 = vst [vmem:[#allocation4 + $0x10] sm:$0xff] %v7663_v4  ;;  %v7664_v39 = vmul.f32 %v14222_v32, %v7660_v42 }
 0xe83   :  { %7669 = vst [vmem:[#allocation4] sm:$0xff] %v7661_v55  ;;  %p10240_p11 = por %p10239_p10, %p10238_p9 }
 0xe84   :  { %7672 = vst [vmem:[#allocation4 + $0x18] sm:$0xff] %v7664_v39 }
 0xe85   :  { %p10241_p12 = pnand %p10240_p11, %p10234_p8 }
 0xe86   :  { %v10142_v28 = vpop.eup %10141 }
 0xe87   :  { %v7654_v57 = vmul.f32 %v10142_v28, %v14044_v8 }
 0xe89   :  { %v7658_v2 = vadd.f32 %v7654_v57, %v13853_v15 }
 0xe8b   :  { %v7662_v5 = vmul.f32 %v14222_v32, %v7658_v2 }
 0xe8d   :  { %7670 = vst [vmem:[#allocation4 + $0x8] sm:$0xff] %v7662_v5 }
 0xe8e   :  { %10244 = shalt.err (!%p10241_p12)
}
 0xe8f   :  { %s10245_s27 = scalar_lea.hbm %s14120_s22, 512 }
 0xe90   :  { %p10246_p13 = scmp.ne.s32.totalorder %s14120_s22, %s10245_s27  ;;  %p10249_p0 = scmp.lt.u32.totalorder %s10245_s27, %s14120_s22 }
 0xe92   :  { %p10251_p1 = pnand %p10249_p0, %p10246_p13 }
 0xe94   :  { %10254 = shalt.err (!%p10251_p1)
}
 0xe95   :  { %7696 = dma.vmem_to_hbm [thread:$0]  %s7691_s26, 512, %s14120_s22, [#allocation5], %s10261_s24, %s10261_s24, %s10262_s0  }
 0xe96   :  { %10255 = dma.done.wait [#allocation3], 512  }
 0xe97   :  { %10256 = vsyncadd [#allocation3], 4294966784 }
 0xe98   :  { %10257 = dma.done.wait [#allocation5], 512  }
 0xe99   :  { %10258 = vsyncadd [#allocation5], 4294966784 }
 0xe9a   :  { %7703 = vsyncpa [#allocation3], 1 }
 0xe9b   :  { %7704 = vsyncpa [#allocation5], 1 }

</bundles_post_ra>
